<compile_context>
chip_gen: v7x
topology: tpu7x:2x2x1
jax: 0.10.0
libtpu: 0.0.40
codegen_flags: <defaults>
</compile_context>

<pallas_src>
import functools

import jax
import jax.numpy as jnp
from jax import lax
from jax.experimental import pallas as pl
from jax.experimental.pallas import tpu as pltpu


_VMEM = pl.BlockSpec(memory_space=pltpu.MemorySpace.VMEM)


# -----------------------------------------------------------------------------
# Single fused Pallas kernel
# -----------------------------------------------------------------------------
def _make_fused_kernel(B, HW, C):
    """stem -> head -> channel gate -> spatial gate -> weighted avgpool -> classifier."""
    inv_hw = 1.0 / float(HW)

    def kernel(patches_ref, stem_w_ref, stem_s_ref, stem_b_ref,
               head_w_ref, head_s_ref, head_b_ref,
               w1_ref, b1_ref, w2_ref, b2_ref,
               sp_op_ref, sp_bias_ref,
               cls_w_ref, cls_b_ref,
               logits_ref):
        # ---- stem conv 3x3 / stride 2 (im2col matmul, bf16 MXU, f32 acc) + BN + SiLU
        y = jnp.dot(patches_ref[...], stem_w_ref[...],
                    preferred_element_type=jnp.float32)
        y = y * stem_s_ref[...] + stem_b_ref[...]
        stem_out = y * jax.nn.sigmoid(y)                       # (M, 32) f32

        # ---- head 1x1 conv -> C channels + BN + SiLU (bf16 MXU, f32 acc) ----
        h = jnp.dot(stem_out.astype(jnp.bfloat16), head_w_ref[...],
                    preferred_element_type=jnp.float32)
        h = h * head_s_ref[...] + head_b_ref[...]
        feat = h * jax.nn.sigmoid(h)                           # (M, C) f32
        featb = feat.reshape(B, HW, C)

        # ---- CBAM channel gate: shared MLP run once on stacked [avg; max] ----
        avg = jnp.mean(featb, axis=1)                          # (B, C)
        mx = jnp.max(featb, axis=1)                            # (B, C)
        pooled = jnp.concatenate([avg, mx], axis=0)            # (2B, C)
        hh = jnp.dot(pooled.astype(jnp.bfloat16), w1_ref[...],
                     preferred_element_type=jnp.float32) + b1_ref[...]
        hh = jnp.maximum(hh, 0.0)                              # ReLU (f32)
        mlp = jnp.dot(hh.astype(jnp.bfloat16), w2_ref[...],
                      preferred_element_type=jnp.float32) + b2_ref[...]
        cscale = jax.nn.sigmoid(mlp[:B] + mlp[B:])             # (B, C)

        # channel-refined features, stored once in bf16 for all downstream MXU feeds
        xr = (featb * cscale[:, None, :]).astype(jnp.bfloat16)  # (B, HW, C) bf16

        # ---- CBAM spatial gate: [max, mean] over C -> ONE fused MXU matmul ----
        # (stacked conv-operator [kmax; kmean] precomputed outside; BN scale folded)
        mx_map = jnp.max(xr, axis=2).astype(jnp.float32)        # (B, HW)
        mean_map = jnp.mean(xr, axis=2, dtype=jnp.float32)      # (B, HW), f32 acc
        sp_in = jnp.concatenate([mx_map, mean_map], axis=1)     # (B, 2*HW)
        s = jnp.dot(sp_in.astype(jnp.bfloat16), sp_op_ref[...],
                    preferred_element_type=jnp.float32) + sp_bias_ref[...]
        att = jax.nn.sigmoid(s)                                  # (B, HW) f32

        # ---- fused spatial-refine + global avg-pool: weighted MXU reduction ----
        # (never materializes yref = xr * att; B is small/static so per-sample
        #  (1,HW)x(HW,C) 2-D matmuls avoid batched-dot / reshape relayouts)
        rows = []
        for b in range(B):
            rows.append(jnp.dot(att[b:b + 1, :].astype(jnp.bfloat16), xr[b],
                                preferred_element_type=jnp.float32))
        pooled_feat = jnp.concatenate(rows, axis=0) * inv_hw     # (B, C) f32

        # ---- Dropout (inference identity) + Linear; weight stored (num_classes, C)
        logits = lax.dot_general(pooled_feat.astype(jnp.bfloat16), cls_w_ref[...],
                                 dimension_numbers=(((1,), (1,)), ((), ())),
                                 preferred_element_type=jnp.float32)
        logits_ref[...] = logits + cls_b_ref[...]

    return kernel


# -----------------------------------------------------------------------------
# Plain-JAX glue
# -----------------------------------------------------------------------------
def _extract_patches(x_nhwc, ksize, stride, pad):
    """im2col for the stem conv: (B, Ho*Wo, ksize*ksize*C), (kh, kw, c) order."""
    B, H, W, C = x_nhwc.shape
    xp = jnp.pad(x_nhwc, ((0, 0), (pad, pad), (pad, pad), (0, 0)))
    Ho = (H + 2 * pad - ksize) // stride + 1
    Wo = (W + 2 * pad - ksize) // stride + 1
    pieces = []
    for kh in range(ksize):
        for kw in range(ksize):
            pieces.append(xp[:, kh:kh + Ho * stride:stride, kw:kw + Wo * stride:stride, :])
    patches = jnp.stack(pieces, axis=3)            # (B, Ho, Wo, k*k, C)
    return patches.reshape(B, Ho * Wo, ksize * ksize * C), Ho, Wo


def _build_spatial_conv_operator(sp_w_khkwc, H, W):
    """Builds K_c[p, q] (HW x HW) so that s[b, q] = sum_p map_c[b, p] * K_c[p, q]
    reproduces a ksize x ksize 'same' cross-correlation (PyTorch Conv2d) over
    the HxW map for channel c in {max=0, mean=1}."""
    ks = sp_w_khkwc.shape[0]
    P = ks // 2
    idx = jnp.arange(H * W)
    pi, pj = idx // W, idx % W                      # input pixel (rows of K)
    qi, qj = idx // W, idx % W                      # output pixel (cols of K)
    di = pi[:, None] - qi[None, :] + P              # (HW, HW)
    dj = pj[:, None] - qj[None, :] + P
    valid = (di >= 0) & (di < ks) & (dj >= 0) & (dj < ks)
    di_c = jnp.clip(di, 0, ks - 1)
    dj_c = jnp.clip(dj, 0, ks - 1)
    kmax = jnp.where(valid, sp_w_khkwc[di_c, dj_c, 0], 0.0)
    kmean = jnp.where(valid, sp_w_khkwc[di_c, dj_c, 1], 0.0)
    return kmax.astype(jnp.float32), kmean.astype(jnp.float32)


def init_params(key, cin=3, stem_c=32, feat_c=1280, reduction_ratio=16,
                spatial_kernel_size=7, num_classes=4):
    ks = jax.random.split(key, 9)

    def bn_affine(k, c):
        kg, kb, km, kv = jax.random.split(k, 4)
        gamma = 1.0 + 0.05 * jax.random.normal(kg, (1, c))
        beta = 0.05 * jax.random.normal(kb, (1, c))
        mean = 0.05 * jax.random.normal(km, (1, c))
        var = 1.0 + 0.05 * jax.random.uniform(kv, (1, c))
        scale = gamma / jnp.sqrt(var + 1e-5)
        bias = beta - mean * scale
        return scale.astype(jnp.float32), bias.astype(jnp.float32)

    cr = feat_c // reduction_ratio
    p = {}
    p['stem_w'] = 0.1 * jax.random.normal(ks[0], (3 * 3 * cin, stem_c), jnp.float32)
    p['stem_scale'], p['stem_bias'] = bn_affine(ks[1], stem_c)
    p['head_w'] = 0.05 * jax.random.normal(ks[2], (stem_c, feat_c), jnp.float32)
    p['head_scale'], p['head_bias'] = bn_affine(ks[3], feat_c)
    p['ca_w1'] = 0.05 * jax.random.normal(ks[4], (feat_c, cr), jnp.float32)
    p['ca_b1'] = jnp.zeros((1, cr), jnp.float32)
    p['ca_w2'] = 0.05 * jax.random.normal(ks[5], (cr, feat_c), jnp.float32)
    p['ca_b2'] = jnp.zeros((1, feat_c), jnp.float32)
    p['sp_w'] = 0.05 * jax.random.normal(
        ks[6], (1, spatial_kernel_size * spatial_kernel_size * 2), jnp.float32)
    p['sp_scale'], p['sp_bias'] = bn_affine(ks[7], 1)
    p['cls_w'] = 0.05 * jax.random.normal(ks[8], (feat_c, num_classes), jnp.float32)
    p['cls_b'] = jnp.zeros((1, num_classes), jnp.float32)
    return p


@functools.partial(jax.jit, static_argnames=("spatial_kernel_size",))
def efficientnet_b1_single_cbam_forward(x_nchw, params, spatial_kernel_size=7):
    """Forward pass; returns (logits, logits) like the PyTorch module."""
    x = jnp.transpose(x_nchw, (0, 2, 3, 1)).astype(jnp.float32)   # NCHW -> NHWC
    B = x.shape[0]

    # ---- stem im2col (plain JAX); pad K=27 -> 32, cast bf16 for the MXU ------
    patches, Ho, Wo = _extract_patches(x, ksize=3, stride=2, pad=1)
    HW = Ho * Wo
    M = B * HW
    patches = patches.reshape(M, -1)
    k_in = patches.shape[1]
    k_pad = ((k_in + 31) // 32) * 32
    patches_p = jnp.pad(patches, ((0, 0), (0, k_pad - k_in))).astype(jnp.bfloat16)
    stem_w_p = jnp.pad(params['stem_w'], ((0, k_pad - k_in), (0, 0))).astype(jnp.bfloat16)
    stem_c = params['stem_w'].shape[1]

    # ---- channel-MLP hidden dim padded 80 -> 128 (lane-aligned, math exact) --
    cr = params['ca_w1'].shape[1]
    crp = ((cr + 127) // 128) * 128
    ca_w1 = jnp.pad(params['ca_w1'], ((0, 0), (0, crp - cr))).astype(jnp.bfloat16)
    ca_b1 = jnp.pad(params['ca_b1'], ((0, 0), (0, crp - cr)))
    ca_w2 = jnp.pad(params['ca_w2'], ((0, crp - cr), (0, 0))).astype(jnp.bfloat16)

    # ---- precompute spatial-gate conv operator (BN scale folded, stacked) ----
    # NOTE: assumes the CBAM 7x7 Conv2d has bias=False (standard CBAM); only the
    # folded BN beta lands in sp_bias_vec.
    ks = spatial_kernel_size
    sp_w = params['sp_w'].reshape(ks, ks, 2)
    kmax, kmean = _build_spatial_conv_operator(sp_w, Ho, Wo)
    sp_scale = params['sp_scale'][0, 0]
    sp_bias = params['sp_bias'][0, 0]
    sp_op = (jnp.concatenate([kmax, kmean], axis=0) * sp_scale).astype(jnp.bfloat16)
    sp_bias_vec = jnp.full((1, HW), sp_bias, jnp.float32)

    C = params['head_w'].shape[1]
    num_classes = params['cls_w'].shape[1]
    cls_w_t = params['cls_w'].T.astype(jnp.bfloat16)       # (num_classes, C)

    operands = (patches_p, stem_w_p, params['stem_scale'], params['stem_bias'],
                params['head_w'].astype(jnp.bfloat16),
                params['head_scale'], params['head_bias'],
                ca_w1, ca_b1, ca_w2, params['ca_b2'],
                sp_op, sp_bias_vec,
                cls_w_t, params['cls_b'])

    # ---- cost estimate + VMEM limit sized from actual residency --------------
    io_bytes = sum(int(o.size) * o.dtype.itemsize for o in operands) + B * num_classes * 4
    interm_bytes = M * C * (4 + 2) + M * (k_pad + stem_c) * 6      # feat f32 + xr bf16 + stem
    vmem_limit_bytes = int(min(48 << 20, max(8 << 20, io_bytes + 2 * interm_bytes)))
    flops = int(2 * M * k_pad * stem_c + 2 * M * stem_c * C
                + 2 * (2 * B) * C * crp * 2
                + 2 * B * (2 * HW) * HW
                + 2 * B * HW * C
                + 2 * B * C * num_classes)
    transcendentals = int(M * stem_c + M * C + B * C + B * HW)
    cost = pl.CostEstimate(flops=flops, transcendentals=transcendentals,
                           bytes_accessed=int(io_bytes))

    # ---- single fused Pallas kernel ------------------------------------------
    logits = pl.pallas_call(
        _make_fused_kernel(B, HW, C),
        out_shape=jax.ShapeDtypeStruct((B, num_classes), jnp.float32),
        in_specs=[_VMEM] * len(operands),
        out_specs=_VMEM,
        compiler_params=pltpu.CompilerParams(vmem_limit_bytes=vmem_limit_bytes),
        cost_estimate=cost,
    )(*operands)
    return logits, logits


if __name__ == "__main__":
    key = jax.random.PRNGKey(0)
    kx, kp = jax.random.split(key)

    B, Cin, H, W = 2, 3, 16, 16          # small synthetic image batch (NCHW)
    x = jax.random.normal(kx, (B, Cin, H, W), dtype=jnp.float32)
    params = init_params(kp)

    logits, logits_dup = efficientnet_b1_single_cbam_forward(x, params)
    jax.block_until_ready(logits)

    assert logits.shape == (B, 4)
    assert bool(jnp.all(jnp.isfinite(logits)))
    assert bool(jnp.array_equal(logits, logits_dup))
    print("KERNEL_OK")
</pallas_src>

<mosaic_0001>
module attributes {stable_mosaic.version = 11 : i64} {
  func.func @kernel(%arg0: memref<128x32xbf16, #tpu.memory_space<vmem>>, %arg1: memref<32x32xbf16, #tpu.memory_space<vmem>>, %arg2: memref<1x32xf32, #tpu.memory_space<vmem>>, %arg3: memref<1x32xf32, #tpu.memory_space<vmem>>, %arg4: memref<32x1280xbf16, #tpu.memory_space<vmem>>, %arg5: memref<1x1280xf32, #tpu.memory_space<vmem>>, %arg6: memref<1x1280xf32, #tpu.memory_space<vmem>>, %arg7: memref<1280x128xbf16, #tpu.memory_space<vmem>>, %arg8: memref<1x128xf32, #tpu.memory_space<vmem>>, %arg9: memref<128x1280xbf16, #tpu.memory_space<vmem>>, %arg10: memref<1x1280xf32, #tpu.memory_space<vmem>>, %arg11: memref<128x64xbf16, #tpu.memory_space<vmem>>, %arg12: memref<1x64xf32, #tpu.memory_space<vmem>>, %arg13: memref<4x1280xbf16, #tpu.memory_space<vmem>>, %arg14: memref<1x4xf32, #tpu.memory_space<vmem>>, %arg15: memref<2x4xf32, #tpu.memory_space<vmem>>) attributes {dimension_semantics = [], scalar_prefetch = 0 : i64, scratch_operands = 0 : i64, tpu.core_type = #tpu.core_type<tc>} {
    %c0 = arith.constant 0 : index
    %c0_0 = arith.constant 0 : index
    %0 = vector.load %arg0[%c0, %c0_0] : memref<128x32xbf16, #tpu.memory_space<vmem>>, vector<128x32xbf16>
    %c0_1 = arith.constant 0 : index
    %c0_2 = arith.constant 0 : index
    %1 = vector.load %arg1[%c0_1, %c0_2] : memref<32x32xbf16, #tpu.memory_space<vmem>>, vector<32x32xbf16>
    %cst = arith.constant dense<0.000000e+00> : vector<128x32xf32>
    %2 = tpu.matmul %0, %1, %cst {dimension_numbers = #tpu.dot_dimension_numbers<[1], [0], [0], [1], [0, 0, 1, 1], [], []>} : vector<128x32xbf16>, vector<32x32xbf16>, vector<128x32xf32> -> vector<128x32xf32>
    %c0_3 = arith.constant 0 : index
    %c0_4 = arith.constant 0 : index
    %3 = vector.load %arg2[%c0_3, %c0_4] : memref<1x32xf32, #tpu.memory_space<vmem>>, vector<1x32xf32>
    %4 = vector.broadcast %3 : vector<1x32xf32> to vector<128x32xf32>
    %5 = arith.mulf %2, %4 : vector<128x32xf32>
    %c0_5 = arith.constant 0 : index
    %c0_6 = arith.constant 0 : index
    %6 = vector.load %arg3[%c0_5, %c0_6] : memref<1x32xf32, #tpu.memory_space<vmem>>, vector<1x32xf32>
    %7 = vector.broadcast %6 : vector<1x32xf32> to vector<128x32xf32>
    %8 = arith.addf %5, %7 : vector<128x32xf32>
    %9 = arith.negf %8 : vector<128x32xf32>
    %10 = math.exp %9 : vector<128x32xf32>
    %cst_7 = arith.constant 1.000000e+00 : f32
    %11 = vector.broadcast %cst_7 : f32 to vector<128x32xf32>
    %12 = arith.addf %11, %10 : vector<128x32xf32>
    %13 = arith.divf %11, %12 : vector<128x32xf32>
    %14 = arith.mulf %8, %13 : vector<128x32xf32>
    %15 = arith.truncf %14 : vector<128x32xf32> to vector<128x32xbf16>
    %c0_8 = arith.constant 0 : index
    %c0_9 = arith.constant 0 : index
    %16 = vector.load %arg4[%c0_8, %c0_9] : memref<32x1280xbf16, #tpu.memory_space<vmem>>, vector<32x1280xbf16>
    %cst_10 = arith.constant dense<0.000000e+00> : vector<128x1280xf32>
    %17 = tpu.matmul %15, %16, %cst_10 {dimension_numbers = #tpu.dot_dimension_numbers<[1], [0], [0], [1], [0, 0, 1, 1], [], []>} : vector<128x32xbf16>, vector<32x1280xbf16>, vector<128x1280xf32> -> vector<128x1280xf32>
    %c0_11 = arith.constant 0 : index
    %c0_12 = arith.constant 0 : index
    %18 = vector.load %arg5[%c0_11, %c0_12] : memref<1x1280xf32, #tpu.memory_space<vmem>>, vector<1x1280xf32>
    %19 = vector.broadcast %18 : vector<1x1280xf32> to vector<128x1280xf32>
    %20 = arith.mulf %17, %19 : vector<128x1280xf32>
    %c0_13 = arith.constant 0 : index
    %c0_14 = arith.constant 0 : index
    %21 = vector.load %arg6[%c0_13, %c0_14] : memref<1x1280xf32, #tpu.memory_space<vmem>>, vector<1x1280xf32>
    %22 = vector.broadcast %21 : vector<1x1280xf32> to vector<128x1280xf32>
    %23 = arith.addf %20, %22 : vector<128x1280xf32>
    %24 = arith.negf %23 : vector<128x1280xf32>
    %25 = math.exp %24 : vector<128x1280xf32>
    %cst_15 = arith.constant 1.000000e+00 : f32
    %26 = vector.broadcast %cst_15 : f32 to vector<128x1280xf32>
    %27 = arith.addf %26, %25 : vector<128x1280xf32>
    %28 = arith.divf %26, %27 : vector<128x1280xf32>
    %29 = arith.mulf %23, %28 : vector<128x1280xf32>
    %30 = vector.shape_cast %29 : vector<128x1280xf32> to vector<2x64x1280xf32>
    %cst_16 = arith.constant dense<0.000000e+00> : vector<2x1280xf32>
    %31 = vector.multi_reduction <add>, %30, %cst_16 [1] : vector<2x64x1280xf32> to vector<2x1280xf32>
    %cst_17 = arith.constant 6.400000e+01 : f32
    %32 = vector.broadcast %cst_17 : f32 to vector<2x1280xf32>
    %33 = arith.divf %31, %32 : vector<2x1280xf32>
    %cst_18 = arith.constant dense<0xFF800000> : vector<2x1280xf32>
    %34 = vector.multi_reduction <maximumf>, %30, %cst_18 [1] : vector<2x64x1280xf32> to vector<2x1280xf32>
    %35 = tpu.concatenate %33, %34 in 0 : vector<2x1280xf32>, vector<2x1280xf32> -> vector<4x1280xf32>
    %36 = arith.truncf %35 : vector<4x1280xf32> to vector<4x1280xbf16>
    %c0_19 = arith.constant 0 : index
    %c0_20 = arith.constant 0 : index
    %37 = vector.load %arg7[%c0_19, %c0_20] : memref<1280x128xbf16, #tpu.memory_space<vmem>>, vector<1280x128xbf16>
    %cst_21 = arith.constant dense<0.000000e+00> : vector<4x128xf32>
    %38 = tpu.matmul %36, %37, %cst_21 {dimension_numbers = #tpu.dot_dimension_numbers<[1], [0], [0], [1], [0, 0, 1, 1], [], []>} : vector<4x1280xbf16>, vector<1280x128xbf16>, vector<4x128xf32> -> vector<4x128xf32>
    %c0_22 = arith.constant 0 : index
    %c0_23 = arith.constant 0 : index
    %39 = vector.load %arg8[%c0_22, %c0_23] : memref<1x128xf32, #tpu.memory_space<vmem>>, vector<1x128xf32>
    %40 = vector.broadcast %39 : vector<1x128xf32> to vector<4x128xf32>
    %41 = arith.addf %38, %40 : vector<4x128xf32>
    %cst_24 = arith.constant 0.000000e+00 : f32
    %42 = vector.broadcast %cst_24 : f32 to vector<4x128xf32>
    %43 = arith.maximumf %41, %42 : vector<4x128xf32>
    %44 = arith.truncf %43 : vector<4x128xf32> to vector<4x128xbf16>
    %c0_25 = arith.constant 0 : index
    %c0_26 = arith.constant 0 : index
    %45 = vector.load %arg9[%c0_25, %c0_26] : memref<128x1280xbf16, #tpu.memory_space<vmem>>, vector<128x1280xbf16>
    %cst_27 = arith.constant dense<0.000000e+00> : vector<4x1280xf32>
    %46 = tpu.matmul %44, %45, %cst_27 {dimension_numbers = #tpu.dot_dimension_numbers<[1], [0], [0], [1], [0, 0, 1, 1], [], []>} : vector<4x128xbf16>, vector<128x1280xbf16>, vector<4x1280xf32> -> vector<4x1280xf32>
    %c0_28 = arith.constant 0 : index
    %c0_29 = arith.constant 0 : index
    %47 = vector.load %arg10[%c0_28, %c0_29] : memref<1x1280xf32, #tpu.memory_space<vmem>>, vector<1x1280xf32>
    %48 = vector.broadcast %47 : vector<1x1280xf32> to vector<4x1280xf32>
    %49 = arith.addf %46, %48 : vector<4x1280xf32>
    %50 = vector.extract_strided_slice %49 {offsets = [0, 0], sizes = [2, 1280], strides = [1, 1]} : vector<4x1280xf32> to vector<2x1280xf32>
    %51 = vector.extract_strided_slice %49 {offsets = [2, 0], sizes = [2, 1280], strides = [1, 1]} : vector<4x1280xf32> to vector<2x1280xf32>
    %52 = arith.addf %50, %51 : vector<2x1280xf32>
    %53 = arith.negf %52 : vector<2x1280xf32>
    %54 = math.exp %53 : vector<2x1280xf32>
    %cst_30 = arith.constant 1.000000e+00 : f32
    %55 = vector.broadcast %cst_30 : f32 to vector<2x1280xf32>
    %56 = arith.addf %55, %54 : vector<2x1280xf32>
    %57 = arith.divf %55, %56 : vector<2x1280xf32>
    %58 = vector.shape_cast %57 : vector<2x1280xf32> to vector<2x1x1280xf32>
    %59 = vector.broadcast %58 : vector<2x1x1280xf32> to vector<2x64x1280xf32>
    %60 = arith.mulf %30, %59 : vector<2x64x1280xf32>
    %61 = arith.truncf %60 : vector<2x64x1280xf32> to vector<2x64x1280xbf16>
    %cst_31 = arith.constant dense<0xFF80> : vector<2x64xbf16>
    %62 = vector.multi_reduction <maximumf>, %61, %cst_31 [2] : vector<2x64x1280xbf16> to vector<2x64xbf16>
    %63 = arith.extf %62 : vector<2x64xbf16> to vector<2x64xf32>
    %64 = arith.extf %61 : vector<2x64x1280xbf16> to vector<2x64x1280xf32>
    %cst_32 = arith.constant dense<0.000000e+00> : vector<2x64xf32>
    %65 = vector.multi_reduction <add>, %64, %cst_32 [2] : vector<2x64x1280xf32> to vector<2x64xf32>
    %cst_33 = arith.constant 1.280000e+03 : f32
    %66 = vector.broadcast %cst_33 : f32 to vector<2x64xf32>
    %67 = arith.divf %65, %66 : vector<2x64xf32>
    %68 = tpu.concatenate %63, %67 in 1 : vector<2x64xf32>, vector<2x64xf32> -> vector<2x128xf32>
    %69 = arith.truncf %68 : vector<2x128xf32> to vector<2x128xbf16>
    %c0_34 = arith.constant 0 : index
    %c0_35 = arith.constant 0 : index
    %70 = vector.load %arg11[%c0_34, %c0_35] : memref<128x64xbf16, #tpu.memory_space<vmem>>, vector<128x64xbf16>
    %cst_36 = arith.constant dense<0.000000e+00> : vector<2x64xf32>
    %71 = tpu.matmul %69, %70, %cst_36 {dimension_numbers = #tpu.dot_dimension_numbers<[1], [0], [0], [1], [0, 0, 1, 1], [], []>} : vector<2x128xbf16>, vector<128x64xbf16>, vector<2x64xf32> -> vector<2x64xf32>
    %c0_37 = arith.constant 0 : index
    %c0_38 = arith.constant 0 : index
    %72 = vector.load %arg12[%c0_37, %c0_38] : memref<1x64xf32, #tpu.memory_space<vmem>>, vector<1x64xf32>
    %73 = vector.broadcast %72 : vector<1x64xf32> to vector<2x64xf32>
    %74 = arith.addf %71, %73 : vector<2x64xf32>
    %75 = arith.negf %74 : vector<2x64xf32>
    %76 = math.exp %75 : vector<2x64xf32>
    %cst_39 = arith.constant 1.000000e+00 : f32
    %77 = vector.broadcast %cst_39 : f32 to vector<2x64xf32>
    %78 = arith.addf %77, %76 : vector<2x64xf32>
    %79 = arith.divf %77, %78 : vector<2x64xf32>
    %80 = vector.extract_strided_slice %79 {offsets = [0, 0], sizes = [1, 64], strides = [1, 1]} : vector<2x64xf32> to vector<1x64xf32>
    %81 = arith.truncf %80 : vector<1x64xf32> to vector<1x64xbf16>
    %82 = vector.extract_strided_slice %61 {offsets = [0, 0, 0], sizes = [1, 64, 1280], strides = [1, 1, 1]} : vector<2x64x1280xbf16> to vector<1x64x1280xbf16>
    %83 = vector.shape_cast %82 : vector<1x64x1280xbf16> to vector<64x1280xbf16>
    %cst_40 = arith.constant dense<0.000000e+00> : vector<1x1280xf32>
    %84 = tpu.matmul %81, %83, %cst_40 {dimension_numbers = #tpu.dot_dimension_numbers<[1], [0], [0], [1], [0, 0, 1, 1], [], []>} : vector<1x64xbf16>, vector<64x1280xbf16>, vector<1x1280xf32> -> vector<1x1280xf32>
    %85 = vector.extract_strided_slice %79 {offsets = [1, 0], sizes = [1, 64], strides = [1, 1]} : vector<2x64xf32> to vector<1x64xf32>
    %86 = arith.truncf %85 : vector<1x64xf32> to vector<1x64xbf16>
    %87 = vector.extract_strided_slice %61 {offsets = [1, 0, 0], sizes = [1, 64, 1280], strides = [1, 1, 1]} : vector<2x64x1280xbf16> to vector<1x64x1280xbf16>
    %88 = vector.shape_cast %87 : vector<1x64x1280xbf16> to vector<64x1280xbf16>
    %cst_41 = arith.constant dense<0.000000e+00> : vector<1x1280xf32>
    %89 = tpu.matmul %86, %88, %cst_41 {dimension_numbers = #tpu.dot_dimension_numbers<[1], [0], [0], [1], [0, 0, 1, 1], [], []>} : vector<1x64xbf16>, vector<64x1280xbf16>, vector<1x1280xf32> -> vector<1x1280xf32>
    %90 = tpu.concatenate %84, %89 in 0 : vector<1x1280xf32>, vector<1x1280xf32> -> vector<2x1280xf32>
    %cst_42 = arith.constant 1.562500e-02 : f32
    %91 = vector.broadcast %cst_42 : f32 to vector<2x1280xf32>
    %92 = arith.mulf %90, %91 : vector<2x1280xf32>
    %93 = arith.truncf %92 : vector<2x1280xf32> to vector<2x1280xbf16>
    %c0_43 = arith.constant 0 : index
    %c0_44 = arith.constant 0 : index
    %94 = vector.load %arg13[%c0_43, %c0_44] : memref<4x1280xbf16, #tpu.memory_space<vmem>>, vector<4x1280xbf16>
    %cst_45 = arith.constant dense<0.000000e+00> : vector<2x4xf32>
    %95 = tpu.matmul %93, %94, %cst_45 {dimension_numbers = #tpu.dot_dimension_numbers<[1], [1], [0], [0], [0, 0, 1, 0], [], []>} : vector<2x1280xbf16>, vector<4x1280xbf16>, vector<2x4xf32> -> vector<2x4xf32>
    %c0_46 = arith.constant 0 : index
    %c0_47 = arith.constant 0 : index
    %96 = vector.load %arg14[%c0_46, %c0_47] : memref<1x4xf32, #tpu.memory_space<vmem>>, vector<1x4xf32>
    %97 = vector.broadcast %96 : vector<1x4xf32> to vector<2x4xf32>
    %98 = arith.addf %95, %97 : vector<2x4xf32>
    %c0_48 = arith.constant 0 : index
    %c0_49 = arith.constant 0 : index
    %99 = vector.load %arg15[%c0_48, %c0_49] : memref<2x4xf32, #tpu.memory_space<vmem>>, vector<2x4xf32>
    tpu.vector_store %arg15[%c0_48, %c0_49], %98 {strides = array<i32>} : memref<2x4xf32, #tpu.memory_space<vmem>>, vector<2x4xf32>,
    return
  }
}

</mosaic_0001>

<bundles_post_ra>
// kernel: efficientnet_b1_single_cbam_forward.1
= control target key start
LH: loop header
LB: loop body
LE: loop exit
PB: predicated region body
PF: predicated region fallthrough
CT: control target
= control target key end

     0   :  { %vm123_vm0 = vcmask 261120   ;;  %v13517_v18 = vmov 0   ;;  %vm3229_vm1 = vcmask 1041409   ;;  %vm3270_vm2 = vcmask 1043459   ;;  %s13500_s1 = inlined_call_operand.vmem [shape: bf16[32,32], index: 1, kind: input, shape index: {}]   ;;  %s13501_s0 = inlined_call_operand.vmem [shape: bf16[128,32], index: 0, kind: input, shape index: {}]   ;;  %s13502_s4 = inlined_call_operand.vmem [shape: bf16[32,1280], index: 4, kind: input, shape index: {}]   ;;  %s13503_s2 = inlined_call_operand.vmem [shape: f32[1,32], index: 2, kind: input, shape index: {}]   ;;  %s13504_s3 = inlined_call_operand.vmem [shape: f32[1,32], index: 3, kind: input, shape index: {}]   ;;  %s13505_s5 = inlined_call_operand.vmem [shape: f32[1,1280], index: 5, kind: input, shape index: {}]   ;;  %s13506_s6 = inlined_call_operand.vmem [shape: f32[1,1280], index: 6, kind: input, shape index: {}]   ;;  %s13507_s7 = inlined_call_operand.vmem [shape: bf16[1280,128], index: 7, kind: input, shape index: {}]   ;;  %s13508_s9 = inlined_call_operand.vmem [shape: bf16[128,1280], index: 9, kind: input, shape index: {}]   ;;  %s13509_s8 = inlined_call_operand.vmem [shape: f32[1,128], index: 8, kind: input, shape index: {}]   ;;  %s13510_s11 = inlined_call_operand.vmem [shape: bf16[128,64], index: 11, kind: input, shape index: {}]   ;;  %s13511_s10 = inlined_call_operand.vmem [shape: f32[1,1280], index: 10, kind: input, shape index: {}]   ;;  %s13512_s12 = inlined_call_operand.vmem [shape: f32[1,64], index: 12, kind: input, shape index: {}]   ;;  %s13513_s13 = inlined_call_operand.vmem [shape: bf16[4,1280], index: 13, kind: input, shape index: {}]   ;;  %s13514_s14 = inlined_call_operand.vmem [shape: f32[1,4], index: 14, kind: input, shape index: {}]   ;;  %s13515_s15 = inlined_call_operand.vmem [shape: f32[2,4], index: 15, kind: output, shape index: {}]  }
   0x1   :  { %v7634_v0 = vld [vmem:[%s13500_s1] sm:$0xff]   ;;  %v7635_v1 = vld [vmem:[%s13500_s1 + $0x8] sm:$0xff]   ;;  %v7637_v3 = vld [vmem:[%s13501_s0 + $0x10] sm:$0xff]   ;;  %vm3291_vm3 = vcmask 1041408   ;;  %vm8637_vm4 = vmmov 0   ;;  %vm5923_vm5 = vcmask 130112  }
   0x2   :  { %7568 = vmatprep.subr.bf16.mxu0 %v7634_v0  ;;  %7608 = vmatprep.subr.bf16.mxu1 %v7634_v0  ;;  %v7636_v2 = vld [vmem:[%s13501_s0] sm:$0xff]   ;;  %v7638_v4 = vld [vmem:[%s13501_s0 + $0x8] sm:$0xff]   ;;  %v7639_v5 = vld [vmem:[%s13501_s0 + $0x18] sm:$0xff]   ;;  %vm5930_vm6 = vcmask 195712   ;;  %vm5937_vm7 = vcmask 261312   ;;  %vm6034_vm8 = vcmask 654912  }
   0x3   :  { %7569 = vmatpush3.bf16.msra.mxu0 %v7634_v0  ;;  %7610 = vmatpush3.bf16.msra.mxu1 %v7634_v0  ;;  %v7640_v6 = vld [vmem:[%s13501_s0 + $0x20] sm:$0xff]   ;;  %v7641_v7 = vld [vmem:[%s13501_s0 + $0x28] sm:$0xff]   ;;  %v7642_v8 = vld [vmem:[%s13501_s0 + $0x30] sm:$0xff]   ;;  %vm5944_vm9 = vcmask 326912   ;;  %vm6041_vm10 = vcmask 720512   ;;  %vm6048_vm11 = vcmask 786112  }
   0x4   :  { %7570 = vmatprep.subr.bf16.mxu0 %v7635_v1  ;;  %7609 = vmatprep.subr.bf16.mxu1 %v7635_v1  ;;  %v7643_v9 = vld [vmem:[%s13501_s0 + $0x38] sm:$0xff]   ;;  %v7646_v10 = vld [vmem:[%s13502_s4 + $0x4] ss:$40 sps:$4 sm:$0xff]   ;;  %v7644_v11 = vld [vmem:[%s13502_s4] ss:$40 sps:$4 sm:$0xff]   ;;  %vm6055_vm12 = vcmask 851712  }
   0x5   :  { %7572 = vmatprep.mubr.msk.bf16.mxu0 %vm123_vm0, %v7636_v2  ;;  %7576 = vmatprep.mubr.msk.bf16.mxu1 %vm123_vm0, %v7637_v3  ;;  %v7652_v12 = vld [vmem:[%s13502_s4 + $0xc] ss:$40 sps:$4 sm:$0xff]   ;;  %v7650_v13 = vld [vmem:[%s13502_s4 + $0x8] ss:$40 sps:$4 sm:$0xff]   ;;  %v7655_v15 = vld [vmem:[%s13502_s4 + $0x5c] ss:$40 sps:$4 sm:$0xff]  }
   0x6   :  { %v7649_v14 = vld [vmem:[%s13502_s4 + $0x54] ss:$40 sps:$4 sm:$0xff]   ;;  %v7647_v16 = vld [vmem:[%s13502_s4 + $0x50] ss:$40 sps:$4 sm:$0xff]   ;;  %v8792_v21 = vld [vmem:[%s13503_s2] ss:$0 sm:$0xff] }
   0x7   :  { %7571 = vmatpush3.bf16.msra.mxu0 %v7635_v1  ;;  %7611 = vmatpush3.bf16.msra.mxu1 %v7635_v1  ;;  %v7653_v17 = vld [vmem:[%s13502_s4 + $0x58] ss:$40 sps:$4 sm:$0xff]   ;;  %v7658_v19 = vld [vmem:[%s13502_s4 + $0x14] ss:$40 sps:$4 sm:$0xff]   ;;  %vm5951_vm13 = vcmask 392512   ;;  %vm6062_vm14 = vcmask 917312  }
   0x8   :  { %555 = vmatprep.subr.bf16.mxu1 %v7646_v10  ;;  %668 = vmatprep.subr.bf16.mxu0 %v7652_v12  ;;  %v7664_v20 = vld [vmem:[%s13502_s4 + $0x1c] ss:$40 sps:$4 sm:$0xff]   ;;  %v8797_v23 = vld [vmem:[%s13504_s3] ss:$0 sm:$0xff]  ;;  %vm5958_vm15 = vcmask 458112  }
   0xa   :  { %7573 = vmatmul.mubr.msk.bf16.vlgmr.msra.gmra.mrb[0].mxu0 %vm123_vm0, %v7638_v4  ;;  %7577 = vmatmul.mubr.msk.bf16.vlgmr.msra.gmra.mrb[0].mxu1 %vm123_vm0, %v7639_v5 }
   0xb   :  { %7580 = vmatprep.mubr.msk.bf16.mxu1 %vm123_vm0, %v7640_v6  ;;  %556 = vmatpush1.bf16.msra.mxu1 %v7644_v11 }
   0xc   :  { %669 = vmatpush1.bf16.msra.mxu0 %v7650_v13  ;;  %557 = vmatprep.subr.bf16.mxu1 %v7649_v14 }
   0xd   :  { %670 = vmatprep.subr.bf16.mxu0 %v7655_v15  ;;  %700 = vmatprep.mubr.bf16.mxu0 %v13517_v18 }
   0xf   :  { %558 = vmatpush1.bf16.msra.mxu1 %v7647_v16 }
  0x10   :  { %671 = vmatpush1.bf16.msra.mxu0 %v7653_v17  ;;  %781 = vmatprep.subr.bf16.mxu1 %v7658_v19 }
  0x11   :  { %894 = vmatprep.subr.bf16.mxu0 %v7664_v20 }
  0x12   :  { %7581 = vmatmul.mubr.msk.bf16.gmra.mrb[4].mxu1 %vm123_vm0, %v7641_v7 }
  0x13   :  { %7584 = vmatprep.mubr.msk.bf16.mxu1 %vm123_vm0, %v7642_v8 }
  0x1a   :  { %7585 = vmatmul.mubr.msk.bf16.gmra.mrb[8].mxu1 %vm123_vm0, %v7643_v9 }
  0x1b   :  { %587 = vmatprep.mubr.bf16.mxu1 %v13517_v18 }
  0xdd   :  { %v7574_v22 = vpop.f32.mrb[0].mxu0  ;;  %v7578_v24 = vpop.f32.mrb[0].mxu1 }
  0xde   :  { %v254_v25 = vmul.f32 %v7574_v22, %v8792_v21  ;;  %v258_v26 = vmul.f32 %v7578_v24, %v8792_v21  ;;  %v182_v27 = vpop.f32.mrb[1].mxu0  ;;  %v198_v28 = vpop.f32.mrb[1].mxu1 }
  0xdf   :  { %v252_v29 = vmul.f32 %v8792_v21, %v182_v27  ;;  %v256_v30 = vmul.f32 %v8792_v21, %v198_v28  ;;  %v7575_v31 = vpop.f32.mrb[2].mxu0  ;;  %v7579_v32 = vpop.f32.mrb[2].mxu1 }
  0xe0   :  { %v8804_v33 = vadd.f32 %v8797_v23, %v254_v25  ;;  %v8807_v34 = vadd.f32 %v8797_v23, %v258_v26  ;;  %v255_v35 = vmul.f32 %v7575_v31, %v8792_v21  ;;  %v259_v36 = vmul.f32 %v7579_v32, %v8792_v21  ;;  %v185_v37 = vpop.f32.mrb[3].mxu0  ;;  %v201_v38 = vpop.f32.mrb[3].mxu1 }
  0xe1   :  { %v8812_v39 = vadd.f32 %v8797_v23, %v252_v29  ;;  %v8815_v40 = vadd.f32 %v8797_v23, %v256_v30  ;;  %v253_v41 = vmul.f32 %v8792_v21, %v185_v37  ;;  %v257_v42 = vmul.f32 %v8792_v21, %v201_v38 }
  0xe2   :  { %v7012_v43 = vmul.f32 -1.442695, %v8804_v33  ;;  %v7016_v44 = vmul.f32 -1.442695, %v8807_v34  ;;  %v8822_v45 = vadd.f32 %v8797_v23, %v255_v35  ;;  %v8825_v46 = vadd.f32 %v8797_v23, %v259_v36 }
  0xe3   :  { %v7010_v47 = vmul.f32 -1.442695, %v8812_v39  ;;  %v7014_v48 = vmul.f32 -1.442695, %v8815_v40  ;;  %v8830_v49 = vadd.f32 %v8797_v23, %v253_v41  ;;  %v8833_v50 = vadd.f32 %v8797_v23, %v257_v42 }
  0xe4   :  { %7884 = vpow2.f32 %v7012_v43  ;;  %v7013_v51 = vmul.f32 -1.442695, %v8822_v45  ;;  %v7017_v52 = vmul.f32 -1.442695, %v8825_v46 }
  0xe5   :  { %7886 = vpow2.f32 %v7016_v44  ;;  %v7582_v53 = vpop.f32.mrb[4].mxu1  ;;  %v7011_v54 = vmul.f32 -1.442695, %v8830_v49  ;;  %v7015_v57 = vmul.f32 -1.442695, %v8833_v50 }
  0xe6   :  { %7888 = vpow2.f32 %v7010_v47  ;;  %v262_v55 = vmul.f32 %v7582_v53, %v8792_v21  ;;  %v214_v56 = vpop.f32.mrb[5].mxu1 }
  0xe7   :  { %7890 = vpow2.f32 %v7014_v48  ;;  %v260_v58 = vmul.f32 %v8792_v21, %v214_v56  ;;  %v7583_v59 = vpop.f32.mrb[6].mxu1 }
  0xe8   :  { %7892 = vpow2.f32 %v7013_v51  ;;  %v8842_v60 = vadd.f32 %v8797_v23, %v262_v55  ;;  %v263_v61 = vmul.f32 %v7583_v59, %v8792_v21  ;;  %v217_v62 = vpop.f32.mrb[7].mxu1 }
  0xe9   :  { %7894 = vpow2.f32 %v7017_v52  ;;  %v8846_v63 = vadd.f32 %v8797_v23, %v260_v58  ;;  %v261_v0 = vmul.f32 %v8792_v21, %v217_v62 }
  0xea   :  { %7896 = vpow2.f32 %v7011_v54  ;;  %v7020_v1 = vmul.f32 -1.442695, %v8842_v60  ;;  %v8851_v2 = vadd.f32 %v8797_v23, %v263_v61 }
  0xeb   :  { %7898 = vpow2.f32 %v7015_v57  ;;  %v7018_v3 = vmul.f32 -1.442695, %v8846_v63  ;;  %v8855_v4 = vadd.f32 %v8797_v23, %v261_v0 }
  0xec   :  { %7900 = vpow2.f32 %v7020_v1  ;;  %v7021_v5 = vmul.f32 -1.442695, %v8851_v2 }
  0xed   :  { %7902 = vpow2.f32 %v7018_v3  ;;  %v7019_v6 = vmul.f32 -1.442695, %v8855_v4  ;;  %v7586_v7 = vpop.f32.mrb[8].mxu1 }
  0xee   :  { %v7885_v8 = vpop.eup %7884  ;;  %7904 = vpow2.f32 %v7021_v5  ;;  %v230_v9 = vpop.f32.mrb[9].mxu1  ;;  %v266_v19 = vmul.f32 %v7586_v7, %v8792_v21 }
  0xef   :  { %v7887_v10 = vpop.eup %7886  ;;  %v341_v11 = vadd.f32 1.0, %v7885_v8  ;;  %7906 = vpow2.f32 %v7019_v6  ;;  %v7587_v12 = vpop.f32.mrb[10].mxu1  ;;  %v264_v24 = vmul.f32 %v8792_v21, %v230_v9 }
  0xf0   :  { %v7889_v13 = vpop.eup %7888  ;;  %v345_v14 = vadd.f32 1.0, %v7887_v10  ;;  %v233_v15 = vpop.f32.mrb[11].mxu1  ;;  %v267_v27 = vmul.f32 %v7587_v12, %v8792_v21  ;;  %v8864_v35 = vadd.f32 %v8797_v23, %v266_v19 }
  0xf1   :  { %v7891_v16 = vpop.eup %7890  ;;  %7908 = vrcp.f32 %v341_v11  ;;  %v339_v17 = vadd.f32 1.0, %v7889_v13  ;;  %v265_v30 = vmul.f32 %v8792_v21, %v233_v15  ;;  %v8867_v38 = vadd.f32 %v8797_v23, %v264_v24 }
  0xf2   :  { %v7893_v20 = vpop.eup %7892  ;;  %7910 = vrcp.f32 %v345_v14  ;;  %v343_v22 = vadd.f32 1.0, %v7891_v16  ;;  %v8870_v43 = vadd.f32 %v8797_v23, %v267_v27  ;;  %v7024_v52 = vmul.f32 -1.442695, %v8864_v35 }
  0xf3   :  { %v7895_v25 = vpop.eup %7894  ;;  %7912 = vrcp.f32 %v339_v17  ;;  %v342_v26 = vadd.f32 1.0, %v7893_v20  ;;  %v8873_v47 = vadd.f32 %v8797_v23, %v265_v30  ;;  %v7022_v54 = vmul.f32 -1.442695, %v8867_v38  ;;  %v7667_v17 = vld [vmem:[%s13502_s4 + $0x6c] ss:$40 sps:$4 sm:$0xff]  }
  0xf4   :  { %v7897_v28 = vpop.eup %7896  ;;  %7914 = vrcp.f32 %v343_v22  ;;  %v346_v29 = vadd.f32 1.0, %v7895_v25  ;;  %v7025_v56 = vmul.f32 -1.442695, %v8870_v43 }
  0xf5   :  { %v7899_v31 = vpop.eup %7898  ;;  %7916 = vrcp.f32 %v342_v26  ;;  %v340_v32 = vadd.f32 1.0, %v7897_v28  ;;  %v7023_v58 = vmul.f32 -1.442695, %v8873_v47  ;;  %v7665_v28 = vld [vmem:[%s13502_s4 + $0x68] ss:$40 sps:$4 sm:$0xff]  }
  0xf6   :  { %v7901_v36 = vpop.eup %7900  ;;  %7918 = vrcp.f32 %v346_v29  ;;  %v344_v37 = vadd.f32 1.0, %v7899_v31 }
  0xf7   :  { %v7903_v41 = vpop.eup %7902  ;;  %7920 = vrcp.f32 %v340_v32  ;;  %v349_v42 = vadd.f32 1.0, %v7901_v36 }
  0xf8   :  { %v7905_v44 = vpop.eup %7904  ;;  %7922 = vrcp.f32 %v344_v37  ;;  %v347_v21 = vadd.f32 1.0, %v7903_v41 }
  0xf9   :  { %v7907_v48 = vpop.eup %7906  ;;  %7924 = vrcp.f32 %v349_v42  ;;  %v350_v51 = vadd.f32 1.0, %v7905_v44 }
  0xfa   :  { %7926 = vrcp.f32 %v347_v21  ;;  %v348_v53 = vadd.f32 1.0, %v7907_v48 }
  0xfb   :  { %v7909_v55 = vpop.eup %7908  ;;  %7928 = vrcp.f32 %v350_v51 }
  0xfc   :  { %v7911_v57 = vpop.eup %7910  ;;  %7930 = vrcp.f32 %v348_v53  ;;  %v389_v0 = vmul.f32 %v7909_v55, %v8804_v33 }
  0xfd   :  { %v7913_v59 = vpop.eup %7912  ;;  %7932 = vpow2.f32 %v7024_v52  ;;  %v393_v5 = vmul.f32 %v7911_v57, %v8807_v34  ;;  %v7656_v34 = vld [vmem:[%s13502_s4 + $0x10] ss:$40 sps:$4 sm:$0xff]   ;;  %v13516_v52 = vlaneseq }
  0xfe   :  { %v7915_v23 = vpop.eup %7914  ;;  %7934 = vpow2.f32 %v7022_v54  ;;  %v387_v8 = vmul.f32 %v7913_v59, %v8812_v39  ;;  %v7661_v39 = vld [vmem:[%s13502_s4 + $0x64] ss:$40 sps:$4 sm:$0xff]  }
  0xff   :  { %v7917_v61 = vpop.eup %7916  ;;  %7936 = vpow2.f32 %v7025_v56  ;;  %v391_v12 = vmul.f32 %v7915_v23, %v8815_v40  ;;  %v7662_v40 = vld [vmem:[%s13502_s4 + $0x18] ss:$40 sps:$4 sm:$0xff]   ;;  %v9060_v53 = vshrl.u32 %v13516_v52, 7 }
 0x100   :  { %v7919_v62 = vpop.eup %7918  ;;  %v390_v1 = vmul.f32 %v7917_v61, %v8822_v45  ;;  %7938 = vpow2.f32 %v7023_v58  ;;  %v1120_v56 = vld [vmem:[%s13505_s5] sm:$0xff] }
 0x101   :  { %v7921_v3 = vpop.eup %7920  ;;  %v394_v6 = vmul.f32 %v7919_v62, %v8825_v46  ;;  %13892 = vst [vmem:[#allocation2_spill] sm:$0xff] %v9060_v53  ;;  %v9063_v54 = vsub.s32 0, %v9060_v53  ;;  %v9066_v55 = vsub.s32 2, %v9060_v53  ;;  %v9072_v57 = vsub.s32 1, %v9060_v53  ;;  %v1334_v59 = vld [vmem:[%s13506_s6] sm:$0xff] }
 0x102   :  { %v7923_v7 = vpop.eup %7922  ;;  %v8884_v9 = vpack.c.bf16 %v390_v1, %v389_v0  ;;  %v388_v10 = vmul.f32 %v7921_v3, %v8830_v49  ;;  %v9075_v58 = vsub.s32 3, %v9060_v53 }
 0x103   :  { %v7925_v11 = vpop.eup %7924  ;;  %v8888_v13 = vpack.c.bf16 %v394_v6, %v393_v5  ;;  %v392_v33 = vmul.f32 %v7923_v7, %v8833_v50  ;;  %13893 = vst [vmem:[#allocation3_spill] sm:$0xff] %v9063_v54  ;;  %13894 = vst [vmem:[#allocation4_spill] sm:$0xff] %v9066_v55  ;;  %v9081_v23 = vrot.slane %v1120_v56, %v9063_v54 }
 0x104   :  { %v7927_v45 = vpop.eup %7926  ;;  %v8894_v46 = vpack.c.bf16 %v388_v10, %v387_v8  ;;  %v397_v50 = vmul.f32 %v7925_v11, %v8842_v60  ;;  %v7659_v60 = vld [vmem:[%s13502_s4 + $0x60] ss:$40 sps:$4 sm:$0xff]   ;;  %13895 = vst [vmem:[#allocation5_spill] sm:$0xff] %v9072_v57  ;;  %13896 = vst [vmem:[#allocation6_spill] sm:$0xff] %v9075_v58  ;;  %v9084_v61 = vrot.slane %v1120_v56, %v9066_v55 }
 0x105   :  { %v7929_v14 = vpop.eup %7928  ;;  %v8899_v49 = vpack.c.bf16 %v392_v33, %v391_v12  ;;  %v395_v20 = vmul.f32 %v7927_v45, %v8846_v63  ;;  %v7670_v63 = vld [vmem:[%s13502_s4 + $0x24] ss:$40 sps:$4 sm:$0xff]   ;;  %v9087_v62 = vrot.slane %v1120_v56, %v9072_v57  ;;  %v9090_v0 = vrot.slane %v1120_v56, %v9075_v58 }
 0x106   :  { %v7931_v15 = vpop.eup %7930  ;;  %v398_v16 = vmul.f32 %v7929_v14, %v8851_v2  ;;  %7046 = vmatmul.mubr.msk.bf16.vlgmr.msra.gmra.mrb[12].mxu1 %vm123_vm0, %v8894_v46  ;;  %7054 = vmatmul.mubr.msk.bf16.vlgmr.msra.gmra.mrb[4].mxu0 %vm123_vm0, %v8894_v46  ;;  %v9093_v1 = vrot.slane %v1334_v59, %v9063_v54  ;;  %v9096_v3 = vrot.slane %v1334_v59, %v9066_v55 }
 0x107   :  { %v7933_v19 = vpop.eup %7932  ;;  %v396_v22 = vmul.f32 %v7931_v15, %v8855_v4  ;;  %782 = vmatpush1.bf16.msra.mxu1 %v7656_v34  ;;  %597 = vmatprep.mubr.bf16.mxu1 %v13517_v18  ;;  %v9099_v7 = vrot.slane %v1334_v59, %v9072_v57  ;;  %v9102_v8 = vrot.slane %v1334_v59, %v9075_v58 }
 0x108   :  { %v7935_v2 = vpop.eup %7934  ;;  %v8919_v24 = vpack.c.bf16 %v398_v16, %v397_v50  ;;  %v353_v25 = vadd.f32 1.0, %v7933_v19  ;;  %710 = vmatprep.mubr.bf16.mxu0 %v13517_v18  ;;  %783 = vmatprep.subr.bf16.mxu1 %v7661_v39 }
 0x109   :  { %v7937_v26 = vpop.eup %7936  ;;  %v8925_v4 = vpack.c.bf16 %v396_v22, %v395_v20  ;;  %v351_v27 = vadd.f32 1.0, %v7935_v2  ;;  %895 = vmatpush1.bf16.msra.mxu0 %v7662_v40 }
 0x10a   :  { %v7939_v29 = vpop.eup %7938  ;;  %7940 = vrcp.f32 %v353_v25  ;;  %v354_v30 = vadd.f32 1.0, %v7937_v26  ;;  %896 = vmatprep.subr.bf16.mxu0 %v7667_v17 }
 0x10b   :  { %7942 = vrcp.f32 %v351_v27  ;;  %v352_v31 = vadd.f32 1.0, %v7939_v29  ;;  %784 = vmatpush1.bf16.msra.mxu1 %v7659_v60 }
 0x10c   :  { %7944 = vrcp.f32 %v354_v30  ;;  %1007 = vmatprep.subr.bf16.mxu1 %v7670_v63 }
 0x10d   :  { %7946 = vrcp.f32 %v352_v31  ;;  %897 = vmatpush1.bf16.msra.mxu0 %v7665_v28 }
 0x10e   :  { %7047 = vmatmul.mubr.msk.bf16.gmra.mrb[16].mxu1 %vm123_vm0, %v8884_v9  ;;  %7055 = vmatmul.mubr.msk.bf16.gmra.mrb[8].mxu0 %vm123_vm0, %v8884_v9 }
 0x10f   :  { %607 = vmatprep.mubr.bf16.mxu1 %v13517_v18  ;;  %720 = vmatprep.mubr.bf16.mxu0 %v13517_v18 }
 0x114   :  { %v7941_v32 = vpop.eup %7940 }
 0x115   :  { %v7943_v36 = vpop.eup %7942  ;;  %v401_v37 = vmul.f32 %v7941_v32, %v8864_v35 }
 0x116   :  { %v7945_v41 = vpop.eup %7944  ;;  %v399_v42 = vmul.f32 %v7943_v36, %v8867_v38  ;;  %7048 = vmatmul.mubr.msk.bf16.gmra.mrb[20].mxu1 %vm123_vm0, %v8899_v49  ;;  %7056 = vmatmul.mubr.msk.bf16.gmra.mrb[12].mxu0 %vm123_vm0, %v8899_v49  ;;  %v7668_v38 = vld [vmem:[%s13502_s4 + $0x20] ss:$40 sps:$4 sm:$0xff]  }
 0x117   :  { %v7947_v44 = vpop.eup %7946  ;;  %v402_v21 = vmul.f32 %v7945_v41, %v8870_v43  ;;  %617 = vmatprep.mubr.bf16.mxu1 %v13517_v18  ;;  %730 = vmatprep.mubr.bf16.mxu0 %v13517_v18  ;;  %v7673_v43 = vld [vmem:[%s13502_s4 + $0x74] ss:$40 sps:$4 sm:$0xff]  }
 0x118   :  { %v400_v48 = vmul.f32 %v7947_v44, %v8873_v47  ;;  %v7671_v47 = vld [vmem:[%s13502_s4 + $0x70] ss:$40 sps:$4 sm:$0xff]  }
 0x119   :  { %v8946_v51 = vpack.c.bf16 %v402_v21, %v401_v37 }
 0x11a   :  { %v8948_v35 = vpack.c.bf16 %v400_v48, %v399_v42 }
 0x11e   :  { %7049 = vmatmul.mubr.msk.bf16.gmra.mrb[24].mxu1 %vm123_vm0, %v8888_v13  ;;  %7057 = vmatmul.mubr.msk.bf16.gmra.mrb[16].mxu0 %vm123_vm0, %v8888_v13 }
 0x11f   :  { %627 = vmatprep.mubr.bf16.mxu1 %v13517_v18  ;;  %740 = vmatprep.mubr.bf16.mxu0 %v13517_v18 }
 0x126   :  { %7050 = vmatmul.mubr.msk.bf16.gmra.mrb[28].mxu1 %vm123_vm0, %v8925_v4  ;;  %7058 = vmatmul.mubr.msk.bf16.gmra.mrb[20].mxu0 %vm123_vm0, %v8925_v4 }
 0x127   :  { %637 = vmatprep.mubr.bf16.mxu1 %v13517_v18  ;;  %750 = vmatprep.mubr.bf16.mxu0 %v13517_v18 }
 0x12e   :  { %7051 = vmatmul.mubr.msk.bf16.gmra.mrb[32].mxu1 %vm123_vm0, %v8919_v24  ;;  %7059 = vmatmul.mubr.msk.bf16.gmra.mrb[24].mxu0 %vm123_vm0, %v8919_v24 }
 0x12f   :  { %647 = vmatprep.mubr.bf16.mxu1 %v13517_v18  ;;  %760 = vmatprep.mubr.bf16.mxu0 %v13517_v18 }
 0x136   :  { %7052 = vmatmul.mubr.msk.bf16.gmra.mrb[36].mxu1 %vm123_vm0, %v8948_v35  ;;  %7060 = vmatmul.mubr.msk.bf16.gmra.mrb[28].mxu0 %vm123_vm0, %v8948_v35 }
 0x137   :  { %657 = vmatprep.mubr.bf16.mxu1 %v13517_v18  ;;  %770 = vmatprep.mubr.bf16.mxu0 %v13517_v18 }
 0x13e   :  { %7053 = vmatmul.mubr.msk.bf16.gmra.mrb[40].mxu1 %vm123_vm0, %v8946_v51  ;;  %7061 = vmatmul.mubr.msk.bf16.gmra.mrb[32].mxu0 %vm123_vm0, %v8946_v51 }
 0x13f   :  { %813 = vmatprep.mubr.bf16.mxu1 %v13517_v18  ;;  %926 = vmatprep.mubr.bf16.mxu0 %v13517_v18 }
 0x146   :  { %7062 = vmatmul.mubr.msk.bf16.vlgmr.msra.gmra.mrb[44].mxu1 %vm123_vm0, %v8894_v46  ;;  %7070 = vmatmul.mubr.msk.bf16.vlgmr.msra.gmra.mrb[36].mxu0 %vm123_vm0, %v8894_v46 }
 0x147   :  { %1008 = vmatpush1.bf16.msra.mxu1 %v7668_v38  ;;  %823 = vmatprep.mubr.bf16.mxu1 %v13517_v18 }
 0x148   :  { %936 = vmatprep.mubr.bf16.mxu0 %v13517_v18  ;;  %1009 = vmatprep.subr.bf16.mxu1 %v7673_v43 }
 0x14b   :  { %1010 = vmatpush1.bf16.msra.mxu1 %v7671_v47 }
 0x14e   :  { %7063 = vmatmul.mubr.msk.bf16.gmra.mrb[48].mxu1 %vm123_vm0, %v8884_v9  ;;  %7071 = vmatmul.mubr.msk.bf16.gmra.mrb[40].mxu0 %vm123_vm0, %v8884_v9 }
 0x14f   :  { %833 = vmatprep.mubr.bf16.mxu1 %v13517_v18  ;;  %946 = vmatprep.mubr.bf16.mxu0 %v13517_v18 }
 0x156   :  { %7064 = vmatmul.mubr.msk.bf16.gmra.mrb[52].mxu1 %vm123_vm0, %v8899_v49  ;;  %7072 = vmatmul.mubr.msk.bf16.gmra.mrb[44].mxu0 %vm123_vm0, %v8899_v49 }
 0x157   :  { %843 = vmatprep.mubr.bf16.mxu1 %v13517_v18  ;;  %956 = vmatprep.mubr.bf16.mxu0 %v13517_v18 }
 0x15e   :  { %7065 = vmatmul.mubr.msk.bf16.gmra.mrb[56].mxu1 %vm123_vm0, %v8888_v13  ;;  %7073 = vmatmul.mubr.msk.bf16.gmra.mrb[48].mxu0 %vm123_vm0, %v8888_v13 }
 0x15f   :  { %853 = vmatprep.mubr.bf16.mxu1 %v13517_v18  ;;  %966 = vmatprep.mubr.bf16.mxu0 %v13517_v18 }
 0x166   :  { %7066 = vmatmul.mubr.msk.bf16.gmra.mrb[60].mxu1 %vm123_vm0, %v8925_v4  ;;  %7074 = vmatmul.mubr.msk.bf16.gmra.mrb[52].mxu0 %vm123_vm0, %v8925_v4 }
 0x167   :  { %863 = vmatprep.mubr.bf16.mxu1 %v13517_v18  ;;  %976 = vmatprep.mubr.bf16.mxu0 %v13517_v18 }
 0x16e   :  { %7067 = vmatmul.mubr.msk.bf16.gmra.mrb[64].mxu1 %vm123_vm0, %v8919_v24  ;;  %7075 = vmatmul.mubr.msk.bf16.gmra.mrb[56].mxu0 %vm123_vm0, %v8919_v24 }
 0x16f   :  { %873 = vmatprep.mubr.bf16.mxu1 %v13517_v18  ;;  %986 = vmatprep.mubr.bf16.mxu0 %v13517_v18 }
 0x176   :  { %7068 = vmatmul.mubr.msk.bf16.gmra.mrb[68].mxu1 %vm123_vm0, %v8948_v35  ;;  %7076 = vmatmul.mubr.msk.bf16.gmra.mrb[60].mxu0 %vm123_vm0, %v8948_v35 }
 0x177   :  { %883 = vmatprep.mubr.bf16.mxu1 %v13517_v18  ;;  %996 = vmatprep.mubr.bf16.mxu0 %v13517_v18 }
 0x17e   :  { %7069 = vmatmul.mubr.msk.bf16.gmra.mrb[72].mxu1 %vm123_vm0, %v8946_v51  ;;  %7077 = vmatmul.mubr.msk.bf16.gmra.mrb[64].mxu0 %vm123_vm0, %v8946_v51 }
 0x17f   :  { %1039 = vmatprep.mubr.bf16.mxu1 %v13517_v18 }
 0x186   :  { %7078 = vmatmul.mubr.msk.bf16.vlgmr.msra.gmra.mrb[76].mxu1 %vm123_vm0, %v8894_v46 }
 0x187   :  { %1049 = vmatprep.mubr.bf16.mxu1 %v13517_v18 }
 0x18e   :  { %7079 = vmatmul.mubr.msk.bf16.gmra.mrb[80].mxu1 %vm123_vm0, %v8884_v9 }
 0x18f   :  { %1059 = vmatprep.mubr.bf16.mxu1 %v13517_v18 }
 0x196   :  { %7080 = vmatmul.mubr.msk.bf16.gmra.mrb[84].mxu1 %vm123_vm0, %v8899_v49 }
 0x197   :  { %1069 = vmatprep.mubr.bf16.mxu1 %v13517_v18 }
 0x19e   :  { %7081 = vmatmul.mubr.msk.bf16.gmra.mrb[88].mxu1 %vm123_vm0, %v8888_v13 }
 0x19f   :  { %1079 = vmatprep.mubr.bf16.mxu1 %v13517_v18 }
 0x1a6   :  { %7082 = vmatmul.mubr.msk.bf16.gmra.mrb[92].mxu1 %vm123_vm0, %v8925_v4 }
 0x1a7   :  { %1089 = vmatprep.mubr.bf16.mxu1 %v13517_v18 }
 0x1ae   :  { %7083 = vmatmul.mubr.msk.bf16.gmra.mrb[96].mxu1 %vm123_vm0, %v8919_v24 }
 0x1af   :  { %1099 = vmatprep.mubr.bf16.mxu1 %v13517_v18 }
 0x1b6   :  { %7084 = vmatmul.mubr.msk.bf16.gmra.mrb[100].mxu1 %vm123_vm0, %v8948_v35 }
 0x1b7   :  { %1109 = vmatprep.mubr.bf16.mxu1 %v13517_v18 }
 0x1be   :  { %7085 = vmatmul.mubr.msk.bf16.gmra.mrb[104].mxu1 %vm123_vm0, %v8946_v51  ;;  %vm6069_vm0 = vcmask 982912  }
 0x1d9   :  { %v589_v5 = vpop.f32.mrb[12].mxu1  ;;  %v702_v6 = vpop.f32.mrb[4].mxu0 }
 0x1da   :  { %v1174_v9 = vmul.f32 %v9081_v23, %v589_v5  ;;  %v1176_v10 = vmul.f32 %v9084_v61, %v702_v6  ;;  %v591_v11 = vpop.f32.mrb[13].mxu1  ;;  %v704_v12 = vpop.f32.mrb[5].mxu0 }
 0x1db   :  { %v1175_v13 = vmul.f32 %v9087_v62, %v591_v11  ;;  %v1177_v33 = vmul.f32 %v9090_v0, %v704_v12  ;;  %v593_v34 = vpop.f32.mrb[14].mxu1  ;;  %v706_v45 = vpop.f32.mrb[6].mxu0 }
 0x1dc   :  { %v9109_v46 = vadd.f32 %v9093_v1, %v1174_v9  ;;  %v9112_v39 = vadd.f32 %v9096_v3, %v1176_v10  ;;  %v1184_v14 = vmul.f32 %v9081_v23, %v593_v34  ;;  %v1186_v49 = vmul.f32 %v9084_v61, %v706_v45  ;;  %v595_v40 = vpop.f32.mrb[15].mxu1  ;;  %v708_v15 = vpop.f32.mrb[7].mxu0 }
 0x1dd   :  { %v9117_v50 = vadd.f32 %v9099_v7, %v1175_v13  ;;  %v9120_v16 = vadd.f32 %v9102_v8, %v1177_v33  ;;  %v1185_v17 = vmul.f32 %v9087_v62, %v595_v40  ;;  %v1187_v19 = vmul.f32 %v9090_v0, %v708_v15 }
 0x1de   :  { %v7086_v20 = vmul.f32 -1.442695, %v9109_v46  ;;  %v7088_v22 = vmul.f32 -1.442695, %v9112_v39  ;;  %v9127_v60 = vadd.f32 %v9093_v1, %v1184_v14  ;;  %v9130_v2 = vadd.f32 %v9096_v3, %v1186_v49 }
 0x1df   :  { %v7087_v24 = vmul.f32 -1.442695, %v9117_v50  ;;  %v7089_v25 = vmul.f32 -1.442695, %v9120_v16  ;;  %v9135_v63 = vadd.f32 %v9099_v7, %v1185_v17  ;;  %v9138_v26 = vadd.f32 %v9102_v8, %v1187_v19 }
 0x1e0   :  { %7948 = vpow2.f32 %v7086_v20  ;;  %v7096_v4 = vmul.f32 -1.442695, %v9127_v60  ;;  %v7098_v27 = vmul.f32 -1.442695, %v9130_v2 }
 0x1e1   :  { %7950 = vpow2.f32 %v7088_v22  ;;  %v599_v28 = vpop.f32.mrb[16].mxu1  ;;  %v712_v29 = vpop.f32.mrb[8].mxu0  ;;  %v7097_v30 = vmul.f32 -1.442695, %v9135_v63  ;;  %v7099_v41 = vmul.f32 -1.442695, %v9138_v26 }
 0x1e2   :  { %7952 = vpow2.f32 %v7087_v24  ;;  %v1194_v31 = vmul.f32 %v9081_v23, %v599_v28  ;;  %v1196_v32 = vmul.f32 %v9084_v61, %v712_v29  ;;  %v601_v36 = vpop.f32.mrb[17].mxu1  ;;  %v714_v37 = vpop.f32.mrb[9].mxu0 }
 0x1e3   :  { %7954 = vpow2.f32 %v7089_v25  ;;  %v1195_v42 = vmul.f32 %v9087_v62, %v601_v36  ;;  %v1197_v44 = vmul.f32 %v9090_v0, %v714_v37  ;;  %v603_v21 = vpop.f32.mrb[18].mxu1  ;;  %v716_v48 = vpop.f32.mrb[10].mxu0 }
 0x1e4   :  { %7956 = vpow2.f32 %v7096_v4  ;;  %v9149_v51 = vadd.f32 %v9093_v1, %v1194_v31  ;;  %v9152_v35 = vadd.f32 %v9096_v3, %v1196_v32  ;;  %v1204_v38 = vmul.f32 %v9081_v23, %v603_v21  ;;  %v605_v43 = vpop.f32.mrb[19].mxu1  ;;  %v718_v47 = vpop.f32.mrb[11].mxu0 }
 0x1e5   :  { %7958 = vpow2.f32 %v7098_v27  ;;  %v9156_v56 = vadd.f32 %v9099_v7, %v1195_v42  ;;  %v9159_v59 = vadd.f32 %v9102_v8, %v1197_v44  ;;  %v1206_v45 = vmul.f32 %v9084_v61, %v716_v48 }
 0x1e6   :  { %7960 = vpow2.f32 %v7097_v30  ;;  %v7106_v5 = vmul.f32 -1.442695, %v9149_v51  ;;  %v7108_v6 = vmul.f32 -1.442695, %v9152_v35  ;;  %v9164_v9 = vadd.f32 %v9093_v1, %v1204_v38 }
 0x1e7   :  { %7962 = vpow2.f32 %v7099_v41  ;;  %v7107_v10 = vmul.f32 -1.442695, %v9156_v56  ;;  %v7109_v11 = vmul.f32 -1.442695, %v9159_v59  ;;  %v1205_v24 = vmul.f32 %v9087_v62, %v605_v43 }
 0x1e8   :  { %7964 = vpow2.f32 %v7106_v5  ;;  %v7116_v12 = vmul.f32 -1.442695, %v9164_v9  ;;  %v9172_v31 = vadd.f32 %v9096_v3, %v1206_v45  ;;  %v1207_v37 = vmul.f32 %v9090_v0, %v718_v47 }
 0x1e9   :  { %7966 = vpow2.f32 %v7108_v6  ;;  %v609_v13 = vpop.f32.mrb[20].mxu1  ;;  %v722_v33 = vpop.f32.mrb[12].mxu0  ;;  %v9176_v44 = vadd.f32 %v9099_v7, %v1205_v24 }
 0x1ea   :  { %v7949_v34 = vpop.eup %7948  ;;  %7968 = vpow2.f32 %v7107_v10  ;;  %v611_v14 = vpop.f32.mrb[21].mxu1  ;;  %v1214_v38 = vmul.f32 %v9081_v23, %v609_v13  ;;  %v1216_v47 = vmul.f32 %v9084_v61, %v722_v33 }
 0x1eb   :  { %v724_v49 = vpop.f32.mrb[13].mxu0  ;;  %v7951_v40 = vpop.eup %7950  ;;  %v2028_v15 = vadd.f32 1.0, %v7949_v34  ;;  %7970 = vpow2.f32 %v7109_v11  ;;  %v7118_v11 = vmul.f32 -1.442695, %v9172_v31  ;;  %v1215_v13 = vmul.f32 %v9087_v62, %v611_v14 }
 0x1ec   :  { %v613_v17 = vpop.f32.mrb[22].mxu1  ;;  %v726_v19 = vpop.f32.mrb[14].mxu0  ;;  %v2030_v22 = vadd.f32 1.0, %v7951_v40  ;;  %7972 = vpow2.f32 %v7116_v12  ;;  %v7117_v33 = vmul.f32 -1.442695, %v9176_v44  ;;  %v9198_v14 = vadd.f32 %v9093_v1, %v1214_v38 }
 0x1ed   :  { %v7953_v20 = vpop.eup %7952  ;;  %v615_v25 = vpop.f32.mrb[23].mxu1  ;;  %7974 = vrcp.f32 %v2028_v15  ;;  %v9184_v15 = vadd.f32 %v9102_v8, %v1207_v37  ;;  %v1224_v37 = vmul.f32 %v9081_v23, %v613_v17 }
 0x1ee   :  { %v7955_v4 = vpop.eup %7954  ;;  %v2029_v27 = vadd.f32 1.0, %v7953_v20  ;;  %v728_v28 = vpop.f32.mrb[15].mxu0  ;;  %7976 = vrcp.f32 %v2030_v22 }
 0x1ef   :  { %v7957_v29 = vpop.eup %7956  ;;  %v2031_v30 = vadd.f32 1.0, %v7955_v4  ;;  %v7119_v17 = vmul.f32 -1.442695, %v9184_v15 }
 0x1f0   :  { %v7959_v32 = vpop.eup %7958  ;;  %7978 = vrcp.f32 %v2029_v27  ;;  %v2038_v36 = vadd.f32 1.0, %v7957_v29  ;;  %v1217_v27 = vmul.f32 %v9090_v0, %v724_v49  ;;  %v1226_v49 = vmul.f32 %v9084_v61, %v726_v19 }
 0x1f1   :  { %v7961_v41 = vpop.eup %7960  ;;  %7980 = vrcp.f32 %v2031_v30  ;;  %v2040_v42 = vadd.f32 1.0, %v7959_v32  ;;  %v619_v43 = vpop.f32.mrb[24].mxu1  ;;  %v7126_v19 = vmul.f32 -1.442695, %v9198_v14 }
 0x1f2   :  { %v7963_v21 = vpop.eup %7962  ;;  %7982 = vrcp.f32 %v2038_v36  ;;  %v2039_v48 = vadd.f32 1.0, %v7961_v41  ;;  %v732_v5 = vpop.f32.mrb[16].mxu0 }
 0x1f3   :  { %v7965_v6 = vpop.eup %7964  ;;  %7984 = vrcp.f32 %v2040_v42  ;;  %v2041_v10 = vadd.f32 1.0, %v7963_v21  ;;  %v621_v12 = vpop.f32.mrb[25].mxu1  ;;  %v9202_v21 = vadd.f32 %v9096_v3, %v1216_v47  ;;  %v1227_v47 = vmul.f32 %v9090_v0, %v728_v28 }
 0x1f4   :  { %v9181_v34 = vpop.f32.mrb[17].mxu0  ;;  %v7967_v45 = vpop.eup %7966  ;;  %7986 = vrcp.f32 %v2039_v48  ;;  %v2048_v40 = vadd.f32 1.0, %v7965_v6  ;;  %v1236_v28 = vmul.f32 %v9084_v61, %v732_v5 }
 0x1f5   :  { %v9187_v20 = vpop.f32.mrb[26].mxu1  ;;  %v9189_v22 = vpop.f32.mrb[18].mxu0  ;;  %7988 = vrcp.f32 %v2041_v10  ;;  %v2050_v4 = vadd.f32 1.0, %v7967_v45  ;;  %v9206_v10 = vadd.f32 %v9099_v7, %v1215_v13  ;;  %v1225_v45 = vmul.f32 %v9087_v62, %v615_v25 }
 0x1f6   :  { %v7969_v24 = vpop.eup %7968  ;;  %v9193_v29 = vpop.f32.mrb[27].mxu1  ;;  %7990 = vrcp.f32 %v2048_v40  ;;  %v9211_v40 = vadd.f32 %v9102_v8, %v1217_v27  ;;  %v1234_v13 = vmul.f32 %v9081_v23, %v619_v43  ;;  %v7128_v27 = vmul.f32 -1.442695, %v9202_v21 }
 0x1f7   :  { %v9195_v30 = vpop.f32.mrb[19].mxu0  ;;  %v7971_v32 = vpop.eup %7970  ;;  %v2049_v36 = vadd.f32 1.0, %v7969_v24  ;;  %7992 = vrcp.f32 %v2050_v4  ;;  %v9216_v4 = vadd.f32 %v9093_v1, %v1224_v37  ;;  %v7127_v43 = vmul.f32 -1.442695, %v9206_v10 }
 0x1f8   :  { %v7973_v41 = vpop.eup %7972  ;;  %v2051_v42 = vadd.f32 1.0, %v7971_v32  ;;  %13897 = vst [vmem:[#allocation7_spill] sm:$0xff] %v9211_v40  ;;  %v9234_v52 = vadd.f32 %v9099_v7, %v1225_v45  ;;  %v7129_v5 = vmul.f32 -1.442695, %v9211_v40  ;;  %v9243_v55 = vadd.f32 %v9102_v8, %v1227_v47 }
 0x1f9   :  { %v7975_v48 = vpop.eup %7974  ;;  %7994 = vrcp.f32 %v2049_v36  ;;  %v2058_v6 = vadd.f32 1.0, %v7973_v41  ;;  %13898 = vst [vmem:[#allocation8_spill] sm:$0xff] %v9216_v4  ;;  %v9219_v32 = vpop.f32.mrb[28].mxu1  ;;  %v9225_v41 = vadd.f32 %v9096_v3, %v1226_v49  ;;  %v7136_v45 = vmul.f32 -1.442695, %v9216_v4 }
 0x1fa   :  { %v7977_v38 = vpop.eup %7976  ;;  %7996 = vrcp.f32 %v2051_v42  ;;  %v9221_v25 = vpop.f32.mrb[20].mxu0  ;;  %13900 = vst [vmem:[#allocation10_spill] sm:$0xff] %v9234_v52  ;;  %v9255_v40 = vadd.f32 %v9096_v3, %v1236_v28  ;;  %v9264_v4 = vmul.f32 %v7975_v48, %v9109_v46 }
 0x1fb   :  { %v7979_v24 = vpop.eup %7978  ;;  %7998 = vrcp.f32 %v2058_v6  ;;  %13899 = vst [vmem:[#allocation9_spill] sm:$0xff] %v9225_v41  ;;  %v9228_v42 = vpop.f32.mrb[29].mxu1 }
 0x1fc   :  { %v7981_v36 = vpop.eup %7980  ;;  %8000 = vpow2.f32 %v7118_v11  ;;  %v9230_v6 = vpop.f32.mrb[21].mxu0  ;;  %v1235_v11 = vmul.f32 %v9087_v62, %v621_v12  ;;  %v9251_v12 = vadd.f32 %v9093_v1, %v1234_v13  ;;  %13905 = vst [vmem:[#allocation15_spill] sm:$0xff] %v9264_v4  ;;  %v7139_v13 = vmul.f32 -1.442695, %v9243_v55 }
 0x1fd   :  { %v7983_v37 = vpop.eup %7982  ;;  %8002 = vpow2.f32 %v7117_v33  ;;  %v9237_v18 = vpop.f32.mrb[30].mxu1 }
 0x1fe   :  { %v9239_v58 = vpop.f32.mrb[22].mxu0  ;;  %v7985_v49 = vpop.eup %7984  ;;  %8004 = vpow2.f32 %v7119_v17  ;;  %13903 = vst [vmem:[#allocation13_spill] sm:$0xff] %v9251_v12  ;;  %v7138_v17 = vmul.f32 -1.442695, %v9225_v41 }
 0x1ff   :  { %v9245_v57 = vpop.f32.mrb[31].mxu1  ;;  %v9247_v33 = vpop.f32.mrb[23].mxu0  ;;  %8006 = vpow2.f32 %v7126_v19 }
 0x200   :  { %13901 = vst [vmem:[#allocation11_spill] sm:$0xff] %v9245_v57  ;;  %13902 = vst [vmem:[#allocation12_spill] sm:$0xff] %v9247_v33  ;;  %v7987_v54 = vpop.eup %7986  ;;  %8008 = vpow2.f32 %v7128_v27  ;;  %v7137_v57 = vmul.f32 -1.442695, %v9234_v52  ;;  %v9259_v33 = vadd.f32 %v9099_v7, %v1235_v11  ;;  %v1237_v27 = vmul.f32 %v9090_v0, %v9181_v34 }
 0x201   :  { %v7989_v53 = vpop.eup %7988  ;;  %8010 = vpow2.f32 %v7127_v43  ;;  %v9272_v43 = vmul.f32 %v7977_v38, %v9112_v39  ;;  %v9275_v52 = vmul.f32 %v7983_v37, %v9127_v60  ;;  %v7146_v11 = vmul.f32 -1.442695, %v9251_v12  ;;  %v9278_v41 = vpop.f32.mrb[32].mxu1 }
 0x202   :  { %v7991_v47 = vpop.eup %7990  ;;  %13904 = vst [vmem:[#allocation14_spill] sm:$0xff] %v9259_v33  ;;  %8012 = vpow2.f32 %v7129_v5  ;;  %v9280_v46 = vpop.f32.mrb[24].mxu0  ;;  %v9285_v5 = vmul.f32 %v7979_v24, %v9117_v50  ;;  %v9288_v34 = vmul.f32 %v7985_v49, %v9130_v2  ;;  %v7148_v39 = vmul.f32 -1.442695, %v9255_v40 }
 0x203   :  { %v9261_v19 = vpop.eup %7992  ;;  %13906 = vst [vmem:[#allocation16_spill] sm:$0xff] %v9272_v43  ;;  %13907 = vst [vmem:[#allocation17_spill] sm:$0xff] %v9275_v52  ;;  %8014 = vpow2.f32 %v7136_v45  ;;  %v9291_v60 = vpop.f32.mrb[33].mxu1  ;;  %v9298_v45 = vmul.f32 %v7981_v36, %v9120_v16  ;;  %v9301_v12 = vmul.f32 -1.442695, %v9259_v33  ;;  %v1244_v50 = vmul.f32 %v9081_v23, %v9187_v20 }
 0x204   :  { %v9269_v28 = vpop.eup %7994  ;;  %13908 = vst [vmem:[#allocation18_spill] sm:$0xff] %v9285_v5  ;;  %13909 = vst [vmem:[#allocation19_spill] sm:$0xff] %v9288_v34  ;;  %8016 = vpow2.f32 %v7138_v17  ;;  %v9293_v38 = vpop.f32.mrb[25].mxu0  ;;  %v9310_v17 = vmul.f32 %v7987_v54, %v9135_v63 }
 0x205   :  { %v9282_v48 = vpop.eup %7996  ;;  %13910 = vst [vmem:[#allocation20_spill] sm:$0xff] %v9291_v60  ;;  %13911 = vst [vmem:[#allocation21_spill] sm:$0xff] %v9293_v38  ;;  %8018 = vpow2.f32 %v7137_v57  ;;  %v9305_v2 = vpop.f32.mrb[34].mxu1  ;;  %v9313_v38 = vadd.f32 %v9102_v8, %v1237_v27  ;;  %v1246_v57 = vmul.f32 %v9084_v61, %v9189_v22  ;;  %v9329_v27 = vadd.f32 %v9288_v34, %v9272_v43 }
 0x206   :  { %v9295_v37 = vpop.eup %7998  ;;  %13912 = vst [vmem:[#allocation22_spill] sm:$0xff] %v9298_v45  ;;  %13913 = vst [vmem:[#allocation23_spill] sm:$0xff] %v9305_v2  ;;  %v9307_v24 = vpop.f32.mrb[26].mxu0  ;;  %8020 = vpow2.f32 %v7139_v13  ;;  %v9323_v2 = vadd.f32 %v9275_v52, %v9264_v4  ;;  %v9337_v54 = vadd.f32 %v9093_v1, %v1244_v50  ;;  %v9346_v22 = vmul.f32 %v7991_v47, %v9149_v51 }
 0x207   :  { %13914 = vst [vmem:[#allocation24_spill] sm:$0xff] %v9307_v24  ;;  %v8001_v49 = vpop.eup %8000  ;;  %13915 = vst [vmem:[#allocation25_spill] sm:$0xff] %v9310_v17  ;;  %v9317_v16 = vpop.f32.mrb[35].mxu1  ;;  %8022 = vpow2.f32 %v7146_v11  ;;  %v9334_v24 = vmul.f32 %v7989_v53, %v9138_v26  ;;  %v1247_v26 = vmul.f32 %v9090_v0, %v9195_v30 }
 0x208   :  { %13916 = vst [vmem:[#allocation26_spill] sm:$0xff] %v9313_v38  ;;  %13917 = vst [vmem:[#allocation27_spill] sm:$0xff] %v9317_v16  ;;  %v9319_v36 = vpop.f32.mrb[27].mxu0  ;;  %v8003_v20 = vpop.eup %8002  ;;  %v2060_v63 = vadd.f32 1.0, %v8001_v49  ;;  %8024 = vpow2.f32 %v7148_v39  ;;  %v9341_v49 = vadd.f32 %v9310_v17, %v9285_v5 }
 0x209   :  { %13918 = vst [vmem:[#allocation28_spill] sm:$0xff] %v9319_v36  ;;  %v8005_v13 = vpop.eup %8004  ;;  %v2059_v16 = vadd.f32 1.0, %v8003_v20  ;;  %13919 = vst [vmem:[#allocation29_spill] sm:$0xff] %v9334_v24  ;;  %v1245_v20 = vmul.f32 %v9087_v62, %v9193_v29  ;;  %v9350_v50 = vpop.f32.mrb[36].mxu1  ;;  %v9358_v29 = vadd.f32 %v9096_v3, %v1246_v57 }
 0x20a   :  { %v8007_v36 = vpop.eup %8006  ;;  %8026 = vrcp.f32 %v2060_v63  ;;  %v2061_v33 = vadd.f32 1.0, %v8005_v13  ;;  %13920 = vst [vmem:[#allocation30_spill] sm:$0xff] %v9337_v54  ;;  %13921 = vst [vmem:[#allocation31_spill] sm:$0xff] %v9346_v22  ;;  %v9352_v63 = vpop.f32.mrb[28].mxu0 }
 0x20b   :  { %v8009_v11 = vpop.eup %8008  ;;  %8028 = vrcp.f32 %v2059_v16  ;;  %v2068_v60 = vadd.f32 1.0, %v8007_v36  ;;  %13922 = vst [vmem:[#allocation32_spill] sm:$0xff] %v9350_v50  ;;  %13923 = vst [vmem:[#allocation33_spill] sm:$0xff] %v9352_v63  ;;  %v9355_v36 = vmul.f32 -1.442695, %v9313_v38  ;;  %v9360_v51 = vpop.f32.mrb[37].mxu1 }
 0x20c   :  { %v8011_v39 = vpop.eup %8010  ;;  %8030 = vrcp.f32 %v2061_v33  ;;  %v2070_v53 = vadd.f32 1.0, %v8009_v11  ;;  %13924 = vst [vmem:[#allocation34_spill] sm:$0xff] %v9358_v29  ;;  %13925 = vst [vmem:[#allocation35_spill] sm:$0xff] %v9360_v51  ;;  %v9362_v33 = vpop.f32.mrb[29].mxu0  ;;  %v9365_v11 = vmul.f32 -1.442695, %v9337_v54  ;;  %v9374_v51 = vadd.f32 %v9099_v7, %v1245_v20 }
 0x20d   :  { %v8013_v13 = vpop.eup %8012  ;;  %8032 = vrcp.f32 %v2068_v60  ;;  %v2069_v16 = vadd.f32 1.0, %v8011_v39  ;;  %13926 = vst [vmem:[#allocation36_spill] sm:$0xff] %v9362_v33  ;;  %v1254_v60 = vmul.f32 %v9081_v23, %v9219_v32  ;;  %v9369_v39 = vpop.f32.mrb[38].mxu1 }
 0x20e   :  { %v8015_v47 = vpop.eup %8014  ;;  %8034 = vrcp.f32 %v2070_v53  ;;  %v2071_v30 = vadd.f32 1.0, %v8013_v13  ;;  %13927 = vst [vmem:[#allocation37_spill] sm:$0xff] %v9369_v39  ;;  %v9371_v63 = vpop.f32.mrb[30].mxu0  ;;  %v1256_v53 = vmul.f32 %v9084_v61, %v9221_v25  ;;  %v9383_v39 = vadd.f32 %v9102_v8, %v1247_v26 }
 0x20f   :  { %13928 = vst [vmem:[#allocation38_spill] sm:$0xff] %v9371_v63  ;;  %v8017_v50 = vpop.eup %8016  ;;  %8036 = vrcp.f32 %v2069_v16  ;;  %v2078_v57 = vadd.f32 1.0, %v8015_v47  ;;  %v9378_v13 = vpop.f32.mrb[39].mxu1  ;;  %v9386_v63 = vadd.f32 %v9093_v1, %v1254_v60  ;;  %v1255_v25 = vmul.f32 %v9087_v62, %v9228_v42 }
 0x210   :  { %13929 = vst [vmem:[#allocation39_spill] sm:$0xff] %v9378_v13  ;;  %v9380_v33 = vpop.f32.mrb[31].mxu0  ;;  %v8019_v54 = vpop.eup %8018  ;;  %8038 = vrcp.f32 %v2071_v30  ;;  %v2080_v32 = vadd.f32 1.0, %v8017_v50  ;;  %v9389_v47 = vadd.f32 %v9096_v3, %v1256_v53  ;;  %v7158_v50 = vmul.f32 -1.442695, %v9358_v29 }
 0x211   :  { %13930 = vst [vmem:[#allocation40_spill] sm:$0xff] %v9380_v33  ;;  %13931 = vst [vmem:[#allocation41_spill] sm:$0xff] %v9386_v63  ;;  %v8021_v16 = vpop.eup %8020  ;;  %8040 = vrcp.f32 %v2078_v57  ;;  %v2079_v20 = vadd.f32 1.0, %v8019_v54  ;;  %v1257_v26 = vmul.f32 %v9090_v0, %v9230_v6  ;;  %v7157_v57 = vmul.f32 -1.442695, %v9374_v51  ;;  %v9406_v29 = vpop.f32.mrb[32].mxu0 }
 0x212   :  { %13932 = vst [vmem:[#allocation42_spill] sm:$0xff] %v9389_v47  ;;  %v8023_v13 = vpop.eup %8022  ;;  %8042 = vrcp.f32 %v2080_v32  ;;  %v2081_v33 = vadd.f32 1.0, %v8021_v16  ;;  %v9398_v54 = vadd.f32 %v9099_v7, %v1255_v25  ;;  %v7159_v42 = vmul.f32 -1.442695, %v9383_v39  ;;  %v9404_v16 = vpop.f32.mrb[40].mxu1  ;;  %13935 = vst [vmem:[#allocation45_spill] sm:$0xff] %v9406_v29 }
 0x213   :  { %v8025_v30 = vpop.eup %8024  ;;  %8044 = vrcp.f32 %v2079_v20  ;;  %v2088_v60 = vadd.f32 1.0, %v8023_v13  ;;  %v9402_v32 = vadd.f32 %v9102_v8, %v1257_v26  ;;  %v9410_v13 = vmul.f32 %v9261_v19, %v9152_v35  ;;  %v9418_v25 = vpop.f32.mrb[41].mxu1 }
 0x214   :  { %13933 = vst [vmem:[#allocation43_spill] sm:$0xff] %v9398_v54  ;;  %v8027_v53 = vpop.eup %8026  ;;  %8046 = vrcp.f32 %v2081_v33  ;;  %v2090_v38 = vadd.f32 1.0, %v8025_v30  ;;  %v9413_v20 = vmul.f32 -1.442695, %v9386_v63  ;;  %v9416_v33 = vmul.f32 -1.442695, %v9389_v47 }
 0x215   :  { %13934 = vst [vmem:[#allocation44_spill] sm:$0xff] %v9402_v32  ;;  %v8029_v6 = vpop.eup %8028  ;;  %13936 = vst [vmem:[#allocation46_spill] sm:$0xff] %v9410_v13  ;;  %8048 = vrcp.f32 %v2088_v60  ;;  %v9420_v26 = vpop.f32.mrb[33].mxu0  ;;  %v9424_v29 = vmul.f32 %v9269_v28, %v9156_v56  ;;  %v9427_v35 = vmul.f32 -1.442695, %v9398_v54  ;;  %v9442_v56 = vmul.f32 %v9282_v48, %v9159_v59  ;;  %v7674_v59 = vld [vmem:[%s13507_s7 + $0x40] sm:$0xff]  }
 0x216   :  { %13937 = vst [vmem:[#allocation47_spill] sm:$0xff] %v9418_v25  ;;  %13938 = vst [vmem:[#allocation48_spill] sm:$0xff] %v9420_v26  ;;  %v8031_v30 = vpop.eup %8030  ;;  %8050 = vrcp.f32 %v2090_v38  ;;  %v9430_v19 = vmul.f32 -1.442695, %v9402_v32  ;;  %v9432_v60 = vpop.f32.mrb[42].mxu1  ;;  %v2962_v26 = vmax.f32 %v9285_v5, %v9310_v17  ;;  %v2707_v25 = vadd.f32 %v9334_v24, %v9298_v45  ;;  %7449 = vmatprep.subr.bf16.mxu0 %v7674_v59 }
 0x217   :  { %13939 = vst [vmem:[#allocation49_spill] sm:$0xff] %v9424_v29  ;;  %v9434_v47 = vpop.f32.mrb[34].mxu0  ;;  %v8033_v63 = vpop.eup %8032  ;;  %13941 = vst [vmem:[#allocation51_spill] sm:$0xff] %v9442_v56  ;;  %8052 = vpow2.f32 %v9301_v12  ;;  %v2988_v54 = vmax.f32 %v9298_v45, %v9334_v24  ;;  %v2669_v17 = vadd.f32 %v9323_v2, %v9346_v22  ;;  %v13942_v5 = vmax.f32 %v9264_v4, %v9275_v52 }
 0x218   :  { %13940 = vst [vmem:[#allocation50_spill] sm:$0xff] %v9434_v47  ;;  %v9445_v28 = vpop.f32.mrb[43].mxu1  ;;  %v9447_v38 = vpop.f32.mrb[35].mxu0  ;;  %8054 = vpow2.f32 %v9355_v36  ;;  %v2695_v48 = vadd.f32 %v9329_v27, %v9410_v13  ;;  %v9465_v24 = vmul.f32 %v9295_v37, %v9164_v9  ;;  %v1264_v2 = vmul.f32 %v9081_v23, %v9237_v18 }
 0x219   :  { %v8035_v32 = vpop.eup %8034  ;;  %v2950_v47 = vmax.f32 %v13942_v5, %v9346_v22  ;;  %8056 = vpow2.f32 %v9365_v11  ;;  %v7675_v5 = vld [vmem:[%s13507_s7] sm:$0xff]   ;;  %v13944_v22 = vmax.f32 %v9272_v43, %v9288_v34  ;;  %v2682_v27 = vadd.f32 %v9341_v49, %v9424_v29 }
 0x21a   :  { %v8037_v12 = vpop.eup %8036  ;;  %13943 = vst [vmem:[#allocation52_spill] sm:$0xff] %v9465_v24  ;;  %v9480_v9 = vmul.f32 %v8027_v53, %v9172_v31  ;;  %8058 = vpow2.f32 %v7158_v50  ;;  %v2963_v18 = vmax.f32 %v2962_v26, %v9424_v29  ;;  %v2708_v11 = vadd.f32 %v2707_v25, %v9442_v56  ;;  %7450 = vmatpush3.bf16.msra.mxu0 %v7675_v5  ;;  %v9496_v50 = vpop.f32.mrb[44].mxu1  ;;  %v13975_v29 = vld [vmem:[#allocation13_spill] sm:$0xff] }
 0x21b   :  { %v8039_v36 = vpop.eup %8038  ;;  %v2976_v52 = vmax.f32 %v13944_v22, %v9410_v13  ;;  %v9485_v4 = vmul.f32 %v8029_v6, %v9176_v44  ;;  %8060 = vpow2.f32 %v7157_v57  ;;  %v9488_v22 = vmax.f32 %v2988_v54, %v9442_v56  ;;  %v9498_v53 = vpop.f32.mrb[36].mxu0  ;;  %v13956_v56 = vld [vmem:[#allocation7_spill] sm:$0xff]  ;;  %v13958_v13 = vld [vmem:[#allocation8_spill] sm:$0xff] }
 0x21c   :  { %13945 = vst [vmem:[#allocation53_spill] sm:$0xff] %v9480_v9  ;;  %v8041_v37 = vpop.eup %8040  ;;  %v9491_v49 = vmul.f32 %v8031_v30, %v9184_v15  ;;  %v9494_v31 = vmul.f32 %v8033_v63, %v9198_v14  ;;  %8062 = vpow2.f32 %v7159_v42  ;;  %v2670_v44 = vadd.f32 %v2669_v17, %v9465_v24  ;;  %v9509_v15 = vpop.f32.mrb[45].mxu1 }
 0x21d   :  { %13946 = vst [vmem:[#allocation54_spill] sm:$0xff] %v9485_v4  ;;  %v8043_v34 = vpop.eup %8042  ;;  %v9504_v57 = vmul.f32 %v8035_v32, %v9202_v21  ;;  %v9507_v54 = vadd.f32 %v9093_v1, %v1264_v2  ;;  %v9511_v6 = vpop.f32.mrb[37].mxu0  ;;  %v2951_v63 = vmax.f32 %v2950_v47, %v9465_v24  ;;  %v2696_v42 = vadd.f32 %v2695_v48, %v9480_v9 }
 0x21e   :  { %13947 = vst [vmem:[#allocation55_spill] sm:$0xff] %v9491_v49  ;;  %13948 = vst [vmem:[#allocation56_spill] sm:$0xff] %v9494_v31  ;;  %v9500_v25 = vpop.eup %8044  ;;  %v2977_v26 = vmax.f32 %v2976_v52, %v9480_v9  ;;  %v1266_v17 = vmul.f32 %v9084_v61, %v9239_v58  ;;  %v9520_v21 = vpop.f32.mrb[46].mxu1  ;;  %v2683_v59 = vadd.f32 %v2682_v27, %v9485_v4  ;;  %8064 = vpow2.f32 %v9413_v20 }
 0x21f   :  { %13949 = vst [vmem:[#allocation57_spill] sm:$0xff] %v9504_v57  ;;  %13950 = vst [vmem:[#allocation58_spill] sm:$0xff] %v9511_v6  ;;  %v9513_v14 = vpop.eup %8046  ;;  %v9522_v32 = vpop.f32.mrb[38].mxu0  ;;  %v2964_v2 = vmax.f32 %v2963_v18, %v9485_v4  ;;  %v9527_v5 = vmul.f32 %v8037_v12, %v9206_v10  ;;  %v2709_v58 = vadd.f32 %v2708_v11, %v9491_v49  ;;  %8066 = vpow2.f32 %v9416_v33  ;;  %v13972_v4 = vld [vmem:[#allocation10_spill] sm:$0xff] }
 0x220   :  { %13951 = vst [vmem:[#allocation59_spill] sm:$0xff] %v9520_v21  ;;  %13952 = vst [vmem:[#allocation60_spill] sm:$0xff] %v9522_v32  ;;  %v8049_v30 = vpop.eup %8048  ;;  %v9530_v47 = vpop.f32.mrb[47].mxu1  ;;  %v2990_v43 = vmax.f32 %v9488_v22, %v9491_v49  ;;  %v2671_v9 = vadd.f32 %v2670_v44, %v9494_v31  ;;  %v9540_v10 = vmax.f32 %v2951_v63, %v9494_v31  ;;  %8068 = vpow2.f32 %v9427_v35  ;;  %v14034_v21 = vld [vmem:[#allocation40_spill] sm:$0xff] }
 0x221   :  { %13953 = vst [vmem:[#allocation61_spill] sm:$0xff] %v9527_v5  ;;  %13954 = vst [vmem:[#allocation62_spill] sm:$0xff] %v9530_v47  ;;  %v9532_v52 = vpop.f32.mrb[39].mxu0  ;;  %v8051_v48 = vpop.eup %8050  ;;  %v2697_v20 = vadd.f32 %v2696_v42, %v9504_v57  ;;  %v7176_v12 = vmul.f32 -1.442695, %v9507_v54  ;;  %v9546_v11 = vmax.f32 %v2977_v26, %v9504_v57  ;;  %v9549_v22 = vmul.f32 %v8039_v36, %v13956_v56  ;;  %v13960_v57 = vld [vmem:[#allocation11_spill] sm:$0xff] }
 0x222   :  { %13955 = vst [vmem:[#allocation63_spill] sm:$0xff] %v9532_v52  ;;  %v8053_v27 = vpop.eup %8052  ;;  %8070 = vpow2.f32 %v9430_v19  ;;  %v2684_v63 = vadd.f32 %v2683_v59, %v9527_v5  ;;  %v9554_v49 = vmax.f32 %v2964_v2, %v9527_v5  ;;  %v9557_v31 = vmul.f32 %v8041_v37, %v13958_v13  ;;  %v9561_v36 = vpop.f32.mrb[48].mxu1  ;;  %v13963_v59 = vld [vmem:[#allocation9_spill] sm:$0xff] }
 0x223   :  { %v8055_v18 = vpop.eup %8054  ;;  %13957 = vst [vmem:[#allocation7_spill] sm:$0xff] %v9549_v22  ;;  %v2089_v44 = vadd.f32 1.0, %v8053_v27  ;;  %8072 = vpow2.f32 %v7176_v12  ;;  %v1265_v56 = vmul.f32 %v9087_v62, %v13960_v57  ;;  %13961 = vst [vmem:[#allocation11_spill] sm:$0xff] %v9561_v36  ;;  %v9563_v19 = vpop.f32.mrb[40].mxu0  ;;  %v9566_v24 = vmul.f32 %v8043_v34, %v13963_v59 }
 0x224   :  { %v8057_v33 = vpop.eup %8056  ;;  %v2091_v42 = vadd.f32 1.0, %v8055_v18  ;;  %13959 = vst [vmem:[#allocation8_spill] sm:$0xff] %v9557_v31  ;;  %13962 = vst [vmem:[#allocation64_spill] sm:$0xff] %v9563_v19  ;;  %v9569_v12 = vadd.f32 %v9096_v3, %v1266_v17  ;;  %v9571_v13 = vpop.f32.mrb[49].mxu1  ;;  %v1274_v5 = vmul.f32 %v9081_v23, %v9278_v41  ;;  %v1276_v59 = vmul.f32 %v9084_v61, %v9280_v46 }
 0x225   :  { %v8059_v35 = vpop.eup %8058  ;;  %8074 = vrcp.f32 %v2089_v44  ;;  %v2098_v26 = vadd.f32 1.0, %v8057_v33  ;;  %13964 = vst [vmem:[#allocation9_spill] sm:$0xff] %v9566_v24  ;;  %13965 = vst [vmem:[#allocation65_spill] sm:$0xff] %v9571_v13  ;;  %v9573_v37 = vpop.f32.mrb[41].mxu0  ;;  %v13967_v44 = vld [vmem:[#allocation12_spill] sm:$0xff]  ;;  %v9595_v41 = vmul.f32 %v9500_v25, %v13972_v4  ;;  %v9606_v45 = vmul.f32 %v8049_v30, %v13975_v29 }
 0x226   :  { %v8061_v27 = vpop.eup %8060  ;;  %8076 = vrcp.f32 %v2091_v42  ;;  %v2100_v2 = vadd.f32 1.0, %v8059_v35  ;;  %13966 = vst [vmem:[#allocation66_spill] sm:$0xff] %v9573_v37  ;;  %v1267_v33 = vmul.f32 %v9090_v0, %v13967_v44  ;;  %v9579_v34 = vpop.f32.mrb[50].mxu1  ;;  %v9584_v35 = vadd.f32 %v9099_v7, %v1265_v56  ;;  %v7676_v56 = vld [vmem:[%s13507_s7 + $0x48] sm:$0xff]  }
 0x227   :  { %v8063_v18 = vpop.eup %8062  ;;  %8078 = vrcp.f32 %v2098_v26  ;;  %v2099_v57 = vadd.f32 1.0, %v8061_v27  ;;  %13968 = vst [vmem:[#allocation12_spill] sm:$0xff] %v9579_v34  ;;  %v9581_v42 = vpop.f32.mrb[42].mxu0  ;;  %v2710_v44 = vadd.f32 %v2709_v58, %v9549_v22  ;;  %13973 = vst [vmem:[#allocation10_spill] sm:$0xff] %v9595_v41  ;;  %v9609_v58 = vmul.f32 %v8051_v48, %v9255_v40  ;;  %7451 = vmatprep.subr.bf16.mxu0 %v7676_v56 }
 0x228   :  { %13969 = vst [vmem:[#allocation67_spill] sm:$0xff] %v9581_v42  ;;  %8080 = vrcp.f32 %v2100_v2  ;;  %v2101_v17 = vadd.f32 1.0, %v8063_v18  ;;  %v9588_v26 = vpop.f32.mrb[51].mxu1  ;;  %v9590_v27 = vpop.f32.mrb[43].mxu0  ;;  %v9599_v2 = vmul.f32 %v9513_v14, %v9243_v55  ;;  %v2991_v18 = vmax.f32 %v2990_v43, %v9549_v22  ;;  %13976 = vst [vmem:[#allocation13_spill] sm:$0xff] %v9606_v45  ;;  %v7677_v55 = vld [vmem:[%s13507_s7 + $0x8] sm:$0xff]  }
 0x229   :  { %13970 = vst [vmem:[#allocation68_spill] sm:$0xff] %v9588_v26  ;;  %13971 = vst [vmem:[#allocation69_spill] sm:$0xff] %v9590_v27  ;;  %8082 = vrcp.f32 %v2099_v57  ;;  %v8065_v46 = vpop.eup %8064  ;;  %v2672_v25 = vadd.f32 %v2671_v9, %v9557_v31  ;;  %v2953_v14 = vmax.f32 %v9540_v10, %v9557_v31  ;;  %v9618_v57 = vmul.f32 -1.442695, %v9569_v12  ;;  %7452 = vmatpush3.bf16.msra.mxu0 %v7677_v55  ;;  %v9639_v22 = vpop.f32.mrb[52].mxu1 }
 0x22a   :  { %13974 = vst [vmem:[#allocation70_spill] sm:$0xff] %v9599_v2  ;;  %13977 = vst [vmem:[#allocation71_spill] sm:$0xff] %v9609_v58  ;;  %8084 = vrcp.f32 %v2101_v17  ;;  %v8067_v4 = vpop.eup %8066  ;;  %v9621_v43 = vadd.f32 %v9102_v8, %v1267_v33  ;;  %v2698_v29 = vadd.f32 %v2697_v20, %v9566_v24  ;;  %v9625_v30 = vmul.f32 -1.442695, %v9584_v35  ;;  %v9641_v31 = vpop.f32.mrb[44].mxu0 }
 0x22b   :  { %v8069_v40 = vpop.eup %8068  ;;  %v9628_v48 = vadd.f32 %v9093_v1, %v1274_v5  ;;  %v9631_v9 = vadd.f32 %v9096_v3, %v1276_v59  ;;  %v2979_v17 = vmax.f32 %v9546_v11, %v9566_v24  ;;  %v2685_v33 = vadd.f32 %v2684_v63, %v9595_v41  ;;  %13978 = vst [vmem:[#allocation72_spill] sm:$0xff] %v9639_v22  ;;  %v7678_v5 = vld [vmem:[%s13507_s7 + $0x50] sm:$0xff]   ;;  %v9652_v24 = vpop.f32.mrb[53].mxu1 }
 0x22c   :  { %v8071_v10 = vpop.eup %8070  ;;  %v2966_v56 = vmax.f32 %v9554_v49, %v9595_v41  ;;  %v2711_v20 = vadd.f32 %v2710_v44, %v9599_v2  ;;  %13979 = vst [vmem:[#allocation73_spill] sm:$0xff] %v9641_v31  ;;  %v2992_v55 = vmax.f32 %v2991_v18, %v9599_v2  ;;  %v2673_v11 = vadd.f32 %v2672_v25, %v9606_v45  ;;  %v9654_v44 = vpop.f32.mrb[45].mxu0  ;;  %v7679_v41 = vld [vmem:[%s13507_s7 + $0x10] sm:$0xff]  }
 0x22d   :  { %v9646_v59 = vpop.eup %8072  ;;  %v2954_v63 = vmax.f32 %v2953_v14, %v9606_v45  ;;  %v2699_v49 = vadd.f32 %v2698_v29, %v9609_v58  ;;  %13980 = vst [vmem:[#allocation74_spill] sm:$0xff] %v9652_v24  ;;  %13981 = vst [vmem:[#allocation75_spill] sm:$0xff] %v9654_v44  ;;  %v9659_v22 = vadd.f32 1.0, %v8065_v46  ;;  %v9661_v27 = vadd.f32 1.0, %v8067_v4  ;;  %v13982_v25 = vld [vmem:[#allocation20_spill] sm:$0xff]  ;;  %v9668_v29 = vpop.f32.mrb[54].mxu1  ;;  %7453 = vmatprep.subr.bf16.mxu0 %v7678_v5 }
 0x22e   :  { %v9664_v18 = vmul.f32 -1.442695, %v9621_v43  ;;  %v1275_v14 = vmul.f32 %v9087_v62, %v13982_v25  ;;  %13983 = vst [vmem:[#allocation20_spill] sm:$0xff] %v9668_v29  ;;  %v9670_v2 = vpop.f32.mrb[46].mxu0  ;;  %v2980_v44 = vmax.f32 %v2979_v17, %v9609_v58  ;;  %v13985_v24 = vld [vmem:[#allocation14_spill] sm:$0xff]  ;;  %v9682_v42 = vpop.f32.mrb[55].mxu1  ;;  %7454 = vmatpush3.bf16.msra.mxu0 %v7679_v41  ;;  %8086 = vpow2.f32 %v9618_v57 }
 0x22f   :  { %v8075_v31 = vpop.eup %8074  ;;  %13984 = vst [vmem:[#allocation76_spill] sm:$0xff] %v9670_v2  ;;  %v9677_v46 = vmul.f32 -1.442695, %v9628_v48  ;;  %v9680_v4 = vmul.f32 -1.442695, %v9631_v9  ;;  %13987 = vst [vmem:[#allocation77_spill] sm:$0xff] %v9682_v42  ;;  %8088 = vrcp.f32 %v9659_v22 }
 0x230   :  { %v8077_v45 = vpop.eup %8076  ;;  %v9674_v26 = vmul.f32 %v8075_v31, %v13985_v24  ;;  %v9684_v25 = vpop.f32.mrb[47].mxu0  ;;  %v13989_v2 = vld [vmem:[#allocation26_spill] sm:$0xff]  ;;  %v9689_v34 = vadd.f32 1.0, %v8069_v40  ;;  %v9691_v17 = vadd.f32 1.0, %v8071_v10  ;;  %v13991_v24 = vld [vmem:[#allocation21_spill] sm:$0xff]  ;;  %v13994_v41 = vld [vmem:[#allocation23_spill] sm:$0xff]  ;;  %8090 = vpow2.f32 %v9625_v30 }
 0x231   :  { %13988 = vst [vmem:[#allocation78_spill] sm:$0xff] %v9684_v25  ;;  %v8079_v29 = vpop.eup %8078  ;;  %v9687_v5 = vmul.f32 %v8077_v45, %v13989_v2  ;;  %v1277_v31 = vmul.f32 %v9090_v0, %v13991_v24  ;;  %v13992_v42 = vld [vmem:[#allocation30_spill] sm:$0xff]  ;;  %v1284_v25 = vmul.f32 %v9081_v23, %v13994_v41  ;;  %v9708_v24 = vadd.f32 %v9099_v7, %v1275_v14 }
 0x232   :  { %13986 = vst [vmem:[#allocation14_spill] sm:$0xff] %v9674_v26  ;;  %v8081_v58 = vpop.eup %8080  ;;  %v2686_v37 = vadd.f32 %v2685_v33, %v9674_v26  ;;  %v2967_v13 = vmax.f32 %v2966_v56, %v9674_v26  ;;  %v9698_v19 = vmul.f32 %v8079_v29, %v13992_v42  ;;  %v13995_v10 = vld [vmem:[#allocation34_spill] sm:$0xff]  ;;  %v7680_v33 = vld [vmem:[%s13507_s7 + $0x58] sm:$0xff]   ;;  %8092 = vrcp.f32 %v9661_v27 }
 0x233   :  { %13990 = vst [vmem:[#allocation26_spill] sm:$0xff] %v9687_v5  ;;  %v8083_v45 = vpop.eup %8082  ;;  %v2712_v2 = vadd.f32 %v2711_v20, %v9687_v5  ;;  %v2993_v40 = vmax.f32 %v2992_v55, %v9687_v5  ;;  %v9705_v36 = vmul.f32 %v8081_v58, %v13995_v10  ;;  %v13998_v20 = vld [vmem:[#allocation24_spill] sm:$0xff]  ;;  %v7681_v58 = vld [vmem:[%s13507_s7 + $0x18] sm:$0xff]   ;;  %7455 = vmatprep.subr.bf16.mxu0 %v7680_v33  ;;  %v7682_v30 = vld [vmem:[%s13507_s7 + $0x60] sm:$0xff]   ;;  %8094 = vrcp.f32 %v9689_v34 }
 0x234   :  { %13993 = vst [vmem:[#allocation21_spill] sm:$0xff] %v9698_v19  ;;  %v8085_v42 = vpop.eup %8084  ;;  %v2674_v56 = vadd.f32 %v2673_v11, %v9698_v19  ;;  %v2955_v29 = vmax.f32 %v2954_v63, %v9698_v19  ;;  %v9716_v41 = vmul.f32 %v8083_v45, %v9374_v51  ;;  %v1286_v55 = vmul.f32 %v9084_v61, %v13998_v20  ;;  %v9731_v63 = vpop.f32.mrb[56].mxu1  ;;  %v14018_v34 = vld [vmem:[#allocation32_spill] sm:$0xff] }
 0x235   :  { %13996 = vst [vmem:[#allocation30_spill] sm:$0xff] %v9705_v36  ;;  %v2700_v14 = vadd.f32 %v2699_v49, %v9705_v36  ;;  %v2981_v10 = vmax.f32 %v2980_v44, %v9705_v36  ;;  %v9726_v5 = vmul.f32 %v8085_v42, %v9383_v39  ;;  %v9729_v11 = vadd.f32 %v9102_v8, %v1277_v31  ;;  %v9733_v51 = vpop.f32.mrb[48].mxu0  ;;  %v9737_v49 = vpop.f32.mrb[57].mxu1 }
 0x236   :  { %13997 = vst [vmem:[#allocation23_spill] sm:$0xff] %v9716_v41  ;;  %14000 = vst [vmem:[#allocation24_spill] sm:$0xff] %v9731_v63  ;;  %v2675_v45 = vrot.slane %v2674_v56, 4  ;;  %v2956_v20 = vrot.slane %v2955_v29, 4  ;;  %v2687_v19 = vadd.f32 %v2686_v37, %v9716_v41  ;;  %v2968_v26 = vmax.f32 %v2967_v13, %v9716_v41  ;;  %v9739_v44 = vpop.f32.mrb[49].mxu0  ;;  %7456 = vmatpush3.bf16.msra.mxu0 %v7681_v58 }
 0x237   :  { %13999 = vst [vmem:[#allocation34_spill] sm:$0xff] %v9726_v5  ;;  %14001 = vst [vmem:[#allocation79_spill] sm:$0xff] %v9733_v51  ;;  %v2701_v39 = vrot.slane %v2700_v14, 4  ;;  %v2713_v31 = vadd.f32 %v2712_v2, %v9726_v5  ;;  %v2994_v42 = vmax.f32 %v2993_v40, %v9726_v5  ;;  %v2118_v36 = vadd.f32 1.0, %v9646_v59  ;;  %v9744_v51 = vpop.f32.mrb[58].mxu1  ;;  %v9746_v33 = vpop.f32.mrb[50].mxu0  ;;  %7457 = vmatprep.subr.bf16.mxu0 %v7682_v30 }
 0x238   :  { %14002 = vst [vmem:[#allocation80_spill] sm:$0xff] %v9737_v49  ;;  %14003 = vst [vmem:[#allocation81_spill] sm:$0xff] %v9739_v44  ;;  %v2676_v63 = vadd.f32 %v2675_v45, %v2674_v56  ;;  %v2957_v37 = vmax.f32 %v2955_v29, %v2956_v20  ;;  %v2982_v52 = vrot.slane %v2981_v10, 4  ;;  %v2688_v13 = vrot.slane %v2687_v19, 4  ;;  %v9748_v41 = vpop.f32.mrb[59].mxu1  ;;  %v9750_v49 = vpop.f32.mrb[51].mxu0 }
 0x239   :  { %14004 = vst [vmem:[#allocation82_spill] sm:$0xff] %v9744_v51  ;;  %14005 = vst [vmem:[#allocation83_spill] sm:$0xff] %v9746_v33  ;;  %v2702_v58 = vadd.f32 %v2701_v39, %v2700_v14  ;;  %v2969_v44 = vrot.slane %v2968_v26, 4  ;;  %v2714_v47 = vrot.slane %v2713_v31, 4  ;;  %v2995_v40 = vrot.slane %v2994_v42, 4  ;;  %v9768_v22 = vpop.f32.mrb[60].mxu1 }
 0x23a   :  { %14006 = vst [vmem:[#allocation84_spill] sm:$0xff] %v9748_v41  ;;  %14007 = vst [vmem:[#allocation85_spill] sm:$0xff] %v9750_v49  ;;  %v2677_v2 = vrot.slane %v2676_v63, 2  ;;  %v2958_v59 = vrot.slane %v2957_v37, 2  ;;  %v9756_v56 = vadd.f32 %v9093_v1, %v1284_v25  ;;  %v7187_v29 = vmul.f32 -1.442695, %v9708_v24 }
 0x23b   :  { %v2703_v5 = vrot.slane %v2702_v58, 2  ;;  %v9760_v14 = vmax.f32 %v2981_v10, %v2982_v52  ;;  %v9762_v45 = vadd.f32 %v2688_v13, %v2687_v19  ;;  %v7189_v57 = vmul.f32 -1.442695, %v9729_v11  ;;  %14008 = vst [vmem:[#allocation86_spill] sm:$0xff] %v9768_v22  ;;  %v9770_v39 = vpop.f32.mrb[52].mxu0 }
 0x23c   :  { %v9766_v20 = vadd.f32 %v9096_v3, %v1286_v55  ;;  %14009 = vst [vmem:[#allocation87_spill] sm:$0xff] %v9770_v39  ;;  %v9775_v27 = vadd.f32 %v2677_v2, %v2676_v63  ;;  %v9777_v25 = vmax.f32 %v2968_v26, %v2969_v44  ;;  %v9779_v52 = vadd.f32 %v2714_v47, %v2713_v31  ;;  %v14013_v39 = vld [vmem:[#allocation27_spill] sm:$0xff]  ;;  %v14014_v26 = vld [vmem:[#allocation28_spill] sm:$0xff]  ;;  %v14015_v44 = vld [vmem:[#allocation2_spill] sm:$0xff] }
 0x23d   :  { %v9781_v19 = vmax.f32 %v2994_v42, %v2995_v40  ;;  %v9783_v10 = vmax.f32 %v2957_v37, %v2958_v59  ;;  %v9785_v55 = vadd.f32 %v2703_v5, %v2702_v58  ;;  %v7196_v13 = vmul.f32 -1.442695, %v9756_v56  ;;  %v9797_v42 = vpop.f32.mrb[61].mxu1  ;;  %v8087_v59 = vpop.eup %8086 }
 0x23e   :  { %14010 = vst [vmem:[#allocation88_spill] sm:$0xff] %v9777_v25  ;;  %8096 = vrcp.f32 %v9691_v17  ;;  %v1285_v63 = vmul.f32 %v9087_v62, %v14013_v39  ;;  %v1287_v47 = vmul.f32 %v9090_v0, %v14014_v26  ;;  %v9795_v31 = vsub.s32 4, %v14015_v44  ;;  %14017 = vst [vmem:[#allocation28_spill] sm:$0xff] %v9797_v42  ;;  %v9809_v26 = vpop.eup %8088  ;;  %v14019_v17 = vld [vmem:[#allocation33_spill] sm:$0xff] }
 0x23f   :  { %14011 = vst [vmem:[#allocation89_spill] sm:$0xff] %v9781_v19  ;;  %14012 = vst [vmem:[#allocation90_spill] sm:$0xff] %v9785_v55  ;;  %8098 = vpow2.f32 %v9664_v18  ;;  %v7198_v37 = vmul.f32 -1.442695, %v9766_v20  ;;  %v1294_v58 = vmul.f32 %v9081_v23, %v14018_v34  ;;  %v1296_v2 = vmul.f32 %v9084_v61, %v14019_v17  ;;  %v8091_v40 = vpop.eup %8090  ;;  %v14021_v55 = vld [vmem:[#allocation36_spill] sm:$0xff] }
 0x240   :  { %14016 = vst [vmem:[#allocation27_spill] sm:$0xff] %v9795_v31  ;;  %8100 = vrcp.f32 %v2118_v36  ;;  %v9813_v18 = vadd.f32 %v9099_v7, %v1285_v63  ;;  %v9821_v39 = vadd.f32 %v9102_v8, %v1287_v47  ;;  %v14020_v36 = vld [vmem:[#allocation35_spill] sm:$0xff]  ;;  %v9825_v5 = vpop.eup %8092  ;;  %v1297_v17 = vmul.f32 %v9090_v0, %v14021_v55 }
 0x241   :  { %8102 = vpow2.f32 %v9677_v46  ;;  %v1295_v30 = vmul.f32 %v9087_v62, %v14020_v36  ;;  %v2120_v46 = vadd.f32 1.0, %v8087_v59  ;;  %v9828_v63 = vadd.f32 %v9093_v1, %v1294_v58  ;;  %v14024_v59 = vld [vmem:[#allocation38_spill] sm:$0xff]  ;;  %v9843_v42 = vpop.eup %8094 }
 0x242   :  { %8104 = vpow2.f32 %v9680_v4  ;;  %v9831_v34 = vadd.f32 %v9096_v3, %v1296_v2  ;;  %v14022_v4 = vld [vmem:[#allocation37_spill] sm:$0xff]  ;;  %v2119_v19 = vadd.f32 1.0, %v8091_v40  ;;  %v7197_v25 = vmul.f32 -1.442695, %v9813_v18 }
 0x243   :  { %8106 = vpow2.f32 %v7187_v29  ;;  %v1304_v47 = vmul.f32 %v9081_v23, %v14022_v4  ;;  %v9839_v36 = vadd.f32 %v9099_v7, %v1295_v30  ;;  %v1306_v58 = vmul.f32 %v9084_v61, %v14024_v59  ;;  %v9853_v30 = vpop.f32.mrb[53].mxu0  ;;  %v7683_v4 = vld [vmem:[%s13507_s7 + $0x20] sm:$0xff]  }
 0x244   :  { %8108 = vpow2.f32 %v7189_v57  ;;  %v7199_v2 = vmul.f32 -1.442695, %v9821_v39  ;;  %v7206_v55 = vmul.f32 -1.442695, %v9828_v63  ;;  %v7208_v29 = vmul.f32 -1.442695, %v9831_v34  ;;  %7458 = vmatpush3.bf16.msra.mxu0 %v7683_v4 }
 0x245   :  { %14023 = vst [vmem:[#allocation32_spill] sm:$0xff] %v9839_v36  ;;  %8110 = vpow2.f32 %v7196_v13  ;;  %v9851_v40 = vadd.f32 %v9102_v8, %v1297_v17  ;;  %14026 = vst [vmem:[#allocation35_spill] sm:$0xff] %v9853_v30  ;;  %v9859_v57 = vadd.f32 %v9093_v1, %v1304_v47  ;;  %v9862_v49 = vadd.f32 %v9096_v3, %v1306_v58  ;;  %v9865_v17 = vpop.f32.mrb[62].mxu1  ;;  %v9867_v41 = vpop.f32.mrb[54].mxu0  ;;  %v14031_v47 = vld [vmem:[#allocation39_spill] sm:$0xff] }
 0x246   :  { %8112 = vpow2.f32 %v7198_v37  ;;  %v7207_v13 = vmul.f32 -1.442695, %v9839_v36  ;;  %14029 = vst [vmem:[#allocation38_spill] sm:$0xff] %v9865_v17  ;;  %14030 = vst [vmem:[#allocation91_spill] sm:$0xff] %v9867_v41  ;;  %v1305_v58 = vmul.f32 %v9087_v62, %v14031_v47  ;;  %v9874_v32 = vpop.f32.mrb[63].mxu1  ;;  %v14035_v47 = vrot.slane %v9760_v14, 2 }
 0x247   :  { %14025 = vst [vmem:[#allocation33_spill] sm:$0xff] %v9851_v40  ;;  %14027 = vst [vmem:[#allocation36_spill] sm:$0xff] %v9859_v57  ;;  %8114 = vpow2.f32 %v7197_v25  ;;  %v7209_v37 = vmul.f32 -1.442695, %v9851_v40  ;;  %v9876_v25 = vpop.f32.mrb[55].mxu0 }
 0x248   :  { %v9848_v22 = vpop.eup %8096  ;;  %14028 = vst [vmem:[#allocation37_spill] sm:$0xff] %v9862_v49  ;;  %8116 = vpow2.f32 %v7199_v2  ;;  %14032 = vst [vmem:[#allocation39_spill] sm:$0xff] %v9874_v32  ;;  %v7216_v17 = vmul.f32 -1.442695, %v9859_v57  ;;  %v7218_v41 = vmul.f32 -1.442695, %v9862_v49  ;;  %v1307_v2 = vmul.f32 %v9090_v0, %v14034_v21 }
 0x249   :  { %v8099_v59 = vpop.eup %8098  ;;  %8118 = vpow2.f32 %v7206_v55  ;;  %14033 = vst [vmem:[#allocation92_spill] sm:$0xff] %v9876_v25  ;;  %v7684_v55 = vld [vmem:[%s13507_s7 + $0x68] sm:$0xff]   ;;  %v9891_v25 = vmax.f32 %v9760_v14, %v14035_v47  ;;  %v14037_v21 = vrot.slane %v9775_v27, 1  ;;  %v14038_v57 = vld [vmem:[#allocation45_spill] sm:$0xff]  ;;  %v9901_v6 = vadd.f32 %v9099_v7, %v1305_v58  ;;  %v9915_v58 = vpop.f32.mrb[64].mxu1 }
 0x24a   :  { %v9869_v30 = vpop.eup %8100  ;;  %v2121_v51 = vadd.f32 1.0, %v8099_v59  ;;  %8120 = vpow2.f32 %v7208_v29  ;;  %v7685_v59 = vld [vmem:[%s13507_s7 + $0x28] sm:$0xff]   ;;  %v1314_v29 = vmul.f32 %v9081_v23, %v9404_v16  ;;  %v1316_v40 = vmul.f32 %v9084_v61, %v14038_v57  ;;  %7459 = vmatprep.subr.bf16.mxu0 %v7684_v55  ;;  %v7686_v16 = vld [vmem:[%s13507_s7 + $0x70] sm:$0xff]   ;;  %14042 = vst [vmem:[#allocation93_spill] sm:$0xff] %v9915_v58  ;;  %v9917_v55 = vpop.f32.mrb[56].mxu0 }
 0x24b   :  { %v8103_v33 = vpop.eup %8102  ;;  %14036 = vst [vmem:[#allocation40_spill] sm:$0xff] %v9891_v25  ;;  %8122 = vrcp.f32 %v2120_v46  ;;  %v2680_v49 = vadd.f32 %v14037_v21, %v9775_v27  ;;  %v14039_v14 = vld [vmem:[#allocation47_spill] sm:$0xff]  ;;  %7460 = vmatpush3.bf16.msra.mxu0 %v7685_v59  ;;  %v9909_v27 = vadd.f32 %v9102_v8, %v1307_v2  ;;  %14043 = vst [vmem:[#allocation94_spill] sm:$0xff] %v9917_v55 }
 0x24c   :  { %v8105_v4 = vpop.eup %8104  ;;  %8124 = vpow2.f32 %v7207_v13  ;;  %v2128_v36 = vadd.f32 1.0, %v8103_v33  ;;  %v1315_v46 = vmul.f32 %v9087_v62, %v14039_v14  ;;  %7461 = vmatprep.subr.bf16.mxu0 %v7686_v16  ;;  %v9922_v2 = vadd.f32 %v9096_v3, %v1316_v40  ;;  %v9924_v14 = vpop.f32.mrb[65].mxu1  ;;  %v14048_v16 = vld [vmem:[#allocation48_spill] sm:$0xff]  ;;  %v14049_v40 = vld [vmem:[#allocation50_spill] sm:$0xff] }
 0x24d   :  { %v8107_v32 = vpop.eup %8106  ;;  %8126 = vpow2.f32 %v7209_v37  ;;  %14040 = vst [vmem:[#allocation45_spill] sm:$0xff] %v9909_v27  ;;  %v2130_v13 = vadd.f32 1.0, %v8105_v4  ;;  %v9913_v37 = vadd.f32 %v9093_v1, %v1314_v29  ;;  %v9919_v21 = vmul.f32 0.015625, %v2680_v49  ;;  %14046 = vst [vmem:[#allocation97_spill] sm:$0xff] %v9924_v14 }
 0x24e   :  { %v8109_v47 = vpop.eup %8108  ;;  %8128 = vpow2.f32 %v7216_v17  ;;  %v2129_v17 = vadd.f32 1.0, %v8107_v32  ;;  %14045 = vst [vmem:[#allocation96_spill] sm:$0xff] %v9922_v2  ;;  %v7217_v29 = vmul.f32 -1.442695, %v9901_v6  ;;  %v9930_v33 = vadd.f32 %v9099_v7, %v1315_v46 }
 0x24f   :  { %v8111_v57 = vpop.eup %8110  ;;  %8130 = vrcp.f32 %v2119_v19  ;;  %14041 = vst [vmem:[#allocation47_spill] sm:$0xff] %v9913_v37  ;;  %14044 = vst [vmem:[#allocation95_spill] sm:$0xff] %v9919_v21  ;;  %v9926_v19 = vpop.f32.mrb[57].mxu0  ;;  %v1317_v49 = vmul.f32 %v9090_v0, %v14048_v16  ;;  %v7219_v32 = vmul.f32 -1.442695, %v9909_v27  ;;  %v1326_v21 = vmul.f32 %v9084_v61, %v14049_v40 }
 0x250   :  { %v8113_v59 = vpop.eup %8112  ;;  %8132 = vrcp.f32 %v2121_v51  ;;  %14047 = vst [vmem:[#allocation98_spill] sm:$0xff] %v9926_v19  ;;  %v1324_v51 = vmul.f32 %v9081_v23, %v9432_v60  ;;  %v1325_v46 = vmul.f32 %v9087_v62, %v9445_v28  ;;  %v2131_v60 = vadd.f32 1.0, %v8109_v47 }
 0x251   :  { %v8115_v4 = vpop.eup %8114  ;;  %8134 = vrcp.f32 %v2128_v36  ;;  %v9940_v36 = vmul.f32 -1.442695, %v9913_v37  ;;  %v9948_v16 = vadd.f32 %v9102_v8, %v1317_v49  ;;  %v2138_v55 = vadd.f32 1.0, %v8111_v57 }
 0x252   :  { %v8117_v25 = vpop.eup %8116  ;;  %8136 = vpow2.f32 %v7218_v41  ;;  %v9945_v41 = vmul.f32 -1.442695, %v9922_v2  ;;  %v2140_v61 = vadd.f32 1.0, %v8113_v59  ;;  %v2139_v58 = vadd.f32 1.0, %v8115_v4 }
 0x253   :  { %v8119_v19 = vpop.eup %8118  ;;  %8138 = vrcp.f32 %v2130_v13  ;;  %v9951_v13 = vadd.f32 %v9093_v1, %v1324_v51  ;;  %v2141_v37 = vadd.f32 1.0, %v8117_v25  ;;  %v9954_v62 = vmul.f32 -1.442695, %v9930_v33  ;;  %v9985_v51 = vpop.f32.mrb[66].mxu1 }
 0x254   :  { %v8121_v14 = vpop.eup %8120  ;;  %8140 = vrcp.f32 %v2129_v17  ;;  %v9957_v28 = vadd.f32 %v9096_v3, %v1326_v21  ;;  %v2148_v2 = vadd.f32 1.0, %v8119_v19  ;;  %v9960_v27 = vadd.f32 %v9099_v7, %v1325_v46  ;;  %v7687_v7 = vld [vmem:[%s13507_s7 + $0x30] sm:$0xff]   ;;  %14051 = vst [vmem:[#allocation50_spill] sm:$0xff] %v9985_v51  ;;  %v9987_v46 = vpop.f32.mrb[58].mxu0 }
 0x255   :  { %v8123_v23 = vpop.eup %8122  ;;  %v2150_v49 = vadd.f32 1.0, %v8121_v14  ;;  %v1327_v47 = vmul.f32 %v9090_v0, %v9447_v38  ;;  %8142 = vpow2.f32 %v7217_v29  ;;  %v9965_v57 = vmul.f32 -1.442695, %v9948_v16  ;;  %7462 = vmatpush3.bf16.msra.mxu0 %v7687_v7  ;;  %14052 = vst [vmem:[#allocation99_spill] sm:$0xff] %v9987_v46  ;;  %v10002_v7 = vld [vmem:[%s13505_s5] sm:$0xff] }
 0x256   :  { %v8125_v40 = vpop.eup %8124  ;;  %8144 = vpow2.f32 %v7219_v32  ;;  %v9968_v3 = vmul.f32 -1.442695, %v9951_v13  ;;  %v9977_v0 = vmul.f32 -1.442695, %v9957_v28  ;;  %v9980_v29 = vmul.f32 -1.442695, %v9960_v27 }
 0x257   :  { %v8127_v17 = vpop.eup %8126  ;;  %v2149_v59 = vadd.f32 1.0, %v8125_v40  ;;  %v9971_v21 = vadd.f32 %v9102_v8, %v1327_v47  ;;  %8146 = vrcp.f32 %v2131_v60  ;;  %v9994_v47 = vpop.f32.mrb[59].mxu0  ;;  %v14059_v51 = vrot.slane %v9779_v52, 2 }
 0x258   :  { %v8129_v1 = vpop.eup %8128  ;;  %8148 = vrcp.f32 %v2138_v55  ;;  %v2151_v19 = vadd.f32 1.0, %v8127_v17  ;;  %v9990_v55 = vsub.s32 6, %v14015_v44  ;;  %v9992_v17 = vpop.f32.mrb[67].mxu1  ;;  %14055 = vst [vmem:[#allocation102_spill] sm:$0xff] %v9994_v47  ;;  %v14056_v47 = vrot.slane %v9762_v45, 2 }
 0x259   :  { %v8131_v25 = vpop.eup %8130  ;;  %14050 = vst [vmem:[#allocation48_spill] sm:$0xff] %v9971_v21  ;;  %v2158_v4 = vadd.f32 1.0, %v8129_v1  ;;  %8150 = vrcp.f32 %v2140_v61  ;;  %v9983_v8 = vmul.f32 -1.442695, %v9971_v21  ;;  %14054 = vst [vmem:[#allocation101_spill] sm:$0xff] %v9992_v17  ;;  %v7688_v61 = vld [vmem:[%s13507_s7 + $0x78] sm:$0xff]  }
 0x25a   :  { %v8133_v14 = vpop.eup %8132  ;;  %8152 = vrcp.f32 %v2139_v58  ;;  %14053 = vst [vmem:[#allocation100_spill] sm:$0xff] %v9990_v55  ;;  %v7689_v58 = vld [vmem:[%s13507_s7 + $0x38] sm:$0xff]   ;;  %v10014_v17 = vadd.f32 %v14056_v47, %v9762_v45  ;;  %7463 = vmatprep.subr.bf16.mxu0 %v7688_v61  ;;  %v10032_v45 = vadd.f32 %v14059_v51, %v9779_v52  ;;  %v14066_v61 = vld [vmem:[#allocation42_spill] sm:$0xff]  ;;  %v10051_v52 = vmul.f32 %v8131_v25, %v9584_v35  ;;  %v14069_v51 = vld [vmem:[#allocation43_spill] sm:$0xff] }
 0x25b   :  { %v8135_v38 = vpop.eup %8134  ;;  %8154 = vrcp.f32 %v2141_v37  ;;  %v10006_v37 = vrot.slane %v10002_v7, %v9795_v31  ;;  %v14061_v47 = vld [vmem:[#allocation41_spill] sm:$0xff]  ;;  %7464 = vmatpush3.bf16.msra.mxu0 %v7689_v58  ;;  %v10048_v21 = vmul.f32 %v9825_v5, %v14066_v61 }
 0x25c   :  { %v8137_v32 = vpop.eup %8136  ;;  %8156 = vrcp.f32 %v2148_v2  ;;  %14057 = vst [vmem:[#allocation103_spill] sm:$0xff] %v10014_v17  ;;  %v10018_v2 = vmul.f32 %v9869_v30, %v9507_v54  ;;  %14060 = vst [vmem:[#allocation105_spill] sm:$0xff] %v10032_v45  ;;  %v10036_v54 = vmul.f32 %v9809_v26, %v14061_v47  ;;  %v10039_v30 = vmul.f32 %v8123_v23, %v9569_v12  ;;  %v14071_v23 = vld [vmem:[#allocation44_spill] sm:$0xff] }
 0x25d   :  { %v8139_v60 = vpop.eup %8138  ;;  %v2160_v1 = vadd.f32 1.0, %v8137_v32  ;;  %8158 = vrcp.f32 %v2150_v49  ;;  %v10023_v32 = vld [vmem:[%s13506_s6] sm:$0xff]  ;;  %v14064_v17 = vrot.slane %v9783_v10, 1  ;;  %14067 = vst [vmem:[#allocation42_spill] sm:$0xff] %v10048_v21  ;;  %14068 = vst [vmem:[#allocation108_spill] sm:$0xff] %v10051_v52  ;;  %v10055_v12 = vmul.f32 %v9843_v42, %v14069_v51  ;;  %v10073_v42 = vpop.f32.mrb[68].mxu1 }
 0x25e   :  { %v8141_v40 = vpop.eup %8140  ;;  %14058 = vst [vmem:[#allocation104_spill] sm:$0xff] %v10018_v2  ;;  %v10027_v46 = vrot.slane %v10023_v32, %v9795_v31  ;;  %14062 = vst [vmem:[#allocation41_spill] sm:$0xff] %v10036_v54  ;;  %8160 = vrcp.f32 %v2149_v59  ;;  %v10059_v59 = vmul.f32 %v9848_v22, %v14071_v23  ;;  %v2798_v5 = vadd.f32 %v10018_v2, %v10036_v54  ;;  %v10075_v22 = vpop.f32.mrb[60].mxu0 }
 0x25f   :  { %14063 = vst [vmem:[#allocation106_spill] sm:$0xff] %v10039_v30  ;;  %v8143_v49 = vpop.eup %8142  ;;  %v10044_v31 = vmax.f32 %v9783_v10, %v14064_v17  ;;  %8162 = vrcp.f32 %v2151_v19  ;;  %14070 = vst [vmem:[#allocation43_spill] sm:$0xff] %v10055_v12  ;;  %v10062_v10 = vmul.f32 %v8133_v14, %v9621_v43  ;;  %v10067_v35 = vmul.f32 %v8135_v38, %v9628_v48 }
 0x260   :  { %v8145_v26 = vpop.eup %8144  ;;  %14072 = vst [vmem:[#allocation44_spill] sm:$0xff] %v10059_v59  ;;  %8164 = vrcp.f32 %v2158_v4  ;;  %v10070_v25 = vmul.f32 %v8139_v60, %v9631_v9  ;;  %14076 = vst [vmem:[#allocation112_spill] sm:$0xff] %v10073_v42  ;;  %v3079_v43 = vmax.f32 %v10036_v54, %v10018_v2  ;;  %v2824_v14 = vadd.f32 %v10039_v30, %v10048_v21 }
 0x261   :  { %14065 = vst [vmem:[#allocation107_spill] sm:$0xff] %v10044_v31  ;;  %14073 = vst [vmem:[#allocation109_spill] sm:$0xff] %v10062_v10  ;;  %v8147_v17 = vpop.eup %8146  ;;  %8166 = vpow2.f32 %v9940_v36  ;;  %v1178_v48 = vmul.f32 %v10006_v37, %v9496_v50  ;;  %v3105_v36 = vmax.f32 %v10048_v21, %v10039_v30  ;;  %v2811_v38 = vadd.f32 %v10051_v52, %v10055_v12 }
 0x262   :  { %14074 = vst [vmem:[#allocation110_spill] sm:$0xff] %v10067_v35  ;;  %14075 = vst [vmem:[#allocation111_spill] sm:$0xff] %v10070_v25  ;;  %v8149_v19 = vpop.eup %8148  ;;  %8168 = vpow2.f32 %v9945_v41  ;;  %v10089_v4 = vmul.f32 %v8141_v40, %v9708_v24  ;;  %v3092_v58 = vmax.f32 %v10055_v12, %v10051_v52  ;;  %v2837_v41 = vadd.f32 %v10062_v10, %v10059_v59 }
 0x263   :  { %14077 = vst [vmem:[#allocation113_spill] sm:$0xff] %v10075_v22  ;;  %v8151_v9 = vpop.eup %8150  ;;  %8170 = vpow2.f32 %v9954_v62  ;;  %v3118_v50 = vmax.f32 %v10059_v59, %v10062_v10  ;;  %v2799_v61 = vadd.f32 %v2798_v5, %v10067_v35  ;;  %v3080_v24 = vmax.f32 %v3079_v43, %v10067_v35 }
 0x264   :  { %14078 = vst [vmem:[#allocation114_spill] sm:$0xff] %v10089_v4  ;;  %v8153_v60 = vpop.eup %8152  ;;  %8172 = vpow2.f32 %v9965_v57  ;;  %v2825_v40 = vadd.f32 %v2824_v14, %v10070_v25  ;;  %v10104_v51 = vmax.f32 %v3105_v36, %v10070_v25  ;;  %v2159_v23 = vadd.f32 1.0, %v8143_v49 }
 0x265   :  { %v8155_v47 = vpop.eup %8154  ;;  %8174 = vpow2.f32 %v9968_v3  ;;  %v10108_v10 = vadd.f32 %v10027_v46, %v1178_v48  ;;  %v2812_v59 = vadd.f32 %v2811_v38, %v10089_v4  ;;  %v10112_v5 = vmul.f32 %v8147_v17, %v9729_v11 }
 0x266   :  { %v8157_v62 = vpop.eup %8156  ;;  %8176 = vpow2.f32 %v9977_v0  ;;  %v10116_v3 = vrot.slane %v10002_v7, %v9990_v55  ;;  %v10119_v14 = vmax.f32 %v3092_v58, %v10089_v4  ;;  %v2161_v49 = vadd.f32 1.0, %v8145_v26 }
 0x267   :  { %v8159_v57 = vpop.eup %8158  ;;  %14079 = vst [vmem:[#allocation115_spill] sm:$0xff] %v10112_v5  ;;  %8178 = vrcp.f32 %v2160_v1  ;;  %v10123_v0 = vsub.s32 5, %v14015_v44  ;;  %v10126_v36 = vmul.f32 %v8149_v19, %v9756_v56  ;;  %v10129_v11 = vmul.f32 %v8151_v9, %v9766_v20 }
 0x268   :  { %v8161_v43 = vpop.eup %8160  ;;  %8180 = vpow2.f32 %v9980_v29  ;;  %v10133_v1 = vsub.s32 7, %v14015_v44  ;;  %v10138_v26 = vmul.f32 %v8153_v60, %v9813_v18  ;;  %v7090_v29 = vmul.f32 -1.442695, %v10108_v10 }
 0x269   :  { %14080 = vst [vmem:[#allocation116_spill] sm:$0xff] %v10123_v0  ;;  %v8163_v48 = vpop.eup %8162  ;;  %14081 = vst [vmem:[#allocation117_spill] sm:$0xff] %v10126_v36  ;;  %8182 = vpow2.f32 %v9983_v8  ;;  %v10143_v56 = vrot.slane %v10023_v32, %v9990_v55  ;;  %v2838_v20 = vadd.f32 %v2837_v41, %v10112_v5  ;;  %v10147_v8 = vmax.f32 %v3118_v50, %v10112_v5 }
 0x26a   :  { %14082 = vst [vmem:[#allocation118_spill] sm:$0xff] %v10129_v11  ;;  %14083 = vst [vmem:[#allocation119_spill] sm:$0xff] %v10133_v1  ;;  %v10135_v17 = vpop.eup %8164  ;;  %8184 = vrcp.f32 %v2159_v23  ;;  %v10150_v9 = vmul.f32 %v8155_v47, %v9821_v39  ;;  %v1180_v18 = vmul.f32 %v10116_v3, %v9498_v53  ;;  %v10155_v60 = vmul.f32 %v8157_v62, %v9828_v63 }
 0x26b   :  { %14084 = vst [vmem:[#allocation120_spill] sm:$0xff] %v10138_v26  ;;  %v8167_v19 = vpop.eup %8166  ;;  %8186 = vrcp.f32 %v2161_v49  ;;  %v10159_v58 = vrot.slane %v10002_v7, %v10123_v0  ;;  %v10163_v41 = vrot.slane %v10023_v32, %v10123_v0  ;;  %v2800_v39 = vadd.f32 %v2799_v61, %v10126_v36 }
 0x26c   :  { %14085 = vst [vmem:[#allocation121_spill] sm:$0xff] %v10150_v9  ;;  %v8169_v38 = vpop.eup %8168  ;;  %14086 = vst [vmem:[#allocation122_spill] sm:$0xff] %v10155_v60  ;;  %v3081_v47 = vmax.f32 %v3080_v24, %v10126_v36  ;;  %v2826_v53 = vadd.f32 %v2825_v40, %v10129_v11  ;;  %v10170_v63 = vrot.slane %v10002_v7, %v10133_v1  ;;  %v2168_v21 = vadd.f32 1.0, %v8167_v19 }
 0x26d   :  { %v8171_v50 = vpop.eup %8170  ;;  %v3107_v23 = vmax.f32 %v10104_v51, %v10129_v11  ;;  %v2813_v49 = vadd.f32 %v2812_v59, %v10138_v26  ;;  %v3094_v30 = vmax.f32 %v10119_v14, %v10138_v26  ;;  %v2839_v61 = vadd.f32 %v2838_v20, %v10150_v9  ;;  %v14088_v20 = vld [vmem:[#allocation58_spill] sm:$0xff]  ;;  %v14093_v11 = vld [vmem:[#allocation33_spill] sm:$0xff] }
 0x26e   :  { %v8173_v62 = vpop.eup %8172  ;;  %v3120_v24 = vmax.f32 %v10147_v8, %v10150_v9  ;;  %v10181_v40 = vmul.f32 %v8159_v57, %v9831_v34  ;;  %v2170_v7 = vadd.f32 1.0, %v8169_v38  ;;  %v2801_v12 = vadd.f32 %v2800_v39, %v10155_v60  ;;  %v14089_v38 = vld [vmem:[#allocation32_spill] sm:$0xff] }
 0x26f   :  { %v8175_v52 = vpop.eup %8174  ;;  %v10185_v51 = vmax.f32 %v3081_v47, %v10155_v60  ;;  %v2169_v59 = vadd.f32 1.0, %v8171_v50  ;;  %v1179_v14 = vmul.f32 %v10159_v58, %v9509_v15  ;;  %v2171_v54 = vadd.f32 1.0, %v8173_v62  ;;  %v14091_v50 = vld [vmem:[#allocation59_spill] sm:$0xff] }
 0x270   :  { %14087 = vst [vmem:[#allocation123_spill] sm:$0xff] %v10181_v40  ;;  %v8177_v2 = vpop.eup %8176  ;;  %8188 = vpow2.f32 %v7090_v29  ;;  %v1181_v8 = vmul.f32 %v10170_v63, %v14088_v20  ;;  %v10193_v34 = vrot.slane %v10023_v32, %v10133_v1  ;;  %v10196_v39 = vmul.f32 %v8161_v43, %v14089_v38  ;;  %v14092_v20 = vld [vmem:[#allocation60_spill] sm:$0xff] }
 0x271   :  { %v8179_v19 = vpop.eup %8178  ;;  %8190 = vrcp.f32 %v2168_v21  ;;  %v2178_v47 = vadd.f32 1.0, %v8175_v52  ;;  %v1188_v60 = vmul.f32 %v10006_v37, %v14091_v50  ;;  %v2180_v62 = vadd.f32 1.0, %v8177_v2 }
 0x272   :  { %v8181_v57 = vpop.eup %8180  ;;  %14090 = vst [vmem:[#allocation58_spill] sm:$0xff] %v10196_v39  ;;  %8192 = vrcp.f32 %v2170_v7  ;;  %v10201_v29 = vadd.f32 %v10143_v56, %v1180_v18  ;;  %v1190_v9 = vmul.f32 %v10116_v3, %v14092_v20  ;;  %v2827_v5 = vadd.f32 %v2826_v53, %v10181_v40  ;;  %v14095_v18 = vld [vmem:[#allocation62_spill] sm:$0xff] }
 0x273   :  { %v8183_v15 = vpop.eup %8182  ;;  %v10207_v43 = vmul.f32 %v8163_v48, %v14093_v11  ;;  %8194 = vrcp.f32 %v2169_v59  ;;  %v10210_v21 = vadd.f32 %v10163_v41, %v1179_v14  ;;  %v2179_v52 = vadd.f32 1.0, %v8181_v57  ;;  %v14096_v11 = vld [vmem:[#allocation36_spill] sm:$0xff] }
 0x274   :  { %v8185_v32 = vpop.eup %8184  ;;  %8196 = vrcp.f32 %v2171_v54  ;;  %v10213_v2 = vadd.f32 %v10193_v34, %v1181_v8  ;;  %v1189_v7 = vmul.f32 %v10159_v58, %v14095_v18  ;;  %v10218_v50 = vmax.f32 %v3107_v23, %v10181_v40  ;;  %v14104_v40 = vld [vmem:[#allocation45_spill] sm:$0xff] }
 0x275   :  { %14094 = vst [vmem:[#allocation32_spill] sm:$0xff] %v10207_v43  ;;  %v8187_v38 = vpop.eup %8186  ;;  %8198 = vrcp.f32 %v2178_v47  ;;  %v2181_v53 = vadd.f32 1.0, %v8183_v15  ;;  %v10221_v48 = vadd.f32 %v10027_v46, %v1188_v60  ;;  %v10225_v59 = vmul.f32 %v10135_v17, %v14096_v11 }
 0x276   :  { %8200 = vrcp.f32 %v2180_v62  ;;  %v7092_v54 = vmul.f32 -1.442695, %v10201_v29  ;;  %v10229_v14 = vadd.f32 %v10143_v56, %v1190_v9  ;;  %v2814_v8 = vadd.f32 %v2813_v49, %v10196_v39  ;;  %v14098_v9 = vld [vmem:[#allocation37_spill] sm:$0xff]  ;;  %v14100_v49 = vld [vmem:[#allocation63_spill] sm:$0xff] }
 0x277   :  { %14097 = vst [vmem:[#allocation59_spill] sm:$0xff] %v10225_v59  ;;  %v10233_v23 = vmax.f32 %v3094_v30, %v10196_v39  ;;  %v2840_v57 = vadd.f32 %v2839_v61, %v10207_v43  ;;  %v7091_v60 = vmul.f32 -1.442695, %v10210_v21  ;;  %v10238_v47 = vmax.f32 %v3120_v24, %v10207_v43  ;;  %v14106_v39 = vld [vmem:[#allocation65_spill] sm:$0xff] }
 0x278   :  { %8202 = vrcp.f32 %v2179_v52  ;;  %v7093_v17 = vmul.f32 -1.442695, %v10213_v2  ;;  %v10242_v15 = vadd.f32 %v10163_v41, %v1189_v7  ;;  %v10245_v62 = vmul.f32 %v8179_v19, %v14098_v9  ;;  %v14101_v52 = vld [vmem:[#allocation11_spill] sm:$0xff]  ;;  %v14103_v9 = vld [vmem:[#allocation64_spill] sm:$0xff] }
 0x279   :  { %8204 = vrcp.f32 %v2181_v53  ;;  %v7100_v30 = vmul.f32 -1.442695, %v10221_v48  ;;  %v1191_v61 = vmul.f32 %v10170_v63, %v14100_v49  ;;  %v2802_v18 = vadd.f32 %v2801_v12, %v10225_v59 }
 0x27a   :  { %14099 = vst [vmem:[#allocation60_spill] sm:$0xff] %v10245_v62  ;;  %v8189_v20 = vpop.eup %8188  ;;  %8206 = vpow2.f32 %v7092_v54  ;;  %v7102_v24 = vmul.f32 -1.442695, %v10229_v14  ;;  %v1198_v11 = vmul.f32 %v10006_v37, %v14101_v52  ;;  %v3083_v19 = vmax.f32 %v10185_v51, %v10225_v59 }
 0x27b   :  { %v8191_v7 = vpop.eup %8190  ;;  %v10257_v53 = vmul.f32 %v8185_v32, %v9901_v6  ;;  %8208 = vpow2.f32 %v7091_v60  ;;  %v1200_v49 = vmul.f32 %v10116_v3, %v14103_v9  ;;  %v10262_v12 = vmul.f32 %v8187_v38, %v14104_v40  ;;  %v14107_v40 = vld [vmem:[#allocation47_spill] sm:$0xff] }
 0x27c   :  { %v8193_v43 = vpop.eup %8192  ;;  %8210 = vpow2.f32 %v7093_v17  ;;  %v7101_v54 = vmul.f32 -1.442695, %v10242_v15  ;;  %v1199_v52 = vmul.f32 %v10159_v58, %v14106_v39  ;;  %v2828_v51 = vadd.f32 %v2827_v5, %v10245_v62  ;;  %v7690_v5 = vld [vmem:[%s13507_s7 + $0xc0] sm:$0xff]   ;;  %v10282_v39 = vpop.f32.mrb[69].mxu1 }
 0x27d   :  { %14102 = vst [vmem:[#allocation33_spill] sm:$0xff] %v10257_v53  ;;  %14105 = vst [vmem:[#allocation62_spill] sm:$0xff] %v10262_v12  ;;  %v8195_v25 = vpop.eup %8194  ;;  %v2032_v59 = vadd.f32 1.0, %v8189_v20  ;;  %8212 = vpow2.f32 %v7100_v30  ;;  %v10269_v6 = vadd.f32 %v10193_v34, %v1191_v61  ;;  %v3109_v60 = vmax.f32 %v10218_v50, %v10245_v62  ;;  %v14110_v50 = vld [vmem:[#allocation96_spill] sm:$0xff]  ;;  %7471 = vmatprep.subr.bf16.mxu0 %v7690_v5 }
 0x27e   :  { %v8197_v32 = vpop.eup %8196  ;;  %v10274_v38 = vmul.f32 %v8191_v7, %v14107_v40  ;;  %8214 = vpow2.f32 %v7102_v24  ;;  %v10277_v17 = vadd.f32 %v10027_v46, %v1198_v11  ;;  %14109 = vst [vmem:[#allocation37_spill] sm:$0xff] %v10282_v39  ;;  %v2815_v61 = vadd.f32 %v2814_v8, %v10257_v53 }
 0x27f   :  { %v8199_v30 = vpop.eup %8198  ;;  %v3096_v20 = vmax.f32 %v10233_v23, %v10257_v53  ;;  %v10288_v9 = vmul.f32 %v8193_v43, %v14110_v50  ;;  %v10291_v24 = vadd.f32 %v10143_v56, %v1200_v49  ;;  %v2841_v7 = vadd.f32 %v2840_v57, %v10262_v12  ;;  %v14116_v50 = vld [vmem:[#allocation66_spill] sm:$0xff]  ;;  %v14124_v53 = vld [vmem:[#allocation72_spill] sm:$0xff] }
 0x280   :  { %14108 = vst [vmem:[#allocation36_spill] sm:$0xff] %v10274_v38  ;;  %v8201_v11 = vpop.eup %8200  ;;  %v10295_v40 = vmul.f32 %v8195_v25, %v9930_v33  ;;  %8216 = vpow2.f32 %v7101_v54  ;;  %v10298_v62 = vadd.f32 %v10163_v41, %v1199_v52  ;;  %v3122_v8 = vmax.f32 %v10238_v47, %v10262_v12 }
 0x281   :  { %14111 = vst [vmem:[#allocation63_spill] sm:$0xff] %v10288_v9  ;;  %v10303_v43 = vmul.f32 %v8197_v32, %v9948_v16  ;;  %8218 = vrcp.f32 %v2032_v59  ;;  %v7103_v23 = vmul.f32 -1.442695, %v10269_v6  ;;  %v2803_v57 = vadd.f32 %v2802_v18, %v10274_v38 }
 0x282   :  { %14112 = vst [vmem:[#allocation11_spill] sm:$0xff] %v10295_v40  ;;  %v8203_v49 = vpop.eup %8202  ;;  %v3084_v33 = vmax.f32 %v3083_v19, %v10274_v38  ;;  %v10309_v25 = vmul.f32 %v8199_v30, %v9951_v13  ;;  %v7110_v54 = vmul.f32 -1.442695, %v10277_v17  ;;  %v2829_v5 = vadd.f32 %v2828_v51, %v10288_v9  ;;  %v14117_v30 = vld [vmem:[#allocation12_spill] sm:$0xff] }
 0x283   :  { %14113 = vst [vmem:[#allocation64_spill] sm:$0xff] %v10303_v43  ;;  %v8205_v52 = vpop.eup %8204  ;;  %v3110_v47 = vmax.f32 %v3109_v60, %v10288_v9  ;;  %v10315_v16 = vmul.f32 %v8201_v11, %v9957_v28  ;;  %v7112_v59 = vmul.f32 -1.442695, %v10291_v24  ;;  %v2816_v18 = vadd.f32 %v2815_v61, %v10295_v40 }
 0x284   :  { %14114 = vst [vmem:[#allocation45_spill] sm:$0xff] %v10309_v25  ;;  %v8207_v32 = vpop.eup %8206  ;;  %v7111_v19 = vmul.f32 -1.442695, %v10298_v62  ;;  %v1201_v13 = vmul.f32 %v10170_v63, %v14116_v50  ;;  %v1208_v38 = vmul.f32 %v10006_v37, %v14117_v30  ;;  %v3097_v51 = vmax.f32 %v3096_v20, %v10295_v40 }
 0x285   :  { %14115 = vst [vmem:[#allocation65_spill] sm:$0xff] %v10315_v16  ;;  %v8209_v12 = vpop.eup %8208  ;;  %v2842_v60 = vadd.f32 %v2841_v7, %v10303_v43  ;;  %v10327_v28 = vmax.f32 %v3122_v8, %v10303_v43  ;;  %8220 = vpow2.f32 %v7103_v23  ;;  %v10330_v61 = vadd.f32 %v2803_v57, %v10309_v25 }
 0x286   :  { %v8211_v11 = vpop.eup %8210  ;;  %v10333_v9 = vmax.f32 %v3084_v33, %v10309_v25  ;;  %v10336_v50 = vmul.f32 %v8203_v49, %v9960_v27  ;;  %8222 = vpow2.f32 %v7110_v54  ;;  %v10339_v20 = vadd.f32 %v2829_v5, %v10315_v16  ;;  %v14119_v33 = vld [vmem:[#allocation67_spill] sm:$0xff]  ;;  %v14120_v27 = vld [vmem:[#allocation68_spill] sm:$0xff] }
 0x287   :  { %v8213_v30 = vpop.eup %8212  ;;  %v10342_v7 = vmax.f32 %v3110_v47, %v10315_v16  ;;  %v2034_v8 = vadd.f32 1.0, %v8207_v32  ;;  %8224 = vpow2.f32 %v7112_v59  ;;  %v2033_v43 = vadd.f32 1.0, %v8209_v12  ;;  %v14121_v54 = vld [vmem:[#allocation48_spill] sm:$0xff]  ;;  %v14123_v47 = vld [vmem:[#allocation69_spill] sm:$0xff] }
 0x288   :  { %14118 = vst [vmem:[#allocation47_spill] sm:$0xff] %v10336_v50  ;;  %v8215_v23 = vpop.eup %8214  ;;  %v10345_v57 = vadd.f32 %v10193_v34, %v1201_v13  ;;  %v1210_v25 = vmul.f32 %v10116_v3, %v14119_v33  ;;  %v1209_v49 = vmul.f32 %v10159_v58, %v14120_v27  ;;  %v10352_v40 = vmul.f32 %v8205_v52, %v14121_v54  ;;  %v10369_v54 = vpop.f32.mrb[61].mxu0 }
 0x289   :  { %v2035_v5 = vadd.f32 1.0, %v8211_v11  ;;  %8226 = vpow2.f32 %v7111_v19  ;;  %v1211_v32 = vmul.f32 %v10170_v63, %v14123_v47  ;;  %v2805_v12 = vrot.slane %v10330_v61, 4  ;;  %v14125_v19 = vld [vmem:[#allocation73_spill] sm:$0xff]  ;;  %14126 = vst [vmem:[#allocation66_spill] sm:$0xff] %v10369_v54 }
 0x28a   :  { %14122 = vst [vmem:[#allocation96_spill] sm:$0xff] %v10352_v40  ;;  %v8217_v59 = vpop.eup %8216  ;;  %v2042_v16 = vadd.f32 1.0, %v8213_v30  ;;  %v10358_v13 = vadd.f32 %v10027_v46, %v1208_v38  ;;  %v1218_v33 = vmul.f32 %v10006_v37, %v14124_v53  ;;  %8228 = vrcp.f32 %v2034_v8  ;;  %v10376_v53 = vpop.f32.mrb[70].mxu1  ;;  %v14137_v54 = vld [vmem:[#allocation77_spill] sm:$0xff] }
 0x28b   :  { %v10362_v26 = vpop.eup %8218  ;;  %v2044_v52 = vadd.f32 1.0, %v8215_v23  ;;  %v10365_v11 = vadd.f32 %v10143_v56, %v1210_v25  ;;  %v1220_v27 = vmul.f32 %v10116_v3, %v14125_v19  ;;  %v3086_v30 = vrot.slane %v10333_v9, 4  ;;  %14127 = vst [vmem:[#allocation12_spill] sm:$0xff] %v10376_v53  ;;  %v10378_v8 = vpop.f32.mrb[62].mxu0  ;;  %v14136_v53 = vld [vmem:[#allocation76_spill] sm:$0xff] }
 0x28c   :  { %8230 = vrcp.f32 %v2033_v43  ;;  %v7113_v38 = vmul.f32 -1.442695, %v10345_v57  ;;  %v10374_v47 = vadd.f32 %v10163_v41, %v1209_v49  ;;  %14128 = vst [vmem:[#allocation67_spill] sm:$0xff] %v10378_v8  ;;  %v10381_v25 = vadd.f32 %v2816_v18, %v10336_v50  ;;  %v14130_v49 = vld [vmem:[#allocation74_spill] sm:$0xff]  ;;  %v10402_v1 = vpop.f32.mrb[71].mxu1 }
 0x28d   :  { %8232 = vrcp.f32 %v2035_v5  ;;  %v2043_v23 = vadd.f32 1.0, %v8217_v59  ;;  %v10384_v19 = vadd.f32 %v10193_v34, %v1211_v32  ;;  %v7120_v43 = vmul.f32 -1.442695, %v10358_v13  ;;  %14132 = vst [vmem:[#allocation69_spill] sm:$0xff] %v10402_v1 }
 0x28e   :  { %8234 = vrcp.f32 %v2042_v16  ;;  %v10388_v36 = vadd.f32 %v10027_v46, %v1218_v33  ;;  %v1219_v4 = vmul.f32 %v10159_v58, %v14130_v49  ;;  %v10393_v44 = vmax.f32 %v3097_v51, %v10336_v50  ;;  %v14133_v50 = vld [vmem:[#allocation75_spill] sm:$0xff] }
 0x28f   :  { %v8221_v35 = vpop.eup %8220  ;;  %8236 = vrcp.f32 %v2044_v52  ;;  %v7122_v18 = vmul.f32 -1.442695, %v10365_v11  ;;  %v10397_v5 = vadd.f32 %v10143_v56, %v1220_v27  ;;  %v2831_v16 = vrot.slane %v10339_v20, 4 }
 0x290   :  { %14129 = vst [vmem:[#allocation68_spill] sm:$0xff] %v10388_v36  ;;  %v8223_v32 = vpop.eup %8222  ;;  %v3112_v59 = vrot.slane %v10342_v7, 4  ;;  %8238 = vpow2.f32 %v7113_v38  ;;  %v7121_v33 = vmul.f32 -1.442695, %v10374_v47  ;;  %v10405_v51 = vadd.f32 %v2842_v60, %v10352_v40  ;;  %v14135_v38 = vld [vmem:[#allocation20_spill] sm:$0xff] }
 0x291   :  { %14131 = vst [vmem:[#allocation48_spill] sm:$0xff] %v10397_v5  ;;  %v8225_v49 = vpop.eup %8224  ;;  %8240 = vrcp.f32 %v2043_v23  ;;  %v7123_v52 = vmul.f32 -1.442695, %v10384_v19  ;;  %v1221_v27 = vmul.f32 %v10170_v63, %v14133_v50  ;;  %v7130_v0 = vmul.f32 -1.442695, %v10388_v36 }
 0x292   :  { %8242 = vpow2.f32 %v7120_v43  ;;  %v10412_v55 = vadd.f32 %v10163_v41, %v1219_v4  ;;  %v1228_v8 = vmul.f32 %v10006_v37, %v14135_v38  ;;  %v3124_v60 = vmax.f32 %v10327_v28, %v10352_v40 }
 0x293   :  { %v8227_v1 = vpop.eup %8226  ;;  %8244 = vpow2.f32 %v7122_v18  ;;  %v7132_v23 = vmul.f32 -1.442695, %v10397_v5  ;;  %v1230_v45 = vmul.f32 %v10116_v3, %v14136_v53  ;;  %v2806_v50 = vadd.f32 %v2805_v12, %v10330_v61  ;;  %v10437_v12 = vpop.f32.mrb[63].mxu0 }
 0x294   :  { %14134 = vst [vmem:[#allocation72_spill] sm:$0xff] %v10412_v55  ;;  %v2045_v43 = vadd.f32 1.0, %v8221_v35  ;;  %8246 = vpow2.f32 %v7121_v33  ;;  %v1229_v4 = vmul.f32 %v10159_v58, %v14137_v54  ;;  %v10424_v39 = vpop.eup %8228  ;;  %v3087_v38 = vmax.f32 %v10333_v9, %v3086_v30  ;;  %14140 = vst [vmem:[#allocation75_spill] sm:$0xff] %v10437_v12  ;;  %v10445_v33 = vpop.f32.mrb[72].mxu1 }
 0x295   :  { %v2052_v31 = vadd.f32 1.0, %v8223_v32  ;;  %8248 = vpow2.f32 %v7123_v52  ;;  %v10428_v28 = vadd.f32 %v10193_v34, %v1221_v27  ;;  %v2818_v53 = vrot.slane %v10381_v25, 4  ;;  %14142 = vst [vmem:[#allocation76_spill] sm:$0xff] %v10445_v33 }
 0x296   :  { %v10430_v18 = vpop.eup %8230  ;;  %8250 = vpow2.f32 %v7130_v0  ;;  %v7131_v35 = vmul.f32 -1.442695, %v10412_v55  ;;  %v10435_v61 = vadd.f32 %v10027_v46, %v1228_v8  ;;  %v3099_v9 = vrot.slane %v10393_v44, 4 }
 0x297   :  { %14138 = vst [vmem:[#allocation73_spill] sm:$0xff] %v10428_v28  ;;  %v10439_v54 = vpop.eup %8232  ;;  %v2054_v30 = vadd.f32 1.0, %v8225_v49  ;;  %8252 = vpow2.f32 %v7132_v23  ;;  %v10443_v32 = vadd.f32 %v10143_v56, %v1230_v45  ;;  %v2832_v0 = vadd.f32 %v2831_v16, %v10339_v20 }
 0x298   :  { %14139 = vst [vmem:[#allocation74_spill] sm:$0xff] %v10435_v61  ;;  %v10447_v52 = vpop.eup %8234  ;;  %8254 = vrcp.f32 %v2045_v43  ;;  %v2053_v8 = vadd.f32 1.0, %v8227_v1  ;;  %v10451_v27 = vadd.f32 %v10163_v41, %v1229_v4  ;;  %v10456_v12 = vmax.f32 %v10342_v7, %v3112_v59  ;;  %v10467_v59 = vpop.f32.mrb[64].mxu0 }
 0x299   :  { %14141 = vst [vmem:[#allocation20_spill] sm:$0xff] %v10443_v32  ;;  %v10453_v40 = vpop.eup %8236  ;;  %v2844_v49 = vrot.slane %v10405_v51, 4  ;;  %8256 = vrcp.f32 %v2052_v31  ;;  %v7133_v45 = vmul.f32 -1.442695, %v10428_v28  ;;  %v2807_v33 = vrot.slane %v2806_v50, 2  ;;  %14144 = vst [vmem:[#allocation124_spill] sm:$0xff] %v10467_v59 }
 0x29a   :  { %14143 = vst [vmem:[#allocation77_spill] sm:$0xff] %v10451_v27  ;;  %v8239_v23 = vpop.eup %8238  ;;  %v3125_v22 = vrot.slane %v3124_v60, 4  ;;  %8258 = vpow2.f32 %v7131_v35  ;;  %v7140_v20 = vmul.f32 -1.442695, %v10435_v61  ;;  %v3088_v16 = vrot.slane %v3087_v38, 2 }
 0x29b   :  { %v10461_v1 = vpop.eup %8240  ;;  %v10464_v43 = vadd.f32 %v2818_v53, %v10381_v25  ;;  %8260 = vrcp.f32 %v2054_v30  ;;  %v7142_v7 = vmul.f32 -1.442695, %v10443_v32  ;;  %v2833_v4 = vrot.slane %v2832_v0, 2  ;;  %v14146_v25 = vld [vmem:[#allocation24_spill] sm:$0xff] }
 0x29c   :  { %v8243_v31 = vpop.eup %8242  ;;  %v10470_v42 = vmax.f32 %v10393_v44, %v3099_v9  ;;  %8262 = vrcp.f32 %v2053_v8  ;;  %v7141_v35 = vmul.f32 -1.442695, %v10451_v27  ;;  %v3114_v28 = vrot.slane %v10456_v12, 2  ;;  %v14147_v44 = vld [vmem:[#allocation79_spill] sm:$0xff] }
 0x29d   :  { %v8245_v61 = vpop.eup %8244  ;;  %v2055_v55 = vadd.f32 1.0, %v8239_v23  ;;  %8264 = vpow2.f32 %v7133_v45  ;;  %v1238_v53 = vmul.f32 %v10006_v37, %v14146_v25  ;;  %v10477_v32 = vadd.f32 %v2844_v49, %v10405_v51  ;;  %v10487_v45 = vpop.f32.mrb[73].mxu1 }
 0x29e   :  { %14145 = vst [vmem:[#allocation125_spill] sm:$0xff] %v10470_v42  ;;  %v8247_v30 = vpop.eup %8246  ;;  %v10479_v59 = vmax.f32 %v3124_v60, %v3125_v22  ;;  %8266 = vpow2.f32 %v7140_v20  ;;  %v1240_v9 = vmul.f32 %v10116_v3, %v14147_v44  ;;  %v10483_v27 = vadd.f32 %v2807_v33, %v2806_v50  ;;  %14148 = vst [vmem:[#allocation24_spill] sm:$0xff] %v10487_v45  ;;  %v14149_v22 = vld [vmem:[#allocation80_spill] sm:$0xff]  ;;  %v10492_v49 = vpop.f32.mrb[65].mxu0  ;;  %v14156_v45 = vld [vmem:[#allocation81_spill] sm:$0xff] }
 0x29f   :  { %v8249_v8 = vpop.eup %8248  ;;  %v10485_v5 = vmax.f32 %v3087_v38, %v3088_v16  ;;  %v2062_v23 = vadd.f32 1.0, %v8243_v31  ;;  %8268 = vpow2.f32 %v7142_v7  ;;  %v2064_v51 = vadd.f32 1.0, %v8245_v61  ;;  %14150 = vst [vmem:[#allocation79_spill] sm:$0xff] %v10492_v49  ;;  %v10498_v16 = vpop.f32.mrb[74].mxu1 }
 0x2a0   :  { %v8251_v25 = vpop.eup %8250  ;;  %8270 = vpow2.f32 %v7141_v35  ;;  %v1239_v60 = vmul.f32 %v10159_v58, %v14149_v22  ;;  %v2063_v38 = vadd.f32 1.0, %v8247_v30  ;;  %v10496_v33 = vadd.f32 %v10027_v46, %v1238_v53  ;;  %14151 = vst [vmem:[#allocation80_spill] sm:$0xff] %v10498_v16  ;;  %v14152_v35 = vld [vmem:[#allocation82_spill] sm:$0xff]  ;;  %v14153_v22 = vld [vmem:[#allocation83_spill] sm:$0xff] }
 0x2a1   :  { %v8253_v20 = vpop.eup %8252  ;;  %8272 = vrcp.f32 %v2055_v55  ;;  %v2065_v31 = vadd.f32 1.0, %v8249_v8  ;;  %v10503_v61 = vadd.f32 %v10143_v56, %v1240_v9  ;;  %v1248_v44 = vmul.f32 %v10006_v37, %v14152_v35  ;;  %v14155_v30 = vld [vmem:[#allocation78_spill] sm:$0xff] }
 0x2a2   :  { %v10500_v7 = vpop.eup %8254  ;;  %v1250_v36 = vmul.f32 %v10116_v3, %v14153_v22  ;;  %v10511_v55 = vadd.f32 %v2833_v4, %v2832_v0  ;;  %8274 = vrcp.f32 %v2062_v23  ;;  %v2072_v53 = vadd.f32 1.0, %v8251_v25  ;;  %v14157_v23 = vld [vmem:[#allocation84_spill] sm:$0xff] }
 0x2a3   :  { %v10509_v50 = vpop.eup %8256  ;;  %v1231_v16 = vmul.f32 %v10170_v63, %v14155_v30  ;;  %8276 = vrcp.f32 %v2064_v51  ;;  %v2074_v8 = vadd.f32 1.0, %v8253_v20  ;;  %v10516_v9 = vadd.f32 %v10163_v41, %v1239_v60  ;;  %v10537_v20 = vpop.f32.mrb[66].mxu0 }
 0x2a4   :  { %14154 = vst [vmem:[#allocation82_spill] sm:$0xff] %v10511_v55  ;;  %v8259_v49 = vpop.eup %8258  ;;  %v1241_v35 = vmul.f32 %v10170_v63, %v14156_v45  ;;  %8278 = vrcp.f32 %v2063_v38  ;;  %v7150_v0 = vmul.f32 -1.442695, %v10496_v33  ;;  %v10524_v4 = vadd.f32 %v10027_v46, %v1248_v44  ;;  %14159 = vst [vmem:[#allocation78_spill] sm:$0xff] %v10537_v20  ;;  %v10543_v55 = vpop.f32.mrb[75].mxu1 }
 0x2a5   :  { %v10520_v42 = vpop.eup %8260  ;;  %v1249_v25 = vmul.f32 %v10159_v58, %v14157_v23  ;;  %v10531_v51 = vmax.f32 %v10456_v12, %v3114_v28  ;;  %8280 = vrcp.f32 %v2065_v31  ;;  %v7152_v60 = vmul.f32 -1.442695, %v10503_v61  ;;  %14160 = vst [vmem:[#allocation81_spill] sm:$0xff] %v10543_v55  ;;  %v10545_v28 = vpop.f32.mrb[67].mxu0 }
 0x2a6   :  { %v10528_v22 = vpop.eup %8262  ;;  %v10535_v45 = vadd.f32 %v10143_v56, %v1250_v36  ;;  %8282 = vrcp.f32 %v2072_v53  ;;  %v2073_v30 = vadd.f32 1.0, %v8259_v49  ;;  %v10541_v23 = vadd.f32 %v10193_v34, %v1231_v16  ;;  %14161 = vst [vmem:[#allocation84_spill] sm:$0xff] %v10545_v28  ;;  %v14163_v28 = vld [vmem:[#allocation85_spill] sm:$0xff] }
 0x2a7   :  { %14158 = vst [vmem:[#allocation83_spill] sm:$0xff] %v10531_v51  ;;  %v8265_v38 = vpop.eup %8264  ;;  %8284 = vrcp.f32 %v2074_v8  ;;  %v7151_v36 = vmul.f32 -1.442695, %v10516_v9  ;;  %v10550_v20 = vadd.f32 %v10193_v34, %v1241_v35  ;;  %v10554_v49 = vmul.f32 %v10447_v52, %v10221_v48 }
 0x2a8   :  { %v8267_v12 = vpop.eup %8266  ;;  %8286 = vpow2.f32 %v7150_v0  ;;  %v7160_v16 = vmul.f32 -1.442695, %v10524_v4  ;;  %v10558_v53 = vadd.f32 %v10163_v41, %v1249_v25  ;;  %v7162_v8 = vmul.f32 -1.442695, %v10535_v45 }
 0x2a9   :  { %v8269_v51 = vpop.eup %8268  ;;  %14162 = vst [vmem:[#allocation126_spill] sm:$0xff] %v10554_v49  ;;  %8288 = vpow2.f32 %v7152_v60  ;;  %v1251_v35 = vmul.f32 %v10170_v63, %v14163_v28  ;;  %v10566_v48 = vmul.f32 %v10362_v26, %v10108_v10  ;;  %v10570_v52 = vmul.f32 %v10424_v39, %v10201_v29  ;;  %v10582_v10 = vpop.f32.mrb[76].mxu1 }
 0x2aa   :  { %v8271_v44 = vpop.eup %8270  ;;  %8290 = vrcp.f32 %v2073_v30  ;;  %v7143_v0 = vmul.f32 -1.442695, %v10541_v23  ;;  %v10575_v25 = vmul.f32 %v10430_v18, %v10210_v21  ;;  %v10579_v60 = vmul.f32 %v10453_v40, %v10229_v14  ;;  %14168 = vst [vmem:[#allocation130_spill] sm:$0xff] %v10582_v10  ;;  %v10591_v18 = vpop.f32.mrb[77].mxu1 }
 0x2ab   :  { %v8273_v55 = vpop.eup %8272  ;;  %14164 = vst [vmem:[#allocation85_spill] sm:$0xff] %v10566_v48  ;;  %14165 = vst [vmem:[#allocation127_spill] sm:$0xff] %v10570_v52  ;;  %8292 = vpow2.f32 %v7151_v36  ;;  %v7153_v28 = vmul.f32 -1.442695, %v10550_v20  ;;  %v10586_v29 = vmul.f32 %v10439_v54, %v10213_v2  ;;  %v2720_v39 = vadd.f32 %v10554_v49, %v10566_v48  ;;  %v10600_v2 = vpop.f32.mrb[78].mxu1 }
 0x2ac   :  { %14166 = vst [vmem:[#allocation128_spill] sm:$0xff] %v10575_v25  ;;  %14167 = vst [vmem:[#allocation129_spill] sm:$0xff] %v10579_v60  ;;  %v8275_v26 = vpop.eup %8274  ;;  %8294 = vpow2.f32 %v7160_v16  ;;  %v7161_v21 = vmul.f32 -1.442695, %v10558_v53  ;;  %v10595_v40 = vmul.f32 %v10461_v1, %v10242_v15  ;;  %v2075_v30 = vadd.f32 1.0, %v8265_v38  ;;  %v10608_v10 = vpop.f32.mrb[79].mxu1 }
 0x2ad   :  { %14169 = vst [vmem:[#allocation131_spill] sm:$0xff] %v10586_v29  ;;  %14170 = vst [vmem:[#allocation132_spill] sm:$0xff] %v10591_v18  ;;  %v8277_v14 = vpop.eup %8276  ;;  %8296 = vpow2.f32 %v7162_v8  ;;  %v10598_v36 = vadd.f32 %v10193_v34, %v1251_v35  ;;  %v3001_v16 = vmax.f32 %v10566_v48, %v10554_v49  ;;  %v10606_v31 = vmul.f32 %v10500_v7, %v10269_v6  ;;  %v14175_v8 = vld [vmem:[#allocation86_spill] sm:$0xff] }
 0x2ae   :  { %14171 = vst [vmem:[#allocation133_spill] sm:$0xff] %v10595_v40  ;;  %14172 = vst [vmem:[#allocation134_spill] sm:$0xff] %v10600_v2  ;;  %v8279_v54 = vpop.eup %8278  ;;  %v2082_v18 = vadd.f32 1.0, %v8267_v12  ;;  %8298 = vpow2.f32 %v7143_v0  ;;  %v2746_v1 = vadd.f32 %v10579_v60, %v10570_v52  ;;  %v2084_v38 = vadd.f32 1.0, %v8269_v51 }
 0x2af   :  { %14173 = vst [vmem:[#allocation135_spill] sm:$0xff] %v10606_v31  ;;  %14174 = vst [vmem:[#allocation136_spill] sm:$0xff] %v10608_v10  ;;  %v8281_v15 = vpop.eup %8280  ;;  %8300 = vpow2.f32 %v7153_v28  ;;  %v1258_v35 = vmul.f32 %v10006_v37, %v14175_v8  ;;  %v3027_v49 = vmax.f32 %v10570_v52, %v10579_v60  ;;  %v10618_v6 = vmul.f32 %v10509_v50, %v10277_v17  ;;  %v10627_v8 = vpop.f32.mrb[80].mxu1 }
 0x2b0   :  { %v8283_v2 = vpop.eup %8282  ;;  %v2083_v7 = vadd.f32 1.0, %v8271_v44  ;;  %8302 = vpow2.f32 %v7161_v21  ;;  %v2733_v0 = vadd.f32 %v10595_v40, %v10575_v25  ;;  %v10624_v51 = vmul.f32 %v10520_v42, %v10291_v24  ;;  %14178 = vst [vmem:[#allocation138_spill] sm:$0xff] %v10627_v8  ;;  %v10645_v52 = vpop.f32.mrb[81].mxu1 }
 0x2b1   :  { %14176 = vst [vmem:[#allocation86_spill] sm:$0xff] %v10618_v6  ;;  %v8285_v12 = vpop.eup %8284  ;;  %8304 = vrcp.f32 %v2075_v30  ;;  %v7163_v28 = vmul.f32 -1.442695, %v10598_v36  ;;  %v3014_v17 = vmax.f32 %v10575_v25, %v10595_v40  ;;  %v2759_v50 = vadd.f32 %v10606_v31, %v10586_v29  ;;  %14181 = vst [vmem:[#allocation141_spill] sm:$0xff] %v10645_v52 }
 0x2b2   :  { %14177 = vst [vmem:[#allocation137_spill] sm:$0xff] %v10624_v51  ;;  %v8287_v60 = vpop.eup %8286  ;;  %v10635_v44 = vmul.f32 %v10528_v22, %v10298_v62  ;;  %8306 = vrcp.f32 %v2082_v18  ;;  %v3040_v42 = vmax.f32 %v10586_v29, %v10606_v31  ;;  %v10640_v24 = vmul.f32 %v8273_v55, %v10345_v57 }
 0x2b3   :  { %v8289_v21 = vpop.eup %8288  ;;  %8308 = vrcp.f32 %v2084_v38  ;;  %v10643_v30 = vadd.f32 %v10027_v46, %v1258_v35  ;;  %v2721_v40 = vadd.f32 %v2720_v39, %v10618_v6  ;;  %v3002_v62 = vmax.f32 %v3001_v16, %v10618_v6  ;;  %v10654_v38 = vpop.f32.mrb[82].mxu1  ;;  %v14189_v6 = vld [vmem:[#allocation68_spill] sm:$0xff] }
 0x2b4   :  { %14179 = vst [vmem:[#allocation139_spill] sm:$0xff] %v10635_v44  ;;  %14180 = vst [vmem:[#allocation140_spill] sm:$0xff] %v10640_v24  ;;  %v8291_v48 = vpop.eup %8290  ;;  %v10650_v22 = vmul.f32 %v8275_v26, %v10358_v13  ;;  %8310 = vrcp.f32 %v2083_v7  ;;  %v2747_v31 = vadd.f32 %v2746_v1, %v10624_v51  ;;  %v3028_v57 = vmax.f32 %v3027_v49, %v10624_v51  ;;  %v10661_v26 = vpop.f32.mrb[83].mxu1 }
 0x2b5   :  { %v8293_v18 = vpop.eup %8292  ;;  %v2092_v55 = vadd.f32 1.0, %v8287_v60  ;;  %8312 = vpow2.f32 %v7163_v28  ;;  %14183 = vst [vmem:[#allocation143_spill] sm:$0xff] %v10654_v38  ;;  %v2734_v29 = vadd.f32 %v2733_v0, %v10635_v44  ;;  %v3015_v39 = vmax.f32 %v3014_v17, %v10635_v44  ;;  %14185 = vst [vmem:[#allocation145_spill] sm:$0xff] %v10661_v26  ;;  %v14187_v28 = vld [vmem:[#allocation87_spill] sm:$0xff] }
 0x2b6   :  { %14182 = vst [vmem:[#allocation142_spill] sm:$0xff] %v10650_v22  ;;  %v8295_v35 = vpop.eup %8294  ;;  %v10659_v16 = vmul.f32 %v8277_v14, %v10365_v11  ;;  %v2094_v13 = vadd.f32 1.0, %v8289_v21  ;;  %v2760_v1 = vadd.f32 %v2759_v50, %v10640_v24  ;;  %v10665_v49 = vmul.f32 %v8279_v54, %v10374_v47 }
 0x2b7   :  { %v8297_v7 = vpop.eup %8296  ;;  %v7170_v60 = vmul.f32 -1.442695, %v10643_v30  ;;  %v1260_v51 = vmul.f32 %v10116_v3, %v14187_v28  ;;  %v3041_v17 = vmax.f32 %v3040_v42, %v10640_v24  ;;  %v2722_v11 = vadd.f32 %v2721_v40, %v10650_v22  ;;  %v14196_v24 = vld [vmem:[#allocation73_spill] sm:$0xff] }
 0x2b8   :  { %14184 = vst [vmem:[#allocation144_spill] sm:$0xff] %v10659_v16  ;;  %14186 = vst [vmem:[#allocation146_spill] sm:$0xff] %v10665_v49  ;;  %v8299_v0 = vpop.eup %8298  ;;  %v10673_v14 = vmul.f32 %v8281_v15, %v10384_v19  ;;  %v2093_v21 = vadd.f32 1.0, %v8293_v18  ;;  %v3003_v50 = vmax.f32 %v3002_v62, %v10650_v22  ;;  %v10677_v47 = vmul.f32 %v8283_v2, %v14189_v6  ;;  %v10683_v62 = vpop.f32.mrb[84].mxu1 }
 0x2b9   :  { %v8301_v44 = vpop.eup %8300  ;;  %8314 = vrcp.f32 %v2092_v55  ;;  %v2102_v54 = vadd.f32 1.0, %v8295_v35  ;;  %v2748_v28 = vadd.f32 %v2747_v31, %v10659_v16  ;;  %v3029_v26 = vmax.f32 %v3028_v57, %v10659_v16  ;;  %14191 = vst [vmem:[#allocation147_spill] sm:$0xff] %v10683_v62  ;;  %v14192_v55 = vld [vmem:[#allocation48_spill] sm:$0xff] }
 0x2ba   :  { %14188 = vst [vmem:[#allocation87_spill] sm:$0xff] %v10673_v14  ;;  %14190 = vst [vmem:[#allocation68_spill] sm:$0xff] %v10677_v47  ;;  %v8303_v25 = vpop.eup %8302  ;;  %8316 = vrcp.f32 %v2094_v13  ;;  %v2104_v42 = vadd.f32 1.0, %v8297_v7  ;;  %v2735_v19 = vadd.f32 %v2734_v29, %v10665_v49  ;;  %v3016_v15 = vmax.f32 %v3015_v39, %v10665_v49 }
 0x2bb   :  { %v8305_v40 = vpop.eup %8304  ;;  %v2085_v18 = vadd.f32 1.0, %v8299_v0  ;;  %8318 = vpow2.f32 %v7170_v60  ;;  %v2761_v6 = vadd.f32 %v2760_v1, %v10673_v14  ;;  %v10687_v35 = vmul.f32 %v8285_v12, %v14192_v55  ;;  %v14194_v0 = vld [vmem:[#allocation72_spill] sm:$0xff]  ;;  %v14201_v55 = vld [vmem:[#allocation74_spill] sm:$0xff] }
 0x2bc   :  { %v8307_v2 = vpop.eup %8306  ;;  %8320 = vrcp.f32 %v2093_v21  ;;  %v2095_v31 = vadd.f32 1.0, %v8301_v44  ;;  %v3042_v13 = vmax.f32 %v3041_v17, %v10673_v14  ;;  %v2723_v7 = vadd.f32 %v2722_v11, %v10677_v47  ;;  %v14198_v44 = vld [vmem:[#allocation28_spill] sm:$0xff]  ;;  %v14199_v17 = vld [vmem:[#allocation35_spill] sm:$0xff]  ;;  %v14215_v14 = vld [vmem:[#allocation97_spill] sm:$0xff] }
 0x2bd   :  { %14193 = vst [vmem:[#allocation48_spill] sm:$0xff] %v10687_v35  ;;  %v8309_v57 = vpop.eup %8308  ;;  %8322 = vrcp.f32 %v2102_v54  ;;  %v2103_v29 = vadd.f32 1.0, %v8303_v25  ;;  %v3004_v60 = vmax.f32 %v3003_v50, %v10677_v47  ;;  %v10693_v16 = vmul.f32 %v8291_v48, %v14194_v0  ;;  %v14200_v54 = vld [vmem:[#allocation38_spill] sm:$0xff]  ;;  %v14205_v0 = vld [vmem:[#allocation91_spill] sm:$0xff] }
 0x2be   :  { %v8311_v39 = vpop.eup %8310  ;;  %v10696_v1 = vmul.f32 %v8305_v40, %v14196_v24  ;;  %8324 = vrcp.f32 %v2104_v42  ;;  %v1259_v21 = vmul.f32 %v10159_v58, %v14198_v44  ;;  %v1261_v11 = vmul.f32 %v10170_v63, %v14199_v17  ;;  %v14203_v40 = vld [vmem:[#allocation20_spill] sm:$0xff] }
 0x2bf   :  { %14195 = vst [vmem:[#allocation72_spill] sm:$0xff] %v10693_v16  ;;  %v8313_v12 = vpop.eup %8312  ;;  %8326 = vrcp.f32 %v2085_v18  ;;  %v1268_v25 = vmul.f32 %v10006_v37, %v14200_v54  ;;  %v2749_v50 = vadd.f32 %v2748_v28, %v10687_v35  ;;  %v10706_v48 = vmul.f32 %v8307_v2, %v14201_v55  ;;  %v14206_v54 = vld [vmem:[#allocation77_spill] sm:$0xff]  ;;  %v10722_v55 = vpop.f32.mrb[85].mxu1 }
 0x2c0   :  { %14197 = vst [vmem:[#allocation73_spill] sm:$0xff] %v10696_v1  ;;  %8328 = vrcp.f32 %v2095_v31  ;;  %v10709_v24 = vadd.f32 %v10143_v56, %v1260_v51  ;;  %v3030_v42 = vmax.f32 %v3029_v26, %v10687_v35  ;;  %v10713_v18 = vmul.f32 %v8309_v57, %v14203_v40  ;;  %14208 = vst [vmem:[#allocation74_spill] sm:$0xff] %v10722_v55 }
 0x2c1   :  { %14202 = vst [vmem:[#allocation28_spill] sm:$0xff] %v10706_v48  ;;  %8330 = vrcp.f32 %v2103_v29  ;;  %v1270_v44 = vmul.f32 %v10116_v3, %v14205_v0  ;;  %v2736_v17 = vadd.f32 %v2735_v19, %v10693_v16  ;;  %v3017_v28 = vmax.f32 %v3016_v15, %v10693_v16 }
 0x2c2   :  { %14204 = vst [vmem:[#allocation35_spill] sm:$0xff] %v10713_v18  ;;  %v10720_v2 = vmul.f32 %v8311_v39, %v14206_v54  ;;  %v2105_v31 = vadd.f32 1.0, %v8313_v12  ;;  %v2762_v26 = vadd.f32 %v2761_v6, %v10696_v1  ;;  %v10726_v57 = vadd.f32 %v10163_v41, %v1259_v21 }
 0x2c3   :  { %v8315_v51 = vpop.eup %8314  ;;  %v10729_v29 = vadd.f32 %v10193_v34, %v1261_v11  ;;  %v10732_v40 = vadd.f32 %v10027_v46, %v1268_v25  ;;  %v10735_v15 = vmax.f32 %v3042_v13, %v10696_v1  ;;  %v2724_v39 = vadd.f32 %v2723_v7, %v10706_v48  ;;  %v14209_v25 = vld [vmem:[#allocation39_spill] sm:$0xff] }
 0x2c4   :  { %14207 = vst [vmem:[#allocation38_spill] sm:$0xff] %v10720_v2  ;;  %v8317_v19 = vpop.eup %8316  ;;  %v3005_v12 = vmax.f32 %v3004_v60, %v10706_v48  ;;  %v7172_v0 = vmul.f32 -1.442695, %v10709_v24  ;;  %v2750_v21 = vadd.f32 %v2749_v50, %v10713_v18  ;;  %v3031_v54 = vmax.f32 %v3030_v42, %v10713_v18 }
 0x2c5   :  { %v8319_v6 = vpop.eup %8318  ;;  %v10743_v11 = vadd.f32 %v10143_v56, %v1270_v44  ;;  %v1269_v35 = vmul.f32 %v10159_v58, %v14209_v25  ;;  %v2737_v13 = vadd.f32 %v2736_v17, %v10720_v2  ;;  %v3018_v7 = vmax.f32 %v3017_v28, %v10720_v2  ;;  %v14212_v17 = vld [vmem:[#allocation92_spill] sm:$0xff]  ;;  %v14213_v2 = vld [vmem:[#allocation93_spill] sm:$0xff] }
 0x2c6   :  { %v8321_v16 = vpop.eup %8320  ;;  %v10750_v60 = vmul.f32 %v8315_v51, %v10496_v33  ;;  %8332 = vrcp.f32 %v2105_v31  ;;  %v10753_v50 = vmul.f32 %v8317_v19, %v10503_v61  ;;  %v7171_v42 = vmul.f32 -1.442695, %v10726_v57  ;;  %v14214_v19 = vld [vmem:[#allocation94_spill] sm:$0xff] }
 0x2c7   :  { %v8323_v1 = vpop.eup %8322  ;;  %v7173_v44 = vmul.f32 -1.442695, %v10729_v29  ;;  %v7180_v18 = vmul.f32 -1.442695, %v10732_v40  ;;  %v2112_v48 = vadd.f32 1.0, %v8319_v6  ;;  %8334 = vpow2.f32 %v7172_v0 }
 0x2c8   :  { %14210 = vst [vmem:[#allocation20_spill] sm:$0xff] %v10750_v60  ;;  %14211 = vst [vmem:[#allocation91_spill] sm:$0xff] %v10753_v50  ;;  %v8325_v25 = vpop.eup %8324  ;;  %v1271_v28 = vmul.f32 %v10170_v63, %v14212_v17  ;;  %v1278_v33 = vmul.f32 %v10006_v37, %v14213_v2  ;;  %v7182_v51 = vmul.f32 -1.442695, %v10743_v11  ;;  %v10764_v61 = vadd.f32 %v10163_v41, %v1269_v35 }
 0x2c9   :  { %v8327_v31 = vpop.eup %8326  ;;  %v1280_v47 = vmul.f32 %v10116_v3, %v14214_v19  ;;  %v1279_v49 = vmul.f32 %v10159_v58, %v14215_v14  ;;  %v2725_v0 = vadd.f32 %v2724_v39, %v10750_v60  ;;  %v3006_v17 = vmax.f32 %v3005_v12, %v10750_v60 }
 0x2ca   :  { %v8329_v6 = vpop.eup %8328  ;;  %v10773_v22 = vmul.f32 %v8321_v16, %v10516_v9  ;;  %v10776_v2 = vmul.f32 %v8323_v1, %v10524_v4  ;;  %v2751_v35 = vadd.f32 %v2750_v21, %v10753_v50  ;;  %v3032_v62 = vmax.f32 %v3031_v54, %v10753_v50 }
 0x2cb   :  { %v8331_v55 = vpop.eup %8330  ;;  %v10781_v19 = vmul.f32 %v8325_v25, %v10535_v45  ;;  %8336 = vpow2.f32 %v7171_v42  ;;  %v10784_v14 = vmul.f32 %v8327_v31, %v10541_v23  ;;  %v10787_v39 = vadd.f32 %v10193_v34, %v1271_v28  ;;  %v7708_v31 = vld [vmem:[%s13507_s7 + $0x100] sm:$0xff]  }
 0x2cc   :  { %14216 = vst [vmem:[#allocation77_spill] sm:$0xff] %v10773_v22  ;;  %14217 = vst [vmem:[#allocation39_spill] sm:$0xff] %v10776_v2  ;;  %8338 = vrcp.f32 %v2112_v48  ;;  %v10790_v9 = vadd.f32 %v10027_v46, %v1278_v33  ;;  %v10793_v4 = vmul.f32 %v8329_v6, %v10550_v20  ;;  %v7181_v16 = vmul.f32 -1.442695, %v10764_v61 }
 0x2cd   :  { %14218 = vst [vmem:[#allocation92_spill] sm:$0xff] %v10781_v19  ;;  %14219 = vst [vmem:[#allocation93_spill] sm:$0xff] %v10784_v14  ;;  %8340 = vpow2.f32 %v7173_v44  ;;  %v10797_v45 = vadd.f32 %v10143_v56, %v1280_v47  ;;  %v2738_v1 = vadd.f32 %v2737_v13, %v10773_v22  ;;  %v2726_v23 = vadd.f32 %v2725_v0, %v10776_v2 }
 0x2ce   :  { %14220 = vst [vmem:[#allocation94_spill] sm:$0xff] %v10793_v4  ;;  %v3007_v48 = vmax.f32 %v3006_v17, %v10776_v2  ;;  %v10803_v12 = vmul.f32 %v8331_v55, %v10558_v53  ;;  %v3019_v21 = vmax.f32 %v3018_v7, %v10773_v22  ;;  %v2752_v20 = vadd.f32 %v2751_v35, %v10781_v19  ;;  %v7706_v53 = vld [vmem:[%s13507_s7 + $0x140] sm:$0xff]   ;;  %v10816_v55 = vpop.f32.mrb[86].mxu1  ;;  %v7710_v35 = vld [vmem:[%s13507_s7 + $0x148] sm:$0xff]  }
 0x2cf   :  { %v3033_v54 = vmax.f32 %v3032_v62, %v10781_v19  ;;  %8342 = vpow2.f32 %v7180_v18  ;;  %v2763_v47 = vadd.f32 %v2762_v26, %v10784_v14  ;;  %v7183_v13 = vmul.f32 -1.442695, %v10787_v39  ;;  %14222 = vst [vmem:[#allocation148_spill] sm:$0xff] %v10816_v55  ;;  %7493 = vmatprep.subr.bf16.mxu1 %v7706_v53 }
 0x2d0   :  { %14221 = vst [vmem:[#allocation97_spill] sm:$0xff] %v10803_v12  ;;  %v8333_v42 = vpop.eup %8332  ;;  %8344 = vpow2.f32 %v7182_v51  ;;  %v10811_v44 = vadd.f32 %v10163_v41, %v1279_v49  ;;  %v3044_v7 = vmax.f32 %v10735_v15, %v10784_v14  ;;  %v7190_v62 = vmul.f32 -1.442695, %v10790_v9  ;;  %v10827_v51 = vpop.f32.mrb[87].mxu1  ;;  %7494 = vmatpush3.bf16.msra.mxu1 %v7708_v31  ;;  %v14236_v14 = vld [vmem:[#allocation103_spill] sm:$0xff] }
 0x2d1   :  { %8346 = vpow2.f32 %v7181_v16  ;;  %v7192_v18 = vmul.f32 -1.442695, %v10797_v45  ;;  %v8335_v26 = vpop.eup %8334  ;;  %v2764_v25 = vadd.f32 %v2763_v47, %v10793_v4  ;;  %v2727_v28 = vrot.slane %v2726_v23, 4  ;;  %14223 = vst [vmem:[#allocation149_spill] sm:$0xff] %v10827_v51  ;;  %7495 = vmatprep.subr.bf16.mxu1 %v7710_v35 }
 0x2d2   :  { %v3008_v49 = vrot.slane %v3007_v48, 4  ;;  %v2739_v33 = vadd.f32 %v2738_v1, %v10803_v12  ;;  %v2753_v15 = vrot.slane %v2752_v20, 4  ;;  %v3034_v6 = vrot.slane %v3033_v54, 4 }
 0x2d3   :  { %v3020_v0 = vmax.f32 %v3019_v21, %v10803_v12  ;;  %v10831_v17 = vmul.f32 %v8333_v42, %v10598_v36  ;;  %v3090_v16 = vrot.slane %v10485_v5, 1  ;;  %v14225_v1 = vrot.slane %v10464_v43, 2  ;;  %v7712_v21 = vld [vmem:[%s13507_s7 + $0x108] sm:$0xff]   ;;  %v10844_v36 = vpop.f32.mrb[88].mxu1 }
 0x2d4   :  { %8348 = vpow2.f32 %v7183_v13  ;;  %v7191_v53 = vmul.f32 -1.442695, %v10811_v44  ;;  %14226 = vst [vmem:[#allocation151_spill] sm:$0xff] %v10844_v36  ;;  %v14227_v19 = vrot.slane %v10483_v27, 1  ;;  %v3045_v2 = vmax.f32 %v3044_v7, %v10793_v4  ;;  %v7714_v13 = vld [vmem:[%s13507_s7 + $0x150] sm:$0xff]   ;;  %7496 = vmatpush3.bf16.msra.mxu1 %v7712_v21 }
 0x2d5   :  { %14224 = vst [vmem:[#allocation150_spill] sm:$0xff] %v10831_v17  ;;  %v2821_v47 = vadd.f32 %v14225_v1, %v10464_v43  ;;  %v8337_v42 = vpop.eup %8336  ;;  %v2114_v50 = vadd.f32 1.0, %v8335_v26  ;;  %8350 = vpow2.f32 %v7190_v62  ;;  %v10850_v43 = vpop.f32.mrb[89].mxu1  ;;  %v10857_v1 = vadd.f32 %v2727_v28, %v2726_v23  ;;  %7497 = vmatprep.subr.bf16.mxu1 %v7714_v13 }
 0x2d6   :  { %v2810_v12 = vadd.f32 %v14227_v19, %v10483_v27  ;;  %14228 = vst [vmem:[#allocation152_spill] sm:$0xff] %v10850_v43  ;;  %v10855_v31 = vpop.eup %8338  ;;  %v10859_v22 = vmax.f32 %v3007_v48, %v3008_v49  ;;  %v2740_v60 = vrot.slane %v2739_v33, 4  ;;  %8352 = vpow2.f32 %v7192_v18  ;;  %v10861_v27 = vpop.f32.mrb[90].mxu1  ;;  %v14242_v43 = vld [vmem:[#allocation101_spill] sm:$0xff] }
 0x2d7   :  { %14229 = vst [vmem:[#allocation153_spill] sm:$0xff] %v10861_v27  ;;  %v8341_v19 = vpop.eup %8340  ;;  %v10863_v7 = vadd.f32 %v2753_v15, %v2752_v20  ;;  %v10865_v62 = vmax.f32 %v3033_v54, %v3034_v6  ;;  %v3021_v26 = vrot.slane %v3020_v0, 4  ;;  %v10868_v35 = vadd.f32 %v2764_v25, %v10831_v17  ;;  %v14233_v25 = vld [vmem:[#allocation98_spill] sm:$0xff]  ;;  %v14237_v6 = vld [vmem:[#allocation99_spill] sm:$0xff] }
 0x2d8   :  { %v14232_v48 = vrot.slane %v10477_v32, 2  ;;  %8354 = vpow2.f32 %v7191_v53  ;;  %v10877_v20 = vmul.f32 0.015625, %v2810_v12  ;;  %v10880_v54 = vmax.f32 %v10485_v5, %v3090_v16  ;;  %v14240_v5 = vld [vmem:[#allocation125_spill] sm:$0xff] }
 0x2d9   :  { %v8343_v18 = vpop.eup %8342  ;;  %8356 = vrcp.f32 %v2114_v50  ;;  %v1281_v49 = vmul.f32 %v10170_v63, %v14233_v25  ;;  %v10889_v53 = vmax.f32 %v3045_v2, %v10831_v17  ;;  %v10893_v50 = vmax.f32 %v3020_v0, %v3021_v26  ;;  %v14238_v17 = vld [vmem:[#allocation88_spill] sm:$0xff] }
 0x2da   :  { %v10875_v28 = vadd.f32 %v14232_v48, %v10477_v32  ;;  %v8345_v15 = vpop.eup %8344  ;;  %v10886_v32 = vadd.f32 %v2740_v60, %v2739_v33  ;;  %v2113_v13 = vadd.f32 1.0, %v8337_v42  ;;  %v14235_v48 = vld [vmem:[#allocation50_spill] sm:$0xff]  ;;  %v2692_v23 = vrot.slane %v14236_v14, 1 }
 0x2db   :  { %v8347_v12 = vpop.eup %8346  ;;  %14234 = vst [vmem:[#allocation98_spill] sm:$0xff] %v10893_v50  ;;  %v1288_v25 = vmul.f32 %v10006_v37, %v14235_v48  ;;  %v2822_v60 = vrot.slane %v2821_v47, 1  ;;  %v2115_v33 = vadd.f32 1.0, %v8341_v19  ;;  %v1290_v2 = vmul.f32 %v10116_v3, %v14237_v6 }
 0x2dc   :  { %v14239_v27 = vrot.slane %v14238_v17, 2  ;;  %v14241_v0 = vrot.slane %v14240_v5, 2  ;;  %v2122_v42 = vadd.f32 1.0, %v8343_v18  ;;  %v10908_v36 = vadd.f32 %v10193_v34, %v1281_v49  ;;  %v7716_v18 = vld [vmem:[%s13507_s7 + $0x110] sm:$0xff]  }
 0x2dd   :  { %v2693_v48 = vadd.f32 %v2692_v23, %v14236_v14  ;;  %v2823_v51 = vadd.f32 %v2822_v60, %v2821_v47  ;;  %v2124_v55 = vadd.f32 1.0, %v8345_v15  ;;  %v1289_v6 = vmul.f32 %v10159_v58, %v14242_v43  ;;  %v10919_v14 = vpop.f32.mrb[91].mxu1  ;;  %v7718_v47 = vld [vmem:[%s13507_s7 + $0x158] sm:$0xff]   ;;  %7498 = vmatpush3.bf16.msra.mxu1 %v7716_v18 }
 0x2de   :  { %v2972_v21 = vmax.f32 %v14238_v17, %v14239_v27  ;;  %v3102_v26 = vmax.f32 %v14240_v5, %v14241_v0  ;;  %v8349_v16 = vpop.eup %8348  ;;  %v2123_v27 = vadd.f32 1.0, %v8347_v12  ;;  %v10914_v52 = vadd.f32 %v10027_v46, %v1288_v25  ;;  %14243 = vst [vmem:[#allocation50_spill] sm:$0xff] %v10919_v14  ;;  %v10927_v15 = vpop.f32.mrb[92].mxu1  ;;  %v7720_v60 = vld [vmem:[%s13507_s7 + $0x118] sm:$0xff]   ;;  %7499 = vmatprep.subr.bf16.mxu1 %v7718_v47 }
 0x2df   :  { %v8351_v19 = vpop.eup %8350  ;;  %v2940_v5 = vmul.f32 0.015625, %v2823_v51  ;;  %8358 = vrcp.f32 %v2113_v13  ;;  %v10925_v43 = vadd.f32 %v10143_v56, %v1290_v2  ;;  %v2930_v23 = vmul.f32 0.015625, %v2693_v48  ;;  %14244 = vst [vmem:[#allocation103_spill] sm:$0xff] %v10927_v15  ;;  %v10933_v0 = vpop.f32.mrb[93].mxu1 }
 0x2e0   :  { %v2973_v4 = vrot.slane %v2972_v21, 1  ;;  %v3103_v38 = vrot.slane %v3102_v26, 1  ;;  %v8353_v17 = vpop.eup %8352  ;;  %8360 = vrcp.f32 %v2115_v33  ;;  %v2125_v12 = vadd.f32 1.0, %v8349_v16  ;;  %14245 = vst [vmem:[#allocation99_spill] sm:$0xff] %v10933_v0  ;;  %v7722_v16 = vld [vmem:[%s13507_s7 + $0x160] sm:$0xff]  }
 0x2e1   :  { %v7193_v25 = vmul.f32 -1.442695, %v10908_v36  ;;  %8362 = vrcp.f32 %v2122_v42  ;;  %v3231_v33 = vsel %vm3229_vm1, %v2940_v5, %v2930_v23  ;;  %v3047_v48 = vrot.slane %v10889_v53, 4  ;;  %v14247_v0 = vld [vmem:[#allocation102_spill] sm:$0xff]  ;;  %v14250_v23 = vld [vmem:[#allocation112_spill] sm:$0xff]  ;;  %7500 = vmatpush3.bf16.msra.mxu1 %v7720_v60  ;;  %v7726_v60 = vld [vmem:[%s13507_s7 + $0x168] sm:$0xff]  }
 0x2e2   :  { %v3104_v49 = vmax.f32 %v3102_v26, %v3103_v38  ;;  %v8355_v51 = vpop.eup %8354  ;;  %v10938_v38 = vadd.f32 %v10163_v41, %v1289_v6  ;;  %v2974_v2 = vmax.f32 %v2972_v21, %v2973_v4  ;;  %v10944_v26 = vpop.f32.mrb[94].mxu1  ;;  %8364 = vrcp.f32 %v2124_v55  ;;  %7501 = vmatprep.subr.bf16.mxu1 %v7722_v16 }
 0x2e3   :  { %v10935_v13 = vpop.eup %8356  ;;  %14246 = vst [vmem:[#allocation88_spill] sm:$0xff] %v10944_v26  ;;  %v7200_v18 = vmul.f32 -1.442695, %v10914_v52  ;;  %v1291_v42 = vmul.f32 %v10170_v63, %v14247_v0  ;;  %v10950_v6 = vpop.f32.mrb[95].mxu1  ;;  %8366 = vrcp.f32 %v2123_v27  ;;  %v7202_v4 = vmul.f32 -1.442695, %v10925_v43 }
 0x2e4   :  { %14248 = vst [vmem:[#allocation125_spill] sm:$0xff] %v10950_v6  ;;  %v3272_v21 = vsel %vm3270_vm2, %v3104_v49, %v2974_v2  ;;  %v10954_v5 = vpop.f32.mrb[96].mxu1  ;;  %v2132_v47 = vadd.f32 1.0, %v8351_v19  ;;  %8368 = vpow2.f32 %v7193_v25  ;;  %v1298_v55 = vmul.f32 %v10006_v37, %v14250_v23  ;;  %v7724_v0 = vld [vmem:[%s13507_s7 + $0x120] sm:$0xff]   ;;  %v7734_v6 = vld [vmem:[%s13507_s7 + $0x178] sm:$0xff]  }
 0x2e5   :  { %14249 = vst [vmem:[#allocation101_spill] sm:$0xff] %v10954_v5  ;;  %v3293_v26 = vsel %vm3291_vm3, %v3231_v33, %v3272_v21  ;;  %v10962_v27 = vpop.f32.mrb[97].mxu1  ;;  %v14252_v49 = vrot.slane %v10857_v1, 2  ;;  %8370 = vrcp.f32 %v2125_v12  ;;  %v7201_v19 = vmul.f32 -1.442695, %v10938_v38  ;;  %7502 = vmatpush3.bf16.msra.mxu1 %v7724_v0 }
 0x2e6   :  { %14251 = vst [vmem:[#allocation102_spill] sm:$0xff] %v10962_v27  ;;  %v3303_v25 = vpack.c.bf16 %v3293_v26, %v3293_v26  ;;  %v14253_v33 = vrot.slane %v10859_v22, 2  ;;  %8372 = vpow2.f32 %v7200_v18  ;;  %v10979_v23 = vadd.f32 %v10193_v34, %v1291_v42  ;;  %v7728_v42 = vld [vmem:[%s13507_s7 + $0x128] sm:$0xff]   ;;  %7503 = vmatprep.subr.bf16.mxu1 %v7726_v60 }
 0x2e7   :  { %v10967_v2 = vadd.f32 %v14252_v49, %v10857_v1  ;;  %v14256_v1 = vld [vmem:[#allocation113_spill] sm:$0xff]  ;;  %v2134_v26 = vadd.f32 1.0, %v8353_v17  ;;  %8374 = vpow2.f32 %v7202_v4  ;;  %v2133_v27 = vadd.f32 1.0, %v8355_v51 }
 0x2e8   :  { %v10976_v21 = vmax.f32 %v10859_v22, %v14253_v33  ;;  %14255 = vst [vmem:[#allocation154_spill] sm:$0xff] %v10979_v23  ;;  %v1300_v12 = vmul.f32 %v10116_v3, %v14256_v1  ;;  %3991 = vmatprep.mubr.bf16.mxu0 %v3303_v25  ;;  %8376 = vrcp.f32 %v2132_v47  ;;  %v10986_v5 = vadd.f32 %v10027_v46, %v1298_v55  ;;  %v14258_v22 = vld [vmem:[#allocation95_spill] sm:$0xff] }
 0x2e9   :  { %v3230_v18 = vsel %vm3229_vm1, %v10877_v20, %v14258_v22  ;;  %v10994_v33 = vpop.eup %8358  ;;  %v14259_v17 = vrot.slane %v10863_v7, 2  ;;  %v14260_v51 = vrot.slane %v10865_v62, 2  ;;  %8378 = vpow2.f32 %v7201_v19  ;;  %v14261_v55 = vld [vmem:[#allocation107_spill] sm:$0xff]  ;;  %v11024_v19 = vpop.f32.mrb[98].mxu1  ;;  %7504 = vmatpush3.bf16.msra.mxu1 %v7728_v42 }
 0x2ea   :  { %14254 = vst [vmem:[#allocation112_spill] sm:$0xff] %v10976_v21  ;;  %14257 = vst [vmem:[#allocation113_spill] sm:$0xff] %v10986_v5  ;;  %v3271_v20 = vsel %vm3270_vm2, %v10880_v54, %v14261_v55  ;;  %v11009_v0 = vpop.eup %8360  ;;  %v7203_v25 = vmul.f32 -1.442695, %v10979_v23  ;;  %v11013_v1 = vadd.f32 %v10143_v56, %v1300_v12  ;;  %v7730_v54 = vld [vmem:[%s13507_s7 + $0x170] sm:$0xff]   ;;  %v14265_v12 = vrot.slane %v10868_v35, 4 }
 0x2eb   :  { %v10999_v4 = vadd.f32 %v14259_v17, %v10863_v7  ;;  %v11004_v47 = vmax.f32 %v10865_v62, %v14260_v51  ;;  %v14263_v7 = vld [vmem:[#allocation37_spill] sm:$0xff]  ;;  %v3292_v17 = vsel %vm3291_vm3, %v3230_v18, %v3271_v20  ;;  %v7691_v62 = vld [vmem:[%s13507_s7 + $0x80] sm:$0xff]   ;;  %14264 = vst [vmem:[#allocation107_spill] sm:$0xff] %v11024_v19  ;;  %v11026_v60 = vpop.eup %8362  ;;  %v11034_v55 = vmax.f32 %v10889_v53, %v3047_v48  ;;  %v7692_v20 = vld [vmem:[%s13507_s7 + $0xc8] sm:$0xff]  }
 0x2ec   :  { %14262 = vst [vmem:[#allocation95_spill] sm:$0xff] %v11013_v1  ;;  %v1299_v22 = vmul.f32 %v10159_v58, %v14263_v7  ;;  %v11031_v51 = vadd.f32 %v14265_v12, %v10868_v35  ;;  %8380 = vrcp.f32 %v2134_v26  ;;  %v3302_v18 = vpack.c.bf16 %v3292_v17, %v3292_v17  ;;  %v11039_v7 = vpop.f32.mrb[99].mxu1  ;;  %v11041_v16 = vpop.eup %8364  ;;  %v7732_v53 = vld [vmem:[%s13507_s7 + $0x130] sm:$0xff]   ;;  %v14268_v17 = vld [vmem:[#allocation66_spill] sm:$0xff]  ;;  %7505 = vmatprep.subr.bf16.mxu1 %v7730_v54  ;;  %v7693_v54 = vld [vmem:[%s13507_s7 + $0x88] sm:$0xff]  }
 0x2ed   :  { %14266 = vst [vmem:[#allocation37_spill] sm:$0xff] %v11039_v7  ;;  %8382 = vrcp.f32 %v2133_v27  ;;  %v7210_v35 = vmul.f32 -1.442695, %v10986_v5  ;;  %v11049_v48 = vpop.f32.mrb[100].mxu1  ;;  %v11051_v26 = vpop.eup %8366  ;;  %v1301_v12 = vmul.f32 %v10170_v63, %v14268_v17  ;;  %v14269_v7 = vld [vmem:[#allocation105_spill] sm:$0xff]  ;;  %v2848_v50 = vrot.slane %v10875_v28, 1  ;;  %7506 = vmatpush3.bf16.msra.mxu1 %v7732_v53 }
 0x2ee   :  { %14267 = vst [vmem:[#allocation155_spill] sm:$0xff] %v11049_v48  ;;  %3992 = vmatmul.mubr.bf16.vlgmr.msra.gmra.mrb[68].mxu0 %v3302_v18  ;;  %v2718_v49 = vrot.slane %v14269_v7, 1  ;;  %v14270_v27 = vld [vmem:[#allocation89_spill] sm:$0xff]  ;;  %v11063_v48 = vpop.f32.mrb[101].mxu1  ;;  %v8369_v15 = vpop.eup %8368  ;;  %8384 = vpow2.f32 %v7203_v25  ;;  %v7212_v17 = vmul.f32 -1.442695, %v11013_v1  ;;  %v11067_v18 = vadd.f32 %v10163_v41, %v1299_v22  ;;  %7507 = vmatprep.subr.bf16.mxu1 %v7734_v6 }
 0x2ef   :  { %v14271_v19 = vrot.slane %v14270_v27, 2  ;;  %14272 = vst [vmem:[#allocation66_spill] sm:$0xff] %v11063_v48  ;;  %7472 = vmatpush3.bf16.msra.mxu0 %v7691_v62  ;;  %v14273_v14 = vrot.slane %v10479_v59, 2  ;;  %v2849_v8 = vadd.f32 %v2848_v50, %v10875_v28  ;;  %v7694_v62 = vld [vmem:[%s13507_s7 + $0xd0] sm:$0xff]   ;;  %8386 = vpow2.f32 %v7210_v35  ;;  %v14277_v1 = vld [vmem:[#allocation67_spill] sm:$0xff]  ;;  %v7736_v28 = vld [vmem:[%s13507_s7 + $0x138] sm:$0xff]  }
 0x2f0   :  { %v2719_v25 = vadd.f32 %v2718_v49, %v14269_v7  ;;  %7473 = vmatprep.subr.bf16.mxu0 %v7692_v20  ;;  %v2135_v49 = vadd.f32 1.0, %v8369_v15  ;;  %v11095_v20 = vadd.f32 %v10193_v34, %v1301_v12  ;;  %8388 = vpow2.f32 %v7212_v17  ;;  %v7695_v53 = vld [vmem:[%s13507_s7 + $0x90] sm:$0xff]  }
 0x2f1   :  { %v2998_v42 = vmax.f32 %v14270_v27, %v14271_v19  ;;  %v3128_v21 = vmax.f32 %v10479_v59, %v14273_v14  ;;  %v11075_v19 = vpop.eup %8370  ;;  %v14274_v27 = vld [vmem:[#allocation12_spill] sm:$0xff]  ;;  %v14275_v14 = vrot.slane %v10886_v32, 2  ;;  %v2942_v23 = vmul.f32 0.015625, %v2849_v8  ;;  %7508 = vmatpush3.bf16.msra.mxu1 %v7736_v28  ;;  %v7697_v28 = vld [vmem:[%s13507_s7 + $0x98] sm:$0xff]  }
 0x2f2   :  { %v1308_v48 = vmul.f32 %v10006_v37, %v14274_v27  ;;  %v8373_v59 = vpop.eup %8372  ;;  %v1310_v27 = vmul.f32 %v10116_v3, %v14277_v1  ;;  %v2932_v7 = vmul.f32 0.015625, %v2719_v25  ;;  %v7211_v35 = vmul.f32 -1.442695, %v11067_v18  ;;  %v14278_v6 = vld [vmem:[#allocation76_spill] sm:$0xff] }
 0x2f3   :  { %v2999_v22 = vrot.slane %v2998_v42, 1  ;;  %v11087_v10 = vadd.f32 %v14275_v14, %v10886_v32  ;;  %v3129_v5 = vrot.slane %v3128_v21, 1  ;;  %v8375_v50 = vpop.eup %8374  ;;  %7474 = vmatpush3.bf16.msra.mxu0 %v7693_v54  ;;  %v2142_v15 = vadd.f32 1.0, %v8373_v59  ;;  %v14279_v54 = vld [vmem:[#allocation69_spill] sm:$0xff]  ;;  %v14280_v59 = vld [vmem:[#allocation75_spill] sm:$0xff] }
 0x2f4   :  { %v11097_v32 = vpop.eup %8376  ;;  %v11104_v12 = vadd.f32 %v10027_v46, %v1308_v48  ;;  %v3233_v8 = vsel %vm3229_vm1, %v2942_v23, %v2932_v7  ;;  %v1318_v25 = vmul.f32 %v10006_v37, %v14278_v6  ;;  %7475 = vmatprep.subr.bf16.mxu0 %v7694_v62  ;;  %v1309_v48 = vmul.f32 %v10159_v58, %v14279_v54 }
 0x2f5   :  { %14276 = vst [vmem:[#allocation105_spill] sm:$0xff] %v11087_v10  ;;  %v3000_v1 = vmax.f32 %v2998_v42, %v2999_v22  ;;  %v3130_v14 = vmax.f32 %v3128_v21, %v3129_v5  ;;  %v8379_v10 = vpop.eup %8378  ;;  %v7696_v5 = vld [vmem:[%s13507_s7 + $0xd8] sm:$0xff]   ;;  %v2144_v21 = vadd.f32 1.0, %v8375_v50  ;;  %v11113_v42 = vadd.f32 %v10143_v56, %v1310_v27 }
 0x2f6   :  { %v11118_v22 = vpop.eup %8380  ;;  %8390 = vrcp.f32 %v2135_v49  ;;  %v7213_v23 = vmul.f32 -1.442695, %v11095_v20  ;;  %v1311_v7 = vmul.f32 %v10170_v63, %v14280_v59  ;;  %v11128_v27 = vmul.f32 %v10855_v31, %v10643_v30 }
 0x2f7   :  { %v3274_v17 = vsel %vm3270_vm2, %v3130_v14, %v3000_v1  ;;  %v11124_v50 = vpop.eup %8382  ;;  %v2143_v1 = vadd.f32 1.0, %v8379_v10  ;;  %8392 = vpow2.f32 %v7211_v35  ;;  %7476 = vmatpush3.bf16.msra.mxu0 %v7695_v53  ;;  %v11136_v6 = vadd.f32 %v10027_v46, %v1318_v25  ;;  %v7698_v10 = vld [vmem:[%s13507_s7 + $0xe0] sm:$0xff]  }
 0x2f8   :  { %v3295_v62 = vsel %vm3291_vm3, %v3233_v8, %v3274_v17  ;;  %14281 = vst [vmem:[#allocation89_spill] sm:$0xff] %v11128_v27  ;;  %8394 = vrcp.f32 %v2142_v15  ;;  %v7220_v8 = vmul.f32 -1.442695, %v11104_v12  ;;  %7477 = vmatprep.subr.bf16.mxu0 %v7696_v5  ;;  %v8385_v30 = vpop.eup %8384  ;;  %v7222_v35 = vmul.f32 -1.442695, %v11113_v42 }
 0x2f9   :  { %v3305_v14 = vpack.c.bf16 %v3295_v62, %v3295_v62  ;;  %8396 = vrcp.f32 %v2144_v21  ;;  %v11144_v53 = vadd.f32 %v10163_v41, %v1309_v48  ;;  %v11149_v5 = vadd.f32 %v10193_v34, %v1311_v7  ;;  %v8387_v17 = vpop.eup %8386 }
 0x2fa   :  { %8398 = vpow2.f32 %v7213_v23  ;;  %v14282_v54 = vrot.slane %v10967_v2, 1  ;;  %v11158_v21 = vmul.f32 %v10935_v13, %v10709_v24  ;;  %v11162_v48 = vmul.f32 %v10994_v33, %v10726_v57  ;;  %v7699_v23 = vld [vmem:[%s13507_s7 + $0xa0] sm:$0xff]   ;;  %v7700_v24 = vld [vmem:[%s13507_s7 + $0xe8] sm:$0xff]   ;;  %v8389_v57 = vpop.eup %8388  ;;  %v14286_v33 = vld [vmem:[#allocation124_spill] sm:$0xff] }
 0x2fb   :  { %4031 = vmatprep.mubr.bf16.mxu0 %v3305_v14  ;;  %8400 = vrcp.f32 %v2143_v1  ;;  %7478 = vmatpush3.bf16.msra.mxu0 %v7697_v28  ;;  %v11169_v59 = vmul.f32 %v11026_v60, %v10732_v40  ;;  %v7230_v7 = vmul.f32 -1.442695, %v11136_v6  ;;  %v7221_v13 = vmul.f32 -1.442695, %v11144_v53  ;;  %v14287_v14 = vld [vmem:[#allocation24_spill] sm:$0xff]  ;;  %v14288_v28 = vld [vmem:[#allocation79_spill] sm:$0xff] }
 0x2fc   :  { %v11154_v62 = vadd.f32 %v14282_v54, %v10967_v2  ;;  %14283 = vst [vmem:[#allocation12_spill] sm:$0xff] %v11158_v21  ;;  %14284 = vst [vmem:[#allocation67_spill] sm:$0xff] %v11162_v48  ;;  %v2145_v2 = vadd.f32 1.0, %v8385_v30  ;;  %8402 = vpow2.f32 %v7220_v8  ;;  %7479 = vmatprep.subr.bf16.mxu0 %v7698_v10  ;;  %v1320_v1 = vmul.f32 %v10116_v3, %v14286_v33  ;;  %v14289_v10 = vld [vmem:[#allocation80_spill] sm:$0xff]  ;;  %v14290_v54 = vld [vmem:[#allocation78_spill] sm:$0xff] }
 0x2fd   :  { %14285 = vst [vmem:[#allocation76_spill] sm:$0xff] %v11169_v59  ;;  %8404 = vpow2.f32 %v7222_v35  ;;  %v1319_v40 = vmul.f32 %v10159_v58, %v14287_v14  ;;  %v7223_v60 = vmul.f32 -1.442695, %v11149_v5  ;;  %v1321_v8 = vmul.f32 %v10170_v63, %v14288_v28  ;;  %v7701_v14 = vld [vmem:[%s13507_s7 + $0xa8] sm:$0xff]  }
 0x2fe   :  { %v1328_v30 = vmul.f32 %v10006_v37, %v14289_v10  ;;  %v1330_v31 = vmul.f32 %v10116_v3, %v14290_v54  ;;  %v2152_v35 = vadd.f32 1.0, %v8387_v17  ;;  %8406 = vpow2.f32 %v7230_v7  ;;  %v11208_v7 = vpop.f32.mrb[102].mxu1 }
 0x2ff   :  { %v11188_v49 = vadd.f32 %v10143_v56, %v1320_v1  ;;  %v11191_v33 = vadd.f32 %v10163_v41, %v1319_v40  ;;  %7480 = vmatpush3.bf16.msra.mxu0 %v7699_v23  ;;  %v11200_v37 = vmul.f32 %v11041_v16, %v10743_v11  ;;  %8408 = vrcp.f32 %v2145_v2  ;;  %v7702_v23 = vld [vmem:[%s13507_s7 + $0xf0] sm:$0xff]   ;;  %v14292_v11 = vld [vmem:[#allocation81_spill] sm:$0xff] }
 0x300   :  { %v11196_v28 = vpop.eup %8390  ;;  %v2154_v3 = vadd.f32 1.0, %v8389_v57  ;;  %v11203_v17 = vadd.f32 %v10027_v46, %v1328_v30  ;;  %7481 = vmatprep.subr.bf16.mxu0 %v7700_v24  ;;  %8410 = vpow2.f32 %v7221_v13  ;;  %v11212_v10 = vadd.f32 %v10143_v56, %v1330_v31  ;;  %v14293_v57 = vld [vmem:[#allocation84_spill] sm:$0xff] }
 0x301   :  { %14291 = vst [vmem:[#allocation69_spill] sm:$0xff] %v11200_v37  ;;  %v8393_v1 = vpop.eup %8392  ;;  %v7232_v40 = vmul.f32 -1.442695, %v11188_v49  ;;  %v1329_v16 = vmul.f32 %v10159_v58, %v14292_v11  ;;  %8412 = vpow2.f32 %v7223_v60  ;;  %v11219_v46 = vadd.f32 %v10193_v34, %v1321_v8  ;;  %v7703_v60 = vld [vmem:[%s13507_s7 + $0xb0] sm:$0xff]  }
 0x302   :  { %v11216_v2 = vpop.eup %8394  ;;  %v7240_v24 = vmul.f32 -1.442695, %v11203_v17  ;;  %v1331_v30 = vmul.f32 %v10170_v63, %v14293_v57  ;;  %v11228_v56 = vmul.f32 %v11009_v0, %v10729_v29  ;;  %v2850_v58 = vadd.f32 %v11169_v59, %v11128_v27  ;;  %v7704_v0 = vld [vmem:[%s13507_s7 + $0xf8] sm:$0xff]  }
 0x303   :  { %v11224_v13 = vpop.eup %8396  ;;  %8414 = vrcp.f32 %v2152_v35  ;;  %v7231_v31 = vmul.f32 -1.442695, %v11191_v33  ;;  %7482 = vmatpush3.bf16.msra.mxu0 %v7701_v14  ;;  %v11238_v63 = vmul.f32 %v11051_v26, %v10764_v61  ;;  %v2153_v54 = vadd.f32 1.0, %v8393_v1  ;;  %v11246_v35 = vpop.f32.mrb[103].mxu1 }
 0x304   :  { %14294 = vst [vmem:[#allocation75_spill] sm:$0xff] %v11228_v56  ;;  %v8399_v8 = vpop.eup %8398  ;;  %8416 = vpow2.f32 %v7232_v40  ;;  %v11241_v29 = vadd.f32 %v10163_v41, %v1329_v16  ;;  %7483 = vmatprep.subr.bf16.mxu0 %v7702_v23  ;;  %v3131_v11 = vmax.f32 %v11128_v27, %v11169_v59  ;;  %v2876_v61 = vadd.f32 %v11200_v37, %v11158_v21  ;;  %v11255_v41 = vpop.f32.mrb[104].mxu1 }
 0x305   :  { %14295 = vst [vmem:[#allocation124_spill] sm:$0xff] %v11238_v63  ;;  %v11248_v14 = vpop.eup %8400  ;;  %8418 = vrcp.f32 %v2154_v3  ;;  %v7242_v26 = vmul.f32 -1.442695, %v11212_v10  ;;  %v11259_v1 = vmul.f32 %v11075_v19, %v10787_v39  ;;  %v7233_v40 = vmul.f32 -1.442695, %v11219_v46  ;;  %v11265_v57 = vpop.f32.mrb[105].mxu1 }
 0x306   :  { %v8403_v23 = vpop.eup %8402  ;;  %8420 = vpow2.f32 %v7240_v24  ;;  %v11263_v16 = vadd.f32 %v10193_v34, %v1331_v30  ;;  %v3157_v3 = vmax.f32 %v11158_v21, %v11200_v37  ;;  %v11271_v15 = vmul.f32 %v11097_v32, %v10790_v9  ;;  %v7705_v39 = vld [vmem:[%s13507_s7 + $0xb8] sm:$0xff]   ;;  %v11276_v19 = vpop.f32.mrb[106].mxu1  ;;  %v7707_v9 = vld [vmem:[%s13507_s7 + $0x1c0] sm:$0xff]  }
 0x307   :  { %14296 = vst [vmem:[#allocation24_spill] sm:$0xff] %v11259_v1  ;;  %v8405_v25 = vpop.eup %8404  ;;  %v2155_v59 = vadd.f32 1.0, %v8399_v8  ;;  %8422 = vpow2.f32 %v7231_v31  ;;  %7484 = vmatpush3.bf16.msra.mxu0 %v7703_v60  ;;  %v2863_v34 = vadd.f32 %v11238_v63, %v11162_v48  ;;  %v3144_v24 = vmax.f32 %v11162_v48, %v11238_v63 }
 0x308   :  { %14297 = vst [vmem:[#allocation79_spill] sm:$0xff] %v11271_v15  ;;  %8424 = vrcp.f32 %v2153_v54  ;;  %v7241_v30 = vmul.f32 -1.442695, %v11241_v29  ;;  %7485 = vmatprep.subr.bf16.mxu0 %v7704_v0  ;;  %v8407_v32 = vpop.eup %8406  ;;  %v11288_v31 = vmul.f32 %v11118_v22, %v10797_v45  ;;  %v11292_v60 = vmul.f32 %v11124_v50, %v10811_v44  ;;  %v1121_v54 = vld [vmem:[%s13505_s5 + $0x8] sm:$0x3] }
 0x309   :  { %v2162_v8 = vadd.f32 1.0, %v8403_v23  ;;  %8426 = vpow2.f32 %v7242_v26  ;;  %v8409_v0 = vpop.eup %8408  ;;  %v2889_v37 = vadd.f32 %v11259_v1, %v11228_v56  ;;  %v3170_v63 = vmax.f32 %v11228_v56, %v11259_v1  ;;  %v14301_v1 = vld [vmem:[#allocation3_spill] sm:$0xff] }
 0x30a   :  { %14298 = vst [vmem:[#allocation80_spill] sm:$0xff] %v11288_v31  ;;  %14299 = vst [vmem:[#allocation78_spill] sm:$0xff] %v11292_v60  ;;  %8428 = vpow2.f32 %v7233_v40  ;;  %v7243_v45 = vmul.f32 -1.442695, %v11263_v16  ;;  %v8411_v22 = vpop.eup %8410  ;;  %v2851_v44 = vadd.f32 %v2850_v58, %v11271_v15  ;;  %v11305_v50 = vmul.f32 %v11196_v28, %v10908_v36 }
 0x30b   :  { %8430 = vrcp.f32 %v2155_v59  ;;  %v2164_v26 = vadd.f32 1.0, %v8405_v25  ;;  %7486 = vmatpush3.bf16.msra.mxu0 %v7705_v39  ;;  %v8413_v23 = vpop.eup %8412  ;;  %v11308_v21 = vmax.f32 %v3131_v11, %v11271_v15  ;;  %v2172_v48 = vadd.f32 1.0, %v8407_v32  ;;  %v1335_v25 = vld [vmem:[%s13506_s6 + $0x8] sm:$0x3]  ;;  %v14303_v39 = vld [vmem:[#allocation5_spill] sm:$0xff] }
 0x30c   :  { %14300 = vst [vmem:[#allocation81_spill] sm:$0xff] %v11305_v50  ;;  %8432 = vpow2.f32 %v7241_v30  ;;  %v11311_v40 = vrot.slane %v1121_v54, %v14301_v1  ;;  %7515 = vmatprep.subr.bf16.mxu0 %v7707_v9  ;;  %v2877_v58 = vadd.f32 %v2876_v61, %v11288_v31  ;;  %v11315_v27 = vmax.f32 %v3157_v3, %v11288_v31 }
 0x30d   :  { %v8415_v56 = vpop.eup %8414  ;;  %v2864_v36 = vadd.f32 %v2863_v34, %v11292_v60  ;;  %8434 = vrcp.f32 %v2162_v8  ;;  %v11323_v28 = vmul.f32 %v11216_v2, %v10914_v52  ;;  %v2163_v11 = vadd.f32 1.0, %v8411_v22  ;;  %v14305_v52 = vld [vmem:[#allocation130_spill] sm:$0xff] }
 0x30e   :  { %v8417_v59 = vpop.eup %8416  ;;  %8436 = vpow2.f32 %v7243_v45  ;;  %v11326_v30 = vrot.slane %v1121_v54, %v14303_v39  ;;  %v11329_v3 = vmax.f32 %v3144_v24, %v11292_v60  ;;  %v2890_v34 = vadd.f32 %v2889_v37, %v11305_v50 }
 0x30f   :  { %14302 = vst [vmem:[#allocation84_spill] sm:$0xff] %v11323_v28  ;;  %v8419_v61 = vpop.eup %8418  ;;  %8438 = vrcp.f32 %v2164_v26  ;;  %v2165_v9 = vadd.f32 1.0, %v8413_v23  ;;  %v11334_v8 = vmul.f32 %v11224_v13, %v10925_v43  ;;  %v1182_v2 = vmul.f32 %v11311_v40, %v14305_v52 }
 0x310   :  { %v8421_v32 = vpop.eup %8420  ;;  %8440 = vrcp.f32 %v2172_v48  ;;  %v11339_v54 = vrot.slane %v1335_v25, %v14301_v1  ;;  %v11342_v24 = vmax.f32 %v3170_v63, %v11305_v50  ;;  %v11346_v37 = vmul.f32 %v11248_v14, %v10938_v38  ;;  %v14307_v48 = vld [vmem:[#allocation132_spill] sm:$0xff]  ;;  %v14308_v50 = vld [vmem:[#allocation154_spill] sm:$0xff]  ;;  %v14310_v38 = vld [vmem:[#allocation113_spill] sm:$0xff] }
 0x311   :  { %14304 = vst [vmem:[#allocation156_spill] sm:$0xff] %v11334_v8  ;;  %v8423_v45 = vpop.eup %8422  ;;  %v2174_v22 = vadd.f32 1.0, %v8417_v59  ;;  %v2182_v26 = vadd.f32 1.0, %v8421_v32  ;;  %v2852_v43 = vadd.f32 %v2851_v44, %v11323_v28  ;;  %8442 = vrcp.f32 %v2163_v11  ;;  %v11362_v59 = vpop.f32.mrb[107].mxu1  ;;  %v7738_v44 = vld [vmem:[%s13507_s7 + $0x240] sm:$0xff]  }
 0x312   :  { %14306 = vst [vmem:[#allocation130_spill] sm:$0xff] %v11346_v37  ;;  %v8425_v23 = vpop.eup %8424  ;;  %v1183_v13 = vmul.f32 %v11326_v30, %v14307_v48  ;;  %v11352_v52 = vrot.slane %v1335_v25, %v14303_v39  ;;  %v3133_v63 = vmax.f32 %v11308_v21, %v11323_v28  ;;  %v11357_v60 = vmul.f32 %v8409_v0, %v14308_v50  ;;  %v14312_v28 = vld [vmem:[#allocation95_spill] sm:$0xff]  ;;  %v14360_v39 = vld [vmem:[#allocation88_spill] sm:$0xff] }
 0x313   :  { %v8427_v31 = vpop.eup %8426  ;;  %v11360_v14 = vmul.f32 %v8415_v56, %v14310_v38  ;;  %8444 = vrcp.f32 %v2165_v9  ;;  %v2878_v25 = vadd.f32 %v2877_v58, %v11334_v8  ;;  %v2173_v32 = vadd.f32 1.0, %v8423_v45  ;;  %7537 = vmatprep.subr.bf16.mxu1 %v7738_v44 }
 0x314   :  { %14309 = vst [vmem:[#allocation132_spill] sm:$0xff] %v11357_v60  ;;  %v8429_v11 = vpop.eup %8428  ;;  %8446 = vrcp.f32 %v2182_v26  ;;  %v11369_v21 = vadd.f32 %v11339_v54, %v1182_v2  ;;  %v3159_v56 = vmax.f32 %v11315_v27, %v11334_v8  ;;  %v2865_v50 = vadd.f32 %v2864_v36, %v11346_v37  ;;  %v14314_v2 = vld [vmem:[#allocation134_spill] sm:$0xff]  ;;  %v14317_v8 = vld [vmem:[#allocation136_spill] sm:$0xff] }
 0x315   :  { %14311 = vst [vmem:[#allocation154_spill] sm:$0xff] %v11360_v14  ;;  %v8431_v0 = vpop.eup %8430  ;;  %8448 = vrcp.f32 %v2174_v22  ;;  %v2184_v9 = vadd.f32 1.0, %v8427_v31  ;;  %v3146_v38 = vmax.f32 %v11329_v3, %v11346_v37  ;;  %v11377_v58 = vmul.f32 %v8419_v61, %v14312_v28 }
 0x316   :  { %v8433_v48 = vpop.eup %8432  ;;  %v11380_v45 = vadd.f32 %v11352_v52, %v1183_v13  ;;  %v1192_v26 = vmul.f32 %v11311_v40, %v14314_v2  ;;  %v2891_v27 = vadd.f32 %v2890_v34, %v11357_v60  ;;  %v3172_v31 = vmax.f32 %v11342_v24, %v11357_v60 }
 0x317   :  { %14313 = vst [vmem:[#allocation113_spill] sm:$0xff] %v11377_v58  ;;  %v8435_v15 = vpop.eup %8434  ;;  %v2853_v36 = vadd.f32 %v2852_v43, %v11360_v14  ;;  %v2175_v22 = vadd.f32 1.0, %v8429_v11  ;;  %v3134_v3 = vmax.f32 %v3133_v63, %v11360_v14  ;;  %v11390_v28 = vmul.f32 %v8425_v23, %v11067_v18 }
 0x318   :  { %v8437_v44 = vpop.eup %8436  ;;  %8450 = vrcp.f32 %v2173_v32  ;;  %v7094_v61 = vmul.f32 -1.442695, %v11369_v21  ;;  %v11394_v2 = vmul.f32 %v8431_v0, %v11095_v20  ;;  %v2183_v34 = vadd.f32 1.0, %v8433_v48  ;;  %v14319_v0 = vld [vmem:[#allocation138_spill] sm:$0xff] }
 0x319   :  { %14315 = vst [vmem:[#allocation95_spill] sm:$0xff] %v11390_v28  ;;  %v8439_v13 = vpop.eup %8438  ;;  %8452 = vrcp.f32 %v2184_v9  ;;  %v1193_v24 = vmul.f32 %v11326_v30, %v14317_v8  ;;  %v2879_v11 = vadd.f32 %v2878_v25, %v11377_v58  ;;  %v11400_v63 = vmul.f32 %v8435_v15, %v11104_v12 }
 0x31a   :  { %14316 = vst [vmem:[#allocation134_spill] sm:$0xff] %v11394_v2  ;;  %v8441_v43 = vpop.eup %8440  ;;  %v7095_v18 = vmul.f32 -1.442695, %v11380_v45  ;;  %v11404_v23 = vadd.f32 %v11339_v54, %v1192_v26  ;;  %v3160_v32 = vmax.f32 %v3159_v56, %v11377_v58  ;;  %8454 = vrcp.f32 %v2175_v22  ;;  %v14340_v58 = vld [vmem:[#allocation40_spill] sm:$0xff] }
 0x31b   :  { %14318 = vst [vmem:[#allocation136_spill] sm:$0xff] %v11400_v63  ;;  %v2185_v20 = vadd.f32 1.0, %v8437_v44  ;;  %v1202_v9 = vmul.f32 %v11311_v40, %v14319_v0  ;;  %v8443_v48 = vpop.eup %8442  ;;  %v2866_v8 = vadd.f32 %v2865_v50, %v11390_v28  ;;  %v11411_v25 = vmax.f32 %v3146_v38, %v11390_v28 }
 0x31c   :  { %v11414_v12 = vmul.f32 %v8439_v13, %v11113_v42  ;;  %8456 = vpow2.f32 %v7094_v61  ;;  %v2892_v26 = vadd.f32 %v2891_v27, %v11394_v2  ;;  %v11418_v56 = vmul.f32 %v8441_v43, %v11136_v6  ;;  %v14322_v27 = vld [vmem:[#allocation141_spill] sm:$0xff] }
 0x31d   :  { %v8445_v15 = vpop.eup %8444  ;;  %8458 = vrcp.f32 %v2183_v34  ;;  %v11421_v22 = vadd.f32 %v11352_v52, %v1193_v24  ;;  %v2854_v50 = vadd.f32 %v2853_v36, %v11400_v63  ;;  %v3135_v38 = vmax.f32 %v3134_v3, %v11400_v63  ;;  %v14323_v34 = vld [vmem:[#allocation143_spill] sm:$0xff] }
 0x31e   :  { %14320 = vst [vmem:[#allocation138_spill] sm:$0xff] %v11414_v12  ;;  %14321 = vst [vmem:[#allocation157_spill] sm:$0xff] %v11418_v56  ;;  %v8447_v44 = vpop.eup %8446  ;;  %8460 = vpow2.f32 %v7095_v18  ;;  %v7104_v42 = vmul.f32 -1.442695, %v11404_v23  ;;  %v11427_v61 = vadd.f32 %v11339_v54, %v1202_v9  ;;  %v1203_v6 = vmul.f32 %v11326_v30, %v14322_v27  ;;  %v14325_v18 = vld [vmem:[#allocation145_spill] sm:$0xff] }
 0x31f   :  { %v8449_v13 = vpop.eup %8448  ;;  %8462 = vrcp.f32 %v2185_v20  ;;  %v1212_v24 = vmul.f32 %v11311_v40, %v14323_v34  ;;  %v3173_v43 = vmax.f32 %v3172_v31, %v11394_v2  ;;  %v2880_v36 = vadd.f32 %v2879_v11, %v11414_v12 }
 0x320   :  { %v11436_v3 = vmul.f32 %v8443_v48, %v11144_v53  ;;  %v1213_v0 = vmul.f32 %v11326_v30, %v14325_v18  ;;  %v2855_v20 = vadd.f32 %v2854_v50, %v11418_v56  ;;  %v3136_v9 = vmax.f32 %v3135_v38, %v11418_v56 }
 0x321   :  { %v11443_v63 = vmul.f32 %v8447_v44, %v11203_v17  ;;  %v7105_v27 = vmul.f32 -1.442695, %v11421_v22  ;;  %v3161_v31 = vmax.f32 %v3160_v32, %v11414_v12  ;;  %v11448_v11 = vmul.f32 %v8445_v15, %v11149_v5  ;;  %v14329_v44 = vld [vmem:[#allocation82_spill] sm:$0xff] }
 0x322   :  { %14324 = vst [vmem:[#allocation141_spill] sm:$0xff] %v11436_v3  ;;  %v8451_v34 = vpop.eup %8450  ;;  %v11451_v53 = vmul.f32 %v8449_v13, %v11188_v49  ;;  %8464 = vpow2.f32 %v7104_v42  ;;  %v7114_v50 = vmul.f32 -1.442695, %v11427_v61  ;;  %v11455_v38 = vadd.f32 %v11352_v52, %v1203_v6  ;;  %v14331_v42 = vld [vmem:[#allocation147_spill] sm:$0xff]  ;;  %v14332_v12 = vld [vmem:[#allocation90_spill] sm:$0xff] }
 0x323   :  { %14326 = vst [vmem:[#allocation143_spill] sm:$0xff] %v11443_v63  ;;  %14327 = vst [vmem:[#allocation145_spill] sm:$0xff] %v11448_v11  ;;  %v8453_v48 = vpop.eup %8452  ;;  %v11458_v17 = vadd.f32 %v11339_v54, %v1212_v24  ;;  %v14330_v18 = vrot.slane %v14329_v44, 1  ;;  %v2867_v5 = vadd.f32 %v2866_v8, %v11436_v3  ;;  %v3148_v49 = vmax.f32 %v11411_v25, %v11436_v3 }
 0x324   :  { %14328 = vst [vmem:[#allocation158_spill] sm:$0xff] %v11451_v53  ;;  %v11467_v15 = vadd.f32 %v11352_v52, %v1213_v0  ;;  %v1222_v13 = vmul.f32 %v11311_v40, %v14331_v42  ;;  %v8455_v6 = vpop.eup %8454  ;;  %v2856_v56 = vadd.f32 %v2855_v20, %v11443_v63  ;;  %v3137_v24 = vmax.f32 %v3136_v9, %v11443_v63 }
 0x325   :  { %v2836_v32 = vadd.f32 %v14330_v18, %v14329_v44  ;;  %8466 = vpow2.f32 %v7105_v27  ;;  %v14333_v44 = vrot.slane %v14332_v12, 1  ;;  %v2893_v2 = vadd.f32 %v2892_v26, %v11448_v11 }
 0x326   :  { %v8457_v8 = vpop.eup %8456  ;;  %v2881_v25 = vadd.f32 %v2880_v36, %v11451_v53  ;;  %v11479_v0 = vmul.f32 %v8451_v34, %v11191_v33  ;;  %v11482_v42 = vmul.f32 %v8453_v48, %v11212_v10  ;;  %v3174_v20 = vmax.f32 %v3173_v43, %v11448_v11  ;;  %v14337_v43 = vld [vmem:[#allocation83_spill] sm:$0xff] }
 0x327   :  { %v2706_v18 = vadd.f32 %v14333_v44, %v14332_v12  ;;  %v8459_v3 = vpop.eup %8458  ;;  %v3162_v9 = vmax.f32 %v3161_v31, %v11451_v53  ;;  %8468 = vpow2.f32 %v7114_v50  ;;  %v2941_v27 = vmul.f32 0.015625, %v2836_v32 }
 0x328   :  { %14334 = vst [vmem:[#allocation82_spill] sm:$0xff] %v11479_v0  ;;  %14335 = vst [vmem:[#allocation147_spill] sm:$0xff] %v11482_v42  ;;  %v8461_v63 = vpop.eup %8460  ;;  %v11487_v12 = vmul.f32 %v8455_v6, %v11219_v46  ;;  %v7115_v26 = vmul.f32 -1.442695, %v11455_v38  ;;  %v7124_v36 = vmul.f32 -1.442695, %v11458_v17  ;;  %v11492_v33 = vadd.f32 %v11339_v54, %v1222_v13 }
 0x329   :  { %v8463_v10 = vpop.eup %8462  ;;  %v2857_v34 = vrot.slane %v2856_v56, 4  ;;  %v3138_v48 = vrot.slane %v3137_v24, 4  ;;  %v2931_v44 = vmul.f32 0.015625, %v2706_v18  ;;  %v14338_v11 = vrot.slane %v14337_v43, 1 }
 0x32a   :  { %14336 = vst [vmem:[#allocation90_spill] sm:$0xff] %v11487_v12  ;;  %v2868_v50 = vadd.f32 %v2867_v5, %v11479_v0  ;;  %v3149_v46 = vmax.f32 %v3148_v49, %v11479_v0  ;;  %v2882_v32 = vadd.f32 %v2881_v25, %v11482_v42  ;;  %v11501_v6 = vmul.f32 %v8459_v3, %v11241_v29 }
 0x32b   :  { %v3117_v31 = vmax.f32 %v14337_v43, %v14338_v11  ;;  %v3163_v13 = vmax.f32 %v3162_v9, %v11482_v42  ;;  %v2036_v53 = vadd.f32 1.0, %v8457_v8  ;;  %v14341_v28 = vrot.slane %v14340_v58, 1 }
 0x32c   :  { %14339 = vst [vmem:[#allocation83_spill] sm:$0xff] %v11501_v6  ;;  %v3232_v14 = vsel %vm3229_vm1, %v2941_v27, %v2931_v44  ;;  %v8465_v60 = vpop.eup %8464  ;;  %v2894_v11 = vadd.f32 %v2893_v2, %v11487_v12  ;;  %v11510_v5 = vmul.f32 %v8463_v10, %v11263_v16  ;;  %v2037_v49 = vadd.f32 1.0, %v8461_v63  ;;  %v14343_v2 = vld [vmem:[#allocation112_spill] sm:$0xff] }
 0x32d   :  { %v2987_v18 = vmax.f32 %v14340_v58, %v14341_v28  ;;  %8470 = vpow2.f32 %v7115_v26  ;;  %v3175_v29 = vmax.f32 %v3174_v20, %v11487_v12  ;;  %v2858_v3 = vadd.f32 %v2857_v34, %v2856_v56 }
 0x32e   :  { %14342 = vst [vmem:[#allocation40_spill] sm:$0xff] %v11510_v5  ;;  %v3139_v25 = vmax.f32 %v3137_v24, %v3138_v48  ;;  %v2883_v9 = vrot.slane %v2882_v32, 4  ;;  %v2869_v43 = vadd.f32 %v2868_v50, %v11501_v6  ;;  %v3150_v58 = vmax.f32 %v3149_v46, %v11501_v6  ;;  %v14357_v6 = vld [vmem:[#allocation103_spill] sm:$0xff] }
 0x32f   :  { %v3273_v8 = vsel %vm3270_vm2, %v3117_v31, %v2987_v18  ;;  %v8467_v27 = vpop.eup %8466  ;;  %v14344_v44 = vrot.slane %v14343_v2, 1  ;;  %v3164_v63 = vrot.slane %v3163_v13, 4  ;;  %8472 = vrcp.f32 %v2036_v53 }
 0x330   :  { %v3294_v28 = vsel %vm3291_vm3, %v3232_v14, %v3273_v8  ;;  %v2046_v20 = vadd.f32 1.0, %v8465_v60  ;;  %v2895_v56 = vadd.f32 %v2894_v11, %v11510_v5  ;;  %8474 = vpow2.f32 %v7124_v36  ;;  %v7709_v14 = vld [vmem:[%s13507_s7 + $0x180] sm:$0xff]   ;;  %v7711_v60 = vld [vmem:[%s13507_s7 + $0x1c8] sm:$0xff]  }
 0x331   :  { %v11520_v16 = vmax.f32 %v14343_v2, %v14344_v44  ;;  %v7125_v24 = vmul.f32 -1.442695, %v11467_v15  ;;  %v7134_v26 = vmul.f32 -1.442695, %v11492_v33  ;;  %v8469_v10 = vpop.eup %8468  ;;  %v2859_v34 = vrot.slane %v2858_v3, 2 }
 0x332   :  { %v3140_v48 = vrot.slane %v3139_v25, 2  ;;  %v3176_v31 = vmax.f32 %v3175_v29, %v11510_v5  ;;  %v3304_v50 = vpack.c.bf16 %v3294_v28, %v3294_v28  ;;  %v2884_v53 = vadd.f32 %v2883_v9, %v2882_v32  ;;  %v14346_v28 = vld [vmem:[#allocation74_spill] sm:$0xff]  ;;  %v7713_v32 = vld [vmem:[%s13507_s7 + $0x188] sm:$0xff]  }
 0x333   :  { %v2870_v36 = vrot.slane %v2869_v43, 4  ;;  %v3151_v46 = vrot.slane %v3150_v58, 4  ;;  %8476 = vrcp.f32 %v2037_v49  ;;  %v14345_v18 = vrot.slane %v11031_v51, 2 }
 0x334   :  { %v3165_v8 = vmax.f32 %v3163_v13, %v3164_v63  ;;  %8478 = vrcp.f32 %v2046_v20  ;;  %v2047_v2 = vadd.f32 1.0, %v8467_v27  ;;  %4032 = vmatmul.mubr.bf16.vlgmr.msra.gmra.mrb[72].mxu0 %v3304_v50  ;;  %v2896_v44 = vrot.slane %v2895_v56, 4 }
 0x335   :  { %v11535_v11 = vadd.f32 %v14345_v18, %v11031_v51  ;;  %v2056_v29 = vadd.f32 1.0, %v8469_v10  ;;  %8480 = vpow2.f32 %v7125_v24  ;;  %v1223_v5 = vmul.f32 %v11326_v30, %v14346_v28  ;;  %7516 = vmatpush3.bf16.msra.mxu0 %v7709_v14  ;;  %v7715_v51 = vld [vmem:[%s13507_s7 + $0x1d0] sm:$0xff]  }
 0x336   :  { %v2860_v49 = vadd.f32 %v2859_v34, %v2858_v3  ;;  %v3141_v9 = vmax.f32 %v3139_v25, %v3140_v48  ;;  %v3177_v42 = vrot.slane %v3176_v31, 4  ;;  %8482 = vpow2.f32 %v7134_v26  ;;  %7517 = vmatprep.subr.bf16.mxu0 %v7711_v60  ;;  %v14347_v24 = vld [vmem:[#allocation148_spill] sm:$0xff]  ;;  %v14348_v25 = vld [vmem:[#allocation149_spill] sm:$0xff] }
 0x337   :  { %v8471_v13 = vpop.eup %8470  ;;  %v2885_v27 = vrot.slane %v2884_v53, 2  ;;  %v2871_v63 = vadd.f32 %v2870_v36, %v2869_v43  ;;  %v11545_v20 = vmax.f32 %v3150_v58, %v3151_v46  ;;  %v1232_v14 = vmul.f32 %v11311_v40, %v14347_v24  ;;  %v14349_v43 = vld [vmem:[#allocation151_spill] sm:$0xff]  ;;  %v14350_v18 = vld [vmem:[#allocation152_spill] sm:$0xff] }
 0x338   :  { %v11550_v10 = vmul.f32 0.015625, %v11154_v62  ;;  %v3166_v3 = vrot.slane %v3165_v8, 2  ;;  %8484 = vrcp.f32 %v2047_v2  ;;  %v1233_v26 = vmul.f32 %v11326_v30, %v14348_v25  ;;  %v7717_v62 = vld [vmem:[%s13507_s7 + $0x190] sm:$0xff]  }
 0x339   :  { %v11554_v34 = vadd.f32 %v2896_v44, %v2895_v56  ;;  %8486 = vrcp.f32 %v2056_v29  ;;  %v11557_v48 = vadd.f32 %v11352_v52, %v1223_v5  ;;  %7518 = vmatpush3.bf16.msra.mxu0 %v7713_v32  ;;  %v1242_v58 = vmul.f32 %v11311_v40, %v14349_v43  ;;  %v8473_v50 = vpop.eup %8472  ;;  %v7719_v5 = vld [vmem:[%s13507_s7 + $0x1d8] sm:$0xff]  }
 0x33a   :  { %v2861_v60 = vrot.slane %v2860_v49, 1  ;;  %v3142_v36 = vrot.slane %v3141_v9, 1  ;;  %v11564_v46 = vmax.f32 %v3176_v31, %v3177_v42  ;;  %v1243_v56 = vmul.f32 %v11326_v30, %v14350_v18  ;;  %7519 = vmatprep.subr.bf16.mxu0 %v7715_v51  ;;  %v8475_v2 = vpop.eup %8474  ;;  %v14353_v51 = vld [vmem:[#allocation153_spill] sm:$0xff] }
 0x33b   :  { %v11571_v44 = vadd.f32 %v2885_v27, %v2884_v53  ;;  %v2872_v29 = vrot.slane %v2871_v63, 2  ;;  %v11575_v32 = vadd.f32 %v11339_v54, %v1232_v14  ;;  %v11577_v24 = vmax.f32 %v3165_v8, %v3166_v3  ;;  %v14355_v14 = vld [vmem:[#allocation50_spill] sm:$0xff] }
 0x33c   :  { %v2057_v42 = vadd.f32 1.0, %v8471_v13  ;;  %v11580_v31 = vadd.f32 %v11352_v52, %v1233_v26  ;;  %v1252_v25 = vmul.f32 %v11311_v40, %v14353_v51  ;;  %v2898_v53 = vrot.slane %v11554_v34, 2  ;;  %v7721_v13 = vld [vmem:[%s13507_s7 + $0x198] sm:$0xff]   ;;  %v14358_v26 = vld [vmem:[#allocation99_spill] sm:$0xff] }
 0x33d   :  { %14351 = vst [vmem:[#allocation112_spill] sm:$0xff] %v11575_v32  ;;  %v11584_v43 = vpop.eup %8476  ;;  %v7135_v27 = vmul.f32 -1.442695, %v11557_v48  ;;  %v11589_v18 = vadd.f32 %v11339_v54, %v1242_v58  ;;  %7520 = vmatpush3.bf16.msra.mxu0 %v7717_v62  ;;  %v1253_v8 = vmul.f32 %v11326_v30, %v14355_v14  ;;  %v2066_v51 = vadd.f32 1.0, %v8475_v2  ;;  %v7723_v62 = vld [vmem:[%s13507_s7 + $0x1e0] sm:$0xff]  }
 0x33e   :  { %14352 = vst [vmem:[#allocation74_spill] sm:$0xff] %v11580_v31  ;;  %v11596_v3 = vpop.eup %8478  ;;  %v11600_v28 = vadd.f32 %v11352_v52, %v1243_v56  ;;  %7521 = vmatprep.subr.bf16.mxu0 %v7719_v5  ;;  %v1262_v58 = vmul.f32 %v11311_v40, %v14357_v6  ;;  %v11607_v12 = vadd.f32 %v2861_v60, %v2860_v49  ;;  %v7144_v37 = vmul.f32 -1.442695, %v11575_v32 }
 0x33f   :  { %14354 = vst [vmem:[#allocation148_spill] sm:$0xff] %v11589_v18  ;;  %v8481_v14 = vpop.eup %8480  ;;  %v11609_v0 = vmax.f32 %v3141_v9, %v3142_v36  ;;  %v1263_v2 = vmul.f32 %v11326_v30, %v14358_v26  ;;  %8488 = vrcp.f32 %v2057_v42  ;;  %v7145_v5 = vmul.f32 -1.442695, %v11580_v31  ;;  %v7725_v36 = vld [vmem:[%s13507_s7 + $0x1a0] sm:$0xff]  }
 0x340   :  { %14356 = vst [vmem:[#allocation149_spill] sm:$0xff] %v11600_v28  ;;  %v11614_v56 = vpop.eup %8482  ;;  %v11618_v6 = vadd.f32 %v11339_v54, %v1252_v25  ;;  %v1272_v1 = vmul.f32 %v11311_v40, %v14360_v39  ;;  %v2873_v49 = vadd.f32 %v2872_v29, %v2871_v63  ;;  %8490 = vpow2.f32 %v7135_v27  ;;  %v14363_v39 = vld [vmem:[#allocation125_spill] sm:$0xff]  ;;  %v7727_v29 = vld [vmem:[%s13507_s7 + $0x1e8] sm:$0xff]  }
 0x341   :  { %v7154_v9 = vmul.f32 -1.442695, %v11589_v18  ;;  %v11624_v60 = vadd.f32 %v11352_v52, %v1253_v8  ;;  %7522 = vmatpush3.bf16.msra.mxu0 %v7721_v13  ;;  %8492 = vrcp.f32 %v2066_v51  ;;  %v7155_v25 = vmul.f32 -1.442695, %v11600_v28  ;;  %v14365_v51 = vld [vmem:[#allocation101_spill] sm:$0xff] }
 0x342   :  { %14359 = vst [vmem:[#allocation151_spill] sm:$0xff] %v11618_v6  ;;  %v11629_v42 = vpop.eup %8484  ;;  %v11633_v26 = vadd.f32 %v11339_v54, %v1262_v58  ;;  %7523 = vmatprep.subr.bf16.mxu0 %v7723_v62  ;;  %v1273_v63 = vmul.f32 %v11326_v30, %v14363_v39  ;;  %v11643_v8 = vmul.f32 %v8473_v50, %v11369_v21  ;;  %8494 = vpow2.f32 %v7144_v37  ;;  %v7729_v37 = vld [vmem:[%s13507_s7 + $0x1a8] sm:$0xff]   ;;  %v14367_v50 = vld [vmem:[#allocation102_spill] sm:$0xff] }
 0x343   :  { %14361 = vst [vmem:[#allocation152_spill] sm:$0xff] %v11624_v60  ;;  %v11640_v27 = vpop.eup %8486  ;;  %v11646_v13 = vadd.f32 %v11352_v52, %v1263_v2  ;;  %v1282_v58 = vmul.f32 %v11311_v40, %v14365_v51  ;;  %8496 = vpow2.f32 %v7145_v5  ;;  %v7164_v39 = vmul.f32 -1.442695, %v11618_v6 }
 0x344   :  { %14362 = vst [vmem:[#allocation153_spill] sm:$0xff] %v11633_v26  ;;  %v11653_v28 = vadd.f32 %v11339_v54, %v1272_v1  ;;  %8498 = vpow2.f32 %v7154_v9  ;;  %v7165_v21 = vmul.f32 -1.442695, %v11624_v60  ;;  %v1283_v2 = vmul.f32 %v11326_v30, %v14367_v50  ;;  %v7731_v9 = vld [vmem:[%s13507_s7 + $0x1f0] sm:$0xff]   ;;  %v14370_v50 = vld [vmem:[#allocation107_spill] sm:$0xff] }
 0x345   :  { %14364 = vst [vmem:[#allocation50_spill] sm:$0xff] %v11646_v13  ;;  %7524 = vmatpush3.bf16.msra.mxu0 %v7725_v36  ;;  %v11663_v5 = vadd.f32 %v2898_v53, %v11554_v34  ;;  %8500 = vpow2.f32 %v7155_v25  ;;  %v7174_v1 = vmul.f32 -1.442695, %v11633_v26  ;;  %v11667_v51 = vadd.f32 %v11352_v52, %v1273_v63  ;;  %v14371_v53 = vld [vmem:[#allocation105_spill] sm:$0xff] }
 0x346   :  { %14366 = vst [vmem:[#allocation103_spill] sm:$0xff] %v11653_v28  ;;  %7525 = vmatprep.subr.bf16.mxu0 %v7727_v29  ;;  %v7175_v36 = vmul.f32 -1.442695, %v11646_v13  ;;  %v11674_v18 = vadd.f32 %v11339_v54, %v1282_v58  ;;  %v1292_v34 = vmul.f32 %v11311_v40, %v14370_v50  ;;  %v2744_v25 = vrot.slane %v14371_v53, 1  ;;  %v14372_v63 = vld [vmem:[#allocation37_spill] sm:$0xff]  ;;  %v7733_v58 = vld [vmem:[%s13507_s7 + $0x1b0] sm:$0xff]  }
 0x347   :  { %14368 = vst [vmem:[#allocation99_spill] sm:$0xff] %v11667_v51  ;;  %8502 = vpow2.f32 %v7164_v39  ;;  %v7184_v62 = vmul.f32 -1.442695, %v11653_v28  ;;  %v1293_v29 = vmul.f32 %v11326_v30, %v14372_v63  ;;  %v2874_v60 = vrot.slane %v2873_v49, 1  ;;  %v14374_v50 = vld [vmem:[#allocation98_spill] sm:$0xff] }
 0x348   :  { %14369 = vst [vmem:[#allocation88_spill] sm:$0xff] %v11674_v18  ;;  %v2067_v26 = vadd.f32 1.0, %v8481_v14  ;;  %8504 = vpow2.f32 %v7165_v21  ;;  %v11683_v13 = vadd.f32 %v11352_v52, %v1283_v2  ;;  %v14375_v6 = vrot.slane %v14374_v50, 2  ;;  %v7735_v14 = vld [vmem:[%s13507_s7 + $0x1f8] sm:$0xff]  }
 0x349   :  { %7526 = vmatpush3.bf16.msra.mxu0 %v7729_v37  ;;  %v11691_v31 = vpop.eup %8488  ;;  %8506 = vpow2.f32 %v7174_v1  ;;  %v7185_v63 = vmul.f32 -1.442695, %v11667_v51  ;;  %v2875_v21 = vadd.f32 %v2874_v60, %v2873_v49  ;;  %v14376_v37 = vrot.slane %v11545_v20, 2 }
 0x34a   :  { %14373 = vst [vmem:[#allocation125_spill] sm:$0xff] %v11683_v13  ;;  %v3024_v39 = vmax.f32 %v14374_v50, %v14375_v6  ;;  %7527 = vmatprep.subr.bf16.mxu0 %v7731_v9  ;;  %v8491_v28 = vpop.eup %8490  ;;  %8508 = vpow2.f32 %v7175_v36  ;;  %v7194_v32 = vmul.f32 -1.442695, %v11674_v18  ;;  %v11702_v6 = vadd.f32 %v11339_v54, %v1292_v34  ;;  %v7737_v36 = vld [vmem:[%s13507_s7 + $0x1b8] sm:$0xff]  }
 0x34b   :  { %v3154_v2 = vmax.f32 %v11545_v20, %v14376_v37  ;;  %v2745_v1 = vadd.f32 %v2744_v25, %v14371_v53  ;;  %v11705_v50 = vpop.eup %8492  ;;  %v2076_v9 = vadd.f32 1.0, %v11614_v56  ;;  %8510 = vpow2.f32 %v7184_v62 }
 0x34c   :  { %v11709_v49 = vadd.f32 %v11352_v52, %v1293_v29  ;;  %v8495_v51 = vpop.eup %8494  ;;  %8512 = vrcp.f32 %v2067_v26  ;;  %v7195_v20 = vmul.f32 -1.442695, %v11683_v13  ;;  %v2944_v34 = vmul.f32 0.015625, %v2875_v21 }
 0x34d   :  { %v3155_v60 = vrot.slane %v3154_v2, 1  ;;  %7528 = vmatpush3.bf16.msra.mxu0 %v7733_v58  ;;  %v3025_v53 = vrot.slane %v3024_v39, 1  ;;  %v8497_v25 = vpop.eup %8496  ;;  %v11717_v56 = vmul.f32 %v11584_v43, %v11380_v45  ;;  %v11721_v62 = vmul.f32 %v11596_v3, %v11404_v23 }
 0x34e   :  { %v2077_v29 = vadd.f32 1.0, %v8491_v28  ;;  %8514 = vpow2.f32 %v7185_v63  ;;  %7529 = vmatprep.subr.bf16.mxu0 %v7735_v14  ;;  %v8499_v26 = vpop.eup %8498  ;;  %v7204_v58 = vmul.f32 -1.442695, %v11702_v6  ;;  %v2934_v37 = vmul.f32 0.015625, %v2745_v1  ;;  %v14377_v14 = vld [vmem:[#allocation155_spill] sm:$0xff] }
 0x34f   :  { %8516 = vpow2.f32 %v7194_v32  ;;  %v3156_v13 = vmax.f32 %v3154_v2, %v3155_v60  ;;  %v8501_v21 = vpop.eup %8500  ;;  %v11725_v18 = vmul.f32 0.015625, %v11607_v12  ;;  %v11729_v45 = vmul.f32 %v11629_v42, %v11421_v22 }
 0x350   :  { %8518 = vrcp.f32 %v2076_v9  ;;  %v7205_v23 = vmul.f32 -1.442695, %v11709_v49  ;;  %v2086_v28 = vadd.f32 1.0, %v8495_v51  ;;  %v3026_v43 = vmax.f32 %v3024_v39, %v3025_v53 }
 0x351   :  { %8520 = vpow2.f32 %v7195_v20  ;;  %7530 = vmatpush3.bf16.msra.mxu0 %v7737_v36  ;;  %v3235_v32 = vsel %vm3229_vm1, %v2944_v34, %v2934_v37  ;;  %v8503_v3 = vpop.eup %8502  ;;  %v11735_v63 = vmul.f32 %v11640_v27, %v11427_v61  ;;  %v2087_v12 = vadd.f32 1.0, %v8497_v25 }
 0x352   :  { %8522 = vrcp.f32 %v2077_v29  ;;  %v1302_v22 = vmul.f32 %v11311_v40, %v14377_v14  ;;  %v8505_v42 = vpop.eup %8504  ;;  %v2772_v2 = vadd.f32 %v11721_v62, %v11643_v8  ;;  %v2096_v51 = vadd.f32 1.0, %v8499_v26 }
 0x353   :  { %8524 = vpow2.f32 %v7204_v58  ;;  %v3276_v39 = vsel %vm3270_vm2, %v3156_v13, %v3026_v43  ;;  %v8507_v1 = vpop.eup %8506  ;;  %v3053_v9 = vmax.f32 %v11643_v8, %v11721_v62  ;;  %v2097_v60 = vadd.f32 1.0, %v8501_v21 }
 0x354   :  { %8526 = vpow2.f32 %v7205_v23  ;;  %v3297_v61 = vsel %vm3291_vm3, %v3235_v32, %v3276_v39  ;;  %v8509_v27 = vpop.eup %8508  ;;  %v2106_v20 = vadd.f32 1.0, %v8503_v3  ;;  %v2900_v34 = vrot.slane %v11663_v5, 1 }
 0x355   :  { %8528 = vrcp.f32 %v2086_v28  ;;  %v3307_v36 = vpack.c.bf16 %v3297_v61, %v3297_v61  ;;  %v8511_v53 = vpop.eup %8510  ;;  %v2785_v25 = vadd.f32 %v11729_v45, %v11717_v56  ;;  %v2107_v13 = vadd.f32 1.0, %v8505_v42 }
 0x356   :  { %8530 = vrcp.f32 %v2087_v12  ;;  %v11749_v29 = vadd.f32 %v11339_v54, %v1302_v22  ;;  %v8513_v26 = vpop.eup %8512  ;;  %v3066_v58 = vmax.f32 %v11717_v56, %v11729_v45  ;;  %v2116_v37 = vadd.f32 1.0, %v8507_v1 }
 0x357   :  { %8532 = vrcp.f32 %v2096_v51  ;;  %4071 = vmatprep.mubr.bf16.mxu1 %v3307_v36  ;;  %v2770_v21 = vrot.slane %v11535_v11, 1  ;;  %v2117_v28 = vadd.f32 1.0, %v8509_v27  ;;  %v14378_v43 = vrot.slane %v11034_v55, 2 }
 0x358   :  { %v8515_v23 = vpop.eup %8514  ;;  %8534 = vrcp.f32 %v2097_v60  ;;  %v14379_v3 = vrot.slane %v11564_v46, 2  ;;  %v11762_v22 = vmul.f32 %v11691_v31, %v11455_v38  ;;  %v2126_v42 = vadd.f32 1.0, %v8511_v53 }
 0x359   :  { %v3050_v32 = vmax.f32 %v11034_v55, %v14378_v43  ;;  %v8517_v14 = vpop.eup %8516  ;;  %8536 = vrcp.f32 %v2106_v20  ;;  %v2901_v51 = vadd.f32 %v2900_v34, %v11663_v5  ;;  %v2773_v1 = vadd.f32 %v2772_v2, %v11735_v63 }
 0x35a   :  { %v3180_v12 = vmax.f32 %v11564_v46, %v14379_v3  ;;  %v8519_v39 = vpop.eup %8518  ;;  %v11768_v60 = vmul.f32 %v11705_v50, %v11458_v17  ;;  %8538 = vrcp.f32 %v2107_v13  ;;  %v7214_v55 = vmul.f32 -1.442695, %v11749_v29 }
 0x35b   :  { %v8521_v46 = vpop.eup %8520  ;;  %v11772_v61 = vmax.f32 %v3053_v9, %v11735_v63  ;;  %8540 = vrcp.f32 %v2116_v37  ;;  %v2127_v38 = vadd.f32 1.0, %v8515_v23  ;;  %v2771_v31 = vadd.f32 %v2770_v21, %v11535_v11 }
 0x35c   :  { %v8523_v27 = vpop.eup %8522  ;;  %8542 = vrcp.f32 %v2117_v28  ;;  %v2136_v5 = vadd.f32 1.0, %v8517_v14  ;;  %v3051_v20 = vrot.slane %v3050_v32, 1  ;;  %v3181_v2 = vrot.slane %v3180_v12, 1 }
 0x35d   :  { %v8525_v36 = vpop.eup %8524  ;;  %v11776_v17 = vadd.f32 %v2785_v25, %v11762_v22  ;;  %v11779_v50 = vmax.f32 %v3066_v58, %v11762_v22  ;;  %8544 = vrcp.f32 %v2126_v42  ;;  %v2946_v34 = vmul.f32 0.015625, %v2901_v51  ;;  %v14380_v42 = vld [vmem:[#allocation66_spill] sm:$0xff] }
 0x35e   :  { %v8527_v9 = vpop.eup %8526  ;;  %v11782_v53 = vadd.f32 %v2773_v1, %v11768_v60  ;;  %v11785_v11 = vmul.f32 %v8513_v26, %v11467_v15  ;;  %v2137_v13 = vadd.f32 1.0, %v8521_v46  ;;  %8546 = vpow2.f32 %v7214_v55 }
 0x35f   :  { %v11787_v37 = vpop.eup %8528  ;;  %v11790_v21 = vmul.f32 %v8519_v39, %v11492_v33  ;;  %v11793_v25 = vmul.f32 %v8523_v27, %v11557_v48  ;;  %8548 = vrcp.f32 %v2127_v38  ;;  %v2936_v58 = vmul.f32 0.015625, %v2771_v31 }
 0x360   :  { %v11795_v23 = vpop.eup %8530  ;;  %8550 = vrcp.f32 %v2136_v5  ;;  %v2146_v28 = vadd.f32 1.0, %v8525_v36  ;;  %v3052_v43 = vmax.f32 %v3050_v32, %v3051_v20  ;;  %v3182_v3 = vmax.f32 %v3180_v12, %v3181_v2  ;;  %v7740_v36 = vld [vmem:[%s13507_s7 + $0x248] sm:$0xff]  }
 0x361   :  { %v11797_v15 = vpop.eup %8532  ;;  %v2147_v26 = vadd.f32 1.0, %v8527_v9  ;;  %v3237_v14 = vsel %vm3229_vm1, %v2946_v34, %v2936_v58  ;;  %v1303_v33 = vmul.f32 %v11326_v30, %v14380_v42  ;;  %v3234_v48 = vsel %vm3229_vm1, %v11725_v18, %v11550_v10 }
 0x362   :  { %v11805_v51 = vpop.eup %8534  ;;  %8552 = vrcp.f32 %v2137_v13  ;;  %v3278_v39 = vsel %vm3270_vm2, %v3182_v3, %v3052_v43  ;;  %v3275_v32 = vsel %vm3270_vm2, %v11609_v0, %v11520_v16  ;;  %v14381_v12 = vrot.slane %v10999_v4, 1  ;;  %v7739_v0 = vld [vmem:[%s13507_s7 + $0x200] sm:$0xff]  }
 0x363   :  { %v11814_v55 = vpop.eup %8536  ;;  %v3299_v46 = vsel %vm3291_vm3, %v3237_v14, %v3278_v39  ;;  %v11818_v38 = vadd.f32 %v11352_v52, %v1303_v33  ;;  %v3296_v10 = vsel %vm3291_vm3, %v3234_v48, %v3275_v32  ;;  %v14382_v18 = vrot.slane %v11571_v44, 1 }
 0x364   :  { %v2758_v1 = vadd.f32 %v14381_v12, %v10999_v4  ;;  %v11827_v16 = vpop.eup %8538  ;;  %v3309_v4 = vpack.c.bf16 %v3299_v46, %v3299_v46  ;;  %v3306_v27 = vpack.c.bf16 %v3296_v10, %v3296_v10  ;;  %v14383_v20 = vrot.slane %v11004_v47, 1  ;;  %v7742_v12 = vld [vmem:[%s13507_s7 + $0x250] sm:$0xff]  }
 0x365   :  { %v2888_v31 = vadd.f32 %v14382_v18, %v11571_v44  ;;  %v11835_v34 = vpop.eup %8540  ;;  %v7215_v44 = vmul.f32 -1.442695, %v11818_v38  ;;  %v14384_v13 = vrot.slane %v11577_v24, 1  ;;  %v1312_v43 = vmul.f32 %v11311_v40, %v11208_v7 }
 0x366   :  { %v2935_v5 = vmul.f32 0.015625, %v2758_v1  ;;  %v3039_v2 = vmax.f32 %v11004_v47, %v14383_v20  ;;  %v11843_v3 = vpop.eup %8542  ;;  %8554 = vrcp.f32 %v2146_v28  ;;  %4111 = vmatprep.mubr.bf16.mxu0 %v3309_v4  ;;  %4072 = vmatmul.mubr.bf16.vlgmr.msra.gmra.mrb[108].mxu1 %v3306_v27  ;;  %v1313_v47 = vmul.f32 %v11326_v30, %v11246_v35  ;;  %v7741_v35 = vld [vmem:[%s13507_s7 + $0x208] sm:$0xff]  }
 0x367   :  { %v2945_v9 = vmul.f32 0.015625, %v2888_v31  ;;  %v3169_v58 = vmax.f32 %v11577_v24, %v14384_v13  ;;  %v1322_v14 = vmul.f32 %v11311_v40, %v11255_v41  ;;  %v1323_v42 = vmul.f32 %v11326_v30, %v11265_v57  ;;  %v11851_v33 = vpop.eup %8544  ;;  %7538 = vmatpush3.bf16.msra.mxu1 %v7739_v0  ;;  %v14386_v13 = vld [vmem:[#allocation112_spill] sm:$0xff] }
 0x368   :  { %8556 = vpow2.f32 %v7215_v44  ;;  %v11856_v28 = vadd.f32 %v11339_v54, %v1312_v43  ;;  %v8547_v48 = vpop.eup %8546  ;;  %v11863_v57 = vadd.f32 %v11352_v52, %v1313_v47  ;;  %7539 = vmatprep.subr.bf16.mxu1 %v7740_v36  ;;  %v1332_v18 = vmul.f32 %v11311_v40, %v11276_v19  ;;  %v7743_v19 = vld [vmem:[%s13507_s7 + $0x210] sm:$0xff]   ;;  %v14387_v43 = vld [vmem:[#allocation74_spill] sm:$0xff] }
 0x369   :  { %v3236_v24 = vsel %vm3229_vm1, %v2945_v9, %v2935_v5  ;;  %v3277_v7 = vsel %vm3270_vm2, %v3169_v58, %v3039_v2  ;;  %v11866_v39 = vadd.f32 %v11339_v54, %v1322_v14  ;;  %v11869_v32 = vadd.f32 %v11352_v52, %v1323_v42  ;;  %v11874_v1 = vpop.eup %8548 }
 0x36a   :  { %v3298_v41 = vsel %vm3291_vm3, %v3236_v24, %v3277_v7  ;;  %v7224_v10 = vmul.f32 -1.442695, %v11856_v28  ;;  %v1333_v31 = vmul.f32 %v11326_v30, %v11362_v59  ;;  %v8551_v0 = vpop.eup %8550  ;;  %8558 = vrcp.f32 %v2147_v26 }
 0x36b   :  { %v3308_v46 = vpack.c.bf16 %v3298_v41, %v3298_v41  ;;  %v7225_v4 = vmul.f32 -1.442695, %v11863_v57  ;;  %v7234_v27 = vmul.f32 -1.442695, %v11866_v39  ;;  %v7235_v5 = vmul.f32 -1.442695, %v11869_v32  ;;  %7540 = vmatpush3.bf16.msra.mxu1 %v7741_v35 }
 0x36c   :  { %v2156_v20 = vadd.f32 1.0, %v8547_v48  ;;  %8560 = vpow2.f32 %v7224_v10  ;;  %v11885_v2 = vadd.f32 %v11339_v54, %v1332_v18  ;;  %v11888_v36 = vadd.f32 %v11352_v52, %v1333_v31  ;;  %v8553_v40 = vpop.eup %8552  ;;  %7541 = vmatprep.subr.bf16.mxu1 %v7742_v12  ;;  %v7744_v54 = vld [vmem:[%s13507_s7 + $0x258] sm:$0xff]   ;;  %v7747_v18 = vld [vmem:[%s13507_s7 + $0x220] sm:$0xff]  }
 0x36d   :  { %4112 = vmatmul.mubr.bf16.vlgmr.msra.gmra.mrb[76].mxu0 %v3308_v46  ;;  %v3055_v30 = vmax.f32 %v11772_v61, %v11768_v60  ;;  %v2787_v59 = vadd.f32 %v11776_v17, %v11785_v11  ;;  %8562 = vpow2.f32 %v7225_v4  ;;  %v14385_v52 = vmov 0   ;;  %v14391_v35 = vld [vmem:[#allocation149_spill] sm:$0xff]  ;;  %v14393_v4 = vld [vmem:[#allocation103_spill] sm:$0xff] }
 0x36e   :  { %4727 = vmatprep.mubr.bf16.mxu0 %v14385_v52  ;;  %v3068_v26 = vmax.f32 %v11779_v50, %v11785_v11  ;;  %v2775_v44 = vadd.f32 %v11782_v53, %v11790_v21  ;;  %8564 = vpow2.f32 %v7234_v27  ;;  %v7244_v17 = vmul.f32 -1.442695, %v11885_v2  ;;  %v7745_v53 = vld [vmem:[%s13507_s7 + $0x218] sm:$0xff]   ;;  %v7748_v27 = vld [vmem:[%s13507_s7 + $0x268] sm:$0xff]  }
 0x36f   :  { %v3056_v61 = vmax.f32 %v3055_v30, %v11790_v21  ;;  %v2788_v9 = vadd.f32 %v2787_v59, %v11793_v25  ;;  %8566 = vpow2.f32 %v7235_v5  ;;  %v11910_v58 = vmul.f32 %v11787_v37, %v14386_v13  ;;  %7542 = vmatpush3.bf16.msra.mxu1 %v7743_v19  ;;  %v7746_v37 = vld [vmem:[%s13507_s7 + $0x260] sm:$0xff]   ;;  %v14395_v59 = vld [vmem:[#allocation151_spill] sm:$0xff] }
 0x370   :  { %v11914_v47 = vmul.f32 %v11795_v23, %v14387_v43  ;;  %8568 = vrcp.f32 %v2156_v20  ;;  %v7245_v50 = vmul.f32 -1.442695, %v11888_v36  ;;  %v8555_v14 = vpop.eup %8554  ;;  %v3069_v42 = vmax.f32 %v3068_v26, %v11793_v25  ;;  %7543 = vmatprep.subr.bf16.mxu1 %v7744_v54  ;;  %v14389_v23 = vld [vmem:[#allocation148_spill] sm:$0xff] }
 0x371   :  { %8570 = vpow2.f32 %v7244_v17  ;;  %v11926_v7 = vmul.f32 %v11797_v15, %v14389_v23  ;;  %v11930_v48 = vmul.f32 %v11805_v51, %v14391_v35  ;;  %v2776_v12 = vadd.f32 %v2775_v44, %v11910_v58  ;;  %v14401_v17 = vld [vmem:[#allocation88_spill] sm:$0xff]  ;;  %v14406_v35 = vld [vmem:[#allocation125_spill] sm:$0xff] }
 0x372   :  { %14388 = vst [vmem:[#allocation101_spill] sm:$0xff] %v11914_v47  ;;  %v8557_v24 = vpop.eup %8556  ;;  %8572 = vpow2.f32 %v7245_v50  ;;  %v3057_v46 = vmax.f32 %v3056_v61, %v11910_v58  ;;  %v2789_v10 = vadd.f32 %v2788_v9, %v11914_v47  ;;  %v3070_v15 = vmax.f32 %v3069_v42, %v11914_v47  ;;  %v14399_v61 = vld [vmem:[#allocation99_spill] sm:$0xff]  ;;  %v14402_v42 = vld [vmem:[#allocation152_spill] sm:$0xff] }
 0x373   :  { %14390 = vst [vmem:[#allocation102_spill] sm:$0xff] %v11926_v7  ;;  %14392 = vst [vmem:[#allocation107_spill] sm:$0xff] %v11930_v48  ;;  %v2157_v41 = vadd.f32 1.0, %v8557_v24  ;;  %7544 = vmatpush3.bf16.msra.mxu1 %v7745_v53  ;;  %v11941_v51 = vmul.f32 %v11851_v33, %v14393_v4  ;;  %v2777_v20 = vadd.f32 %v2776_v12, %v11926_v7  ;;  %v14397_v33 = vld [vmem:[#allocation153_spill] sm:$0xff] }
 0x374   :  { %v8559_v31 = vpop.eup %8558  ;;  %7545 = vmatprep.subr.bf16.mxu1 %v7746_v37  ;;  %v3058_v19 = vmax.f32 %v3057_v46, %v11926_v7  ;;  %v2790_v30 = vadd.f32 %v2789_v10, %v11930_v48  ;;  %v11951_v54 = vmul.f32 %v11814_v55, %v14395_v59  ;;  %v11955_v44 = vmul.f32 %v11835_v34, %v14397_v33  ;;  %v14404_v37 = vld [vmem:[#allocation50_spill] sm:$0xff]  ;;  %v7751_v33 = vld [vmem:[%s13507_s7 + $0x230] sm:$0xff]  }
 0x375   :  { %14394 = vst [vmem:[#allocation105_spill] sm:$0xff] %v11941_v51  ;;  %8574 = vrcp.f32 %v2157_v41  ;;  %v11959_v9 = vmul.f32 %v11874_v1, %v14399_v61  ;;  %v11962_v13 = vmul.f32 %v8551_v0, %v14401_v17  ;;  %v3071_v53 = vmax.f32 %v3070_v15, %v11930_v48  ;;  %v7749_v1 = vld [vmem:[%s13507_s7 + $0x228] sm:$0xff]   ;;  %v14465_v7 = vld [vmem:[#allocation144_spill] sm:$0xff] }
 0x376   :  { %v8561_v5 = vpop.eup %8560  ;;  %14396 = vst [vmem:[#allocation37_spill] sm:$0xff] %v11951_v54  ;;  %14398 = vst [vmem:[#allocation98_spill] sm:$0xff] %v11955_v44  ;;  %v11967_v55 = vmul.f32 %v11827_v16, %v14402_v42  ;;  %v11971_v24 = vmul.f32 %v11843_v3, %v14404_v37  ;;  %v2902_v23 = vadd.f32 %v11941_v51, %v11955_v44  ;;  %v7750_v3 = vld [vmem:[%s13507_s7 + $0x270] sm:$0xff]  }
 0x377   :  { %v8563_v26 = vpop.eup %8562  ;;  %14400 = vst [vmem:[#allocation155_spill] sm:$0xff] %v11959_v9  ;;  %v2166_v43 = vadd.f32 1.0, %v8561_v5  ;;  %7546 = vmatpush3.bf16.msra.mxu1 %v7747_v18  ;;  %v11979_v41 = vmul.f32 %v8553_v40, %v14406_v35  ;;  %v2778_v46 = vadd.f32 %v2777_v20, %v11951_v54  ;;  %v3183_v10 = vmax.f32 %v11955_v44, %v11941_v51  ;;  %v14449_v51 = vld [vmem:[#allocation133_spill] sm:$0xff] }
 0x378   :  { %v8565_v50 = vpop.eup %8564  ;;  %14403 = vst [vmem:[#allocation66_spill] sm:$0xff] %v11967_v55  ;;  %14405 = vst [vmem:[#allocation112_spill] sm:$0xff] %v11971_v24  ;;  %v2167_v34 = vadd.f32 1.0, %v8563_v26  ;;  %7547 = vmatprep.subr.bf16.mxu1 %v7748_v27  ;;  %v2915_v40 = vadd.f32 %v11959_v9, %v11971_v24  ;;  %v3196_v4 = vmax.f32 %v11971_v24, %v11959_v9 }
 0x379   :  { %v8567_v0 = vpop.eup %8566  ;;  %8576 = vrcp.f32 %v2166_v43  ;;  %v2176_v16 = vadd.f32 1.0, %v8565_v50  ;;  %v2903_v27 = vadd.f32 %v2902_v23, %v11962_v13  ;;  %v3184_v59 = vmax.f32 %v3183_v10, %v11962_v13 }
 0x37a   :  { %v8569_v12 = vpop.eup %8568  ;;  %8578 = vrcp.f32 %v2167_v34  ;;  %v2177_v18 = vadd.f32 1.0, %v8567_v0  ;;  %v11994_v20 = vmul.f32 %v8555_v14, %v11702_v6  ;;  %v2916_v61 = vadd.f32 %v2915_v40, %v11979_v41  ;;  %v7752_v6 = vld [vmem:[%s13507_s7 + $0x278] sm:$0xff]  }
 0x37b   :  { %v8571_v15 = vpop.eup %8570  ;;  %8580 = vrcp.f32 %v2176_v16  ;;  %7548 = vmatpush3.bf16.msra.mxu1 %v7749_v1  ;;  %v3197_v17 = vmax.f32 %v3196_v4, %v11979_v41  ;;  %v12002_v43 = vmul.f32 %v8559_v31, %v11709_v49  ;;  %v2791_v14 = vadd.f32 %v2790_v30, %v11967_v55  ;;  %v7753_v30 = vld [vmem:[%s13507_s7 + $0x238] sm:$0xff]  }
 0x37c   :  { %v8573_v5 = vpop.eup %8572  ;;  %8582 = vrcp.f32 %v2177_v18  ;;  %v2186_v26 = vadd.f32 1.0, %v8571_v15  ;;  %7549 = vmatprep.subr.bf16.mxu1 %v7750_v3  ;;  %v12009_v42 = vmul.f32 %v8569_v12, %v11749_v29  ;;  %v3059_v34 = vmax.f32 %v3058_v19, %v11951_v54  ;;  %v14460_v54 = vld [vmem:[#allocation146_spill] sm:$0xff] }
 0x37d   :  { %v2187_v50 = vadd.f32 1.0, %v8573_v5  ;;  %v2904_v1 = vadd.f32 %v2903_v27, %v11994_v20  ;;  %v3185_v49 = vmax.f32 %v3184_v59, %v11994_v20  ;;  %v2779_v0 = vrot.slane %v2778_v46, 4 }
 0x37e   :  { %14407 = vst [vmem:[#allocation74_spill] sm:$0xff] %v12009_v42  ;;  %8584 = vrcp.f32 %v2186_v26  ;;  %v3072_v29 = vmax.f32 %v3071_v53, %v11967_v55  ;;  %v2917_v23 = vadd.f32 %v2916_v61, %v12002_v43  ;;  %v3198_v35 = vmax.f32 %v3197_v17, %v12002_v43 }
 0x37f   :  { %v8575_v37 = vpop.eup %8574  ;;  %8586 = vrcp.f32 %v2187_v50  ;;  %7550 = vmatpush3.bf16.msra.mxu1 %v7751_v33  ;;  %v2792_v19 = vrot.slane %v2791_v14, 4  ;;  %v2905_v16 = vadd.f32 %v2904_v1, %v12009_v42  ;;  %v3186_v3 = vmax.f32 %v3185_v49, %v12009_v42  ;;  %v14459_v42 = vld [vmem:[#allocation139_spill] sm:$0xff] }
 0x380   :  { %v12015_v31 = vmul.f32 %v8575_v37, %v11818_v38  ;;  %7551 = vmatprep.subr.bf16.mxu1 %v7752_v6  ;;  %v3060_v15 = vrot.slane %v3059_v34, 4  ;;  %v2780_v4 = vadd.f32 %v2779_v0, %v2778_v46  ;;  %v3073_v27 = vrot.slane %v3072_v29, 4 }
 0x381   :  { %v2793_v26 = vadd.f32 %v2792_v19, %v2791_v14 }
 0x382   :  { %14408 = vst [vmem:[#allocation148_spill] sm:$0xff] %v12015_v31  ;;  %v2918_v12 = vadd.f32 %v2917_v23, %v12015_v31  ;;  %v3199_v10 = vmax.f32 %v3198_v35, %v12015_v31  ;;  %v3061_v37 = vmax.f32 %v3059_v34, %v3060_v15  ;;  %v2781_v49 = vrot.slane %v2780_v4, 2  ;;  %v14463_v31 = vld [vmem:[#allocation19_spill] sm:$0xff] }
 0x383   :  { %v8577_v38 = vpop.eup %8576  ;;  %7552 = vmatpush3.bf16.msra.mxu1 %v7753_v30  ;;  %v2794_v23 = vrot.slane %v2793_v26, 2  ;;  %v3074_v35 = vmax.f32 %v3072_v29, %v3073_v27 }
 0x384   :  { %v8579_v18 = vpop.eup %8578  ;;  %v12028_v40 = vmul.f32 %v8577_v38, %v11856_v28  ;;  %v2782_v38 = vadd.f32 %v2781_v49, %v2780_v4 }
 0x385   :  { %v8581_v53 = vpop.eup %8580  ;;  %v12031_v5 = vmul.f32 %v8579_v18, %v11863_v57  ;;  %v2795_v15 = vadd.f32 %v2794_v23, %v2793_v26 }
 0x386   :  { %14409 = vst [vmem:[#allocation149_spill] sm:$0xff] %v12028_v40  ;;  %v8583_v59 = vpop.eup %8582  ;;  %v2906_v33 = vadd.f32 %v2905_v16, %v12028_v40  ;;  %v3187_v61 = vmax.f32 %v3186_v3, %v12028_v40  ;;  %v12036_v17 = vmul.f32 %v8581_v53, %v11866_v39  ;;  %v14464_v40 = vld [vmem:[#allocation140_spill] sm:$0xff] }
 0x387   :  { %14410 = vst [vmem:[#allocation103_spill] sm:$0xff] %v12031_v5  ;;  %v2919_v50 = vadd.f32 %v2918_v12, %v12031_v5  ;;  %v3200_v28 = vmax.f32 %v3199_v10, %v12031_v5  ;;  %v12041_v6 = vmul.f32 %v8583_v59, %v11869_v32  ;;  %v3062_v12 = vrot.slane %v3061_v37, 2  ;;  %v14453_v5 = vld [vmem:[#allocation53_spill] sm:$0xff] }
 0x388   :  { %14411 = vst [vmem:[#allocation151_spill] sm:$0xff] %v12036_v17  ;;  %v8585_v46 = vpop.eup %8584  ;;  %v2907_v57 = vadd.f32 %v2906_v33, %v12036_v17  ;;  %v3188_v14 = vmax.f32 %v3187_v61, %v12036_v17  ;;  %v2783_v61 = vrot.slane %v2782_v38, 1 }
 0x389   :  { %14412 = vst [vmem:[#allocation153_spill] sm:$0xff] %v12041_v6  ;;  %v8587_v1 = vpop.eup %8586  ;;  %v2920_v30 = vadd.f32 %v2919_v50, %v12041_v6  ;;  %v3201_v39 = vmax.f32 %v3200_v28, %v12041_v6  ;;  %v12048_v0 = vmul.f32 %v8585_v46, %v11885_v2  ;;  %v3075_v2 = vrot.slane %v3074_v35, 2 }
 0x38a   :  { %v12051_v32 = vmul.f32 %v8587_v1, %v11888_v36  ;;  %v3063_v50 = vmax.f32 %v3061_v37, %v3062_v12  ;;  %v2796_v1 = vrot.slane %v2795_v15, 1  ;;  %v2784_v6 = vadd.f32 %v2783_v61, %v2782_v38 }
 0x38b   :  { %14413 = vst [vmem:[#allocation99_spill] sm:$0xff] %v12048_v0  ;;  %v2908_v34 = vadd.f32 %v2907_v57, %v12048_v0  ;;  %v3189_v19 = vmax.f32 %v3188_v14, %v12048_v0 }
 0x38c   :  { %14414 = vst [vmem:[#allocation88_spill] sm:$0xff] %v12051_v32  ;;  %v2921_v16 = vadd.f32 %v2920_v30, %v12051_v32  ;;  %v3202_v3 = vmax.f32 %v3201_v39, %v12051_v32  ;;  %v3076_v30 = vmax.f32 %v3074_v35, %v3075_v2  ;;  %v3064_v26 = vrot.slane %v3063_v50, 1 }
 0x38d   :  { %v2909_v10 = vrot.slane %v2908_v34, 4  ;;  %v3190_v18 = vrot.slane %v3189_v19, 4 }
 0x38e   :  { %v2922_v53 = vrot.slane %v2921_v16, 4  ;;  %v3203_v59 = vrot.slane %v3202_v3, 4  ;;  %v3065_v17 = vmax.f32 %v3063_v50, %v3064_v26  ;;  %v7765_v26 = vld [vmem:[%s13508_s9 + $0x5c] ss:$40 sps:$4 sm:$0xff]  }
 0x38f   :  { %v2910_v29 = vadd.f32 %v2909_v10, %v2908_v34  ;;  %v3191_v27 = vmax.f32 %v3189_v19, %v3190_v18  ;;  %v2797_v34 = vadd.f32 %v2796_v1, %v2795_v15  ;;  %v7757_v1 = vld [vmem:[%s13508_s9 + $0x8] ss:$40 sps:$4 sm:$0xff]  }
 0x390   :  { %v2923_v36 = vadd.f32 %v2922_v53, %v2921_v16  ;;  %v3204_v33 = vmax.f32 %v3202_v3, %v3203_v59  ;;  %v3077_v16 = vrot.slane %v3076_v30, 1  ;;  %v2937_v53 = vmul.f32 0.015625, %v2784_v6 }
 0x391   :  { %v2911_v28 = vrot.slane %v2910_v29, 2  ;;  %v3192_v46 = vrot.slane %v3191_v27, 2  ;;  %v2938_v35 = vmul.f32 0.015625, %v2797_v34  ;;  %v7766_v34 = vld [vmem:[%s13508_s9 + $0xa0] ss:$40 sps:$4 sm:$0xff]  }
 0x392   :  { %v2924_v57 = vrot.slane %v2923_v36, 2  ;;  %v3205_v14 = vrot.slane %v3204_v33, 2 }
 0x393   :  { %v2912_v4 = vadd.f32 %v2911_v28, %v2910_v29  ;;  %v3193_v49 = vmax.f32 %v3191_v27, %v3192_v46  ;;  %v3078_v29 = vmax.f32 %v3076_v30, %v3077_v16  ;;  %v7759_v30 = vld [vmem:[%s13508_s9 + $0xc] ss:$40 sps:$4 sm:$0xff]   ;;  %v7769_v16 = vld [vmem:[%s13508_s9 + $0xa8] ss:$40 sps:$4 sm:$0xff]  }
 0x394   :  { %v2925_v39 = vadd.f32 %v2924_v57, %v2923_v36  ;;  %v3206_v32 = vmax.f32 %v3204_v33, %v3205_v14  ;;  %v7756_v57 = vld [vmem:[%s13508_s9 + $0x4] ss:$40 sps:$4 sm:$0xff]   ;;  %4736 = vmatprep.subr.bf16.mxu1 %v7759_v30 }
 0x395   :  { %v2913_v23 = vrot.slane %v2912_v4, 1  ;;  %v3194_v0 = vrot.slane %v3193_v49, 1  ;;  %4695 = vmatprep.subr.bf16.mxu0 %v7756_v57  ;;  %v7246_v57 = vld [vmem:[%s13509_s8] ss:$0 sm:$0xff] }
 0x396   :  { %v2926_v19 = vrot.slane %v2925_v39, 1  ;;  %v3207_v3 = vrot.slane %v3206_v32, 1 }
 0x397   :  { %v2914_v10 = vadd.f32 %v2913_v23, %v2912_v4  ;;  %v3195_v37 = vmax.f32 %v3193_v49, %v3194_v0  ;;  %v7760_v4 = vld [vmem:[%s13508_s9 + $0x50] ss:$40 sps:$4 sm:$0xff]   ;;  %v7762_v49 = vld [vmem:[%s13508_s9 + $0x54] ss:$40 sps:$4 sm:$0xff]   ;;  %v7768_v23 = vld [vmem:[%s13508_s9 + $0xa4] ss:$40 sps:$4 sm:$0xff]  }
 0x398   :  { %v2927_v12 = vadd.f32 %v2926_v19, %v2925_v39  ;;  %v3208_v18 = vmax.f32 %v3206_v32, %v3207_v3  ;;  %v7763_v39 = vld [vmem:[%s13508_s9 + $0x58] ss:$40 sps:$4 sm:$0xff]   ;;  %v7771_v19 = vld [vmem:[%s13508_s9 + $0xac] ss:$40 sps:$4 sm:$0xff]  }
 0x399   :  { %v2947_v59 = vmul.f32 0.015625, %v2914_v10  ;;  %v3279_v36 = vsel %vm3270_vm2, %v3195_v37, %v3065_v17  ;;  %v7754_v17 = vld [vmem:[%s13508_s9] ss:$40 sps:$4 sm:$0xff]   ;;  %v7774_v3 = vld [vmem:[%s13508_s9 + $0xf4] ss:$40 sps:$4 sm:$0xff]  }
 0x39a   :  { %v2948_v2 = vmul.f32 0.015625, %v2927_v12  ;;  %v3280_v15 = vsel %vm3270_vm2, %v3208_v18, %v3078_v29  ;;  %4696 = vmatpush1.bf16.msra.mxu0 %v7754_v17  ;;  %v7777_v10 = vld [vmem:[%s13508_s9 + $0xfc] ss:$40 sps:$4 sm:$0xff]   ;;  %v7772_v37 = vld [vmem:[%s13508_s9 + $0xf0] ss:$40 sps:$4 sm:$0xff]   ;;  %vm6076_vm2 = vcmask 1048512  }
 0x39b   :  { %v3238_v27 = vsel %vm3229_vm1, %v2947_v59, %v2937_v53  ;;  %4697 = vmatprep.subr.bf16.mxu0 %v7762_v49  ;;  %v7775_v12 = vld [vmem:[%s13508_s9 + $0xf8] ss:$40 sps:$4 sm:$0xff]   ;;  %v7780_v18 = vld [vmem:[%s13508_s9 + $0x144] ss:$40 sps:$4 sm:$0xff]   ;;  %v7804_v17 = vld [vmem:[%s13508_s9 + $0x14] ss:$40 sps:$4 sm:$0xff]  }
 0x39c   :  { %v3239_v38 = vsel %vm3229_vm1, %v2948_v2, %v2938_v35  ;;  %v3300_v33 = vsel %vm3291_vm3, %v3238_v27, %v3279_v36  ;;  %v7778_v53 = vld [vmem:[%s13508_s9 + $0x140] ss:$40 sps:$4 sm:$0xff]   ;;  %v7783_v59 = vld [vmem:[%s13508_s9 + $0x14c] ss:$40 sps:$4 sm:$0xff]   ;;  %v7789_v29 = vld [vmem:[%s13508_s9 + $0x19c] ss:$40 sps:$4 sm:$0xff]  }
 0x39d   :  { %v3301_v0 = vsel %vm3291_vm3, %v3239_v38, %v3280_v15  ;;  %v3310_v32 = vpack.c.bf16 %v3300_v33, %v3300_v33  ;;  %v7781_v35 = vld [vmem:[%s13508_s9 + $0x148] ss:$40 sps:$4 sm:$0xff]   ;;  %v7786_v2 = vld [vmem:[%s13508_s9 + $0x194] ss:$40 sps:$4 sm:$0xff]   ;;  %v7787_v36 = vld [vmem:[%s13508_s9 + $0x198] ss:$40 sps:$4 sm:$0xff]  }
 0x39e   :  { %v3311_v61 = vpack.c.bf16 %v3301_v0, %v3301_v0  ;;  %4698 = vmatpush1.bf16.msra.mxu0 %v7760_v4  ;;  %v7784_v27 = vld [vmem:[%s13508_s9 + $0x190] ss:$40 sps:$4 sm:$0xff]   ;;  %v7790_v38 = vld [vmem:[%s13508_s9 + $0x1e0] ss:$40 sps:$4 sm:$0xff]   ;;  %v7792_v15 = vld [vmem:[%s13508_s9 + $0x1e4] ss:$40 sps:$4 sm:$0xff]  }
 0x39f   :  { %4699 = vmatprep.subr.bf16.mxu0 %v7768_v23  ;;  %v7793_v33 = vld [vmem:[%s13508_s9 + $0x1e8] ss:$40 sps:$4 sm:$0xff]   ;;  %v7795_v0 = vld [vmem:[%s13508_s9 + $0x1ec] ss:$40 sps:$4 sm:$0xff]   ;;  %vm5965_vm3 = vcmask 523712  }
 0x3a0   :  { %4151 = vmatprep.mubr.bf16.mxu1 %v3311_v61  ;;  %v7798_v61 = vld [vmem:[%s13508_s9 + $0x234] ss:$40 sps:$4 sm:$0xff]  }
 0x3a1   :  { %4152 = vmatmul.mubr.bf16.vlgmr.msra.gmra.mrb[112].mxu1 %v3310_v32  ;;  %v7801_v32 = vld [vmem:[%s13508_s9 + $0x23c] ss:$40 sps:$4 sm:$0xff]  }
 0x3a2   :  { %4768 = vmatprep.mubr.bf16.mxu1 %v14385_v52  ;;  %4737 = vmatpush1.bf16.msra.mxu1 %v7757_v1 }
 0x3a3   :  { %4738 = vmatprep.subr.bf16.mxu1 %v7765_v26  ;;  %4700 = vmatpush1.bf16.msra.mxu0 %v7766_v34 }
 0x3a4   :  { %4701 = vmatprep.subr.bf16.mxu0 %v7774_v3 }
 0x3a6   :  { %4739 = vmatpush1.bf16.msra.mxu1 %v7763_v39 }
 0x3a7   :  { %4740 = vmatprep.subr.bf16.mxu1 %v7771_v19  ;;  %4702 = vmatpush1.bf16.msra.mxu0 %v7772_v37 }
 0x3a8   :  { %4703 = vmatprep.subr.bf16.mxu0 %v7780_v18 }
 0x3aa   :  { %4741 = vmatpush1.bf16.msra.mxu1 %v7769_v16 }
 0x3ab   :  { %4742 = vmatprep.subr.bf16.mxu1 %v7777_v10  ;;  %4704 = vmatpush1.bf16.msra.mxu0 %v7778_v53 }
 0x3ac   :  { %4705 = vmatprep.subr.bf16.mxu0 %v7786_v2 }
 0x3ae   :  { %4743 = vmatpush1.bf16.msra.mxu1 %v7775_v12 }
 0x3af   :  { %4744 = vmatprep.subr.bf16.mxu1 %v7783_v59  ;;  %4706 = vmatpush1.bf16.msra.mxu0 %v7784_v27 }
 0x3b0   :  { %4707 = vmatprep.subr.bf16.mxu0 %v7792_v15 }
 0x3b2   :  { %4745 = vmatpush1.bf16.msra.mxu1 %v7781_v35 }
 0x3b3   :  { %4746 = vmatprep.subr.bf16.mxu1 %v7789_v29  ;;  %4708 = vmatpush1.bf16.msra.mxu0 %v7790_v38 }
 0x3b4   :  { %4709 = vmatprep.subr.bf16.mxu0 %v7798_v61 }
 0x3b6   :  { %4747 = vmatpush1.bf16.msra.mxu1 %v7787_v36 }
 0x3b7   :  { %4748 = vmatprep.subr.bf16.mxu1 %v7795_v0  ;;  %v7805_v0 = vld [vmem:[%s13508_s9 + $0x18] ss:$40 sps:$4 sm:$0xff]  }
 0x3ba   :  { %4749 = vmatpush1.bf16.msra.mxu1 %v7793_v33  ;;  %v7802_v33 = vld [vmem:[%s13508_s9 + $0x10] ss:$40 sps:$4 sm:$0xff]  }
 0x3bb   :  { %4750 = vmatprep.subr.bf16.mxu1 %v7801_v32  ;;  %v7810_v32 = vld [vmem:[%s13508_s9 + $0x64] ss:$40 sps:$4 sm:$0xff]  }
 0x3c1   :  { %v7465_v6 = vpop.f32.mrb[68].mxu0 }
 0x3c2   :  { %v7466_v50 = vpop.f32.mrb[69].mxu0 }
 0x3c3   :  { %v12067_v28 = vadd.f32 %v7466_v50, %v7465_v6  ;;  %v7468_v46 = vpop.f32.mrb[70].mxu0  ;;  %v7796_v6 = vld [vmem:[%s13508_s9 + $0x230] ss:$40 sps:$4 sm:$0xff]  }
 0x3c4   :  { %v7469_v14 = vpop.f32.mrb[71].mxu0  ;;  %v7799_v50 = vld [vmem:[%s13508_s9 + $0x238] ss:$40 sps:$4 sm:$0xff]   ;;  %v7807_v46 = vld [vmem:[%s13508_s9 + $0x1c] ss:$40 sps:$4 sm:$0xff]   ;;  %4710 = vmatpush1.bf16.msra.mxu0 %v7796_v6 }
 0x3c5   :  { %4751 = vmatpush1.bf16.msra.mxu1 %v7799_v50  ;;  %4777 = vmatprep.subr.bf16.mxu0 %v7804_v17  ;;  %v3994_v30 = vadd.f32 %v12067_v28, %v7246_v57  ;;  %v7813_v6 = vld [vmem:[%s13508_s9 + $0x6c] ss:$40 sps:$4 sm:$0xff]   ;;  %v7808_v50 = vld [vmem:[%s13508_s9 + $0x60] ss:$40 sps:$4 sm:$0xff]   ;;  %v7819_v57 = vld [vmem:[%s13508_s9 + $0xbc] ss:$40 sps:$4 sm:$0xff]  }
 0x3c6   :  { %4818 = vmatprep.subr.bf16.mxu1 %v7807_v46  ;;  %v7811_v17 = vld [vmem:[%s13508_s9 + $0x68] ss:$40 sps:$4 sm:$0xff]   ;;  %v7816_v46 = vld [vmem:[%s13508_s9 + $0xb4] ss:$40 sps:$4 sm:$0xff]  }
 0x407   :  { %v7487_v14 = vpop.f32.mrb[72].mxu0 }
 0x408   :  { %v7488_v1 = vpop.f32.mrb[73].mxu0 }
 0x409   :  { %v7489_v4 = vadd.f32 %v7488_v1, %v7487_v14  ;;  %v7490_v49 = vpop.f32.mrb[74].mxu0  ;;  %v7814_v14 = vld [vmem:[%s13508_s9 + $0xb0] ss:$40 sps:$4 sm:$0xff]  }
 0x40a   :  { %v7491_v39 = vpop.f32.mrb[75].mxu0  ;;  %v7817_v1 = vld [vmem:[%s13508_s9 + $0xb8] ss:$40 sps:$4 sm:$0xff]  }
 0x40b   :  { %v4034_v26 = vadd.f32 %v7489_v4, %v3994_v30  ;;  %v7822_v30 = vld [vmem:[%s13508_s9 + $0x104] ss:$40 sps:$4 sm:$0xff]   ;;  %v7820_v49 = vld [vmem:[%s13508_s9 + $0x100] ss:$40 sps:$4 sm:$0xff]  }
 0x40c   :  { %v7825_v4 = vld [vmem:[%s13508_s9 + $0x10c] ss:$40 sps:$4 sm:$0xff]   ;;  %v7823_v39 = vld [vmem:[%s13508_s9 + $0x108] ss:$40 sps:$4 sm:$0xff]  }
 0x439   :  { %v7509_v23 = vpop.f32.mrb[108].mxu1 }
 0x43a   :  { %v7510_v34 = vpop.f32.mrb[109].mxu1 }
 0x43b   :  { %v7511_v19 = vadd.f32 %v7510_v34, %v7509_v23  ;;  %v7512_v16 = vpop.f32.mrb[110].mxu1  ;;  %v7831_v23 = vld [vmem:[%s13508_s9 + $0x15c] ss:$40 sps:$4 sm:$0xff]   ;;  %v7826_v34 = vld [vmem:[%s13508_s9 + $0x150] ss:$40 sps:$4 sm:$0xff]  }
 0x43c   :  { %v7513_v3 = vpop.f32.mrb[111].mxu1  ;;  %v7834_v16 = vld [vmem:[%s13508_s9 + $0x1a4] ss:$40 sps:$4 sm:$0xff]  }
 0x43d   :  { %v4074_v10 = vadd.f32 %v7511_v19, %v4034_v26  ;;  %v7828_v26 = vld [vmem:[%s13508_s9 + $0x154] ss:$40 sps:$4 sm:$0xff]   ;;  %v7829_v19 = vld [vmem:[%s13508_s9 + $0x158] ss:$40 sps:$4 sm:$0xff]  }
 0x43e   :  { %v7837_v3 = vld [vmem:[%s13508_s9 + $0x1ac] ss:$40 sps:$4 sm:$0xff]  }
 0x440   :  { %v7531_v37 = vpop.f32.mrb[76].mxu0 }
 0x441   :  { %v7532_v12 = vpop.f32.mrb[77].mxu0 }
 0x442   :  { %v7533_v18 = vadd.f32 %v7532_v12, %v7531_v37  ;;  %v7534_v53 = vpop.f32.mrb[78].mxu0  ;;  %v7835_v37 = vld [vmem:[%s13508_s9 + $0x1a8] ss:$40 sps:$4 sm:$0xff]   ;;  %v7840_v12 = vld [vmem:[%s13508_s9 + $0x1f4] ss:$40 sps:$4 sm:$0xff]  }
 0x443   :  { %v7535_v59 = vpop.f32.mrb[79].mxu0  ;;  %v7838_v53 = vld [vmem:[%s13508_s9 + $0x1f0] ss:$40 sps:$4 sm:$0xff]  }
 0x444   :  { %v4114_v35 = vadd.f32 %v7533_v18, %v4074_v10  ;;  %v7832_v10 = vld [vmem:[%s13508_s9 + $0x1a0] ss:$40 sps:$4 sm:$0xff]   ;;  %v7843_v18 = vld [vmem:[%s13508_s9 + $0x1fc] ss:$40 sps:$4 sm:$0xff]  }
 0x445   :  { %v7841_v59 = vld [vmem:[%s13508_s9 + $0x1f8] ss:$40 sps:$4 sm:$0xff]  }
 0x474   :  { %v7553_v2 = vpop.f32.mrb[112].mxu1 }
 0x475   :  { %v7554_v29 = vpop.f32.mrb[113].mxu1 }
 0x476   :  { %v7555_v27 = vadd.f32 %v7554_v29, %v7553_v2  ;;  %v7556_v28 = vpop.f32.mrb[114].mxu1  ;;  %v7849_v2 = vld [vmem:[%s13508_s9 + $0x24c] ss:$40 sps:$4 sm:$0xff]   ;;  %v7844_v29 = vld [vmem:[%s13508_s9 + $0x240] ss:$40 sps:$4 sm:$0xff]  }
 0x477   :  { %v7557_v36 = vpop.f32.mrb[115].mxu1  ;;  %v7852_v28 = vld [vmem:[%s13508_s9 + $0x24] ss:$40 sps:$4 sm:$0xff]  }
 0x478   :  { %v4154_v38 = vadd.f32 %v7555_v27, %v4114_v35  ;;  %v7846_v35 = vld [vmem:[%s13508_s9 + $0x244] ss:$40 sps:$4 sm:$0xff]   ;;  %v7847_v27 = vld [vmem:[%s13508_s9 + $0x248] ss:$40 sps:$4 sm:$0xff]  }
 0x479   :  { %v7850_v36 = vld [vmem:[%s13508_s9 + $0x20] ss:$40 sps:$4 sm:$0xff]  }
 0x47a   :  { %v4159_v15 = vmax.f32 %v4154_v38, 0.0  ;;  %v7855_v38 = vld [vmem:[%s13508_s9 + $0x74] ss:$40 sps:$4 sm:$0xff]  }
 0x47c   :  { %v12178_v61 = vpack.c.bf16 %v4159_v15, %v4159_v15  ;;  %v7853_v15 = vld [vmem:[%s13508_s9 + $0x70] ss:$40 sps:$4 sm:$0xff]  }
 0x47e   :  { %4728 = vmatmul.mubr.bf16.vlgmr.msra.gmra.mrb[80].mxu0 %v12178_v61  ;;  %4769 = vmatmul.mubr.bf16.vlgmr.msra.gmra.mrb[116].mxu1 %v12178_v61 }
 0x47f   :  { %4778 = vmatpush1.bf16.msra.mxu0 %v7802_v33  ;;  %4819 = vmatpush1.bf16.msra.mxu1 %v7805_v0  ;;  %v7858_v33 = vld [vmem:[%s13508_s9 + $0xc4] ss:$40 sps:$4 sm:$0xff]   ;;  %v7856_v0 = vld [vmem:[%s13508_s9 + $0xc0] ss:$40 sps:$4 sm:$0xff]  }
 0x480   :  { %4779 = vmatprep.subr.bf16.mxu0 %v7810_v32  ;;  %4820 = vmatprep.subr.bf16.mxu1 %v7813_v6  ;;  %v7861_v32 = vld [vmem:[%s13508_s9 + $0x114] ss:$40 sps:$4 sm:$0xff]   ;;  %v7859_v6 = vld [vmem:[%s13508_s9 + $0x110] ss:$40 sps:$4 sm:$0xff]  }
 0x481   :  { %4809 = vmatprep.mubr.bf16.mxu0 %v14385_v52  ;;  %4850 = vmatprep.mubr.bf16.mxu1 %v14385_v52 }
 0x483   :  { %4780 = vmatpush1.bf16.msra.mxu0 %v7808_v50  ;;  %4821 = vmatpush1.bf16.msra.mxu1 %v7811_v17  ;;  %v7864_v50 = vld [vmem:[%s13508_s9 + $0x164] ss:$40 sps:$4 sm:$0xff]   ;;  %v7862_v17 = vld [vmem:[%s13508_s9 + $0x160] ss:$40 sps:$4 sm:$0xff]  }
 0x484   :  { %4781 = vmatprep.subr.bf16.mxu0 %v7816_v46  ;;  %4822 = vmatprep.subr.bf16.mxu1 %v7819_v57  ;;  %v7867_v46 = vld [vmem:[%s13508_s9 + $0x1b4] ss:$40 sps:$4 sm:$0xff]   ;;  %v7865_v57 = vld [vmem:[%s13508_s9 + $0x1b0] ss:$40 sps:$4 sm:$0xff]  }
 0x487   :  { %4782 = vmatpush1.bf16.msra.mxu0 %v7814_v14  ;;  %4823 = vmatpush1.bf16.msra.mxu1 %v7817_v1  ;;  %v7870_v14 = vld [vmem:[%s13508_s9 + $0x204] ss:$40 sps:$4 sm:$0xff]   ;;  %v7868_v1 = vld [vmem:[%s13508_s9 + $0x200] ss:$40 sps:$4 sm:$0xff]  }
 0x488   :  { %4783 = vmatprep.subr.bf16.mxu0 %v7822_v30  ;;  %4824 = vmatprep.subr.bf16.mxu1 %v7825_v4  ;;  %v7873_v30 = vld [vmem:[%s13508_s9 + $0x254] ss:$40 sps:$4 sm:$0xff]   ;;  %v7871_v4 = vld [vmem:[%s13508_s9 + $0x250] ss:$40 sps:$4 sm:$0xff]  }
 0x48b   :  { %4784 = vmatpush1.bf16.msra.mxu0 %v7820_v49  ;;  %4825 = vmatpush1.bf16.msra.mxu1 %v7823_v39  ;;  %v13734_v49 = vmov 0.0   ;;  %v7874_v39 = vld [vmem:[%s13510_s11] sm:$0xff]  }
 0x48c   :  { %4785 = vmatprep.subr.bf16.mxu0 %v7828_v26  ;;  %4826 = vmatprep.subr.bf16.mxu1 %v7831_v23  ;;  %v7875_v26 = vld [vmem:[%s13510_s11 + $0x8] sm:$0xff]   ;;  %v7877_v23 = vld [vmem:[%s13510_s11 + $0x18] sm:$0xff]  }
 0x48f   :  { %4786 = vmatpush1.bf16.msra.mxu0 %v7826_v34  ;;  %4827 = vmatpush1.bf16.msra.mxu1 %v7829_v19  ;;  %v7878_v34 = vld [vmem:[%s13510_s11 + $0x20] sm:$0xff]   ;;  %v7879_v19 = vld [vmem:[%s13510_s11 + $0x28] sm:$0xff]  }
 0x490   :  { %4787 = vmatprep.subr.bf16.mxu0 %v7834_v16  ;;  %4828 = vmatprep.subr.bf16.mxu1 %v7837_v3  ;;  %v7880_v16 = vld [vmem:[%s13510_s11 + $0x30] sm:$0xff]   ;;  %v7881_v3 = vld [vmem:[%s13510_s11 + $0x38] sm:$0xff]  }
 0x493   :  { %4788 = vmatpush1.bf16.msra.mxu0 %v7832_v10  ;;  %4829 = vmatpush1.bf16.msra.mxu1 %v7835_v37  ;;  %v12356_v10 = vld [vmem:[%s13511_s10] sm:$0xff]  ;;  %v14415_v37 = vld [vmem:[#allocation3_spill] sm:$0xff] }
 0x494   :  { %4789 = vmatprep.subr.bf16.mxu0 %v7840_v12  ;;  %4830 = vmatprep.subr.bf16.mxu1 %v7843_v18  ;;  %v4248_v12 = vrot.slane %v12356_v10, %v14415_v37  ;;  %v14416_v18 = vld [vmem:[#allocation4_spill] sm:$0xff] }
 0x497   :  { %4790 = vmatpush1.bf16.msra.mxu0 %v7838_v53  ;;  %4831 = vmatpush1.bf16.msra.mxu1 %v7841_v59  ;;  %v4256_v53 = vrot.slane %v12356_v10, %v14416_v18  ;;  %v14417_v59 = vld [vmem:[#allocation5_spill] sm:$0xff] }
 0x498   :  { %4791 = vmatprep.subr.bf16.mxu0 %v7846_v35  ;;  %4832 = vmatprep.subr.bf16.mxu1 %v7849_v2  ;;  %v4252_v35 = vrot.slane %v12356_v10, %v14417_v59  ;;  %v14418_v2 = vld [vmem:[#allocation6_spill] sm:$0xff] }
 0x49b   :  { %4792 = vmatpush1.bf16.msra.mxu0 %v7844_v29  ;;  %4833 = vmatpush1.bf16.msra.mxu1 %v7847_v27  ;;  %v4260_v29 = vrot.slane %v12356_v10, %v14418_v2 }
 0x49c   :  { %4859 = vmatprep.subr.bf16.mxu0 %v7852_v28  ;;  %7588 = vmatprep.subr.bf16.mxu1 %v13734_v49 }
 0x49e   :  { %4810 = vmatmul.mubr.bf16.vlgmr.msra.gmra.mrb[84].mxu0 %v12178_v61  ;;  %4851 = vmatmul.mubr.bf16.vlgmr.msra.gmra.mrb[120].mxu1 %v12178_v61 }
 0x49f   :  { %4860 = vmatpush1.bf16.msra.mxu0 %v7850_v36  ;;  %4891 = vmatprep.mubr.bf16.mxu0 %v14385_v52 }
 0x4a0   :  { %4861 = vmatprep.subr.bf16.mxu0 %v7855_v38  ;;  %7589 = vmatpush3.bf16.msra.mxu1 %v7874_v39 }
 0x4a1   :  { %7590 = vmatprep.subr.bf16.mxu1 %v13734_v49 }
 0x4a3   :  { %4862 = vmatpush1.bf16.msra.mxu0 %v7853_v15 }
 0x4a4   :  { %4863 = vmatprep.subr.bf16.mxu0 %v7858_v33  ;;  %7591 = vmatpush3.bf16.msra.mxu1 %v7875_v26 }
 0x4a5   :  { %7592 = vmatprep.subr.bf16.mxu1 %v13734_v49 }
 0x4a7   :  { %4864 = vmatpush1.bf16.msra.mxu0 %v7856_v0 }
 0x4a8   :  { %4865 = vmatprep.subr.bf16.mxu0 %v7861_v32 }
 0x4ab   :  { %4866 = vmatpush1.bf16.msra.mxu0 %v7859_v6 }
 0x4ac   :  { %4867 = vmatprep.subr.bf16.mxu0 %v7864_v50 }
 0x4af   :  { %4868 = vmatpush1.bf16.msra.mxu0 %v7862_v17 }
 0x4b0   :  { %4869 = vmatprep.subr.bf16.mxu0 %v7867_v46 }
 0x4b3   :  { %4870 = vmatpush1.bf16.msra.mxu0 %v7865_v57 }
 0x4b4   :  { %4871 = vmatprep.subr.bf16.mxu0 %v7870_v14 }
 0x4b7   :  { %4872 = vmatpush1.bf16.msra.mxu0 %v7868_v1 }
 0x4b8   :  { %4873 = vmatprep.subr.bf16.mxu0 %v7873_v30 }
 0x4bb   :  { %4874 = vmatpush1.bf16.msra.mxu0 %v7871_v4 }
 0x4be   :  { %4892 = vmatmul.mubr.bf16.vlgmr.msra.gmra.mrb[88].mxu0 %v12178_v61  ;;  %v7876_v61 = vld [vmem:[%s13510_s11 + $0x10] sm:$0xff]  }
 0x4bf   :  { %6275 = vmatprep.mubr.bf16.mxu0 %v14385_v52  ;;  %7593 = vmatpush3.bf16.msra.mxu1 %v7876_v61 }
 0x4c0   :  { %7594 = vmatprep.subr.bf16.mxu1 %v13734_v49 }
 0x4c3   :  { %7595 = vmatpush3.bf16.msra.mxu1 %v7877_v23 }
 0x4c4   :  { %7596 = vmatprep.subr.bf16.mxu1 %v13734_v49 }
 0x4c7   :  { %7597 = vmatpush3.bf16.msra.mxu1 %v7878_v34 }
 0x4c8   :  { %7598 = vmatprep.subr.bf16.mxu1 %v13734_v49 }
 0x4cb   :  { %7599 = vmatpush3.bf16.msra.mxu1 %v7879_v19 }
 0x4cc   :  { %7600 = vmatprep.subr.bf16.mxu1 %v13734_v49 }
 0x4cf   :  { %7601 = vmatpush3.bf16.msra.mxu1 %v7880_v16 }
 0x4d0   :  { %7602 = vmatprep.subr.bf16.mxu1 %v13734_v49 }
 0x4d3   :  { %7603 = vmatpush3.bf16.msra.mxu1 %v7881_v3 }
 0x551   :  { %v4729_v27 = vpop.f32.mrb[80].mxu0  ;;  %v4770_v28 = vpop.f32.mrb[116].mxu1 }
 0x552   :  { %v4730_v36 = vadd.f32 %v4729_v27, %v4248_v12  ;;  %v4771_v38 = vadd.f32 %v4770_v28, %v4256_v53  ;;  %v4731_v15 = vpop.f32.mrb[81].mxu0  ;;  %v4772_v33 = vpop.f32.mrb[117].mxu1 }
 0x553   :  { %v4732_v0 = vadd.f32 %v4731_v15, %v4252_v35  ;;  %v4773_v32 = vadd.f32 %v4772_v33, %v4260_v29  ;;  %v4733_v6 = vpop.f32.mrb[82].mxu0  ;;  %v4774_v50 = vpop.f32.mrb[118].mxu1 }
 0x554   :  { %v4910_v17 = vrot.slane %v4730_v36, 2  ;;  %v4912_v46 = vrot.slane %v4771_v38, 2  ;;  %v4734_v57 = vpop.f32.mrb[83].mxu0  ;;  %v4775_v14 = vpop.f32.mrb[119].mxu1  ;;  %v14420_v6 = vld [vmem:[#allocation100_spill] sm:$0xff] }
 0x555   :  { %v4911_v1 = vrot.slane %v4732_v0, 2  ;;  %v4913_v30 = vrot.slane %v4773_v32, 2  ;;  %v4272_v50 = vrot.slane %v12356_v10, %v14420_v6  ;;  %v14422_v57 = vld [vmem:[#allocation119_spill] sm:$0xff] }
 0x556   :  { %v4930_v4 = vadd.f32 %v4910_v17, %v4730_v36  ;;  %v4932_v39 = vadd.f32 %v4912_v46, %v4771_v38  ;;  %v8636_v38 = vmov 1966171168   ;;  %v14421_v17 = vld [vmem:[#allocation116_spill] sm:$0xff]  ;;  %v4276_v14 = vrot.slane %v12356_v10, %v14422_v57 }
 0x557   :  { %v4931_v26 = vadd.f32 %v4911_v1, %v4732_v0  ;;  %v4933_v61 = vadd.f32 %v4913_v30, %v4773_v32  ;;  %v5015_v15 = vunpack.c.l.s4 %v8636_v38  ;;  %v14419_v0 = vld [vmem:[#allocation27_spill] sm:$0xff]  ;;  %v4268_v46 = vrot.slane %v12356_v10, %v14421_v17 }
 0x558   :  { %v7407_v23 = vmul.f32 -1.442695, %v4930_v4  ;;  %v7409_v34 = vmul.f32 -1.442695, %v4932_v39  ;;  %v4264_v32 = vrot.slane %v12356_v10, %v14419_v0 }
 0x559   :  { %v7408_v19 = vmul.f32 -1.442695, %v4931_v26  ;;  %v7410_v16 = vmul.f32 -1.442695, %v4933_v61  ;;  %v5016_v33 = vunpack.c.0.s8 %v5015_v15  ;;  %v14423_v26 = vld [vmem:[#allocation2_spill] sm:$0xff] }
 0x55a   :  { %8588 = vpow2.f32 %v7407_v23 }
 0x55b   :  { %8590 = vpow2.f32 %v7409_v34  ;;  %v12375_v61 = vsub.s32 %v5016_v33, %v14423_v26 }
 0x55c   :  { %8592 = vpow2.f32 %v7408_v19 }
 0x55d   :  { %8594 = vpow2.f32 %v7410_v16 }
 0x564   :  { %v8589_v3 = vpop.eup %8588 }
 0x565   :  { %v8591_v12 = vpop.eup %8590  ;;  %v4970_v53 = vadd.f32 1.0, %v8589_v3 }
 0x566   :  { %v8593_v35 = vpop.eup %8592  ;;  %v4972_v29 = vadd.f32 1.0, %v8591_v12 }
 0x567   :  { %v8595_v27 = vpop.eup %8594  ;;  %8596 = vrcp.f32 %v4970_v53  ;;  %v4971_v28 = vadd.f32 1.0, %v8593_v35 }
 0x568   :  { %8598 = vrcp.f32 %v4972_v29  ;;  %v4973_v36 = vadd.f32 1.0, %v8595_v27 }
 0x569   :  { %8600 = vrcp.f32 %v4971_v28 }
 0x56a   :  { %8602 = vrcp.f32 %v4973_v36 }
 0x571   :  { %v8597_v1 = vpop.eup %8596  ;;  %v4811_v30 = vpop.f32.mrb[84].mxu0 }
 0x572   :  { %v4852_v4 = vpop.f32.mrb[120].mxu1  ;;  %v8599_v39 = vpop.eup %8598  ;;  %v4812_v23 = vadd.f32 %v4811_v30, %v4264_v32 }
 0x573   :  { %v4853_v34 = vadd.f32 %v4852_v4, %v4272_v50  ;;  %v4813_v19 = vpop.f32.mrb[85].mxu0  ;;  %v4854_v16 = vpop.f32.mrb[121].mxu1 }
 0x574   :  { %v8601_v3 = vpop.eup %8600  ;;  %v4814_v12 = vadd.f32 %v4813_v19, %v4268_v46  ;;  %v4855_v53 = vadd.f32 %v4854_v16, %v4276_v14  ;;  %v4815_v35 = vpop.f32.mrb[86].mxu0  ;;  %v4914_v36 = vrot.slane %v4812_v23, 2 }
 0x575   :  { %v4856_v29 = vpop.f32.mrb[122].mxu1  ;;  %v8603_v27 = vpop.eup %8602  ;;  %v5010_v28 = vcombine.low %v8597_v1, %v8601_v3  ;;  %v4916_v10 = vrot.slane %v4853_v34, 2 }
 0x576   :  { %v4816_v38 = vpop.f32.mrb[87].mxu0  ;;  %v4857_v15 = vpop.f32.mrb[123].mxu1  ;;  %v5011_v49 = vcombine.low %v8599_v39, %v8603_v27  ;;  %v4915_v52 = vrot.slane %v4814_v12, 2  ;;  %v4917_v9 = vrot.slane %v4855_v53, 2  ;;  %v4934_v32 = vadd.f32 %v4914_v36, %v4812_v23 }
 0x577   :  { %v5020_v33 = vrot.slane %v5010_v28, %v12375_v61  ;;  %v4936_v50 = vadd.f32 %v4916_v10, %v4853_v34 }
 0x578   :  { %v5027_v30 = vrot.slane %v5011_v49, %v12375_v61  ;;  %v4935_v4 = vadd.f32 %v4915_v52, %v4814_v12  ;;  %v4937_v46 = vadd.f32 %v4917_v9, %v4855_v53  ;;  %v7411_v14 = vmul.f32 -1.442695, %v4934_v32  ;;  %v4242_v9 = vld [vmem:[%s13511_s10 + $0x8] sm:$0x3] }
 0x579   :  { %v7413_v19 = vmul.f32 -1.442695, %v4936_v50  ;;  %v4280_v12 = vrot.slane %v4242_v9, %v14415_v37  ;;  %v4284_v53 = vrot.slane %v4242_v9, %v14417_v59 }
 0x57a   :  { %v5042_v16 = vcombine.low %v5020_v33, %v5027_v30  ;;  %v5043_v35 = vcombine.high %v5020_v33, %v5027_v30  ;;  %v7412_v1 = vmul.f32 -1.442695, %v4935_v4  ;;  %v7414_v3 = vmul.f32 -1.442695, %v4937_v46 }
 0x57b   :  { %8604 = vpow2.f32 %v7411_v14 }
 0x57c   :  { %8606 = vpow2.f32 %v7413_v19  ;;  %v5052_v9 = vrot.slane %v5042_v16, %v12375_v61 }
 0x57d   :  { %8608 = vpow2.f32 %v7412_v1 }
 0x57e   :  { %8610 = vpow2.f32 %v7414_v3 }
 0x585   :  { %v8605_v39 = vpop.eup %8604 }
 0x586   :  { %v8607_v29 = vpop.eup %8606  ;;  %v4974_v27 = vadd.f32 1.0, %v8605_v39 }
 0x587   :  { %v8609_v28 = vpop.eup %8608  ;;  %v4976_v23 = vadd.f32 1.0, %v8607_v29 }
 0x588   :  { %v8611_v34 = vpop.eup %8610  ;;  %8612 = vrcp.f32 %v4974_v27  ;;  %v4975_v49 = vadd.f32 1.0, %v8609_v28 }
 0x589   :  { %8614 = vrcp.f32 %v4976_v23  ;;  %v4977_v52 = vadd.f32 1.0, %v8611_v34 }
 0x58a   :  { %8616 = vrcp.f32 %v4975_v49 }
 0x58b   :  { %8618 = vrcp.f32 %v4977_v52 }
 0x591   :  { %v4893_v10 = vpop.f32.mrb[88].mxu0 }
 0x592   :  { %v8613_v36 = vpop.eup %8612  ;;  %v4894_v15 = vadd.f32 %v4893_v10, %v4280_v12  ;;  %v4895_v33 = vpop.f32.mrb[89].mxu0  ;;  %v5059_v12 = vrot.slane %v5043_v35, %v12375_v61  ;;  %v14424_v35 = vld [vmem:[#allocation18_spill] sm:$0xff] }
 0x593   :  { %v8615_v38 = vpop.eup %8614  ;;  %v4896_v50 = vadd.f32 %v4895_v33, %v4284_v53  ;;  %v4897_v30 = vpop.f32.mrb[90].mxu0 }
 0x594   :  { %v8617_v32 = vpop.eup %8616  ;;  %v4918_v14 = vrot.slane %v4894_v15, 2  ;;  %v4898_v19 = vpop.f32.mrb[91].mxu0 }
 0x595   :  { %v8619_v4 = vpop.eup %8618  ;;  %v5012_v46 = vcombine.low %v8613_v36, %v8617_v32  ;;  %v4919_v3 = vrot.slane %v4896_v50, 2 }
 0x596   :  { %v5013_v1 = vcombine.low %v8615_v38, %v8619_v4  ;;  %v4938_v29 = vadd.f32 %v4918_v14, %v4894_v15  ;;  %v14426_v4 = vld [vmem:[#allocation22_spill] sm:$0xff]  ;;  %v14427_v14 = vld [vmem:[#allocation29_spill] sm:$0xff] }
 0x597   :  { %v5034_v39 = vrot.slane %v5012_v46, %v12375_v61  ;;  %v4939_v28 = vadd.f32 %v4919_v3, %v4896_v50  ;;  %v14425_v50 = vld [vmem:[#allocation25_spill] sm:$0xff] }
 0x598   :  { %v5041_v27 = vrot.slane %v5013_v1, %v12375_v61  ;;  %v7415_v23 = vmul.f32 -1.442695, %v4938_v29  ;;  %v14428_v1 = vld [vmem:[#allocation15_spill] sm:$0xff] }
 0x599   :  { %v7416_v52 = vmul.f32 -1.442695, %v4939_v28 }
 0x59a   :  { %v5044_v34 = vcombine.low %v5034_v39, %v5041_v27  ;;  %v5045_v49 = vcombine.high %v5034_v39, %v5041_v27  ;;  %8620 = vpow2.f32 %v7415_v23  ;;  %v14429_v39 = vld [vmem:[#allocation17_spill] sm:$0xff]  ;;  %v14431_v23 = vld [vmem:[#allocation54_spill] sm:$0xff] }
 0x59b   :  { %8622 = vpow2.f32 %v7416_v52  ;;  %v14430_v27 = vld [vmem:[#allocation49_spill] sm:$0xff] }
 0x59c   :  { %v5066_v53 = vrot.slane %v5044_v34, %v12375_v61  ;;  %v5073_v36 = vrot.slane %v5045_v49, %v12375_v61 }
 0x59e   :  { %v12390_v10 = vcombine.low %v5052_v9, %v5066_v53  ;;  %v12392_v38 = vcombine.low %v5059_v12, %v5073_v36  ;;  %v14433_v9 = vld [vmem:[#allocation31_spill] sm:$0xff] }
 0x5a0   :  { %v5106_v15 = vrot.slane %v12390_v10, %v14417_v59  ;;  %v12398_v33 = vrot.slane %v12390_v10, %v14418_v2  ;;  %v5102_v16 = vrot.slane %v12390_v10, %v14415_v37 }
 0x5a2   :  { %v5200_v32 = vmul.f32 %v5106_v15, %v14424_v35  ;;  %v5210_v30 = vmul.f32 %v5106_v15, %v14425_v50  ;;  %v5202_v46 = vmul.f32 %v12398_v33, %v14426_v4  ;;  %v5212_v19 = vmul.f32 %v12398_v33, %v14427_v14  ;;  %v14434_v35 = vld [vmem:[#allocation52_spill] sm:$0xff]  ;;  %v14435_v4 = vld [vmem:[#allocation61_spill] sm:$0xff] }
 0x5a3   :  { %v5199_v3 = vmul.f32 %v5102_v16, %v14428_v1  ;;  %v5209_v29 = vmul.f32 %v5102_v16, %v14429_v39  ;;  %v5220_v28 = vmul.f32 %v5106_v15, %v14430_v27  ;;  %v5230_v34 = vmul.f32 %v5106_v15, %v14431_v23  ;;  %v14436_v1 = vld [vmem:[#allocation10_spill] sm:$0xff]  ;;  %v14441_v23 = vld [vmem:[#allocation8_spill] sm:$0xff] }
 0x5a4   :  { %v12412_v49 = vpack.c.bf16 %v5210_v30, %v5200_v32  ;;  %v12414_v52 = vpack.c.bf16 %v5212_v19, %v5202_v46  ;;  %v5219_v12 = vmul.f32 %v5102_v16, %v14433_v9  ;;  %v8621_v53 = vpop.eup %8620  ;;  %v5229_v50 = vmul.f32 %v5102_v16, %v14434_v35 }
 0x5a5   :  { %v12417_v36 = vpack.c.bf16 %v5209_v29, %v5199_v3  ;;  %v5240_v14 = vmul.f32 %v5106_v15, %v14435_v4  ;;  %v5250_v26 = vmul.f32 %v5106_v15, %v14436_v1  ;;  %v8623_v39 = vpop.eup %8622  ;;  %v4978_v24 = vadd.f32 1.0, %v8621_v53  ;;  %v14440_v29 = vld [vmem:[#allocation56_spill] sm:$0xff]  ;;  %v14443_v53 = vld [vmem:[#allocation23_spill] sm:$0xff] }
 0x5a6   :  { %14432 = vst [vmem:[#allocation152_spill] sm:$0xff] %v12412_v49  ;;  %6243 = vmatprep.subr.bf16.mxu0 %v12412_v49  ;;  %6284 = vmatprep.subr.bf16.mxu1 %v12414_v52  ;;  %v12424_v32 = vpack.c.bf16 %v5230_v34, %v5220_v28  ;;  %v4979_v30 = vadd.f32 1.0, %v8623_v39  ;;  %v12428_v46 = vpack.c.bf16 %v5229_v50, %v5219_v12  ;;  %v14442_v34 = vld [vmem:[#allocation14_spill] sm:$0xff]  ;;  %v14448_v4 = vld [vmem:[#allocation128_spill] sm:$0xff] }
 0x5a7   :  { %6244 = vmatpush1.bf16.msra.mxu0 %v12417_v36  ;;  %8624 = vrcp.f32 %v4978_v24  ;;  %v12430_v19 = vpack.c.bf16 %v5250_v26, %v5240_v14  ;;  %v12434_v3 = vrot.slane %v12390_v10, %v14421_v17  ;;  %v5239_v27 = vmul.f32 %v5102_v16, %v14440_v29 }
 0x5a8   :  { %14437 = vst [vmem:[#allocation50_spill] sm:$0xff] %v12424_v32  ;;  %6245 = vmatprep.subr.bf16.mxu0 %v12424_v32  ;;  %8626 = vrcp.f32 %v4979_v30  ;;  %14438 = vst [vmem:[#allocation125_spill] sm:$0xff] %v12428_v46  ;;  %v5249_v28 = vmul.f32 %v5102_v16, %v14441_v23  ;;  %v5260_v9 = vmul.f32 %v5106_v15, %v14442_v34  ;;  %v14445_v30 = vld [vmem:[#allocation13_spill] sm:$0xff] }
 0x5a9   :  { %14439 = vst [vmem:[#allocation3_spill] sm:$0xff] %v12430_v19  ;;  %v5270_v35 = vmul.f32 %v5106_v15, %v14443_v53  ;;  %v12442_v24 = vrot.slane %v12392_v38, %v14415_v37  ;;  %v12446_v26 = vrot.slane %v12392_v38, %v14417_v59  ;;  %v12451_v12 = vrot.slane %v12390_v10, %v14416_v18  ;;  %v14446_v23 = vld [vmem:[#allocation21_spill] sm:$0xff] }
 0x5aa   :  { %v12460_v14 = vrot.slane %v12390_v10, %v14419_v0  ;;  %v12463_v39 = vpack.c.bf16 %v5249_v28, %v5239_v27  ;;  %v5259_v29 = vmul.f32 %v5102_v16, %v14445_v30  ;;  %v5269_v34 = vmul.f32 %v5102_v16, %v14446_v23  ;;  %v14450_v16 = vld [vmem:[#allocation46_spill] sm:$0xff]  ;;  %v14452_v23 = vld [vmem:[#allocation51_spill] sm:$0xff] }
 0x5ab   :  { %6246 = vmatpush1.bf16.msra.mxu0 %v12428_v46  ;;  %v12468_v50 = vpack.c.bf16 %v5270_v35, %v5260_v9  ;;  %v5204_v15 = vmul.f32 %v12434_v3, %v14448_v4  ;;  %v5214_v44 = vmul.f32 %v12434_v3, %v14449_v51  ;;  %v5450_v27 = vmax.bf16 %v12424_v32, %v12428_v46  ;;  %v14454_v32 = vld [vmem:[#allocation55_spill] sm:$0xff]  ;;  %v14456_v46 = vld [vmem:[#allocation142_spill] sm:$0xff] }
 0x5ac   :  { %6247 = vmatprep.subr.bf16.mxu0 %v12430_v19  ;;  %14444 = vst [vmem:[#allocation4_spill] sm:$0xff] %v12463_v39  ;;  %v5221_v28 = vmul.f32 %v12451_v12, %v14450_v16  ;;  %v12486_v30 = vpack.c.bf16 %v5269_v34, %v5259_v29  ;;  %v5222_v1 = vmul.f32 %v12398_v33, %v14452_v23 }
 0x5ad   :  { %14447 = vst [vmem:[#allocation5_spill] sm:$0xff] %v12468_v50  ;;  %v5231_v53 = vmul.f32 %v12451_v12, %v14453_v5  ;;  %v5232_v16 = vmul.f32 %v12398_v33, %v14454_v32  ;;  %v12496_v4 = vpack.c.bf16 %v5214_v44, %v5204_v15  ;;  %v12500_v51 = vrot.slane %v12390_v10, %v14420_v6  ;;  %v14455_v32 = vld [vmem:[#allocation86_spill] sm:$0xff] }
 0x5ae   :  { %14451 = vst [vmem:[#allocation6_spill] sm:$0xff] %v12486_v30  ;;  %v12504_v29 = vrot.slane %v12390_v10, %v14422_v57  ;;  %v5223_v23 = vmul.f32 %v12460_v14, %v14455_v32  ;;  %v5233_v44 = vmul.f32 %v12460_v14, %v14456_v46  ;;  %v14458_v10 = vld [vmem:[#allocation16_spill] sm:$0xff]  ;;  %v5224_v55 = vmul.f32 %v12434_v3, %v14459_v42 }
 0x5af   :  { %6248 = vmatpush1.bf16.msra.mxu0 %v12463_v39  ;;  %v12512_v15 = vpack.c.bf16 %v5231_v53, %v5221_v28  ;;  %v5201_v5 = vmul.f32 %v12451_v12, %v14458_v10  ;;  %v5234_v32 = vmul.f32 %v12434_v3, %v14460_v54  ;;  %v12523_v48 = vpack.c.bf16 %v5232_v16, %v5222_v1  ;;  %v14467_v16 = vld [vmem:[#allocation87_spill] sm:$0xff] }
 0x5b0   :  { %6249 = vmatprep.subr.bf16.mxu0 %v12468_v50  ;;  %v5211_v10 = vmul.f32 %v12451_v12, %v14463_v31  ;;  %v5226_v42 = vmul.f32 %v12504_v29, %v14464_v40  ;;  %v5235_v54 = vmul.f32 %v12500_v51, %v14465_v7  ;;  %v12537_v1 = vpack.c.bf16 %v5233_v44, %v5223_v23  ;;  %v14471_v50 = vld [vmem:[#allocation127_spill] sm:$0xff]  ;;  %v14472_v23 = vld [vmem:[#allocation126_spill] sm:$0xff] }
 0x5b1   :  { %v8625_v9 = vpop.eup %8624  ;;  %14457 = vst [vmem:[#allocation27_spill] sm:$0xff] %v12512_v15  ;;  %14461 = vst [vmem:[#allocation100_spill] sm:$0xff] %v12523_v48  ;;  %v5451_v46 = vmax.bf16 %v5450_v27, %v12512_v15  ;;  %v5236_v28 = vmul.f32 %v12504_v29, %v14467_v16  ;;  %v14468_v15 = vld [vmem:[#allocation85_spill] sm:$0xff]  ;;  %v12547_v31 = vpack.c.bf16 %v5234_v32, %v5224_v55 }
 0x5b2   :  { %v8627_v34 = vpop.eup %8626  ;;  %14466 = vst [vmem:[#allocation116_spill] sm:$0xff] %v12537_v1  ;;  %v5205_v7 = vmul.f32 %v12500_v51, %v14471_v50  ;;  %v5213_v44 = vmul.f32 %v12460_v14, %v14472_v23  ;;  %v14474_v55 = vmax.bf16 %v12412_v49, %v12417_v36  ;;  %v14477_v23 = vld [vmem:[#allocation135_spill] sm:$0xff]  ;;  %v12579_v49 = vrot.slane %v12392_v38, %v14416_v18 }
 0x5b3   :  { %6250 = vmatpush1.bf16.msra.mxu0 %v12486_v30  ;;  %v5076_v35 = vcombine.low %v8625_v9, %v8627_v34  ;;  %v14462_v9 = vld [vmem:[#allocation137_spill] sm:$0xff]  ;;  %v5452_v27 = vmax.bf16 %v5451_v46, %v12523_v48  ;;  %v12545_v30 = vpack.c.bf16 %v5211_v10, %v5201_v5  ;;  %14470 = vst [vmem:[#allocation18_spill] sm:$0xff] %v12547_v31  ;;  %v14476_v10 = vld [vmem:[#allocation131_spill] sm:$0xff] }
 0x5b4   :  { %6325 = vmatprep.subr.bf16.mxu0 %v12496_v4  ;;  %v5225_v34 = vmul.f32 %v12500_v51, %v14462_v9  ;;  %v5203_v9 = vmul.f32 %v12460_v14, %v14468_v15  ;;  %v14473_v48 = vld [vmem:[#allocation129_spill] sm:$0xff]  ;;  %v12595_v18 = vrot.slane %v12392_v38, %v14418_v2 }
 0x5b5   :  { %v5083_v53 = vrot.slane %v5076_v35, %v12375_v61  ;;  %14469 = vst [vmem:[#allocation119_spill] sm:$0xff] %v12545_v30  ;;  %v5453_v40 = vmax.bf16 %v5452_v27, %v12537_v1  ;;  %v5215_v5 = vmul.f32 %v12500_v51, %v14473_v48  ;;  %v5440_v15 = vmax.bf16 %v14474_v55, %v12545_v30 }
 0x5b6   :  { %v12566_v32 = vpack.c.bf16 %v5235_v54, %v5225_v34  ;;  %v5206_v27 = vmul.f32 %v12504_v29, %v14476_v10  ;;  %v5216_v1 = vmul.f32 %v12504_v29, %v14477_v23  ;;  %v12575_v48 = vpack.c.bf16 %v5236_v28, %v5226_v42  ;;  %v14486_v23 = vld [vmem:[#allocation117_spill] sm:$0xff] }
 0x5b7   :  { %v5091_v35 = vrot.slane %v5083_v53, %v12375_v61  ;;  %v5454_v50 = vmax.bf16 %v5453_v40, %v12547_v31  ;;  %v12588_v55 = vpack.c.bf16 %v5213_v44, %v5203_v9  ;;  %v5441_v28 = vmax.bf16 %v5440_v15, %v12414_v52  ;;  %v14484_v15 = vld [vmem:[#allocation110_spill] sm:$0xff] }
 0x5b8   :  { %14475 = vst [vmem:[#allocation25_spill] sm:$0xff] %v12566_v32  ;;  %14478 = vst [vmem:[#allocation22_spill] sm:$0xff] %v12575_v48 }
 0x5b9   :  { %v12555_v46 = vrot.slane %v5091_v35, %v14415_v37  ;;  %v12558_v16 = vrot.slane %v5091_v35, %v14417_v59  ;;  %v5084_v35 = vcombine.high %v5083_v53, %v5083_v53  ;;  %v5455_v53 = vmax.bf16 %v5454_v50, %v12566_v32  ;;  %14479 = vst [vmem:[#allocation29_spill] sm:$0xff] %v12588_v55 }
 0x5ba   :  { %v5442_v2 = vmax.bf16 %v5441_v28, %v12588_v55  ;;  %v5299_v50 = vmul.f32 %v12442_v24, %v14484_v15 }
 0x5bb   :  { %v5227_v47 = vmul.f32 %v12555_v46, %v11735_v63  ;;  %v5228_v34 = vmul.f32 %v12558_v16, %v11762_v22  ;;  %v5237_v54 = vmul.f32 %v12555_v46, %v11768_v60  ;;  %v5238_v40 = vmul.f32 %v12558_v16, %v11785_v11 }
 0x5bc   :  { %v12590_v63 = vpack.c.bf16 %v5215_v5, %v5205_v7  ;;  %v5456_v22 = vmax.bf16 %v5455_v53, %v12575_v48  ;;  %v12600_v60 = vpack.c.bf16 %v5216_v1, %v5206_v27  ;;  %v12604_v11 = vrot.slane %v12392_v38, %v14419_v0 }
 0x5bd   :  { %v12597_v42 = vpack.c.bf16 %v5237_v54, %v5227_v47  ;;  %v5098_v9 = vrot.slane %v5084_v35, %v12375_v61  ;;  %v5207_v7 = vmul.f32 %v12555_v46, %v11643_v8  ;;  %v5217_v44 = vmul.f32 %v12555_v46, %v11721_v62  ;;  %v14488_v54 = vld [vmem:[#allocation120_spill] sm:$0xff] }
 0x5be   :  { %14480 = vst [vmem:[#allocation15_spill] sm:$0xff] %v12590_v63  ;;  %14482 = vst [vmem:[#allocation49_spill] sm:$0xff] %v12600_v60  ;;  %v12612_v47 = vpack.c.bf16 %v5238_v40, %v5228_v34  ;;  %v5208_v1 = vmul.f32 %v12558_v16, %v11717_v56  ;;  %v5218_v0 = vmul.f32 %v12558_v16, %v11729_v45  ;;  %v14485_v45 = vld [vmem:[#allocation114_spill] sm:$0xff] }
 0x5bf   :  { %14481 = vst [vmem:[#allocation17_spill] sm:$0xff] %v12597_v42  ;;  %v5457_v5 = vmax.bf16 %v5456_v22, %v12597_v42  ;;  %v5443_v61 = vmax.bf16 %v5442_v2, %v12496_v4  ;;  %v12622_v8 = vrot.slane %v12392_v38, %v14421_v17  ;;  %v12626_v62 = vrot.slane %v12392_v38, %v14420_v6  ;;  %v14491_v22 = vld [vmem:[#allocation118_spill] sm:$0xff] }
 0x5c0   :  { %14483 = vst [vmem:[#allocation54_spill] sm:$0xff] %v12612_v47  ;;  %v12633_v56 = vrot.slane %v12392_v38, %v14422_v57  ;;  %v5300_v27 = vmul.f32 %v12446_v26, %v14485_v45  ;;  %v5309_v17 = vmul.f32 %v12442_v24, %v14486_v23  ;;  %v12640_v35 = vrot.slane %v5098_v9, %v14415_v37  ;;  %v14490_v38 = vld [vmem:[#allocation111_spill] sm:$0xff] }
 0x5c1   :  { %v5458_v10 = vmax.bf16 %v5457_v5, %v12612_v47  ;;  %v12642_v6 = vpack.c.bf16 %v5217_v44, %v5207_v7  ;;  %v5444_v34 = vmax.bf16 %v5443_v61, %v12590_v63  ;;  %v5310_v40 = vmul.f32 %v12446_v26, %v14488_v54  ;;  %v14492_v44 = vld [vmem:[#allocation115_spill] sm:$0xff]  ;;  %v14499_v54 = vld [vmem:[#allocation81_spill] sm:$0xff] }
 0x5c2   :  { %v12648_v53 = vrot.slane %v5098_v9, %v14417_v59  ;;  %v12650_v57 = vpack.c.bf16 %v5218_v0, %v5208_v1  ;;  %v5301_v28 = vmul.f32 %v12579_v49, %v14490_v38  ;;  %v5311_v37 = vmul.f32 %v12579_v49, %v14491_v22  ;;  %v14493_v5 = vld [vmem:[#allocation79_spill] sm:$0xff]  ;;  %v14495_v59 = vld [vmem:[#allocation78_spill] sm:$0xff]  ;;  %v14496_v1 = vld [vmem:[#allocation80_spill] sm:$0xff] }
 0x5c3   :  { %14487 = vst [vmem:[#allocation31_spill] sm:$0xff] %v12642_v6  ;;  %5459 = vmax.xlane.bf16.xlu1 %v5458_v10  ;;  %v5445_v7 = vmax.bf16 %v5444_v34, %v12600_v60  ;;  %v5302_v2 = vmul.f32 %v12595_v18, %v14492_v44  ;;  %v5303_v61 = vmul.f32 %v12604_v11, %v14493_v5  ;;  %v14497_v10 = vld [vmem:[#allocation121_spill] sm:$0xff]  ;;  %v14500_v22 = vld [vmem:[#allocation84_spill] sm:$0xff] }
 0x5c4   :  { %14489 = vst [vmem:[#allocation52_spill] sm:$0xff] %v12650_v57  ;;  %v12661_v15 = vpack.c.bf16 %v5309_v17, %v5299_v50  ;;  %v5304_v9 = vmul.f32 %v12622_v8, %v14495_v59  ;;  %v5305_v0 = vmul.f32 %v12626_v62, %v14496_v1  ;;  %v5312_v45 = vmul.f32 %v12595_v18, %v14497_v10  ;;  %v14501_v17 = vld [vmem:[#allocation130_spill] sm:$0xff]  ;;  %v14502_v5 = vld [vmem:[#allocation156_spill] sm:$0xff] }
 0x5c5   :  { %v12669_v23 = vpack.c.bf16 %v5310_v40, %v5300_v27  ;;  %v5446_v34 = vmax.bf16 %v5445_v7, %v12642_v6  ;;  %v5306_v38 = vmul.f32 %v12633_v56, %v14499_v54  ;;  %v5313_v50 = vmul.f32 %v12604_v11, %v14500_v22  ;;  %v14503_v1 = vld [vmem:[#allocation132_spill] sm:$0xff]  ;;  %v14505_v22 = vld [vmem:[#allocation57_spill] sm:$0xff] }
 0x5c6   :  { %14494 = vst [vmem:[#allocation61_spill] sm:$0xff] %v12661_v15  ;;  %v5314_v44 = vmul.f32 %v12622_v8, %v14501_v17  ;;  %v5315_v59 = vmul.f32 %v12626_v62, %v14502_v5  ;;  %v5316_v47 = vmul.f32 %v12633_v56, %v14503_v1  ;;  %v12682_v10 = vpack.c.bf16 %v5311_v37, %v5301_v28 }
 0x5c7   :  { %14498 = vst [vmem:[#allocation10_spill] sm:$0xff] %v12669_v23  ;;  %v5494_v27 = vmax.bf16 %v12669_v23, %v12661_v15  ;;  %v5447_v40 = vmax.bf16 %v5446_v34, %v12650_v57  ;;  %v5307_v7 = vmul.f32 %v12640_v35, %v11962_v13  ;;  %v5308_v54 = vmul.f32 %v12648_v53, %v11979_v41  ;;  %v14508_v13 = vld [vmem:[#allocation7_spill] sm:$0xff]  ;;  %v14509_v41 = vld [vmem:[#allocation9_spill] sm:$0xff] }
 0x5c8   :  { %14504 = vst [vmem:[#allocation56_spill] sm:$0xff] %v12682_v10  ;;  %v5241_v17 = vmul.f32 %v12451_v12, %v14505_v22  ;;  %v5317_v5 = vmul.f32 %v12640_v35, %v11994_v20  ;;  %v5318_v28 = vmul.f32 %v12648_v53, %v12002_v43  ;;  %v12697_v37 = vpack.c.bf16 %v5312_v45, %v5302_v2  ;;  %v14510_v22 = vld [vmem:[#allocation70_spill] sm:$0xff]  ;;  %v14514_v45 = vld [vmem:[#allocation68_spill] sm:$0xff] }
 0x5c9   :  { %v5495_v1 = vmax.bf16 %v5494_v27, %v12682_v10  ;;  %5448 = vmax.xlane.bf16.xlu0 %v5447_v40  ;;  %v12700_v34 = vpack.c.bf16 %v5313_v50, %v5303_v61  ;;  %v5242_v42 = vmul.f32 %v12398_v33, %v14508_v13  ;;  %v5251_v48 = vmul.f32 %v12451_v12, %v14509_v41  ;;  %v14515_v50 = vld [vmem:[#allocation72_spill] sm:$0xff] }
 0x5ca   :  { %14506 = vst [vmem:[#allocation8_spill] sm:$0xff] %v12697_v37  ;;  %v5252_v32 = vmul.f32 %v12398_v33, %v14510_v22  ;;  %v12708_v20 = vpack.c.bf16 %v5314_v44, %v5304_v9  ;;  %v12710_v31 = vpack.c.bf16 %v5315_v59, %v5305_v0  ;;  %v12712_v43 = vpack.c.bf16 %v5316_v47, %v5306_v38  ;;  %v14516_v40 = vld [vmem:[#allocation28_spill] sm:$0xff]  ;;  %v14519_v47 = vld [vmem:[#allocation73_spill] sm:$0xff]  ;;  %v14520_v59 = vld [vmem:[#allocation38_spill] sm:$0xff] }
 0x5cb   :  { %14507 = vst [vmem:[#allocation14_spill] sm:$0xff] %v12700_v34  ;;  %v5496_v2 = vmax.bf16 %v5495_v1, %v12697_v37  ;;  %v5243_v61 = vmul.f32 %v12460_v14, %v14514_v45  ;;  %v5244_v27 = vmul.f32 %v12434_v3, %v14515_v50  ;;  %v5253_v13 = vmul.f32 %v12460_v14, %v14516_v40  ;;  %v14518_v44 = vld [vmem:[#allocation48_spill] sm:$0xff]  ;;  %v14521_v22 = vld [vmem:[#allocation35_spill] sm:$0xff]  ;;  %v14522_v50 = vld [vmem:[#allocation93_spill] sm:$0xff] }
 0x5cc   :  { %14511 = vst [vmem:[#allocation23_spill] sm:$0xff] %v12708_v20  ;;  %14512 = vst [vmem:[#allocation13_spill] sm:$0xff] %v12710_v31  ;;  %v12721_v41 = vpack.c.bf16 %v5251_v48, %v5241_v17  ;;  %v5245_v0 = vmul.f32 %v12500_v51, %v14518_v44  ;;  %v5246_v38 = vmul.f32 %v12504_v29, %v14519_v47 }
 0x5cd   :  { %14513 = vst [vmem:[#allocation21_spill] sm:$0xff] %v12712_v43  ;;  %v5497_v9 = vmax.bf16 %v5496_v2, %v12700_v34  ;;  %v5254_v1 = vmul.f32 %v12434_v3, %v14520_v59  ;;  %v5255_v45 = vmul.f32 %v12500_v51, %v14521_v22  ;;  %v5256_v37 = vmul.f32 %v12504_v29, %v14522_v50 }
 0x5ce   :  { %14517 = vst [vmem:[#allocation128_spill] sm:$0xff] %v12721_v41  ;;  %v12734_v40 = vpack.c.bf16 %v5252_v32, %v5242_v42  ;;  %v14524_v48 = vmax.bf16 %v12430_v19, %v12463_v39  ;;  %v12740_v2 = vpack.c.bf16 %v5317_v5, %v5307_v7  ;;  %v5247_v47 = vmul.f32 %v12555_v46, %v11790_v21  ;;  %v14526_v32 = vld [vmem:[#allocation101_spill] sm:$0xff]  ;;  %v14530_v19 = vld [vmem:[#allocation152_spill] sm:$0xff] }
 0x5cf   :  { %v5498_v44 = vmax.bf16 %v5497_v9, %v12708_v20  ;;  %v5257_v59 = vmul.f32 %v12555_v46, %v11910_v58  ;;  %v5248_v22 = vmul.f32 %v12558_v16, %v11793_v25  ;;  %v5258_v42 = vmul.f32 %v12558_v16, %v14526_v32 }
 0x5d0   :  { %14523 = vst [vmem:[#allocation133_spill] sm:$0xff] %v12734_v40  ;;  %v5462_v17 = vmax.bf16 %v14524_v48, %v12721_v41  ;;  %14525 = vst [vmem:[#allocation46_spill] sm:$0xff] %v12740_v2  ;;  %v12751_v50 = vpack.c.bf16 %v5253_v13, %v5243_v61  ;;  %v12754_v7 = vpack.c.bf16 %v5318_v28, %v5308_v54  ;;  %v5555_v9 = vunpack.c.h.bf16 %v12545_v30 }
 0x5d1   :  { %v5499_v5 = vmax.bf16 %v5498_v44, %v12710_v31  ;;  %v14529_v21 = vunpack.c.h.bf16 %v12417_v36  ;;  %v14531_v58 = vunpack.c.h.bf16 %v14530_v19  ;;  %v12762_v41 = vpack.c.bf16 %v5254_v1, %v5244_v27  ;;  %v14537_v1 = vld [vmem:[#allocation71_spill] sm:$0xff] }
 0x5d2   :  { %14527 = vst [vmem:[#allocation51_spill] sm:$0xff] %v12751_v50  ;;  %v5463_v48 = vmax.bf16 %v5462_v17, %v12734_v40  ;;  %14528 = vst [vmem:[#allocation53_spill] sm:$0xff] %v12754_v7  ;;  %v12764_v25 = vpack.c.bf16 %v5255_v45, %v5245_v0  ;;  %v12766_v32 = vpack.c.bf16 %v5256_v37, %v5246_v38  ;;  %v5556_v13 = vunpack.c.h.bf16 %v12414_v52 }
 0x5d3   :  { %v5714_v39 = vadd.f32 %v14531_v58, %v14529_v21  ;;  %14532 = vst [vmem:[#allocation55_spill] sm:$0xff] %v12762_v41  ;;  %v5500_v54 = vmax.bf16 %v5499_v5, %v12712_v43  ;;  %v12770_v28 = vpack.c.bf16 %v5257_v59, %v5247_v47  ;;  %v12773_v44 = vpack.c.bf16 %v5258_v42, %v5248_v22  ;;  %v14539_v21 = vld [vmem:[#allocation26_spill] sm:$0xff] }
 0x5d4   :  { %14533 = vst [vmem:[#allocation86_spill] sm:$0xff] %v12764_v25  ;;  %14534 = vst [vmem:[#allocation142_spill] sm:$0xff] %v12766_v32  ;;  %v5464_v61 = vmax.bf16 %v5463_v48, %v12751_v50  ;;  %v5557_v27 = vunpack.c.h.bf16 %v12588_v55  ;;  %v5558_v0 = vunpack.c.h.bf16 %v12496_v4  ;;  %v5261_v45 = vmul.f32 %v12451_v12, %v14537_v1  ;;  %v14538_v48 = vld [vmem:[#allocation30_spill] sm:$0xff]  ;;  %v14549_v50 = vld [vmem:[#allocation97_spill] sm:$0xff] }
 0x5d5   :  { %14535 = vst [vmem:[#allocation16_spill] sm:$0xff] %v12770_v28  ;;  %v5715_v17 = vadd.f32 %v5714_v39, %v5555_v9  ;;  %14536 = vst [vmem:[#allocation139_spill] sm:$0xff] %v12773_v44  ;;  %v5501_v37 = vmax.bf16 %v5500_v54, %v12740_v2  ;;  %v5271_v47 = vmul.f32 %v12451_v12, %v14538_v48  ;;  %v5559_v39 = vunpack.c.h.bf16 %v12590_v63  ;;  %v14541_v12 = vld [vmem:[#allocation20_spill] sm:$0xff]  ;;  %v14543_v48 = vld [vmem:[#allocation91_spill] sm:$0xff] }
 0x5d6   :  { %v5465_v40 = vmax.bf16 %v5464_v61, %v12762_v41  ;;  %v5560_v22 = vunpack.c.h.bf16 %v12600_v60  ;;  %v5561_v42 = vunpack.c.h.bf16 %v12642_v6  ;;  %v5262_v58 = vmul.f32 %v12398_v33, %v14539_v21  ;;  %v14540_v61 = vld [vmem:[#allocation34_spill] sm:$0xff]  ;;  %v14545_v21 = vld [vmem:[#allocation39_spill] sm:$0xff] }
 0x5d7   :  { %v5716_v38 = vadd.f32 %v5715_v17, %v5556_v13  ;;  %v5502_v5 = vmax.bf16 %v5501_v37, %v12754_v7  ;;  %v5272_v54 = vmul.f32 %v12398_v33, %v14540_v61  ;;  %v14542_v17 = vld [vmem:[#allocation77_spill] sm:$0xff]  ;;  %v5273_v41 = vmul.f32 %v12460_v14, %v14545_v21  ;;  %v14547_v61 = vld [vmem:[#allocation102_spill] sm:$0xff] }
 0x5d8   :  { %v5466_v59 = vmax.bf16 %v5465_v40, %v12764_v25  ;;  %v5263_v40 = vmul.f32 %v12460_v14, %v14541_v12  ;;  %v5264_v1 = vmul.f32 %v12434_v3, %v14542_v17  ;;  %v5265_v25 = vmul.f32 %v12500_v51, %v14543_v48  ;;  %v14552_v14 = vld [vmem:[#allocation5_spill] sm:$0xff] }
 0x5d9   :  { %v5717_v9 = vadd.f32 %v5716_v38, %v5557_v27  ;;  %5503 = vmax.xlane.bf16.xlu1 %v5502_v5  ;;  %v14544_v27 = vld [vmem:[#allocation94_spill] sm:$0xff]  ;;  %v12803_v33 = vpack.c.bf16 %v5271_v47, %v5261_v45  ;;  %v5267_v12 = vmul.f32 %v12555_v46, %v14547_v61  ;;  %v5274_v5 = vmul.f32 %v12434_v3, %v14549_v50 }
 0x5da   :  { %v5467_v13 = vmax.bf16 %v5466_v59, %v12766_v32  ;;  %v5266_v38 = vmul.f32 %v12504_v29, %v14544_v27  ;;  %v14548_v32 = vld [vmem:[#allocation107_spill] sm:$0xff]  ;;  %v12814_v27 = vpack.c.bf16 %v5272_v54, %v5262_v58  ;;  %v14553_v45 = vld [vmem:[#allocation6_spill] sm:$0xff]  ;;  %v12828_v58 = vpack.c.bf16 %v5273_v41, %v5263_v40 }
 0x5db   :  { %v5718_v37 = vadd.f32 %v5717_v9, %v5558_v0  ;;  %14546 = vst [vmem:[#allocation146_spill] sm:$0xff] %v12803_v33  ;;  %v5268_v17 = vmul.f32 %v12558_v16, %v14548_v32  ;;  %v14550_v9 = vld [vmem:[#allocation92_spill] sm:$0xff]  ;;  %v14554_v47 = vmax.bf16 %v14552_v14, %v14553_v45  ;;  %v14555_v61 = vld [vmem:[#allocation150_spill] sm:$0xff]  ;;  %v14556_v32 = vld [vmem:[#allocation37_spill] sm:$0xff] }
 0x5dc   :  { %v5468_v59 = vmax.bf16 %v5467_v13, %v12770_v28  ;;  %v5275_v48 = vmul.f32 %v12500_v51, %v14550_v9  ;;  %14551 = vst [vmem:[#allocation137_spill] sm:$0xff] %v12814_v27  ;;  %v5276_v28 = vmul.f32 %v12504_v29, %v14555_v61  ;;  %v5277_v7 = vmul.f32 %v12555_v46, %v14556_v32  ;;  %v14557_v3 = vld [vmem:[#allocation66_spill] sm:$0xff]  ;;  %v14561_v46 = vld [vmem:[#allocation59_spill] sm:$0xff]  ;;  %v14592_v14 = vld [vmem:[#allocation108_spill] sm:$0xff] }
 0x5dd   :  { %v5719_v0 = vadd.f32 %v5718_v37, %v5559_v39  ;;  %v5473_v13 = vmax.bf16 %v14554_v47, %v12803_v33  ;;  %v5278_v50 = vmul.f32 %v12558_v16, %v14557_v3  ;;  %14558 = vst [vmem:[#allocation19_spill] sm:$0xff] %v12828_v58  ;;  %v5562_v37 = vunpack.c.h.bf16 %v12650_v57  ;;  %v14560_v29 = vld [vmem:[#allocation58_spill] sm:$0xff] }
 0x5de   :  { %v5469_v21 = vmax.bf16 %v5468_v59, %v12773_v44  ;;  %v14559_v59 = vld [vmem:[#allocation122_spill] sm:$0xff]  ;;  %v5320_v47 = vmul.f32 %v12446_v26, %v14560_v29  ;;  %v5329_v61 = vmul.f32 %v12442_v24, %v14561_v46  ;;  %v12838_v32 = vpack.c.bf16 %v5274_v5, %v5264_v1  ;;  %v14568_v46 = vld [vmem:[#allocation123_spill] sm:$0xff]  ;;  %v14569_v1 = vld [vmem:[#allocation60_spill] sm:$0xff] }
 0x5df   :  { %v5720_v39 = vadd.f32 %v5719_v0, %v5560_v22  ;;  %v5474_v54 = vmax.bf16 %v5473_v13, %v12814_v27  ;;  %v5319_v9 = vmul.f32 %v12442_v24, %v14559_v59  ;;  %v14563_v22 = vld [vmem:[#allocation33_spill] sm:$0xff]  ;;  %v12843_v0 = vpack.c.bf16 %v5275_v48, %v5265_v25  ;;  %v14571_v25 = vld [vmem:[#allocation154_spill] sm:$0xff]  ;;  %v14591_v27 = vld [vmem:[#allocation104_spill] sm:$0xff] }
 0x5e0   :  { %5470 = vmax.xlane.bf16.xlu0 %v5469_v21  ;;  %14562 = vst [vmem:[#allocation140_spill] sm:$0xff] %v12838_v32  ;;  %v5330_v40 = vmul.f32 %v12446_v26, %v14563_v22  ;;  %v12845_v13 = vpack.c.bf16 %v5276_v28, %v5266_v38  ;;  %v12847_v21 = vpack.c.bf16 %v5277_v7, %v5267_v12  ;;  %v14577_v22 = vld [vmem:[#allocation134_spill] sm:$0xff]  ;;  %v14620_v44 = vld [vmem:[#allocation11_spill] sm:$0xff] }
 0x5e1   :  { %v5721_v16 = vadd.f32 %v5720_v39, %v5561_v42  ;;  %v5475_v41 = vmax.bf16 %v5474_v54, %v12828_v58  ;;  %14564 = vst [vmem:[#allocation144_spill] sm:$0xff] %v12843_v0  ;;  %v12849_v3 = vpack.c.bf16 %v5278_v50, %v5268_v17  ;;  %v5321_v42 = vmul.f32 %v12579_v49, %v14568_v46  ;;  %v14570_v39 = vld [vmem:[#allocation32_spill] sm:$0xff]  ;;  %v14574_v17 = vld [vmem:[#allocation95_spill] sm:$0xff]  ;;  %v14575_v50 = vld [vmem:[#allocation113_spill] sm:$0xff] }
 0x5e2   :  { %14565 = vst [vmem:[#allocation87_spill] sm:$0xff] %v12845_v13  ;;  %14566 = vst [vmem:[#allocation85_spill] sm:$0xff] %v12847_v21  ;;  %v5331_v5 = vmul.f32 %v12579_v49, %v14569_v1  ;;  %v5322_v54 = vmul.f32 %v12595_v18, %v14570_v39  ;;  %v5323_v28 = vmul.f32 %v12604_v11, %v14571_v25  ;;  %v14578_v1 = vld [vmem:[#allocation74_spill] sm:$0xff] }
 0x5e3   :  { %14567 = vst [vmem:[#allocation127_spill] sm:$0xff] %v12849_v3  ;;  %v5722_v59 = vadd.f32 %v5721_v16, %v5562_v37  ;;  %v5476_v29 = vmax.bf16 %v5475_v41, %v12838_v32  ;;  %v12860_v38 = vpack.c.bf16 %v5329_v61, %v5319_v9  ;;  %v12862_v7 = vpack.c.bf16 %v5330_v40, %v5320_v47  ;;  %v14576_v16 = vld [vmem:[#allocation62_spill] sm:$0xff]  ;;  %v14579_v47 = vld [vmem:[#allocation136_spill] sm:$0xff]  ;;  %v14580_v40 = vld [vmem:[#allocation141_spill] sm:$0xff] }
 0x5e4   :  { %v5324_v48 = vmul.f32 %v12622_v8, %v14574_v17  ;;  %v5325_v37 = vmul.f32 %v12626_v62, %v14575_v50  ;;  %v5332_v41 = vmul.f32 %v12595_v18, %v14576_v16  ;;  %v5326_v46 = vmul.f32 %v12633_v56, %v14577_v22  ;;  %v14581_v39 = vld [vmem:[#allocation138_spill] sm:$0xff]  ;;  %v14583_v16 = vld [vmem:[#allocation148_spill] sm:$0xff] }
 0x5e5   :  { %14572 = vst [vmem:[#allocation126_spill] sm:$0xff] %v12860_v38  ;;  %14573 = vst [vmem:[#allocation129_spill] sm:$0xff] %v12862_v7  ;;  %5723 = vadd.xlane.f32.xlu1 %v5722_v59  ;;  %v5477_v12 = vmax.bf16 %v5476_v29, %v12843_v0  ;;  %v5327_v9 = vmul.f32 %v12640_v35, %v14578_v1  ;;  %v5333_v61 = vmul.f32 %v12604_v11, %v14579_v47  ;;  %v14584_v1 = vld [vmem:[#allocation145_spill] sm:$0xff] }
 0x5e6   :  { %v5334_v59 = vmul.f32 %v12622_v8, %v14580_v40  ;;  %v5335_v25 = vmul.f32 %v12626_v62, %v14581_v39  ;;  %v12882_v17 = vpack.c.bf16 %v5331_v5, %v5321_v42  ;;  %v5505_v50 = vmax.bf16 %v12862_v7, %v12860_v38  ;;  %v14585_v47 = vld [vmem:[#allocation149_spill] sm:$0xff]  ;;  %v14586_v40 = vld [vmem:[#allocation103_spill] sm:$0xff] }
 0x5e7   :  { %v5478_v29 = vmax.bf16 %v5477_v12, %v12845_v13  ;;  %v5328_v22 = vmul.f32 %v12648_v53, %v14583_v16  ;;  %v5336_v51 = vmul.f32 %v12633_v56, %v14584_v1  ;;  %v5337_v0 = vmul.f32 %v12640_v35, %v14585_v47  ;;  %v14588_v5 = vld [vmem:[#allocation41_spill] sm:$0xff]  ;;  %v14590_v16 = vld [vmem:[#allocation43_spill] sm:$0xff] }
 0x5e8   :  { %14582 = vst [vmem:[#allocation131_spill] sm:$0xff] %v12882_v17  ;;  %v5338_v12 = vmul.f32 %v12648_v53, %v14586_v40  ;;  %v12895_v39 = vpack.c.bf16 %v5332_v41, %v5322_v54  ;;  %v5506_v42 = vmax.bf16 %v5505_v50, %v12882_v17  ;;  %v5279_v32 = vmul.f32 %v12442_v24, %v14588_v5  ;;  %v14622_v17 = vld [vmem:[#allocation45_spill] sm:$0xff] }
 0x5e9   :  { %v5479_v13 = vmax.bf16 %v5478_v29, %v12847_v21  ;;  %v12900_v58 = vpack.c.bf16 %v5333_v61, %v5323_v28  ;;  %v5280_v1 = vmul.f32 %v12446_v26, %v14590_v16  ;;  %v5289_v47 = vmul.f32 %v12442_v24, %v14591_v27  ;;  %v14597_v61 = vld [vmem:[#allocation42_spill] sm:$0xff] }
 0x5ea   :  { %14587 = vst [vmem:[#allocation135_spill] sm:$0xff] %v12895_v39  ;;  %v5290_v40 = vmul.f32 %v12446_v26, %v14592_v14  ;;  %v12909_v54 = vpack.c.bf16 %v5334_v59, %v5324_v48  ;;  %v12911_v41 = vpack.c.bf16 %v5335_v25, %v5325_v37  ;;  %v5507_v50 = vmax.bf16 %v5506_v42, %v12895_v39  ;;  %v14598_v21 = vld [vmem:[#allocation106_spill] sm:$0xff]  ;;  %v14600_v48 = vld [vmem:[#allocation44_spill] sm:$0xff]  ;;  %v14604_v25 = vld [vmem:[#allocation109_spill] sm:$0xff] }
 0x5eb   :  { %14589 = vst [vmem:[#allocation110_spill] sm:$0xff] %v12900_v58  ;;  %v5480_v29 = vmax.bf16 %v5479_v13, %v12849_v3  ;;  %v12914_v5 = vpack.c.bf16 %v5336_v51, %v5326_v46  ;;  %v12916_v28 = vpack.c.bf16 %v5337_v0, %v5327_v9  ;;  %v5281_v16 = vmul.f32 %v12579_v49, %v14597_v61  ;;  %v14602_v51 = vld [vmem:[#allocation89_spill] sm:$0xff]  ;;  %v14603_v46 = vld [vmem:[#allocation67_spill] sm:$0xff] }
 0x5ec   :  { %14593 = vst [vmem:[#allocation114_spill] sm:$0xff] %v12909_v54  ;;  %14594 = vst [vmem:[#allocation117_spill] sm:$0xff] %v12911_v41  ;;  %v5291_v27 = vmul.f32 %v12579_v49, %v14598_v21  ;;  %v12922_v14 = vpack.c.bf16 %v5338_v12, %v5328_v22  ;;  %v5508_v13 = vmax.bf16 %v5507_v50, %v12900_v58  ;;  %v14606_v12 = vld [vmem:[#allocation12_spill] sm:$0xff]  ;;  %v14607_v50 = vld [vmem:[#allocation75_spill] sm:$0xff] }
 0x5ed   :  { %14595 = vst [vmem:[#allocation120_spill] sm:$0xff] %v12914_v5  ;;  %14596 = vst [vmem:[#allocation111_spill] sm:$0xff] %v12916_v28  ;;  %5481 = vmax.xlane.bf16.xlu0 %v5480_v29  ;;  %v5282_v37 = vmul.f32 %v12595_v18, %v14600_v48  ;;  %v12927_v59 = vpack.c.bf16 %v5289_v47, %v5279_v32  ;;  %v5283_v0 = vmul.f32 %v12604_v11, %v14602_v51  ;;  %v14608_v47 = vld [vmem:[#allocation76_spill] sm:$0xff]  ;;  %v14609_v48 = vld [vmem:[#allocation98_spill] sm:$0xff] }
 0x5ee   :  { %14599 = vst [vmem:[#allocation118_spill] sm:$0xff] %v12922_v14  ;;  %v5284_v9 = vmul.f32 %v12622_v8, %v14603_v46  ;;  %v5292_v42 = vmul.f32 %v12595_v18, %v14604_v25  ;;  %v12935_v21 = vpack.c.bf16 %v5290_v40, %v5280_v1  ;;  %v5509_v22 = vmax.bf16 %v5508_v13, %v12909_v54  ;;  %v14610_v46 = vld [vmem:[#allocation124_spill] sm:$0xff]  ;;  %v14612_v13 = vld [vmem:[#allocation69_spill] sm:$0xff] }
 0x5ef   :  { %14601 = vst [vmem:[#allocation115_spill] sm:$0xff] %v12927_v59  ;;  %v5285_v29 = vmul.f32 %v12626_v62, %v14606_v12  ;;  %v5286_v32 = vmul.f32 %v12633_v56, %v14607_v50  ;;  %v5293_v61 = vmul.f32 %v12604_v11, %v14608_v47  ;;  %v5287_v51 = vmul.f32 %v12640_v35, %v14609_v48  ;;  %v14613_v50 = vld [vmem:[#allocation24_spill] sm:$0xff]  ;;  %v14614_v47 = vld [vmem:[#allocation105_spill] sm:$0xff] }
 0x5f0   :  { %14605 = vst [vmem:[#allocation79_spill] sm:$0xff] %v12935_v21  ;;  %v5294_v3 = vmul.f32 %v12622_v8, %v14610_v46  ;;  %v12948_v25 = vpack.c.bf16 %v5291_v27, %v5281_v16  ;;  %v5483_v1 = vmax.bf16 %v12935_v21, %v12927_v59  ;;  %v5510_v40 = vmax.bf16 %v5509_v22, %v12911_v41  ;;  %v14615_v48 = vld [vmem:[#allocation112_spill] sm:$0xff]  ;;  %v14616_v46 = vld [vmem:[#allocation155_spill] sm:$0xff] }
 0x5f1   :  { %v5295_v12 = vmul.f32 %v12626_v62, %v14612_v13  ;;  %v5296_v33 = vmul.f32 %v12633_v56, %v14613_v50  ;;  %v5297_v45 = vmul.f32 %v12640_v35, %v14614_v47  ;;  %v5288_v54 = vmul.f32 %v12648_v53, %v14615_v48  ;;  %v14619_v13 = vld [vmem:[#allocation36_spill] sm:$0xff] }
 0x5f2   :  { %14611 = vst [vmem:[#allocation78_spill] sm:$0xff] %v12948_v25  ;;  %v5298_v16 = vmul.f32 %v12648_v53, %v14616_v46  ;;  %v12963_v27 = vpack.c.bf16 %v5292_v42, %v5282_v37  ;;  %v5484_v58 = vmax.bf16 %v5483_v1, %v12948_v25  ;;  %v5511_v22 = vmax.bf16 %v5510_v40, %v12914_v5  ;;  %v14623_v42 = vld [vmem:[#allocation47_spill] sm:$0xff] }
 0x5f3   :  { %v12967_v41 = vpack.c.bf16 %v5293_v61, %v5283_v0  ;;  %v5339_v50 = vmul.f32 %v12442_v24, %v14619_v13  ;;  %v5340_v47 = vmul.f32 %v12446_v26, %v14620_v44  ;;  %v12973_v39 = vpack.c.bf16 %v5294_v3, %v5284_v9  ;;  %v14628_v3 = vld [vmem:[#allocation63_spill] sm:$0xff]  ;;  %v14629_v9 = vld [vmem:[#allocation65_spill] sm:$0xff] }
 0x5f4   :  { %14617 = vst [vmem:[#allocation80_spill] sm:$0xff] %v12963_v27  ;;  %v5485_v48 = vmax.bf16 %v5484_v58, %v12963_v27  ;;  %v5349_v37 = vmul.f32 %v12442_v24, %v14622_v17  ;;  %v5350_v1 = vmul.f32 %v12446_v26, %v14623_v42  ;;  %v5512_v40 = vmax.bf16 %v5511_v22, %v12916_v28  ;;  %v14630_v17 = vld [vmem:[#allocation64_spill] sm:$0xff] }
 0x5f5   :  { %14618 = vst [vmem:[#allocation121_spill] sm:$0xff] %v12967_v41  ;;  %14621 = vst [vmem:[#allocation81_spill] sm:$0xff] %v12973_v39  ;;  %v12981_v0 = vpack.c.bf16 %v5295_v12, %v5285_v29  ;;  %v12983_v61 = vpack.c.bf16 %v5296_v33, %v5286_v32  ;;  %v12985_v46 = vpack.c.bf16 %v5297_v45, %v5287_v51  ;;  %v14634_v51 = vld [vmem:[#allocation82_spill] sm:$0xff]  ;;  %v14635_v22 = vld [vmem:[#allocation96_spill] sm:$0xff] }
 0x5f6   :  { %v12987_v13 = vpack.c.bf16 %v5298_v16, %v5288_v54  ;;  %v5486_v44 = vmax.bf16 %v5485_v48, %v12967_v41  ;;  %v5341_v58 = vmul.f32 %v12579_v49, %v14628_v3  ;;  %v5351_v24 = vmul.f32 %v12579_v49, %v14629_v9  ;;  %v14633_v54 = vld [vmem:[#allocation157_spill] sm:$0xff]  ;;  %v14636_v48 = vld [vmem:[#allocation158_spill] sm:$0xff]  ;;  %v14640_v9 = vld [vmem:[#allocation83_spill] sm:$0xff] }
 0x5f7   :  { %14624 = vst [vmem:[#allocation84_spill] sm:$0xff] %v12981_v0  ;;  %14625 = vst [vmem:[#allocation130_spill] sm:$0xff] %v12983_v61  ;;  %v5513_v26 = vmax.bf16 %v5512_v40, %v12922_v14  ;;  %v5342_v29 = vmul.f32 %v12595_v18, %v14630_v17  ;;  %v12997_v12 = vpack.c.bf16 %v5349_v37, %v5339_v50  ;;  %v14637_v40 = vld [vmem:[#allocation90_spill] sm:$0xff] }
 0x5f8   :  { %14626 = vst [vmem:[#allocation156_spill] sm:$0xff] %v12985_v46  ;;  %14627 = vst [vmem:[#allocation132_spill] sm:$0xff] %v12987_v13  ;;  %v12999_v33 = vpack.c.bf16 %v5350_v1, %v5340_v47  ;;  %v5487_v45 = vmax.bf16 %v5486_v44, %v12973_v39  ;;  %v5343_v32 = vmul.f32 %v12604_v11, %v14633_v54  ;;  %v14638_v47 = vld [vmem:[#allocation151_spill] sm:$0xff] }
 0x5f9   :  { %14631 = vst [vmem:[#allocation57_spill] sm:$0xff] %v12997_v12  ;;  %v5344_v16 = vmul.f32 %v12622_v8, %v14634_v51  ;;  %v5352_v49 = vmul.f32 %v12595_v18, %v14635_v22  ;;  %5514 = vmax.xlane.bf16.xlu1 %v5513_v26  ;;  %v5345_v42 = vmul.f32 %v12626_v62, %v14636_v48  ;;  %v14639_v1 = vld [vmem:[#allocation143_spill] sm:$0xff]  ;;  %v14642_v26 = vld [vmem:[#allocation153_spill] sm:$0xff] }
 0x5fa   :  { %14632 = vst [vmem:[#allocation7_spill] sm:$0xff] %v12999_v33  ;;  %v5346_v50 = vmul.f32 %v12633_v56, %v14637_v40  ;;  %v5347_v37 = vmul.f32 %v12640_v35, %v14638_v47  ;;  %v5353_v44 = vmul.f32 %v12604_v11, %v14639_v1  ;;  %v5488_v3 = vmax.bf16 %v5487_v45, %v12981_v0  ;;  %v14643_v22 = vld [vmem:[#allocation147_spill] sm:$0xff]  ;;  %v14644_v40 = vld [vmem:[#allocation40_spill] sm:$0xff] }
 0x5fb   :  { %v5354_v17 = vmul.f32 %v12622_v8, %v14640_v9  ;;  %v13019_v54 = vpack.c.bf16 %v5351_v24, %v5341_v58  ;;  %v5516_v18 = vmax.bf16 %v12999_v33, %v12997_v12  ;;  %v5348_v51 = vmul.f32 %v12648_v53, %v14642_v26  ;;  %v14645_v11 = vld [vmem:[#allocation99_spill] sm:$0xff]  ;;  %v14646_v8 = vld [vmem:[#allocation88_spill] sm:$0xff] }
 0x5fc   :  { %v5355_v48 = vmul.f32 %v12626_v62, %v14643_v22  ;;  %v5356_v47 = vmul.f32 %v12633_v56, %v14644_v40  ;;  %v5357_v45 = vmul.f32 %v12640_v35, %v14645_v11  ;;  %v5489_v1 = vmax.bf16 %v5488_v3, %v12983_v61 }
 0x5fd   :  { %14641 = vst [vmem:[#allocation9_spill] sm:$0xff] %v13019_v54  ;;  %v5358_v58 = vmul.f32 %v12648_v53, %v14646_v8  ;;  %v13034_v24 = vpack.c.bf16 %v5352_v49, %v5342_v29  ;;  %v5517_v9 = vmax.bf16 %v5516_v18, %v13019_v54  ;;  %v5545_v26 = vunpack.c.l.bf16 %v12545_v30 }
 0x5fe   :  { %v14648_v33 = vunpack.c.l.bf16 %v12417_v36  ;;  %v14649_v62 = vunpack.c.l.bf16 %v14530_v19  ;;  %v5633_v56 = vunpack.c.h.bf16 %v12927_v59  ;;  %v5634_v35 = vunpack.c.h.bf16 %v12935_v21 }
 0x5ff   :  { %14647 = vst [vmem:[#allocation70_spill] sm:$0xff] %v13034_v24  ;;  %v5490_v3 = vmax.bf16 %v5489_v1, %v12985_v46  ;;  %v13045_v40 = vpack.c.bf16 %v5353_v44, %v5343_v32  ;;  %v13047_v53 = vpack.c.bf16 %v5354_v17, %v5344_v16  ;;  %v5518_v29 = vmax.bf16 %v5517_v9, %v13034_v24 }
 0x600   :  { %v5703_v22 = vadd.f32 %v14649_v62, %v14648_v33  ;;  %v13050_v49 = vpack.c.bf16 %v5355_v48, %v5345_v42  ;;  %v13052_v18 = vpack.c.bf16 %v5356_v47, %v5346_v50  ;;  %v5546_v36 = vunpack.c.l.bf16 %v12414_v52 }
 0x601   :  { %14650 = vst [vmem:[#allocation68_spill] sm:$0xff] %v13045_v40  ;;  %14651 = vst [vmem:[#allocation72_spill] sm:$0xff] %v13047_v53  ;;  %v5491_v33 = vmax.bf16 %v5490_v3, %v12987_v13  ;;  %v13056_v11 = vpack.c.bf16 %v5357_v45, %v5347_v37  ;;  %v13058_v8 = vpack.c.bf16 %v5358_v58, %v5348_v51  ;;  %v5547_v16 = vunpack.c.l.bf16 %v12588_v55 }
 0x602   :  { %14652 = vst [vmem:[#allocation28_spill] sm:$0xff] %v13050_v49  ;;  %14653 = vst [vmem:[#allocation48_spill] sm:$0xff] %v13052_v18  ;;  %v5704_v19 = vadd.f32 %v5703_v22, %v5545_v26  ;;  %v5519_v32 = vmax.bf16 %v5518_v29, %v13045_v40  ;;  %v5635_v17 = vunpack.c.h.bf16 %v12948_v25  ;;  %v5802_v42 = vadd.f32 %v5634_v35, %v5633_v56  ;;  %v14656_v26 = vld [vmem:[#allocation27_spill] sm:$0xff]  ;;  %v14657_v22 = vld [vmem:[#allocation125_spill] sm:$0xff] }
 0x603   :  { %14654 = vst [vmem:[#allocation73_spill] sm:$0xff] %v13056_v11  ;;  %14655 = vst [vmem:[#allocation38_spill] sm:$0xff] %v13058_v8  ;;  %5492 = vmax.xlane.bf16.xlu0 %v5491_v33  ;;  %v5548_v52 = vunpack.c.l.bf16 %v12496_v4  ;;  %v5549_v48 = vunpack.c.l.bf16 %v12590_v63  ;;  %v5550_v37 = vunpack.c.l.bf16 %v12600_v60  ;;  %v5551_v51 = vunpack.c.l.bf16 %v12642_v6  ;;  %v14659_v35 = vld [vmem:[#allocation50_spill] sm:$0xff]  ;;  %v14661_v33 = vld [vmem:[#allocation100_spill] sm:$0xff] }
 0x604   :  { %v5705_v44 = vadd.f32 %v5704_v19, %v5546_v36  ;;  %v5520_v50 = vmax.bf16 %v5519_v32, %v13047_v53  ;;  %v5636_v45 = vunpack.c.h.bf16 %v12963_v27  ;;  %v5803_v1 = vadd.f32 %v5802_v42, %v5635_v17 }
 0x605   :  { %v5552_v9 = vunpack.c.l.bf16 %v12650_v57  ;;  %v5565_v62 = vunpack.c.l.bf16 %v14656_v26  ;;  %v14658_v56 = vunpack.c.l.bf16 %v14657_v22  ;;  %v14660_v4 = vunpack.c.l.bf16 %v14659_v35 }
 0x606   :  { %v5706_v47 = vadd.f32 %v5705_v44, %v5547_v16  ;;  %v5521_v58 = vmax.bf16 %v5520_v50, %v13050_v49  ;;  %v5637_v36 = vunpack.c.h.bf16 %v12967_v41  ;;  %v5804_v19 = vadd.f32 %v5803_v1, %v5636_v45  ;;  %v14662_v45 = vld [vmem:[#allocation116_spill] sm:$0xff] }
 0x607   :  { %v5725_v3 = vadd.f32 %v14660_v4, %v14658_v56  ;;  %v5566_v32 = vunpack.c.l.bf16 %v14661_v33  ;;  %v5643_v17 = vunpack.c.l.bf16 %v12661_v15  ;;  %v5644_v42 = vunpack.c.l.bf16 %v12669_v23 }
 0x608   :  { %v5707_v29 = vadd.f32 %v5706_v47, %v5548_v52  ;;  %v5522_v16 = vmax.bf16 %v5521_v58, %v13052_v18  ;;  %v5638_v6 = vunpack.c.h.bf16 %v12973_v39  ;;  %v5639_v57 = vunpack.c.h.bf16 %v12981_v0 }
 0x609   :  { %v5726_v44 = vadd.f32 %v5725_v3, %v5565_v62  ;;  %v5805_v63 = vadd.f32 %v5804_v19, %v5637_v36  ;;  %v5640_v47 = vunpack.c.h.bf16 %v12983_v61  ;;  %v5567_v1 = vunpack.c.l.bf16 %v14662_v45  ;;  %v14663_v3 = vld [vmem:[#allocation18_spill] sm:$0xff] }
 0x60a   :  { %v5708_v50 = vadd.f32 %v5707_v29, %v5549_v48  ;;  %v5523_v52 = vmax.bf16 %v5522_v16, %v13056_v11  ;;  %v5641_v58 = vunpack.c.h.bf16 %v12985_v46  ;;  %v5568_v55 = vunpack.c.l.bf16 %v14663_v3  ;;  %v14664_v11 = vld [vmem:[#allocation25_spill] sm:$0xff] }
 0x60b   :  { %v5727_v56 = vadd.f32 %v5726_v44, %v5566_v32  ;;  %v5806_v62 = vadd.f32 %v5805_v63, %v5638_v6  ;;  %v5645_v60 = vunpack.c.l.bf16 %v12682_v10  ;;  %v5813_v30 = vadd.f32 %v5644_v42, %v5643_v17  ;;  %v14665_v32 = vld [vmem:[#allocation22_spill] sm:$0xff] }
 0x60c   :  { %v5709_v4 = vadd.f32 %v5708_v50, %v5550_v37  ;;  %v5524_v48 = vmax.bf16 %v5523_v52, %v13058_v8  ;;  %v5642_v19 = vunpack.c.h.bf16 %v12987_v13  ;;  %v5569_v18 = vunpack.c.l.bf16 %v14664_v11  ;;  %v14666_v50 = vld [vmem:[#allocation8_spill] sm:$0xff]  ;;  %v14667_v52 = vld [vmem:[#allocation17_spill] sm:$0xff] }
 0x60d   :  { %v5728_v29 = vadd.f32 %v5727_v56, %v5567_v1  ;;  %v5807_v16 = vadd.f32 %v5806_v62, %v5639_v57  ;;  %v5570_v37 = vunpack.c.l.bf16 %v14665_v32  ;;  %v5646_v63 = vunpack.c.l.bf16 %v14666_v50 }
 0x60e   :  { %v5710_v36 = vadd.f32 %v5709_v4, %v5551_v51  ;;  %5525 = vmax.xlane.bf16.xlu1 %v5524_v48  ;;  %v5814_v6 = vadd.f32 %v5813_v30, %v5645_v60  ;;  %v5571_v1 = vunpack.c.l.bf16 %v14667_v52  ;;  %v5647_v56 = vunpack.c.l.bf16 %v12700_v34 }
 0x60f   :  { %v5729_v44 = vadd.f32 %v5728_v29, %v5568_v55  ;;  %v5808_v53 = vadd.f32 %v5807_v16, %v5640_v47  ;;  %v5575_v42 = vunpack.c.h.bf16 %v14656_v26  ;;  %v14668_v57 = vunpack.c.h.bf16 %v14657_v22 }
 0x610   :  { %v5711_v49 = vadd.f32 %v5710_v36, %v5552_v9  ;;  %v5815_v51 = vadd.f32 %v5814_v6, %v5646_v63  ;;  %v14669_v4 = vunpack.c.h.bf16 %v14659_v35  ;;  %v5648_v48 = vunpack.c.l.bf16 %v12708_v20  ;;  %v14670_v36 = vld [vmem:[#allocation54_spill] sm:$0xff] }
 0x611   :  { %v5730_v17 = vadd.f32 %v5729_v44, %v5569_v18  ;;  %v5809_v55 = vadd.f32 %v5808_v53, %v5641_v58  ;;  %v5653_v30 = vunpack.c.h.bf16 %v12661_v15  ;;  %v5654_v60 = vunpack.c.h.bf16 %v12669_v23 }
 0x612   :  { %v5736_v62 = vadd.f32 %v14669_v4, %v14668_v57  ;;  %5712 = vadd.xlane.f32.xlu0 %v5711_v49  ;;  %v5816_v47 = vadd.f32 %v5815_v51, %v5647_v56  ;;  %v5576_v18 = vunpack.c.h.bf16 %v14661_v33  ;;  %v5572_v16 = vunpack.c.l.bf16 %v14670_v36  ;;  %v14671_v57 = vld [vmem:[#allocation53_spill] sm:$0xff] }
 0x613   :  { %v5731_v9 = vadd.f32 %v5730_v17, %v5570_v37  ;;  %v5649_v22 = vunpack.c.l.bf16 %v12710_v31  ;;  %v5650_v35 = vunpack.c.l.bf16 %v12712_v43  ;;  %v5577_v49 = vunpack.c.h.bf16 %v14662_v45 }
 0x614   :  { %v5737_v29 = vadd.f32 %v5736_v62, %v5575_v42  ;;  %v5810_v53 = vadd.f32 %v5809_v55, %v5642_v19  ;;  %v5817_v44 = vadd.f32 %v5816_v47, %v5648_v48  ;;  %v5651_v6 = vunpack.c.l.bf16 %v12740_v2 }
 0x615   :  { %v5732_v58 = vadd.f32 %v5731_v9, %v5571_v1  ;;  %v5652_v37 = vunpack.c.l.bf16 %v14671_v57  ;;  %v5655_v56 = vunpack.c.h.bf16 %v12682_v10  ;;  %v5824_v17 = vadd.f32 %v5654_v60, %v5653_v30 }
 0x616   :  { %v5738_v63 = vadd.f32 %v5737_v29, %v5576_v18  ;;  %5811 = vadd.xlane.f32.xlu1 %v5810_v53  ;;  %v5818_v42 = vadd.f32 %v5817_v44, %v5649_v22  ;;  %v5578_v4 = vunpack.c.h.bf16 %v14663_v3  ;;  %v5579_v15 = vunpack.c.h.bf16 %v14664_v11  ;;  %v14672_v29 = vld [vmem:[#allocation128_spill] sm:$0xff]  ;;  %v14675_v53 = vld [vmem:[#allocation3_spill] sm:$0xff]  ;;  %v14690_v11 = vld [vmem:[#allocation117_spill] sm:$0xff] }
 0x617   :  { %v5733_v51 = vadd.f32 %v5732_v58, %v5572_v16  ;;  %v5580_v19 = vunpack.c.h.bf16 %v14665_v32  ;;  %v5656_v1 = vunpack.c.h.bf16 %v14666_v50  ;;  %v5825_v55 = vadd.f32 %v5824_v17, %v5655_v56  ;;  %v14673_v22 = vld [vmem:[#allocation4_spill] sm:$0xff] }
 0x618   :  { %v5739_v62 = vadd.f32 %v5738_v63, %v5577_v49  ;;  %v5819_v48 = vadd.f32 %v5818_v42, %v5650_v35  ;;  %v5581_v9 = vunpack.c.h.bf16 %v14667_v52  ;;  %v5582_v47 = vunpack.c.h.bf16 %v14670_v36  ;;  %v14677_v42 = vld [vmem:[#allocation133_spill] sm:$0xff] }
 0x619   :  { %5734 = vadd.xlane.f32.xlu0 %v5733_v51  ;;  %v5657_v60 = vunpack.c.h.bf16 %v12700_v34  ;;  %v5826_v18 = vadd.f32 %v5825_v55, %v5656_v1  ;;  %v5585_v16 = vunpack.c.l.bf16 %v14672_v29  ;;  %v14674_v49 = vunpack.c.l.bf16 %v14673_v22 }
 0x61a   :  { %v5740_v30 = vadd.f32 %v5739_v62, %v5578_v4  ;;  %v14676_v58 = vunpack.c.l.bf16 %v14675_v53  ;;  %v5820_v63 = vadd.f32 %v5819_v48, %v5651_v6  ;;  %v5663_v56 = vunpack.c.l.bf16 %v12860_v38 }
 0x61b   :  { %v5664_v35 = vunpack.c.l.bf16 %v12862_v7  ;;  %v5658_v17 = vunpack.c.h.bf16 %v12708_v20  ;;  %v5827_v51 = vadd.f32 %v5826_v18, %v5657_v60  ;;  %v5586_v4 = vunpack.c.l.bf16 %v14677_v42  ;;  %v14679_v60 = vld [vmem:[#allocation131_spill] sm:$0xff] }
 0x61c   :  { %v5747_v44 = vadd.f32 %v14676_v58, %v14674_v49  ;;  %v5741_v10 = vadd.f32 %v5740_v30, %v5579_v15  ;;  %v5821_v1 = vadd.f32 %v5820_v63, %v5652_v37  ;;  %v5659_v34 = vunpack.c.h.bf16 %v12710_v31  ;;  %v14678_v15 = vld [vmem:[#allocation51_spill] sm:$0xff] }
 0x61d   :  { %v5660_v50 = vunpack.c.h.bf16 %v12712_v43  ;;  %v5661_v49 = vunpack.c.h.bf16 %v12740_v2  ;;  %v5828_v6 = vadd.f32 %v5827_v51, %v5658_v17  ;;  %v5587_v48 = vunpack.c.l.bf16 %v14678_v15  ;;  %v14680_v37 = vld [vmem:[#allocation55_spill] sm:$0xff]  ;;  %v14682_v43 = vld [vmem:[#allocation142_spill] sm:$0xff] }
 0x61e   :  { %v5748_v62 = vadd.f32 %v5747_v44, %v5585_v16  ;;  %v5742_v55 = vadd.f32 %v5741_v10, %v5580_v19  ;;  %5822 = vadd.xlane.f32.xlu1 %v5821_v1  ;;  %v5662_v20 = vunpack.c.h.bf16 %v14671_v57  ;;  %v5665_v18 = vunpack.c.l.bf16 %v14679_v60  ;;  %v14681_v19 = vld [vmem:[#allocation86_spill] sm:$0xff]  ;;  %v14683_v17 = vld [vmem:[#allocation135_spill] sm:$0xff] }
 0x61f   :  { %v5835_v52 = vadd.f32 %v5664_v35, %v5663_v56  ;;  %v5829_v16 = vadd.f32 %v5828_v6, %v5659_v34  ;;  %v5588_v10 = vunpack.c.l.bf16 %v14680_v37  ;;  %v5589_v44 = vunpack.c.l.bf16 %v14681_v19  ;;  %v14685_v1 = vld [vmem:[#allocation139_spill] sm:$0xff]  ;;  %v14686_v56 = vld [vmem:[#allocation110_spill] sm:$0xff] }
 0x620   :  { %v5749_v30 = vadd.f32 %v5748_v62, %v5586_v4  ;;  %v5743_v58 = vadd.f32 %v5742_v55, %v5581_v9  ;;  %v5590_v2 = vunpack.c.l.bf16 %v14682_v43  ;;  %v5666_v51 = vunpack.c.l.bf16 %v14683_v17  ;;  %v14684_v62 = vld [vmem:[#allocation16_spill] sm:$0xff] }
 0x621   :  { %v5836_v23 = vadd.f32 %v5835_v52, %v5665_v18  ;;  %v5830_v4 = vadd.f32 %v5829_v16, %v5660_v50  ;;  %v5591_v9 = vunpack.c.l.bf16 %v14684_v62  ;;  %v5592_v55 = vunpack.c.l.bf16 %v14685_v1  ;;  %v14689_v18 = vld [vmem:[#allocation114_spill] sm:$0xff] }
 0x622   :  { %v5750_v63 = vadd.f32 %v5749_v30, %v5587_v48  ;;  %v5744_v31 = vadd.f32 %v5743_v58, %v5582_v47  ;;  %v5667_v34 = vunpack.c.l.bf16 %v14686_v56  ;;  %v5595_v6 = vunpack.c.h.bf16 %v14672_v29 }
 0x623   :  { %v5837_v35 = vadd.f32 %v5836_v23, %v5666_v51  ;;  %v14687_v48 = vunpack.c.h.bf16 %v14673_v22  ;;  %v14688_v47 = vunpack.c.h.bf16 %v14675_v53  ;;  %v5831_v58 = vadd.f32 %v5830_v4, %v5661_v49 }
 0x624   :  { %v5751_v57 = vadd.f32 %v5750_v63, %v5588_v10  ;;  %5745 = vadd.xlane.f32.xlu0 %v5744_v31  ;;  %v5673_v50 = vunpack.c.h.bf16 %v12860_v38  ;;  %v5674_v52 = vunpack.c.h.bf16 %v12862_v7  ;;  %v5668_v16 = vunpack.c.l.bf16 %v14689_v18 }
 0x625   :  { %v5758_v30 = vadd.f32 %v14688_v47, %v14687_v48  ;;  %v5838_v10 = vadd.f32 %v5837_v35, %v5667_v34  ;;  %v5596_v31 = vunpack.c.h.bf16 %v14677_v42  ;;  %v5832_v23 = vadd.f32 %v5831_v58, %v5662_v20  ;;  %v14691_v47 = vld [vmem:[#allocation6_spill] sm:$0xff] }
 0x626   :  { %v5752_v36 = vadd.f32 %v5751_v57, %v5589_v44  ;;  %v5669_v45 = vunpack.c.l.bf16 %v14690_v11  ;;  %v5670_v22 = vunpack.c.l.bf16 %v12914_v5  ;;  %v5671_v53 = vunpack.c.l.bf16 %v12916_v28 }
 0x627   :  { %v5759_v63 = vadd.f32 %v5758_v30, %v5595_v6  ;;  %v5839_v49 = vadd.f32 %v5838_v10, %v5668_v16  ;;  %v5597_v57 = vunpack.c.h.bf16 %v14678_v15  ;;  %5833 = vadd.xlane.f32.xlu1 %v5832_v23  ;;  %v5598_v48 = vunpack.c.h.bf16 %v14680_v37 }
 0x628   :  { %v5753_v51 = vadd.f32 %v5752_v36, %v5590_v2  ;;  %v5675_v34 = vunpack.c.h.bf16 %v14679_v60  ;;  %v5846_v35 = vadd.f32 %v5674_v52, %v5673_v50  ;;  %v5623_v2 = vunpack.c.l.bf16 %v12927_v59 }
 0x629   :  { %v5760_v44 = vadd.f32 %v5759_v63, %v5596_v31  ;;  %v5840_v6 = vadd.f32 %v5839_v49, %v5669_v45  ;;  %v5624_v36 = vunpack.c.l.bf16 %v12935_v21  ;;  %v5603_v30 = vunpack.c.l.bf16 %v14691_v47 }
 0x62a   :  { %v5754_v4 = vadd.f32 %v5753_v51, %v5591_v9  ;;  %v5676_v16 = vunpack.c.h.bf16 %v14683_v17  ;;  %v5847_v10 = vadd.f32 %v5846_v35, %v5675_v34  ;;  %v5672_v31 = vunpack.c.l.bf16 %v12922_v14  ;;  %v14692_v35 = vld [vmem:[#allocation7_spill] sm:$0xff] }
 0x62b   :  { %v5761_v20 = vadd.f32 %v5760_v44, %v5597_v57  ;;  %v5841_v9 = vadd.f32 %v5840_v6, %v5670_v22  ;;  %v5599_v63 = vunpack.c.h.bf16 %v14681_v19  ;;  %v5600_v45 = vunpack.c.h.bf16 %v14682_v43 }
 0x62c   :  { %v5755_v58 = vadd.f32 %v5754_v4, %v5592_v55  ;;  %v5601_v50 = vunpack.c.h.bf16 %v14684_v62  ;;  %v5677_v52 = vunpack.c.h.bf16 %v14686_v56  ;;  %v5848_v51 = vadd.f32 %v5847_v10, %v5676_v16 }
 0x62d   :  { %v5762_v23 = vadd.f32 %v5761_v20, %v5598_v48  ;;  %v5842_v49 = vadd.f32 %v5841_v9, %v5671_v53  ;;  %v5625_v55 = vunpack.c.l.bf16 %v12948_v25  ;;  %v5791_v44 = vadd.f32 %v5624_v36, %v5623_v2 }
 0x62e   :  { %5756 = vadd.xlane.f32.xlu0 %v5755_v58  ;;  %v5678_v4 = vunpack.c.h.bf16 %v14689_v18  ;;  %v5849_v34 = vadd.f32 %v5848_v51, %v5677_v52  ;;  %v5683_v22 = vunpack.c.l.bf16 %v12997_v12  ;;  %v5684_v48 = vunpack.c.l.bf16 %v14692_v35 }
 0x62f   :  { %v5763_v57 = vadd.f32 %v5762_v23, %v5599_v63  ;;  %v5843_v6 = vadd.f32 %v5842_v49, %v5672_v31  ;;  %v5626_v58 = vunpack.c.l.bf16 %v12963_v27  ;;  %v5792_v60 = vadd.f32 %v5791_v44, %v5625_v55 }
 0x630   :  { %v5602_v56 = vunpack.c.h.bf16 %v14685_v1  ;;  %v5679_v53 = vunpack.c.h.bf16 %v14690_v11  ;;  %v5680_v16 = vunpack.c.h.bf16 %v12914_v5  ;;  %v5850_v10 = vadd.f32 %v5849_v34, %v5678_v4 }
 0x631   :  { %v5764_v20 = vadd.f32 %v5763_v57, %v5600_v45  ;;  %5844 = vadd.xlane.f32.xlu1 %v5843_v6  ;;  %v5681_v36 = vunpack.c.h.bf16 %v12916_v28  ;;  %v5627_v9 = vunpack.c.l.bf16 %v12967_v41  ;;  %v5793_v63 = vadd.f32 %v5792_v60, %v5626_v58 }
 0x632   :  { %v5682_v31 = vunpack.c.h.bf16 %v12922_v14  ;;  %v5851_v23 = vadd.f32 %v5850_v10, %v5679_v53  ;;  %v5685_v45 = vunpack.c.l.bf16 %v13019_v54  ;;  %v5857_v52 = vadd.f32 %v5684_v48, %v5683_v22  ;;  %v14694_v53 = vld [vmem:[#allocation5_spill] sm:$0xff] }
 0x633   :  { %v5765_v2 = vadd.f32 %v5764_v20, %v5601_v50  ;;  %v5628_v49 = vunpack.c.l.bf16 %v12973_v39  ;;  %v5629_v57 = vunpack.c.l.bf16 %v12981_v0  ;;  %v5794_v55 = vadd.f32 %v5793_v63, %v5627_v9  ;;  %v14693_v20 = vld [vmem:[#allocation146_spill] sm:$0xff] }
 0x634   :  { %v5852_v44 = vadd.f32 %v5851_v23, %v5680_v16  ;;  %v5630_v50 = vunpack.c.l.bf16 %v12983_v61  ;;  %v5686_v4 = vunpack.c.l.bf16 %v13034_v24  ;;  %v5858_v34 = vadd.f32 %v5857_v52, %v5685_v45  ;;  %v14696_v23 = vld [vmem:[#allocation137_spill] sm:$0xff] }
 0x635   :  { %v5766_v51 = vadd.f32 %v5765_v2, %v5602_v56  ;;  %v5795_v60 = vadd.f32 %v5794_v55, %v5628_v49  ;;  %v5687_v6 = vunpack.c.l.bf16 %v13045_v40  ;;  %v5605_v58 = vunpack.c.l.bf16 %v14693_v20  ;;  %v14697_v55 = vld [vmem:[#allocation72_spill] sm:$0xff] }
 0x636   :  { %v14695_v22 = vunpack.c.l.bf16 %v14694_v53  ;;  %v5853_v48 = vadd.f32 %v5852_v44, %v5681_v36  ;;  %v5859_v10 = vadd.f32 %v5858_v34, %v5686_v4  ;;  %v5693_v2 = vunpack.c.h.bf16 %v12997_v12  ;;  %v14698_v44 = vld [vmem:[#allocation19_spill] sm:$0xff] }
 0x637   :  { %5767 = vadd.xlane.f32.xlu0 %v5766_v51  ;;  %v5694_v16 = vunpack.c.h.bf16 %v14692_v35  ;;  %v5631_v9 = vunpack.c.l.bf16 %v12985_v46  ;;  %v5796_v63 = vadd.f32 %v5795_v60, %v5629_v57  ;;  %v5606_v45 = vunpack.c.l.bf16 %v14696_v23 }
 0x638   :  { %v5769_v56 = vadd.f32 %v14695_v22, %v5603_v30  ;;  %v5613_v51 = vunpack.c.h.bf16 %v14691_v47  ;;  %v5854_v49 = vadd.f32 %v5853_v48, %v5682_v31  ;;  %v5688_v28 = vunpack.c.l.bf16 %v14697_v55  ;;  %v14699_v22 = vld [vmem:[#allocation28_spill] sm:$0xff] }
 0x639   :  { %v5860_v11 = vadd.f32 %v5859_v10, %v5687_v6  ;;  %v5632_v30 = vunpack.c.l.bf16 %v12987_v13  ;;  %v5797_v36 = vadd.f32 %v5796_v63, %v5630_v50  ;;  %v5607_v4 = vunpack.c.l.bf16 %v14698_v44  ;;  %v14701_v31 = vld [vmem:[#allocation140_spill] sm:$0xff]  ;;  %v14702_v6 = vld [vmem:[#allocation73_spill] sm:$0xff] }
 0x63a   :  { %v5770_v52 = vadd.f32 %v5769_v56, %v5605_v58  ;;  %5855 = vadd.xlane.f32.xlu1 %v5854_v49  ;;  %v5689_v14 = vunpack.c.l.bf16 %v14699_v22  ;;  %v5695_v57 = vunpack.c.h.bf16 %v13019_v54  ;;  %v5868_v60 = vadd.f32 %v5694_v16, %v5693_v2  ;;  %v14700_v56 = vld [vmem:[#allocation48_spill] sm:$0xff] }
 0x63b   :  { %v5861_v5 = vadd.f32 %v5860_v11, %v5688_v28  ;;  %v5798_v58 = vadd.f32 %v5797_v36, %v5631_v9  ;;  %v5690_v47 = vunpack.c.l.bf16 %v14700_v56  ;;  %v5608_v48 = vunpack.c.l.bf16 %v14701_v31  ;;  %v14704_v11 = vld [vmem:[#allocation87_spill] sm:$0xff]  ;;  %v14705_v9 = vld [vmem:[#allocation85_spill] sm:$0xff] }
 0x63c   :  { %v5771_v34 = vadd.f32 %v5770_v52, %v5606_v45  ;;  %v5691_v10 = vunpack.c.l.bf16 %v14702_v6  ;;  %v5696_v50 = vunpack.c.h.bf16 %v13034_v24  ;;  %v5869_v63 = vadd.f32 %v5868_v60, %v5695_v57  ;;  %v14703_v52 = vld [vmem:[#allocation144_spill] sm:$0xff] }
 0x63d   :  { %v5862_v0 = vadd.f32 %v5861_v5, %v5689_v14  ;;  %v5799_v45 = vadd.f32 %v5798_v58, %v5632_v30  ;;  %v5609_v49 = vunpack.c.l.bf16 %v14703_v52  ;;  %v5610_v61 = vunpack.c.l.bf16 %v14704_v11 }
 0x63e   :  { %v5772_v46 = vadd.f32 %v5771_v34, %v5607_v4  ;;  %v5697_v2 = vunpack.c.h.bf16 %v13045_v40  ;;  %v5870_v16 = vadd.f32 %v5869_v63, %v5696_v50  ;;  %v5611_v36 = vunpack.c.l.bf16 %v14705_v9 }
 0x63f   :  { %v5863_v28 = vadd.f32 %v5862_v0, %v5690_v47  ;;  %5800 = vadd.xlane.f32.xlu0 %v5799_v45  ;;  %v5615_v34 = vunpack.c.h.bf16 %v14693_v20  ;;  %v14706_v5 = vunpack.c.h.bf16 %v14694_v53  ;;  %v5692_v30 = vunpack.c.l.bf16 %v13058_v8 }
 0x640   :  { %v5773_v13 = vadd.f32 %v5772_v46, %v5608_v48  ;;  %v5698_v46 = vunpack.c.h.bf16 %v14697_v55  ;;  %v5871_v0 = vadd.f32 %v5870_v16, %v5697_v2  ;;  %v5616_v58 = vunpack.c.h.bf16 %v14696_v23 }
 0x641   :  { %v5780_v14 = vadd.f32 %v14706_v5, %v5613_v51  ;;  %v5864_v57 = vadd.f32 %v5863_v28, %v5691_v10  ;;  %v5699_v50 = vunpack.c.h.bf16 %v14699_v22  ;;  %v5617_v53 = vunpack.c.h.bf16 %v14698_v44 }
 0x642   :  { %v5774_v4 = vadd.f32 %v5773_v13, %v5609_v49  ;;  %v5872_v63 = vadd.f32 %v5871_v0, %v5698_v46  ;;  %v14707_v13 = vld [vmem:[#allocation127_spill] sm:$0xff]  ;;  %v5700_v10 = vunpack.c.h.bf16 %v14700_v56  ;;  %v5701_v28 = vunpack.c.h.bf16 %v14702_v6 }
 0x643   :  { %v5781_v47 = vadd.f32 %v5780_v14, %v5615_v34  ;;  %v5865_v48 = vadd.f32 %v5864_v57, %v5692_v30  ;;  %v5612_v45 = vunpack.c.l.bf16 %v14707_v13  ;;  %v5618_v16 = vunpack.c.h.bf16 %v14701_v31 }
 0x644   :  { %v5775_v60 = vadd.f32 %v5774_v4, %v5610_v61  ;;  %v5873_v2 = vadd.f32 %v5872_v63, %v5699_v50  ;;  %v5619_v5 = vunpack.c.h.bf16 %v14703_v52  ;;  %v5620_v57 = vunpack.c.h.bf16 %v14704_v11 }
 0x645   :  { %v5782_v51 = vadd.f32 %v5781_v47, %v5616_v58  ;;  %5866 = vadd.xlane.f32.xlu1 %v5865_v48  ;;  %v5621_v46 = vunpack.c.h.bf16 %v14705_v9  ;;  %v5622_v47 = vunpack.c.h.bf16 %v14707_v13  ;;  %v14708_v63 = vmov 0.0  }
 0x646   :  { %v5776_v49 = vadd.f32 %v5775_v60, %v5611_v36  ;;  %v5874_v34 = vadd.f32 %v5873_v2, %v5700_v10  ;;  %v5702_v36 = vunpack.c.h.bf16 %v13058_v8  ;;  %7604 = vmatprep.mubr.msk.bf16.mxu1 %vm8637_vm4, %v14708_v63  ;;  %vm6119_vm4 = vcmask 523264  }
 0x647   :  { %v5783_v4 = vadd.f32 %v5782_v51, %v5617_v53 }
 0x648   :  { %v5777_v61 = vadd.f32 %v5776_v49, %v5612_v45  ;;  %v5875_v30 = vadd.f32 %v5874_v34, %v5701_v28 }
 0x649   :  { %v5784_v14 = vadd.f32 %v5783_v4, %v5618_v16 }
 0x64a   :  { %5778 = vadd.xlane.f32.xlu0 %v5777_v61  ;;  %v5876_v60 = vadd.f32 %v5875_v30, %v5702_v36  ;;  %v14709_v30 = vlaneseq }
 0x64b   :  { %v5785_v0 = vadd.f32 %v5784_v14, %v5619_v5 }
 0x64c   :  { %5877 = vadd.xlane.f32.xlu1 %v5876_v60 }
 0x64d   :  { %v5786_v58 = vadd.f32 %v5785_v0, %v5620_v57  ;;  %v5913_v57 = vand.u32 127, %v14709_v30 }
 0x64f   :  { %v5787_v48 = vadd.f32 %v5786_v58, %v5621_v46  ;;  %v5918_v46 = vadd.s32 4294967288, %v5913_v57  ;;  %v5925_v58 = vadd.s32 4294967280, %v5913_v57  ;;  %v5939_v6 = vadd.s32 4294967264, %v5913_v57 }
 0x650   :  { %v5946_v22 = vadd.s32 4294967256, %v5913_v57  ;;  %v6029_v40 = vadd.s32 4294967224, %v5913_v57  ;;  %v5953_v54 = vadd.s32 4294967248, %v5913_v57  ;;  %v5960_v55 = vadd.s32 4294967240, %v5913_v57 }
 0x651   :  { %v5788_v50 = vadd.f32 %v5787_v48, %v5622_v47  ;;  %v5932_v47 = vadd.s32 4294967272, %v5913_v57  ;;  %v14710_v48 = vld [vmem:[#allocation2_spill] sm:$0xff]  ;;  %v6024_v24 = vadd.s32 4294967232, %v5913_v57  ;;  %v6036_v18 = vadd.s32 4294967216, %v5913_v57 }
 0x652   :  { %v5921_v63 = vsub.s32 %v5918_v46, %v14710_v48  ;;  %v5928_v30 = vsub.s32 %v5925_v58, %v14710_v48  ;;  %v6043_v27 = vadd.s32 4294967208, %v5913_v57  ;;  %v13257_v9 = vsub.s32 %v5946_v22, %v14710_v48 }
 0x653   :  { %5789 = vadd.xlane.f32.xlu0 %v5788_v50  ;;  %v5916_v50 = vsub.s32 %v5913_v57, %v14710_v48  ;;  %v5935_v41 = vsub.s32 %v5932_v47, %v14710_v48  ;;  %v6050_v58 = vadd.s32 4294967200, %v5913_v57  ;;  %v13260_v38 = vsub.s32 %v6029_v40, %v14710_v48 }
 0x654   :  { %v13221_v49 = vpop.xlane.xlu1 %5459  ;;  %v13263_v47 = vsub.s32 %v5953_v54, %v14710_v48  ;;  %v13269_v62 = vsub.s32 %v6024_v24, %v14710_v48  ;;  %v13275_v40 = vsub.s32 %v6043_v27, %v14710_v48  ;;  %v6057_v24 = vadd.s32 4294967192, %v5913_v57 }
 0x655   :  { %v5529_v12 = vunpack.c.l.bf16 %v13221_v49  ;;  %v5530_v59 = vunpack.c.h.bf16 %v13221_v49 }
 0x657   :  { %v5929_v54 = vrot.slane %v5529_v12, %v5928_v30  ;;  %v6071_v12 = vadd.s32 4294967176, %v5913_v57  ;;  %v5936_v44 = vrot.slane %v5530_v59, %v5935_v41 }
 0x65a   :  { %v5449_v45 = vpop.xlane.xlu0 %5448 }
 0x65b   :  { %v5527_v8 = vunpack.c.l.bf16 %v5449_v45  ;;  %v5528_v56 = vunpack.c.h.bf16 %v5449_v45  ;;  %v13254_v45 = vsub.s32 %v5939_v6, %v14710_v48  ;;  %v13272_v6 = vsub.s32 %v6036_v18, %v14710_v48 }
 0x65d   :  { %v5917_v35 = vrot.slane %v5527_v8, %v5916_v50  ;;  %v5922_v13 = vrot.slane %v5528_v56, %v5921_v63 }
 0x65f   :  { %v5924_v18 = vsel %vm5923_vm5, %v5922_v13, %v5917_v35 }
 0x660   :  { %v5931_v35 = vsel %vm5930_vm6, %v5929_v54, %v5924_v18 }
 0x661   :  { %v5938_v59 = vsel %vm5937_vm7, %v5936_v44, %v5931_v35 }
 0x66a   :  { %v13225_v51 = vpop.xlane.xlu1 %5503 }
 0x66b   :  { %v5537_v7 = vunpack.c.l.bf16 %v13225_v51 }
 0x66d   :  { %v5979_v13 = vrot.slane %v5537_v7, %v5928_v30 }
 0x671   :  { %v13223_v53 = vpop.xlane.xlu0 %5470 }
 0x672   :  { %v13229_v28 = vpop.xlane.xlu1 %5723  ;;  %v5531_v27 = vunpack.c.l.bf16 %v13223_v53 }
 0x67e   :  { %v13227_v10 = vpop.xlane.xlu0 %5481 }
 0x68a   :  { %v13231_v61 = vpop.xlane.xlu1 %5514 }
 0x694   :  { %v5493_v2 = vpop.xlane.xlu0 %5492 }
 0x695   :  { %v5535_v25 = vunpack.c.l.bf16 %v5493_v2  ;;  %v5536_v39 = vunpack.c.h.bf16 %v5493_v2  ;;  %v13266_v2 = vsub.s32 %v5960_v55, %v14710_v48  ;;  %v13279_v55 = vsub.s32 %v6050_v58, %v14710_v48 }
 0x697   :  { %v5970_v22 = vrot.slane %v5535_v25, %v5916_v50  ;;  %v5974_v8 = vrot.slane %v5536_v39, %v5921_v63  ;;  %v6064_v39 = vadd.s32 4294967184, %v5913_v57  ;;  %v5532_v63 = vunpack.c.h.bf16 %v13223_v53 }
 0x699   :  { %v5975_v58 = vsel %vm5923_vm5, %v5974_v8, %v5970_v22  ;;  %v13297_v57 = vsub.s32 %v6064_v39, %v14710_v48  ;;  %v5943_v22 = vrot.slane %v5531_v27, %v13254_v45  ;;  %v5539_v8 = vunpack.c.l.bf16 %v13231_v61 }
 0x69a   :  { %v5980_v7 = vsel %vm5930_vm6, %v5979_v13, %v5975_v58  ;;  %vm6984_vm5 = vcmask 25600  }
 0x69b   :  { %v5945_v27 = vsel %vm5944_vm9, %v5943_v22, %v5938_v59 }
 0x69f   :  { %v13233_v16 = vpop.xlane.xlu0 %5712  ;;  %v13235_v4 = vpop.xlane.xlu1 %5525 }
 0x6a0   :  { %v5880_v44 = vmul.f32 0.00078125, %v13233_v16 }
 0x6a3   :  { %v5812_v5 = vpop.xlane.xlu1 %5811 }
 0x6a4   :  { %v5889_v56 = vmul.f32 0.00078125, %v5812_v5  ;;  %v5538_v5 = vunpack.c.h.bf16 %v13225_v51  ;;  %v13292_v51 = vsub.s32 %v6057_v24, %v14710_v48  ;;  %v5540_v24 = vunpack.c.h.bf16 %v13231_v61 }
 0x6a5   :  { %v5989_v61 = vrot.slane %v5539_v8, %v13254_v45 }
 0x6a6   :  { %v13237_v34 = vpop.xlane.xlu0 %5734  ;;  %v6085_v52 = vrot.slane %v5889_v56, %v13260_v38  ;;  %v5984_v30 = vrot.slane %v5538_v5, %v5935_v41  ;;  %v5541_v41 = vunpack.c.l.bf16 %v13235_v4 }
 0x6a8   :  { %v5985_v39 = vsel %vm5937_vm7, %v5984_v30, %v5980_v7  ;;  %v5999_v45 = vrot.slane %v5541_v41, %v13263_v47 }
 0x6a9   :  { %v5990_v16 = vsel %vm5944_vm9, %v5989_v61, %v5985_v39 }
 0x6ab   :  { %v5823_v36 = vpop.xlane.xlu1 %5822 }
 0x6ac   :  { %v5890_v50 = vmul.f32 0.00078125, %v5823_v36 }
 0x6b1   :  { %v13239_v14 = vpop.xlane.xlu0 %5745 }
 0x6b4   :  { %v13244_v60 = vpop.xlane.xlu1 %5833 }
 0x6b5   :  { %v5891_v36 = vmul.f32 0.00078125, %v13244_v60  ;;  %v5950_v60 = vrot.slane %v5532_v63, %v13257_v9 }
 0x6b7   :  { %v6095_v5 = vrot.slane %v5891_v36, %v13275_v40  ;;  %v5994_v36 = vrot.slane %v5540_v24, %v13257_v9  ;;  %v5952_v24 = vsel %vm5951_vm13, %v5950_v60, %v5945_v27 }
 0x6b9   :  { %v5995_v7 = vsel %vm5951_vm13, %v5994_v36, %v5990_v16  ;;  %v14712_v16 = vmov 0  }
 0x6bb   :  { %v13242_v0 = vpop.xlane.xlu0 %5756 }
 0x6bc   :  { %v5884_v35 = vmul.f32 0.00078125, %v13242_v0  ;;  %v5542_v0 = vunpack.c.h.bf16 %v13235_v4 }
 0x6be   :  { %v5845_v46 = vpop.xlane.xlu1 %5844  ;;  %v6004_v39 = vrot.slane %v5542_v0, %v13266_v2  ;;  %v14729_v0 = vld [vmem:[#allocation129_spill] sm:$0xff] }
 0x6bf   :  { %v5892_v18 = vmul.f32 0.00078125, %v5845_v46  ;;  %v5882_v46 = vmul.f32 0.00078125, %v13237_v34  ;;  %v6028_v34 = vrot.slane %v5880_v44, %v13269_v62 }
 0x6c1   :  { %v6100_v13 = vrot.slane %v5892_v18, %v13279_v55 }
 0x6c4   :  { %v13249_v17 = vpop.xlane.xlu0 %5767 }
 0x6c7   :  { %v5856_v21 = vpop.xlane.xlu1 %5855 }
 0x6c8   :  { %v5893_v63 = vmul.f32 0.00078125, %v5856_v21  ;;  %v6040_v21 = vrot.slane %v5882_v46, %v13272_v6 }
 0x6ca   :  { %v6105_v9 = vrot.slane %v5893_v63, %v13292_v51 }
 0x6cc   :  { %v5801_v1 = vpop.xlane.xlu0 %5800 }
 0x6cd   :  { %v5888_v25 = vmul.f32 0.00078125, %v5801_v1  ;;  %v5881_v1 = vmul.f32 0.00078125, %v13229_v28  ;;  %v6090_v28 = vrot.slane %v5890_v50, %v13272_v6  ;;  %v5534_v50 = vunpack.c.h.bf16 %v13227_v10 }
 0x6cf   :  { %v6081_v49 = vrot.slane %v5888_v25, %v13269_v62  ;;  %v6033_v54 = vrot.slane %v5881_v1, %v13260_v38  ;;  %v5533_v38 = vunpack.c.l.bf16 %v13227_v10  ;;  %v5885_v10 = vmul.f32 0.00078125, %v13249_v17 }
 0x6d0   :  { %v6054_v62 = vrot.slane %v5884_v35, %v13279_v55  ;;  %v7417_v35 = vld [vmem:[%s13512_s12] ss:$0 sm:$0xff] }
 0x6d1   :  { %v6086_v53 = vsel %vm6034_vm8, %v6085_v52, %v6081_v49  ;;  %v13306_v52 = vsub.s32 %v6071_v12, %v14710_v48  ;;  %v5883_v12 = vmul.f32 0.00078125, %v13239_v14  ;;  %v5957_v30 = vrot.slane %v5533_v38, %v13263_v47 }
 0x6d2   :  { %v5867_v56 = vpop.xlane.xlu1 %5866  ;;  %v6091_v25 = vsel %vm6041_vm10, %v6090_v28, %v6086_v53  ;;  %v6035_v6 = vsel %vm6034_vm8, %v6033_v54, %v6028_v34  ;;  %v6061_v59 = vrot.slane %v5885_v10, %v13292_v51  ;;  %v14715_v10 = vld [vmem:[#allocation15_spill] sm:$0xff] }
 0x6d3   :  { %v6096_v58 = vsel %vm6048_vm11, %v6095_v5, %v6091_v25  ;;  %v5894_v1 = vmul.f32 0.00078125, %v5867_v56  ;;  %v6047_v28 = vrot.slane %v5883_v12, %v13275_v40  ;;  %v6000_v40 = vsel %vm5958_vm15, %v5999_v45, %v5995_v7  ;;  %v14730_v7 = vld [vmem:[#allocation16_spill] sm:$0xff] }
 0x6d4   :  { %v6101_v53 = vsel %vm6055_vm12, %v6100_v13, %v6096_v58  ;;  %v6042_v18 = vsel %vm6041_vm10, %v6040_v21, %v6035_v6  ;;  %v5964_v25 = vrot.slane %v5534_v50, %v13266_v2  ;;  %v5959_v41 = vsel %vm5958_vm15, %v5957_v30, %v5952_v24  ;;  %v14717_v21 = vld [vmem:[#allocation25_spill] sm:$0xff]  ;;  %v14733_v30 = vld [vmem:[#allocation7_spill] sm:$0xff]  ;;  %v14736_v6 = vld [vmem:[#allocation80_spill] sm:$0xff] }
 0x6d5   :  { %v6110_v17 = vrot.slane %v5894_v1, %v13297_v57  ;;  %v6106_v56 = vsel %vm6062_vm14, %v6105_v9, %v6101_v53  ;;  %v6049_v54 = vsel %vm6048_vm11, %v6047_v28, %v6042_v18  ;;  %v6005_v5 = vsel %vm5965_vm3, %v6004_v39, %v6000_v40  ;;  %v14720_v53 = vld [vmem:[#allocation52_spill] sm:$0xff]  ;;  %v14731_v28 = vld [vmem:[#allocation126_spill] sm:$0xff]  ;;  %v14732_v9 = vld [vmem:[#allocation127_spill] sm:$0xff] }
 0x6d6   :  { %v6056_v44 = vsel %vm6055_vm12, %v6054_v62, %v6049_v54  ;;  %v5966_v2 = vsel %vm5965_vm3, %v5964_v25, %v5959_v41  ;;  %v14734_v62 = vld [vmem:[#allocation85_spill] sm:$0xff]  ;;  %v14740_v40 = vld [vmem:[#allocation8_spill] sm:$0xff]  ;;  %v14741_v18 = vld [vmem:[#allocation23_spill] sm:$0xff] }
 0x6d7   :  { %v5779_v49 = vpop.xlane.xlu0 %5778  ;;  %v6111_v60 = vsel %vm6069_vm0, %v6110_v17, %v6106_v56  ;;  %v6063_v27 = vsel %vm6062_vm14, %v6061_v59, %v6056_v44  ;;  %v6006_v12 = vsel %vm3229_vm1, %v6005_v5, %v5966_v2  ;;  %v14735_v17 = vld [vmem:[#allocation57_spill] sm:$0xff]  ;;  %v14744_v25 = vld [vmem:[#allocation135_spill] sm:$0xff]  ;;  %v14745_v39 = vld [vmem:[#allocation114_spill] sm:$0xff] }
 0x6d8   :  { %v5886_v22 = vmul.f32 0.00078125, %v5779_v49  ;;  %v14711_v49 = vld [vmem:[#allocation119_spill] sm:$0xff]  ;;  %v14737_v59 = vld [vmem:[#allocation81_spill] sm:$0xff]  ;;  %v14748_v41 = vld [vmem:[#allocation70_spill] sm:$0xff] }
 0x6d9   :  { %v5878_v14 = vpop.xlane.xlu1 %5877  ;;  %v14739_v24 = vld [vmem:[#allocation121_spill] sm:$0xff]  ;;  %v14746_v54 = vld [vmem:[#allocation131_spill] sm:$0xff]  ;;  %v14749_v44 = vld [vmem:[#allocation72_spill] sm:$0xff] }
 0x6da   :  { %v5895_v8 = vmul.f32 0.00078125, %v5878_v14  ;;  %v6068_v47 = vrot.slane %v5886_v22, %v13297_v57  ;;  %v14716_v14 = vld [vmem:[#allocation116_spill] sm:$0xff]  ;;  %v14721_v22 = vld [vmem:[#allocation79_spill] sm:$0xff]  ;;  %v14756_v2 = vld [vmem:[#allocation21_spill] sm:$0xff] }
 0x6db   :  { %v14751_v5 = vld [vmem:[#allocation68_spill] sm:$0xff] }
 0x6dc   :  { %v6115_v4 = vrot.slane %v5895_v8, %v13306_v52  ;;  %v6070_v61 = vsel %vm6069_vm0, %v6068_v47, %v6063_v27  ;;  %v14728_v8 = vld [vmem:[#allocation139_spill] sm:$0xff]  ;;  %v14742_v47 = vld [vmem:[#allocation56_spill] sm:$0xff]  ;;  %v14752_v27 = vld [vmem:[#allocation130_spill] sm:$0xff] }
 0x6de   :  { %v6116_v57 = vsel %vm6076_vm2, %v6115_v4, %v6111_v60  ;;  %v14738_v4 = vld [vmem:[#allocation78_spill] sm:$0xff]  ;;  %v14750_v60 = vld [vmem:[#allocation9_spill] sm:$0xff] }
 0x6e0   :  { %v5790_v55 = vpop.xlane.xlu0 %5789 }
 0x6e1   :  { %v5887_v51 = vmul.f32 0.00078125, %v5790_v55  ;;  %v14743_v55 = vld [vmem:[#allocation14_spill] sm:$0xff] }
 0x6e3   :  { %v6075_v38 = vrot.slane %v5887_v51, %v13306_v52  ;;  %v14713_v52 = vld [vmem:[#allocation49_spill] sm:$0xff]  ;;  %v14747_v51 = vld [vmem:[#allocation110_spill] sm:$0xff] }
 0x6e5   :  { %v6077_v46 = vsel %vm6076_vm2, %v6075_v38, %v6070_v61  ;;  %v14754_v38 = vld [vmem:[#allocation84_spill] sm:$0xff] }
 0x6e6   :  { %v6117_v50 = vsel %vm3229_vm1, %v6116_v57, %v6077_v46  ;;  %v14753_v57 = vld [vmem:[#allocation132_spill] sm:$0xff]  ;;  %v14757_v46 = vld [vmem:[#allocation53_spill] sm:$0xff]  ;;  %vm6688_vm1 = vcmask 1040384  }
 0x6e7   :  { %v6120_v63 = vsel %vm6119_vm4, %v6006_v12, %v6117_v50  ;;  %v14755_v61 = vld [vmem:[#allocation156_spill] sm:$0xff]  ;;  %v14758_v50 = vld [vmem:[#allocation13_spill] sm:$0xff]  ;;  %v14759_v12 = vld [vmem:[#allocation46_spill] sm:$0xff] }
 0x6e8   :  { %v6121_v58 = vpack.c.bf16 %v6120_v63, %v6120_v63  ;;  %v14760_v63 = vld [vmem:[#allocation120_spill] sm:$0xff] }
 0x6ea   :  { %7605 = vmatmul.mubr.bf16.vlgmr.msra.gmra.mrb[124].mxu1 %v6121_v58  ;;  %v14761_v58 = vld [vmem:[#allocation118_spill] sm:$0xff] }
 0x6eb   :  { %6285 = vmatpush1.bf16.msra.mxu1 %v14711_v49  ;;  %6316 = vmatprep.mubr.bf16.mxu1 %v14712_v16  ;;  %v14762_v49 = vld [vmem:[#allocation117_spill] sm:$0xff] }
 0x6ec   :  { %6286 = vmatprep.subr.bf16.mxu1 %v14661_v33 }
 0x6ef   :  { %6287 = vmatpush1.bf16.msra.mxu1 %v14656_v26 }
 0x6f0   :  { %6288 = vmatprep.subr.bf16.mxu1 %v14677_v42 }
 0x6f3   :  { %6289 = vmatpush1.bf16.msra.mxu1 %v14672_v29 }
 0x6f4   :  { %6290 = vmatprep.subr.bf16.mxu1 %v14696_v23 }
 0x6f7   :  { %6291 = vmatpush1.bf16.msra.mxu1 %v14693_v20  ;;  %v14714_v20 = vld [vmem:[#allocation29_spill] sm:$0xff] }
 0x6f8   :  { %6366 = vmatprep.subr.bf16.mxu1 %v14713_v52  ;;  %v14763_v52 = vld [vmem:[#allocation111_spill] sm:$0xff] }
 0x7bd   :  { %v6227_v13 = vpop.f32.mrb[124].mxu1 }
 0x7be   :  { %v6228_v1 = vadd.f32 %v7417_v35, %v6227_v13  ;;  %v7606_v36 = vpop.f32.mrb[125].mxu1  ;;  %v14764_v35 = vld [vmem:[#allocation48_spill] sm:$0xff]  ;;  %v14765_v13 = vld [vmem:[#allocation38_spill] sm:$0xff] }
 0x7bf   :  { %v6230_v33 = vpop.f32.mrb[126].mxu1  ;;  %v14767_v36 = vld [vmem:[#allocation73_spill] sm:$0xff] }
 0x7c0   :  { %v7426_v45 = vmul.f32 -1.442695, %v6228_v1  ;;  %v7607_v26 = vpop.f32.mrb[127].mxu1  ;;  %v14766_v1 = vld [vmem:[#allocation28_spill] sm:$0xff] }
 0x7c2   :  { %8628 = vpow2.f32 %v7426_v45  ;;  %v6719_v45 = vld [vmem:[%s13513_s13] sm:$0xff] }
 0x7cc   :  { %v8629_v42 = vpop.eup %8628 }
 0x7cd   :  { %v6236_v34 = vadd.f32 1.0, %v8629_v42  ;;  %v6732_v42 = vcombine.high %v6719_v45, %v6719_v45 }
 0x7cf   :  { %8630 = vrcp.f32 %v6236_v34 }
 0x7d9   :  { %v8631_v29 = vpop.eup %8630 }
 0x7da   :  { %v6239_v23 = vpack.c.bf16 %v8631_v29, %v8631_v29 }
 0x7dc   :  { %7427 = vmatmul.mubr.msk.bf16.vlgmr.msra.gmra.mrb[92].mxu0 %vm6119_vm4, %v6239_v23  ;;  %7428 = vmatmul.mubr.msk.bf16.vlgmr.msra.gmra.mrb[128].mxu1 %vm6119_vm4, %v6239_v23  ;;  %v6448_v56 = vshrl.u32 %v6239_v23, 16 }
 0x7dd   :  { %6326 = vmatpush1.bf16.msra.mxu0 %v14714_v20  ;;  %6367 = vmatpush1.bf16.msra.mxu1 %v14715_v10 }
 0x7de   :  { %6327 = vmatprep.subr.bf16.mxu0 %v14663_v3  ;;  %6368 = vmatprep.subr.bf16.mxu1 %v14665_v32  ;;  %v14718_v3 = vld [vmem:[#allocation19_spill] sm:$0xff]  ;;  %v14719_v32 = vld [vmem:[#allocation144_spill] sm:$0xff] }
 0x7df   :  { %6357 = vmatprep.mubr.bf16.mxu0 %v14712_v16  ;;  %6398 = vmatprep.mubr.bf16.mxu1 %v14712_v16 }
 0x7e1   :  { %6328 = vmatpush1.bf16.msra.mxu0 %v14716_v14  ;;  %6369 = vmatpush1.bf16.msra.mxu1 %v14717_v21  ;;  %v6720_v14 = vld [vmem:[%s13513_s13 + $0x8] sm:$0xff] }
 0x7e2   :  { %6329 = vmatprep.subr.bf16.mxu0 %v14680_v37  ;;  %6370 = vmatprep.subr.bf16.mxu1 %v14682_v43  ;;  %v14722_v43 = vld [vmem:[#allocation31_spill] sm:$0xff]  ;;  %v14724_v37 = vld [vmem:[#allocation54_spill] sm:$0xff] }
 0x7e5   :  { %6330 = vmatpush1.bf16.msra.mxu0 %v14678_v15  ;;  %6371 = vmatpush1.bf16.msra.mxu1 %v14681_v19  ;;  %v14723_v15 = vld [vmem:[#allocation115_spill] sm:$0xff]  ;;  %v14725_v19 = vld [vmem:[#allocation10_spill] sm:$0xff] }
 0x7e6   :  { %6331 = vmatprep.subr.bf16.mxu0 %v14701_v31  ;;  %6372 = vmatprep.subr.bf16.mxu1 %v14704_v11  ;;  %v14726_v31 = vld [vmem:[#allocation17_spill] sm:$0xff] }
 0x7e7   :  { %v14727_v11 = vld [vmem:[#allocation61_spill] sm:$0xff] }
 0x7e9   :  { %6332 = vmatpush1.bf16.msra.mxu0 %v14718_v3  ;;  %6373 = vmatpush1.bf16.msra.mxu1 %v14719_v32  ;;  %v6749_v3 = vcombine.high %v6720_v14, %v6720_v14 }
 0x7ea   :  { %6407 = vmatprep.subr.bf16.mxu0 %v14720_v53  ;;  %6453 = vmatprep.subr.bf16.mxu1 %v14721_v22 }
 0x7ec   :  { %7429 = vmatmul.mubr.msk.bf16.vlgmr.msra.gmra.mrb[96].mxu0 %vm6119_vm4, %v6239_v23  ;;  %7430 = vmatmul.mubr.msk.bf16.vlgmr.msra.gmra.mrb[132].mxu1 %vm6119_vm4, %v6239_v23 }
 0x7ed   :  { %6408 = vmatpush1.bf16.msra.mxu0 %v14722_v43  ;;  %6454 = vmatpush1.bf16.msra.mxu1 %v14723_v15 }
 0x7ee   :  { %6409 = vmatprep.subr.bf16.mxu0 %v14724_v37  ;;  %6455 = vmatprep.subr.bf16.mxu1 %v14725_v19 }
 0x7ef   :  { %6439 = vmatprep.mubr.bf16.mxu0 %v14712_v16  ;;  %6485 = vmatprep.mubr.bf16.mxu1 %v14712_v16 }
 0x7f1   :  { %6410 = vmatpush1.bf16.msra.mxu0 %v14726_v31  ;;  %6456 = vmatpush1.bf16.msra.mxu1 %v14727_v11 }
 0x7f2   :  { %6411 = vmatprep.subr.bf16.mxu0 %v14728_v8  ;;  %6457 = vmatprep.subr.bf16.mxu1 %v14729_v0 }
 0x7f5   :  { %6412 = vmatpush1.bf16.msra.mxu0 %v14730_v7  ;;  %6458 = vmatpush1.bf16.msra.mxu1 %v14731_v28 }
 0x7f6   :  { %6413 = vmatprep.subr.bf16.mxu0 %v14732_v9  ;;  %6459 = vmatprep.subr.bf16.mxu1 %v14733_v30 }
 0x7f9   :  { %6414 = vmatpush1.bf16.msra.mxu0 %v14734_v62  ;;  %6460 = vmatpush1.bf16.msra.mxu1 %v14735_v17 }
 0x7fa   :  { %6494 = vmatprep.subr.bf16.mxu0 %v14736_v6  ;;  %6535 = vmatprep.subr.bf16.mxu1 %v14737_v59 }
 0x7fc   :  { %7431 = vmatmul.mubr.msk.bf16.vlgmr.msra.gmra.mrb[100].mxu0 %vm6119_vm4, %v6239_v23  ;;  %7432 = vmatmul.mubr.msk.bf16.vlgmr.msra.gmra.mrb[136].mxu1 %vm6119_vm4, %v6448_v56 }
 0x7fd   :  { %6495 = vmatpush1.bf16.msra.mxu0 %v14738_v4  ;;  %6536 = vmatpush1.bf16.msra.mxu1 %v14739_v24 }
 0x7fe   :  { %6496 = vmatprep.subr.bf16.mxu0 %v14740_v40  ;;  %6537 = vmatprep.subr.bf16.mxu1 %v14741_v18 }
 0x7ff   :  { %6526 = vmatprep.mubr.bf16.mxu0 %v14712_v16  ;;  %6567 = vmatprep.mubr.bf16.mxu1 %v14712_v16 }
 0x801   :  { %6497 = vmatpush1.bf16.msra.mxu0 %v14742_v47  ;;  %6538 = vmatpush1.bf16.msra.mxu1 %v14743_v55 }
 0x802   :  { %6498 = vmatprep.subr.bf16.mxu0 %v14744_v25  ;;  %6539 = vmatprep.subr.bf16.mxu1 %v14745_v39 }
 0x805   :  { %6499 = vmatpush1.bf16.msra.mxu0 %v14746_v54  ;;  %6540 = vmatpush1.bf16.msra.mxu1 %v14747_v51 }
 0x806   :  { %6500 = vmatprep.subr.bf16.mxu0 %v14748_v41  ;;  %6541 = vmatprep.subr.bf16.mxu1 %v14749_v44 }
 0x809   :  { %6501 = vmatpush1.bf16.msra.mxu0 %v14750_v60  ;;  %6542 = vmatpush1.bf16.msra.mxu1 %v14751_v5 }
 0x80a   :  { %6576 = vmatprep.subr.bf16.mxu0 %v14752_v27  ;;  %6617 = vmatprep.subr.bf16.mxu1 %v14753_v57 }
 0x80c   :  { %7433 = vmatmul.mubr.msk.bf16.vlgmr.msra.gmra.mrb[104].mxu0 %vm6119_vm4, %v6448_v56  ;;  %7434 = vmatmul.mubr.msk.bf16.vlgmr.msra.gmra.mrb[140].mxu1 %vm6119_vm4, %v6448_v56 }
 0x80d   :  { %6577 = vmatpush1.bf16.msra.mxu0 %v14754_v38  ;;  %6618 = vmatpush1.bf16.msra.mxu1 %v14755_v61 }
 0x80e   :  { %6578 = vmatprep.subr.bf16.mxu0 %v14756_v2  ;;  %6619 = vmatprep.subr.bf16.mxu1 %v14757_v46 }
 0x80f   :  { %6608 = vmatprep.mubr.bf16.mxu0 %v14712_v16  ;;  %6649 = vmatprep.mubr.bf16.mxu1 %v14712_v16  ;;  %v8638_v16 = vmov 1983009808  }
 0x810   :  { %v6734_v33 = vunpack.c.l.s4 %v8638_v16 }
 0x811   :  { %6579 = vmatpush1.bf16.msra.mxu0 %v14758_v50  ;;  %6620 = vmatpush1.bf16.msra.mxu1 %v14759_v12 }
 0x812   :  { %6580 = vmatprep.subr.bf16.mxu0 %v14760_v63  ;;  %6621 = vmatprep.subr.bf16.mxu1 %v14761_v58  ;;  %v6735_v26 = vunpack.c.0.s8 %v6734_v33 }
 0x814   :  { %v6738_v34 = vsub.s32 %v6735_v26, %v14710_v48 }
 0x815   :  { %6581 = vmatpush1.bf16.msra.mxu0 %v14762_v49  ;;  %6622 = vmatpush1.bf16.msra.mxu1 %v14763_v52 }
 0x816   :  { %6582 = vmatprep.subr.bf16.mxu0 %v14764_v35  ;;  %6623 = vmatprep.subr.bf16.mxu1 %v14765_v13  ;;  %v6739_v29 = vrot.slane %v6719_v45, %v6738_v34  ;;  %v6746_v23 = vrot.slane %v6732_v42, %v6738_v34  ;;  %v13459_v21 = vrot.slane %v6720_v14, %v6738_v34 }
 0x817   :  { %v13461_v32 = vrot.slane %v6749_v3, %v6738_v34 }
 0x818   :  { %v6747_v20 = vcombine.high %v6739_v29, %v6739_v29  ;;  %v6748_v10 = vcombine.high %v6746_v23, %v6746_v23  ;;  %v6764_v60 = vcombine.high %v13459_v21, %v13459_v21 }
 0x819   :  { %6583 = vmatpush1.bf16.msra.mxu0 %v14766_v1  ;;  %6624 = vmatpush1.bf16.msra.mxu1 %v14767_v36  ;;  %v6765_v42 = vcombine.high %v13461_v32, %v13461_v32 }
 0x81a   :  { %6784 = vmatprep.subr.bf16.mxu0 %v6747_v20 }
 0x81c   :  { %7435 = vmatmul.mubr.msk.bf16.vlgmr.msra.gmra.mrb[108].mxu0 %vm6119_vm4, %v6448_v56  ;;  %7436 = vmatmul.mubr.msk.bf16.vlgmr.msra.gmra.mrb[144].mxu1 %vm6119_vm4, %v6448_v56 }
 0x822   :  { %6785 = vmatpush1.bf16.xpose.msra.mxu0 %v6739_v29  ;;  %v7438_v29 = vld.sshfl [vmem:[%s13513_s13 + $0x10] sm:$0x33 pattern:$0x76325410] }
 0x823   :  { %6824 = vmatprep.subr.bf16.mxu0 %v6748_v10 }
 0x8af   :  { %v6277_v53 = vpop.f32.mrb[92].mxu0  ;;  %v6318_v22 = vpop.f32.mrb[128].mxu1 }
 0x8b0   :  { %v6279_v43 = vpop.f32.mrb[93].mxu0  ;;  %v6320_v48 = vpop.f32.mrb[129].mxu1 }
 0x8b1   :  { %v6281_v15 = vpop.f32.mrb[94].mxu0  ;;  %v6322_v37 = vpop.f32.mrb[130].mxu1 }
 0x8b2   :  { %v6282_v19 = vpop.f32.mrb[95].mxu0  ;;  %v6323_v31 = vpop.f32.mrb[131].mxu1 }
 0x8bf   :  { %v6359_v11 = vpop.f32.mrb[96].mxu0  ;;  %v13463_v8 = vpop.f32.mrb[132].mxu1 }
 0x8c0   :  { %v6361_v0 = vpop.f32.mrb[97].mxu0  ;;  %v13465_v7 = vpop.f32.mrb[133].mxu1 }
 0x8c1   :  { %v6363_v28 = vpop.f32.mrb[98].mxu0  ;;  %v6404_v9 = vpop.f32.mrb[134].mxu1 }
 0x8c2   :  { %v6364_v30 = vpop.f32.mrb[99].mxu0  ;;  %v6405_v62 = vpop.f32.mrb[135].mxu1  ;;  %v6773_v9 = vcombine.high %v7438_v29, %v7438_v29 }
 0x8cf   :  { %v13467_v17 = vpop.f32.mrb[100].mxu0  ;;  %v6487_v6 = vpop.f32.mrb[136].mxu1 }
 0x8d0   :  { %v6668_v59 = vrot.slane %v6487_v6, 7  ;;  %v13469_v56 = vpop.f32.mrb[101].mxu0  ;;  %v6489_v4 = vpop.f32.mrb[137].mxu1 }
 0x8d1   :  { %v6669_v24 = vrot.slane %v6489_v4, 7  ;;  %v6445_v40 = vpop.f32.mrb[102].mxu0  ;;  %v6491_v18 = vpop.f32.mrb[138].mxu1 }
 0x8d2   :  { %v6689_v47 = vsel %vm6688_vm1, %v6277_v53, %v6668_v59  ;;  %v6446_v55 = vpop.f32.mrb[103].mxu0  ;;  %v6492_v25 = vpop.f32.mrb[139].mxu1 }
 0x8d3   :  { %v6699_v39 = vmul.f32 0.015625, %v6689_v47  ;;  %v6690_v54 = vsel %vm6688_vm1, %v6279_v43, %v6669_v24 }
 0x8d4   :  { %v6700_v51 = vmul.f32 0.015625, %v6690_v54 }
 0x8d5   :  { %v6709_v44 = vpack.c.bf16 %v6699_v39, %v6699_v39 }
 0x8d6   :  { %v6710_v41 = vpack.c.bf16 %v6700_v51, %v6700_v51 }
 0x8d8   :  { %6816 = vmatprep.mubr.bf16.mxu0 %v6710_v41 }
 0x8d9   :  { %6817 = vmatmul.mubr.bf16.vlgmr.msra.gmra.mrb[112].mxu0 %v6709_v44 }
 0x8da   :  { %6825 = vmatpush1.bf16.xpose.msra.mxu0 %v6746_v23 }
 0x8db   :  { %6864 = vmatprep.subr.bf16.mxu0 %v6764_v60 }
 0x8df   :  { %v6528_v5 = vpop.f32.mrb[104].mxu0  ;;  %v6569_v27 = vpop.f32.mrb[140].mxu1 }
 0x8e0   :  { %v6670_v57 = vrot.slane %v6528_v5, 7  ;;  %v6672_v38 = vrot.slane %v6569_v27, 7  ;;  %v6530_v61 = vpop.f32.mrb[105].mxu0  ;;  %v6571_v2 = vpop.f32.mrb[141].mxu1 }
 0x8e1   :  { %v6671_v46 = vrot.slane %v6530_v61, 7  ;;  %v6673_v50 = vrot.slane %v6571_v2, 7  ;;  %v6532_v12 = vpop.f32.mrb[106].mxu0  ;;  %v6573_v63 = vpop.f32.mrb[142].mxu1 }
 0x8e2   :  { %v6691_v58 = vsel %vm6688_vm1, %v6318_v22, %v6670_v57  ;;  %v6693_v49 = vsel %vm6688_vm1, %v6359_v11, %v6672_v38  ;;  %v6533_v52 = vpop.f32.mrb[107].mxu0  ;;  %v6574_v35 = vpop.f32.mrb[143].mxu1 }
 0x8e3   :  { %v6701_v13 = vmul.f32 0.015625, %v6691_v58  ;;  %v6692_v1 = vsel %vm6688_vm1, %v6320_v48, %v6671_v46  ;;  %v6694_v36 = vsel %vm6688_vm1, %v6361_v0, %v6673_v50  ;;  %v6703_v23 = vmul.f32 0.015625, %v6693_v49 }
 0x8e4   :  { %v6702_v16 = vmul.f32 0.015625, %v6692_v1  ;;  %v6704_v33 = vmul.f32 0.015625, %v6694_v36 }
 0x8e5   :  { %v6711_v26 = vpack.c.bf16 %v6701_v13, %v6701_v13  ;;  %v6713_v0 = vpack.c.bf16 %v6703_v23, %v6703_v23 }
 0x8e6   :  { %v6712_v45 = vpack.c.bf16 %v6702_v16, %v6702_v16  ;;  %v6714_v34 = vpack.c.bf16 %v6704_v33, %v6704_v33 }
 0x8e8   :  { %6856 = vmatprep.mubr.bf16.mxu0 %v6712_v45 }
 0x8e9   :  { %6857 = vmatmul.mubr.bf16.vlgmr.msra.gmra.mrb[112].mxu0 %v6711_v26 }
 0x8ea   :  { %6865 = vmatpush1.bf16.xpose.msra.mxu0 %v13459_v21  ;;  %6896 = vmatprep.mubr.bf16.mxu0 %v6714_v34 }
 0x8eb   :  { %6904 = vmatprep.subr.bf16.mxu0 %v6765_v42 }
 0x8ef   :  { %v6610_v20 = vpop.f32.mrb[108].mxu0  ;;  %v6651_v10 = vpop.f32.mrb[144].mxu1 }
 0x8f0   :  { %v6674_v14 = vrot.slane %v6610_v20, 7  ;;  %v6676_v3 = vrot.slane %v6651_v10, 7  ;;  %v6612_v53 = vpop.f32.mrb[109].mxu0  ;;  %v6653_v22 = vpop.f32.mrb[145].mxu1 }
 0x8f1   :  { %v6675_v43 = vrot.slane %v6612_v53, 7  ;;  %v6677_v48 = vrot.slane %v6653_v22, 7  ;;  %v6614_v15 = vpop.f32.mrb[110].mxu0  ;;  %v6655_v37 = vpop.f32.mrb[146].mxu1 }
 0x8f2   :  { %v6695_v21 = vsel %vm6688_vm1, %v13463_v8, %v6674_v14  ;;  %v6697_v19 = vsel %vm6688_vm1, %v13467_v17, %v6676_v3  ;;  %v6615_v31 = vpop.f32.mrb[111].mxu0  ;;  %v6656_v11 = vpop.f32.mrb[147].mxu1 }
 0x8f3   :  { %v6696_v28 = vsel %vm6688_vm1, %v13465_v7, %v6675_v43  ;;  %v6698_v30 = vsel %vm6688_vm1, %v13469_v56, %v6677_v48  ;;  %v6705_v8 = vmul.f32 0.015625, %v6695_v21  ;;  %v6707_v24 = vmul.f32 0.015625, %v6697_v19  ;;  %v7437_v56 = vld [vmem:[%s13514_s14] ss:$0 sm:$0xff] }
 0x8f4   :  { %v6706_v62 = vmul.f32 0.015625, %v6696_v28  ;;  %v6708_v59 = vmul.f32 0.015625, %v6698_v30 }
 0x8f5   :  { %6897 = vmatmul.mubr.bf16.vlgmr.msra.gmra.mrb[112].mxu0 %v6713_v0  ;;  %v6715_v17 = vpack.c.bf16 %v6705_v8, %v6705_v8  ;;  %v6717_v7 = vpack.c.bf16 %v6707_v24, %v6707_v24 }
 0x8f6   :  { %6905 = vmatpush1.bf16.xpose.msra.mxu0 %v13461_v32  ;;  %v6716_v6 = vpack.c.bf16 %v6706_v62, %v6706_v62  ;;  %v6718_v4 = vpack.c.bf16 %v6708_v59, %v6708_v59 }
 0x8f7   :  { %6944 = vmatprep.subr.bf16.mxu0 %v6773_v9 }
 0x8f8   :  { %6936 = vmatprep.mubr.bf16.mxu0 %v6716_v6 }
 0x901   :  { %6937 = vmatmul.mubr.bf16.vlgmr.msra.gmra.mrb[112].mxu0 %v6715_v17 }
 0x902   :  { %6945 = vmatpush1.bf16.xpose.msra.mxu0 %v7438_v29  ;;  %6976 = vmatprep.mubr.bf16.mxu0 %v6718_v4 }
 0x90d   :  { %6977 = vmatmul.mubr.bf16.vlgmr.msra.gmra.mrb[112].mxu0 %v6717_v7 }
 0x9e0   :  { %v6978_v40 = vpop.f32.mrb[112].mxu0 }
 0x9e1   :  { %v7612_v32 = vadd.f32 %v7437_v56, %v6978_v40  ;;  %v6980_v18 = vpop.f32.mrb[113].mxu0 }
 0x9e2   :  { %v6981_v47 = vpop.f32.mrb[114].mxu0 }
 0x9e3   :  { %6985 = vst.msk [vmem:[%s13515_s15] sm:$0x3] %vm6984_vm5, %v7612_v32  ;;  %v6982_v55 = vpop.f32.mrb[115].mxu0 }

</bundles_post_ra>
